<compile_context>
chip_gen: v7x
topology: tpu7x:2x2x1
jax: 0.10.0
libtpu: 0.0.40
codegen_flags: <defaults>
</compile_context>

<pallas_src>
"""Scaled-down ResNet-18 (the `resnet` Grad-CAM wrapper forward) in JAX Pallas on TPU.

Performance-reworked version (targets v5e / v6e / v7x), incorporating review
feedback on the previous (already-running) version:

  * All BN folding, weight transposition, bf16 cast and lane padding is done
    ONCE at parameter-build time (eval mode => weights are constants).  The
    jitted forward never re-folds or re-pads weights.
  * Activations are carried end-to-end with channels padded to 128 lanes
    (bf16).  No per-layer `out[:M, :N]` slice and no re-pad of inputs /
    residuals / maxpool: pad channels stay exactly zero through conv (zero
    folded weights + zero shift), ReLU and residual adds, so every vreg is
    lane-dense and K of every 3x3 conv is a multiple of 128.
  * No M padding of the im2col matrix: tm is chosen to divide M exactly
    (multiples of 16 for bf16 sublane density), and when M allows it at least
    2 parallel M tiles are produced so both v7x TensorCores get work.
  * All K values of this net fit one VMEM block, so each conv is a single-shot
    GEMM (no K grid axis, no accumulator scratch, no pl.when) with the
    BatchNorm shift, the BasicBlock residual add and the ReLU fused into the
    epilogue.  Accumulation / epilogue in f32, output bf16, lane-dense tn=128
    (tn=256 would be picked automatically for >=256-wide layers on v6e/v7x).
  * Maxpool runs on 128-lane-padded channels (full vreg use) via a parity
    (even/odd row & col) decomposition; global average pool + fc are fused
    into one small lane-dense kernel (num_classes padded to 128 lanes,
    sliced once at the very end).

BatchNorm uses running statistics (eval mode), the standard setting when
wrapping a pretrained model for Grad-CAM.
"""

import functools

import jax
import jax.numpy as jnp
from jax.experimental import pallas as pl
from jax.experimental.pallas import tpu as pltpu


LANES = 128
CPAD = 128                      # inter-layer activations carry 128 channels
BN_EPS = 1e-5
VMEM_LIMIT = 32 * 1024 * 1024   # explicit budget; tiles here use ~1-2 MiB


def _round_up(x, m):
    return (x + m - 1) // m * m


# ----------------------------------------------------------------------------
# Pallas kernels
# ----------------------------------------------------------------------------
def _gemm_kernel(a_ref, b_ref, shift_ref, o_ref, *, relu):
    """o = relu?( A @ B + shift ); single-shot full-K GEMM tile, f32 accumulate."""
    acc = jnp.dot(a_ref[...], b_ref[...], preferred_element_type=jnp.float32)
    out = acc + shift_ref[...]
    if relu:
        out = jnp.maximum(out, 0.0)
    o_ref[...] = out.astype(o_ref.dtype)


def _gemm_res_kernel(a_ref, b_ref, shift_ref, res_ref, o_ref, *, relu):
    """o = relu?( A @ B + shift + residual ) -- fused BasicBlock tail."""
    acc = jnp.dot(a_ref[...], b_ref[...], preferred_element_type=jnp.float32)
    out = acc + shift_ref[...] + res_ref[...].astype(jnp.float32)
    if relu:
        out = jnp.maximum(out, 0.0)
    o_ref[...] = out.astype(o_ref.dtype)


def _maxpool_kernel(ee_ref, eo_ref, oe_ref, oo_ref, o_ref):
    """3x3 stride-2 max pool from the 4 parity sub-grids of the padded input."""
    oh, ow = o_ref.shape[1], o_ref.shape[2]
    ee = ee_ref[...]
    eo = eo_ref[...]
    oe = oe_ref[...]
    oo = oo_ref[...]
    m = oo[:, :oh, :ow, :]                                # (2i+1, 2j+1)
    m = jnp.maximum(m, ee[:, :oh, :ow, :])                # (2i,   2j)
    m = jnp.maximum(m, ee[:, :oh, 1:ow + 1, :])           # (2i,   2j+2)
    m = jnp.maximum(m, ee[:, 1:oh + 1, :ow, :])           # (2i+2, 2j)
    m = jnp.maximum(m, ee[:, 1:oh + 1, 1:ow + 1, :])      # (2i+2, 2j+2)
    m = jnp.maximum(m, eo[:, :oh, :ow, :])                # (2i,   2j+1)
    m = jnp.maximum(m, eo[:, 1:oh + 1, :ow, :])           # (2i+2, 2j+1)
    m = jnp.maximum(m, oe[:, :oh, :ow, :])                # (2i+1, 2j)
    m = jnp.maximum(m, oe[:, :oh, 1:ow + 1, :])           # (2i+1, 2j+2)
    o_ref[...] = m


def _avgpool_fc_kernel(x_ref, w_ref, b_ref, o_ref):
    """AdaptiveAvgPool2d((1,1)) + flatten + Linear fused (lane-dense output)."""
    pooled = jnp.mean(x_ref[...].astype(jnp.float32), axis=1)          # (N, C)
    o_ref[...] = jnp.dot(pooled, w_ref[...],
                         preferred_element_type=jnp.float32) + b_ref[...]


# ----------------------------------------------------------------------------
# Pallas wrappers
# ----------------------------------------------------------------------------
def _pick_tm(m):
    """>=2 parallel M tiles when possible (v7x megacore), multiples of 16 for
    bf16 sublane density, no M padding (tm always divides M)."""
    for tm in (256, 128, 64, 32, 16):
        if m % tm == 0 and m // tm >= 2:
            return tm
    return m            # tiny M: one full-M tile (block dim == full array dim)


def fused_gemm(a, b, shift, residual=None, relu=False, out_dtype=jnp.bfloat16):
    """relu?( a @ b + shift [+ residual] ), tiled over (M, N) only.

    a: (M, K) bf16, b: (K, Npad) bf16 (pre-folded / pre-padded), shift: (1, Npad)
    f32, residual: (M, Npad) bf16 or None.  K fits one VMEM block for every
    conv of this net, so there is no K grid axis and no accumulator scratch.
    """
    M, K = a.shape
    Kb, Np = b.shape
    assert K == Kb, (K, Kb)
    assert Np % LANES == 0, Np
    assert K <= 8192, "K too large for single-shot full-K GEMM blocks"

    tn = 256 if Np % 256 == 0 else LANES     # 256-wide MXU feed on wide layers
    tm = _pick_tm(M)
    grid = (M // tm, Np // tn)

    in_specs = [
        pl.BlockSpec((tm, K), lambda i, j: (i, 0)),
        pl.BlockSpec((K, tn), lambda i, j: (0, j)),
        pl.BlockSpec((1, tn), lambda i, j: (0, j)),
    ]
    args = [a, b, shift]
    if residual is not None:
        in_specs.append(pl.BlockSpec((tm, tn), lambda i, j: (i, j)))
        args.append(residual)
        kernel = functools.partial(_gemm_res_kernel, relu=relu)
    else:
        kernel = functools.partial(_gemm_kernel, relu=relu)

    return pl.pallas_call(
        kernel,
        out_shape=jax.ShapeDtypeStruct((M, Np), out_dtype),
        grid=grid,
        in_specs=in_specs,
        out_specs=pl.BlockSpec((tm, tn), lambda i, j: (i, j)),
        compiler_params=pltpu.CompilerParams(
            dimension_semantics=("parallel", "parallel"),
            vmem_limit_bytes=VMEM_LIMIT,
        ),
    )(*args)


def maxpool_3x3_s2(x):
    """3x3, stride 2, pad 1 max pool (NHWC, 128-lane-padded channels)."""
    N, H, W, C = x.shape
    assert H % 2 == 0 and W % 2 == 0
    OH, OW = H // 2, W // 2
    xp = jnp.pad(x, ((0, 0), (1, 1), (1, 1), (0, 0)), constant_values=-jnp.inf)
    # Parity decomposition of the padded input (each is (N, OH+1, OW+1, C)).
    ee = xp[:, 0::2, 0::2, :]
    eo = xp[:, 0::2, 1::2, :]
    oe = xp[:, 1::2, 0::2, :]
    oo = xp[:, 1::2, 1::2, :]
    par_spec = pl.BlockSpec(ee.shape, lambda i: (0, 0, 0, 0))
    return pl.pallas_call(
        _maxpool_kernel,
        out_shape=jax.ShapeDtypeStruct((N, OH, OW, C), x.dtype),
        grid=(1,),
        in_specs=[par_spec, par_spec, par_spec, par_spec],
        out_specs=pl.BlockSpec((N, OH, OW, C), lambda i: (0, 0, 0, 0)),
    )(ee, eo, oe, oo)


def avgpool_fc(x, fc_w_pad, fc_b_pad):
    """Fused global average pool + final Linear; output lane-padded to 128."""
    N, H, W, C = x.shape
    xr = x.reshape(N, H * W, C)
    ncp = fc_w_pad.shape[1]
    return pl.pallas_call(
        _avgpool_fc_kernel,
        out_shape=jax.ShapeDtypeStruct((N, ncp), jnp.float32),
        grid=(1,),
        in_specs=[
            pl.BlockSpec((N, H * W, C), lambda i: (0, 0, 0)),
            pl.BlockSpec((C, ncp), lambda i: (0, 0)),
            pl.BlockSpec((1, ncp), lambda i: (0, 0)),
        ],
        out_specs=pl.BlockSpec((N, ncp), lambda i: (0, 0)),
    )(xr, fc_w_pad, fc_b_pad)


# ----------------------------------------------------------------------------
# Conv building blocks (im2col glue in JAX, fused GEMM in Pallas)
# ----------------------------------------------------------------------------
def _im2col(x, kh, kw, stride, padding):
    # TODO(synk): move patch extraction in-kernel (shifted index_map / manual
    # DMA over a spatially padded NHWC input) to delete this HBM intermediate;
    # at these toy sizes it is a few hundred KiB per conv, so kept XLA-side.
    N, H, W, C = x.shape
    if padding:
        x = jnp.pad(x, ((0, 0), (padding, padding), (padding, padding), (0, 0)))
    OH = (H + 2 * padding - kh) // stride + 1
    OW = (W + 2 * padding - kw) // stride + 1
    cols = [x[:, i:i + stride * OH:stride, j:j + stride * OW:stride, :]
            for i in range(kh) for j in range(kw)]
    patches = jnp.stack(cols, axis=3)                  # (N, OH, OW, kh*kw, C)
    return patches.reshape(N * OH * OW, kh * kw * C), OH, OW


def conv_bn(x, cp, stride, padding, relu, residual=None):
    """Conv2d + folded BatchNorm2d (eval) [+ residual] [+ ReLU].

    `cp` holds the pre-folded, pre-padded bf16 weight matrix (K, 128) and the
    f32 shift (1, 128); output channels stay 128-lane padded.
    """
    N = x.shape[0]
    a, OH, OW = _im2col(x, cp["kh"], cp["kw"], stride, padding)
    res2d = None
    if residual is not None:
        res2d = residual.reshape(N * OH * OW, residual.shape[-1])
    out = fused_gemm(a, cp["w"], cp["shift"], residual=res2d, relu=relu)
    return out.reshape(N, OH, OW, cp["w"].shape[1])


def basic_block(x, blk):
    stride = blk["stride"]
    out = conv_bn(x, blk["conv1"], stride=stride, padding=1, relu=True)
    if blk["downsample"] is not None:
        identity = conv_bn(x, blk["downsample"], stride=stride, padding=0,
                           relu=False)
    else:
        identity = x
    # conv2 + BN + residual add + ReLU fused into one Pallas GEMM epilogue.
    return conv_bn(out, blk["conv2"], stride=1, padding=1, relu=True,
                   residual=identity)


# ----------------------------------------------------------------------------
# Parameter construction (deterministic, synthetic "pretrained" weights)
# ----------------------------------------------------------------------------
def _init_conv(key, cout, cin, kh, kw):
    fan_in = cin * kh * kw
    return jax.random.normal(key, (cout, cin, kh, kw), jnp.float32) / jnp.sqrt(fan_in)


def _init_bn(key, c):
    k1, k2, k3, k4 = jax.random.split(key, 4)
    gamma = 1.0 + 0.1 * jax.random.normal(k1, (c,), jnp.float32)
    beta = 0.1 * jax.random.normal(k2, (c,), jnp.float32)
    mean = 0.1 * jax.random.normal(k3, (c,), jnp.float32)
    var = 1.0 + 0.1 * jnp.abs(jax.random.normal(k4, (c,), jnp.float32))
    return (gamma, beta, mean, var)


def build_params(key, widths=(8, 16, 32, 64), blocks=(2, 2, 2, 2),
                 num_classes=10, in_ch=3):
    keys = iter(jax.random.split(key, 128))
    params = {"num_classes": num_classes}
    params["conv1"] = _init_conv(next(keys), widths[0], in_ch, 7, 7)
    params["bn1"] = _init_bn(next(keys), widths[0])
    in_c = widths[0]
    for li, (w, nb) in enumerate(zip(widths, blocks)):
        layer = []
        for bi in range(nb):
            stride = (1 if li == 0 else 2) if bi == 0 else 1
            blk = {
                "stride": stride,
                "conv1": _init_conv(next(keys), w, in_c, 3, 3),
                "bn1": _init_bn(next(keys), w),
                "conv2": _init_conv(next(keys), w, w, 3, 3),
                "bn2": _init_bn(next(keys), w),
                "downsample": None,
            }
            if stride != 1 or in_c != w:
                blk["downsample"] = (
                    _init_conv(next(keys), w, in_c, 1, 1),
                    _init_bn(next(keys), w),
                )
            layer.append(blk)
            in_c = w
        params["layer%d" % (li + 1)] = layer
    params["fc_w"] = jax.random.normal(next(keys), (in_c, num_classes),
                                       jnp.float32) / jnp.sqrt(in_c)
    params["fc_b"] = 0.1 * jax.random.normal(next(keys), (num_classes,), jnp.float32)
    return params


# ----------------------------------------------------------------------------
# One-time (build-time) BN folding, transposition, bf16 cast and lane padding
# ----------------------------------------------------------------------------
def _fold_conv_bn(w, bn, cin_pad, cout_pad):
    cout, cin, kh, kw = w.shape
    gamma, beta, mean, var = bn
    scale = gamma / jnp.sqrt(var + BN_EPS)
    wf = jnp.transpose(w, (2, 3, 1, 0)) * scale          # fold BN scale, HWIO
    wf = jnp.pad(wf, ((0, 0), (0, 0), (0, cin_pad - cin), (0, cout_pad - cout)))
    wmat = wf.reshape(kh * kw * cin_pad, cout_pad).astype(jnp.bfloat16)
    shift = jnp.pad((beta - mean * scale).reshape(1, cout),
                    ((0, 0), (0, cout_pad - cout))).astype(jnp.float32)
    return {"w": wmat, "shift": shift, "kh": kh, "kw": kw}


def fold_params(raw):
    """Precompute every GEMM operand once, outside the jitted forward."""
    num_classes = raw["num_classes"]
    in_ch = raw["conv1"].shape[1]
    p = {
        "num_classes": num_classes,
        "conv1": _fold_conv_bn(raw["conv1"], raw["bn1"],
                               cin_pad=in_ch, cout_pad=CPAD),
    }
    for name in ("layer1", "layer2", "layer3", "layer4"):
        layer = []
        for blk in raw[name]:
            fb = {
                "stride": blk["stride"],
                "conv1": _fold_conv_bn(blk["conv1"], blk["bn1"], CPAD, CPAD),
                "conv2": _fold_conv_bn(blk["conv2"], blk["bn2"], CPAD, CPAD),
                "downsample": None,
            }
            if blk["downsample"] is not None:
                wd, bnd = blk["downsample"]
                fb["downsample"] = _fold_conv_bn(wd, bnd, CPAD, CPAD)
            layer.append(fb)
        p[name] = layer
    in_c, nc = raw["fc_w"].shape
    nc_pad = _round_up(nc, LANES)
    p["fc_w"] = jnp.pad(raw["fc_w"].astype(jnp.float32),
                        ((0, CPAD - in_c), (0, nc_pad - nc)))
    p["fc_b"] = jnp.pad(raw["fc_b"].reshape(1, nc).astype(jnp.float32),
                        ((0, 0), (0, nc_pad - nc)))
    return p


# ----------------------------------------------------------------------------
# Full forward pass (mirrors resnet.forward)
# ----------------------------------------------------------------------------
def resnet_forward(p, x_nchw):
    # NCHW -> NHWC; activations carried in bf16 (128-lane-padded channels).
    x = jnp.transpose(x_nchw, (0, 2, 3, 1)).astype(jnp.bfloat16)
    x = conv_bn(x, p["conv1"], stride=2, padding=3, relu=True)
    x = maxpool_3x3_s2(x)
    for name in ("layer1", "layer2", "layer3", "layer4"):
        for blk in p[name]:
            x = basic_block(x, blk)
    # TODO(synk): x.register_hook(activation_hook) is an autograd backward hook;
    #             it has no effect on the forward computation and is omitted.
    logits = avgpool_fc(x, p["fc_w"], p["fc_b"])
    return logits[:, :p["num_classes"]]


if __name__ == "__main__":
    root = jax.random.PRNGKey(0)
    k_params, k_x = jax.random.split(root)

    raw_params = build_params(k_params)
    params = fold_params(raw_params)          # one-time folding, outside jit
    # Small input consistent with a 3-channel ResNet stem.
    x = jax.random.normal(k_x, (2, 3, 32, 32), jnp.float32)

    forward = jax.jit(lambda inp: resnet_forward(params, inp))
    logits = forward(x)
    jax.block_until_ready(logits)

    assert logits.shape == (2, 10), logits.shape
    assert bool(jnp.isfinite(logits).all()), "non-finite output"
    print("KERNEL_OK")
</pallas_src>

<mosaic_0001>
module attributes {stable_mosaic.version = 11 : i64} {
  func.func @_gemm_kernel(%arg0: i32, %arg1: i32, %arg2: memref<256x147xbf16, #tpu.memory_space<vmem>>, %arg3: memref<147x128xbf16, #tpu.memory_space<vmem>>, %arg4: memref<1x128xf32, #tpu.memory_space<vmem>>, %arg5: memref<256x128xbf16, #tpu.memory_space<vmem>>) attributes {dimension_semantics = [#tpu.dimension_semantics<parallel>, #tpu.dimension_semantics<parallel>], iteration_bounds = array<i64: 2, 1>, scalar_prefetch = 0 : i64, scratch_operands = 0 : i64, tpu.core_type = #tpu.core_type<tc>, window_params = [{transform_indices = @transform_0, window_bounds = array<i64: 256, 147>}, {transform_indices = @transform_1, window_bounds = array<i64: 147, 128>}, {transform_indices = @transform_2, window_bounds = array<i64: 1, 128>}, {transform_indices = @transform_3, window_bounds = array<i64: 256, 128>}]} {
    %c0 = arith.constant 0 : index
    %c0_0 = arith.constant 0 : index
    %0 = vector.load %arg2[%c0, %c0_0] : memref<256x147xbf16, #tpu.memory_space<vmem>>, vector<256x147xbf16>
    %c0_1 = arith.constant 0 : index
    %c0_2 = arith.constant 0 : index
    %1 = vector.load %arg3[%c0_1, %c0_2] : memref<147x128xbf16, #tpu.memory_space<vmem>>, vector<147x128xbf16>
    %cst = arith.constant dense<0.000000e+00> : vector<256x128xf32>
    %2 = tpu.matmul %0, %1, %cst {dimension_numbers = #tpu.dot_dimension_numbers<[1], [0], [0], [1], [0, 0, 1, 1], [], []>} : vector<256x147xbf16>, vector<147x128xbf16>, vector<256x128xf32> -> vector<256x128xf32>
    %c0_3 = arith.constant 0 : index
    %c0_4 = arith.constant 0 : index
    %3 = vector.load %arg4[%c0_3, %c0_4] : memref<1x128xf32, #tpu.memory_space<vmem>>, vector<1x128xf32>
    %4 = vector.broadcast %3 : vector<1x128xf32> to vector<256x128xf32>
    %5 = arith.addf %2, %4 : vector<256x128xf32>
    %cst_5 = arith.constant 0.000000e+00 : f32
    %6 = vector.broadcast %cst_5 : f32 to vector<256x128xf32>
    %7 = arith.maximumf %5, %6 : vector<256x128xf32>
    %8 = arith.truncf %7 : vector<256x128xf32> to vector<256x128xbf16>
    %c0_6 = arith.constant 0 : index
    %c0_7 = arith.constant 0 : index
    %9 = vector.load %arg5[%c0_6, %c0_7] : memref<256x128xbf16, #tpu.memory_space<vmem>>, vector<256x128xbf16>
    tpu.vector_store %arg5[%c0_6, %c0_7], %8 {strides = array<i32>} : memref<256x128xbf16, #tpu.memory_space<vmem>>, vector<256x128xbf16>,
    return
  }
  func.func @transform_0(%arg0: i32, %arg1: i32) -> (i32, i32) {
    %c0_i32 = arith.constant 0 : i32
    %c0_i32_0 = arith.constant 0 : i32
    return %arg0, %c0_i32 : i32, i32
  }
  func.func @transform_1(%arg0: i32, %arg1: i32) -> (i32, i32) {
    %c0_i32 = arith.constant 0 : i32
    %c0_i32_0 = arith.constant 0 : i32
    return %c0_i32, %arg1 : i32, i32
  }
  func.func @transform_2(%arg0: i32, %arg1: i32) -> (i32, i32) {
    %c0_i32 = arith.constant 0 : i32
    %c0_i32_0 = arith.constant 0 : i32
    return %c0_i32, %arg1 : i32, i32
  }
  func.func @transform_3(%arg0: i32, %arg1: i32) -> (i32, i32) {
    %c0_i32 = arith.constant 0 : i32
    return %arg0, %arg1 : i32, i32
  }
}

module attributes {stable_mosaic.version = 11 : i64} {
  func.func @_maxpool_kernel(%arg0: i32, %arg1: memref<2x9x9x128xbf16, #tpu.memory_space<vmem>>, %arg2: memref<2x9x9x128xbf16, #tpu.memory_space<vmem>>, %arg3: memref<2x9x9x128xbf16, #tpu.memory_space<vmem>>, %arg4: memref<2x9x9x128xbf16, #tpu.memory_space<vmem>>, %arg5: memref<2x8x8x128xbf16, #tpu.memory_space<vmem>>) attributes {dimension_semantics = [#tpu.dimension_semantics<arbitrary>], iteration_bounds = array<i64: 1>, scalar_prefetch = 0 : i64, scratch_operands = 0 : i64, tpu.core_type = #tpu.core_type<tc>, window_params = [{pipeline_mode = #tpu.pipeline_mode<synchronous>, transform_indices = @transform_0, window_bounds = array<i64: 2, 9, 9, 128>}, {pipeline_mode = #tpu.pipeline_mode<synchronous>, transform_indices = @transform_1, window_bounds = array<i64: 2, 9, 9, 128>}, {pipeline_mode = #tpu.pipeline_mode<synchronous>, transform_indices = @transform_2, window_bounds = array<i64: 2, 9, 9, 128>}, {pipeline_mode = #tpu.pipeline_mode<synchronous>, transform_indices = @transform_3, window_bounds = array<i64: 2, 9, 9, 128>}, {pipeline_mode = #tpu.pipeline_mode<synchronous>, transform_indices = @transform_4, window_bounds = array<i64: 2, 8, 8, 128>}]} {
    %c0 = arith.constant 0 : index
    %c0_0 = arith.constant 0 : index
    %c0_1 = arith.constant 0 : index
    %c0_2 = arith.constant 0 : index
    %0 = vector.load %arg1[%c0, %c0_0, %c0_1, %c0_2] : memref<2x9x9x128xbf16, #tpu.memory_space<vmem>>, vector<2x9x9x128xbf16>
    %c0_3 = arith.constant 0 : index
    %c0_4 = arith.constant 0 : index
    %c0_5 = arith.constant 0 : index
    %c0_6 = arith.constant 0 : index
    %1 = vector.load %arg2[%c0_3, %c0_4, %c0_5, %c0_6] : memref<2x9x9x128xbf16, #tpu.memory_space<vmem>>, vector<2x9x9x128xbf16>
    %c0_7 = arith.constant 0 : index
    %c0_8 = arith.constant 0 : index
    %c0_9 = arith.constant 0 : index
    %c0_10 = arith.constant 0 : index
    %2 = vector.load %arg3[%c0_7, %c0_8, %c0_9, %c0_10] : memref<2x9x9x128xbf16, #tpu.memory_space<vmem>>, vector<2x9x9x128xbf16>
    %c0_11 = arith.constant 0 : index
    %c0_12 = arith.constant 0 : index
    %c0_13 = arith.constant 0 : index
    %c0_14 = arith.constant 0 : index
    %3 = vector.load %arg4[%c0_11, %c0_12, %c0_13, %c0_14] : memref<2x9x9x128xbf16, #tpu.memory_space<vmem>>, vector<2x9x9x128xbf16>
    %4 = vector.extract_strided_slice %3 {offsets = [0, 0, 0, 0], sizes = [2, 8, 8, 128], strides = [1, 1, 1, 1]} : vector<2x9x9x128xbf16> to vector<2x8x8x128xbf16>
    %5 = vector.extract_strided_slice %0 {offsets = [0, 0, 0, 0], sizes = [2, 8, 8, 128], strides = [1, 1, 1, 1]} : vector<2x9x9x128xbf16> to vector<2x8x8x128xbf16>
    %6 = arith.maximumf %4, %5 : vector<2x8x8x128xbf16>
    %7 = vector.extract_strided_slice %0 {offsets = [0, 0, 1, 0], sizes = [2, 8, 8, 128], strides = [1, 1, 1, 1]} : vector<2x9x9x128xbf16> to vector<2x8x8x128xbf16>
    %8 = arith.maximumf %6, %7 : vector<2x8x8x128xbf16>
    %9 = vector.extract_strided_slice %0 {offsets = [0, 1, 0, 0], sizes = [2, 8, 8, 128], strides = [1, 1, 1, 1]} : vector<2x9x9x128xbf16> to vector<2x8x8x128xbf16>
    %10 = arith.maximumf %8, %9 : vector<2x8x8x128xbf16>
    %11 = vector.extract_strided_slice %0 {offsets = [0, 1, 1, 0], sizes = [2, 8, 8, 128], strides = [1, 1, 1, 1]} : vector<2x9x9x128xbf16> to vector<2x8x8x128xbf16>
    %12 = arith.maximumf %10, %11 : vector<2x8x8x128xbf16>
    %13 = vector.extract_strided_slice %1 {offsets = [0, 0, 0, 0], sizes = [2, 8, 8, 128], strides = [1, 1, 1, 1]} : vector<2x9x9x128xbf16> to vector<2x8x8x128xbf16>
    %14 = arith.maximumf %12, %13 : vector<2x8x8x128xbf16>
    %15 = vector.extract_strided_slice %1 {offsets = [0, 1, 0, 0], sizes = [2, 8, 8, 128], strides = [1, 1, 1, 1]} : vector<2x9x9x128xbf16> to vector<2x8x8x128xbf16>
    %16 = arith.maximumf %14, %15 : vector<2x8x8x128xbf16>
    %17 = vector.extract_strided_slice %2 {offsets = [0, 0, 0, 0], sizes = [2, 8, 8, 128], strides = [1, 1, 1, 1]} : vector<2x9x9x128xbf16> to vector<2x8x8x128xbf16>
    %18 = arith.maximumf %16, %17 : vector<2x8x8x128xbf16>
    %19 = vector.extract_strided_slice %2 {offsets = [0, 0, 1, 0], sizes = [2, 8, 8, 128], strides = [1, 1, 1, 1]} : vector<2x9x9x128xbf16> to vector<2x8x8x128xbf16>
    %20 = arith.maximumf %18, %19 : vector<2x8x8x128xbf16>
    %c0_15 = arith.constant 0 : index
    %c0_16 = arith.constant 0 : index
    %c0_17 = arith.constant 0 : index
    %c0_18 = arith.constant 0 : index
    %21 = vector.load %arg5[%c0_15, %c0_16, %c0_17, %c0_18] : memref<2x8x8x128xbf16, #tpu.memory_space<vmem>>, vector<2x8x8x128xbf16>
    tpu.vector_store %arg5[%c0_15, %c0_16, %c0_17, %c0_18], %20 {strides = array<i32>} : memref<2x8x8x128xbf16, #tpu.memory_space<vmem>>, vector<2x8x8x128xbf16>,
    return
  }
  func.func @transform_0(%arg0: i32) -> (i32, i32, i32, i32) {
    %c0_i32 = arith.constant 0 : i32
    %c0_i32_0 = arith.constant 0 : i32
    %c0_i32_1 = arith.constant 0 : i32
    %c0_i32_2 = arith.constant 0 : i32
    %c0_i32_3 = arith.constant 0 : i32
    return %c0_i32, %c0_i32_0, %c0_i32_1, %c0_i32_2 : i32, i32, i32, i32
  }
  func.func @transform_1(%arg0: i32) -> (i32, i32, i32, i32) {
    %c0_i32 = arith.constant 0 : i32
    %c0_i32_0 = arith.constant 0 : i32
    %c0_i32_1 = arith.constant 0 : i32
    %c0_i32_2 = arith.constant 0 : i32
    %c0_i32_3 = arith.constant 0 : i32
    return %c0_i32, %c0_i32_0, %c0_i32_1, %c0_i32_2 : i32, i32, i32, i32
  }
  func.func @transform_2(%arg0: i32) -> (i32, i32, i32, i32) {
    %c0_i32 = arith.constant 0 : i32
    %c0_i32_0 = arith.constant 0 : i32
    %c0_i32_1 = arith.constant 0 : i32
    %c0_i32_2 = arith.constant 0 : i32
    %c0_i32_3 = arith.constant 0 : i32
    return %c0_i32, %c0_i32_0, %c0_i32_1, %c0_i32_2 : i32, i32, i32, i32
  }
  func.func @transform_3(%arg0: i32) -> (i32, i32, i32, i32) {
    %c0_i32 = arith.constant 0 : i32
    %c0_i32_0 = arith.constant 0 : i32
    %c0_i32_1 = arith.constant 0 : i32
    %c0_i32_2 = arith.constant 0 : i32
    %c0_i32_3 = arith.constant 0 : i32
    return %c0_i32, %c0_i32_0, %c0_i32_1, %c0_i32_2 : i32, i32, i32, i32
  }
  func.func @transform_4(%arg0: i32) -> (i32, i32, i32, i32) {
    %c0_i32 = arith.constant 0 : i32
    %c0_i32_0 = arith.constant 0 : i32
    %c0_i32_1 = arith.constant 0 : i32
    %c0_i32_2 = arith.constant 0 : i32
    %c0_i32_3 = arith.constant 0 : i32
    return %c0_i32, %c0_i32_0, %c0_i32_1, %c0_i32_2 : i32, i32, i32, i32
  }
}

module attributes {stable_mosaic.version = 11 : i64} {
  func.func @_gemm_kernel(%arg0: i32, %arg1: i32, %arg2: memref<64x1152xbf16, #tpu.memory_space<vmem>>, %arg3: memref<1152x128xbf16, #tpu.memory_space<vmem>>, %arg4: memref<1x128xf32, #tpu.memory_space<vmem>>, %arg5: memref<64x128xbf16, #tpu.memory_space<vmem>>) attributes {dimension_semantics = [#tpu.dimension_semantics<parallel>, #tpu.dimension_semantics<parallel>], iteration_bounds = array<i64: 2, 1>, scalar_prefetch = 0 : i64, scratch_operands = 0 : i64, tpu.core_type = #tpu.core_type<tc>, window_params = [{transform_indices = @transform_0, window_bounds = array<i64: 64, 1152>}, {transform_indices = @transform_1, window_bounds = array<i64: 1152, 128>}, {transform_indices = @transform_2, window_bounds = array<i64: 1, 128>}, {transform_indices = @transform_3, window_bounds = array<i64: 64, 128>}]} {
    %c0 = arith.constant 0 : index
    %c0_0 = arith.constant 0 : index
    %0 = vector.load %arg2[%c0, %c0_0] : memref<64x1152xbf16, #tpu.memory_space<vmem>>, vector<64x1152xbf16>
    %c0_1 = arith.constant 0 : index
    %c0_2 = arith.constant 0 : index
    %1 = vector.load %arg3[%c0_1, %c0_2] : memref<1152x128xbf16, #tpu.memory_space<vmem>>, vector<1152x128xbf16>
    %cst = arith.constant dense<0.000000e+00> : vector<64x128xf32>
    %2 = tpu.matmul %0, %1, %cst {dimension_numbers = #tpu.dot_dimension_numbers<[1], [0], [0], [1], [0, 0, 1, 1], [], []>} : vector<64x1152xbf16>, vector<1152x128xbf16>, vector<64x128xf32> -> vector<64x128xf32>
    %c0_3 = arith.constant 0 : index
    %c0_4 = arith.constant 0 : index
    %3 = vector.load %arg4[%c0_3, %c0_4] : memref<1x128xf32, #tpu.memory_space<vmem>>, vector<1x128xf32>
    %4 = vector.broadcast %3 : vector<1x128xf32> to vector<64x128xf32>
    %5 = arith.addf %2, %4 : vector<64x128xf32>
    %cst_5 = arith.constant 0.000000e+00 : f32
    %6 = vector.broadcast %cst_5 : f32 to vector<64x128xf32>
    %7 = arith.maximumf %5, %6 : vector<64x128xf32>
    %8 = arith.truncf %7 : vector<64x128xf32> to vector<64x128xbf16>
    %c0_6 = arith.constant 0 : index
    %c0_7 = arith.constant 0 : index
    %9 = vector.load %arg5[%c0_6, %c0_7] : memref<64x128xbf16, #tpu.memory_space<vmem>>, vector<64x128xbf16>
    tpu.vector_store %arg5[%c0_6, %c0_7], %8 {strides = array<i32>} : memref<64x128xbf16, #tpu.memory_space<vmem>>, vector<64x128xbf16>,
    return
  }
  func.func @transform_0(%arg0: i32, %arg1: i32) -> (i32, i32) {
    %c0_i32 = arith.constant 0 : i32
    %c0_i32_0 = arith.constant 0 : i32
    return %arg0, %c0_i32 : i32, i32
  }
  func.func @transform_1(%arg0: i32, %arg1: i32) -> (i32, i32) {
    %c0_i32 = arith.constant 0 : i32
    %c0_i32_0 = arith.constant 0 : i32
    return %c0_i32, %arg1 : i32, i32
  }
  func.func @transform_2(%arg0: i32, %arg1: i32) -> (i32, i32) {
    %c0_i32 = arith.constant 0 : i32
    %c0_i32_0 = arith.constant 0 : i32
    return %c0_i32, %arg1 : i32, i32
  }
  func.func @transform_3(%arg0: i32, %arg1: i32) -> (i32, i32) {
    %c0_i32 = arith.constant 0 : i32
    return %arg0, %arg1 : i32, i32
  }
}

module attributes {stable_mosaic.version = 11 : i64} {
  func.func @_gemm_res_kernel(%arg0: i32, %arg1: i32, %arg2: memref<64x1152xbf16, #tpu.memory_space<vmem>>, %arg3: memref<1152x128xbf16, #tpu.memory_space<vmem>>, %arg4: memref<1x128xf32, #tpu.memory_space<vmem>>, %arg5: memref<64x128xbf16, #tpu.memory_space<vmem>>, %arg6: memref<64x128xbf16, #tpu.memory_space<vmem>>) attributes {dimension_semantics = [#tpu.dimension_semantics<parallel>, #tpu.dimension_semantics<parallel>], iteration_bounds = array<i64: 2, 1>, scalar_prefetch = 0 : i64, scratch_operands = 0 : i64, tpu.core_type = #tpu.core_type<tc>, window_params = [{transform_indices = @transform_0, window_bounds = array<i64: 64, 1152>}, {transform_indices = @transform_1, window_bounds = array<i64: 1152, 128>}, {transform_indices = @transform_2, window_bounds = array<i64: 1, 128>}, {transform_indices = @transform_3, window_bounds = array<i64: 64, 128>}, {transform_indices = @transform_4, window_bounds = array<i64: 64, 128>}]} {
    %c0 = arith.constant 0 : index
    %c0_0 = arith.constant 0 : index
    %0 = vector.load %arg2[%c0, %c0_0] : memref<64x1152xbf16, #tpu.memory_space<vmem>>, vector<64x1152xbf16>
    %c0_1 = arith.constant 0 : index
    %c0_2 = arith.constant 0 : index
    %1 = vector.load %arg3[%c0_1, %c0_2] : memref<1152x128xbf16, #tpu.memory_space<vmem>>, vector<1152x128xbf16>
    %cst = arith.constant dense<0.000000e+00> : vector<64x128xf32>
    %2 = tpu.matmul %0, %1, %cst {dimension_numbers = #tpu.dot_dimension_numbers<[1], [0], [0], [1], [0, 0, 1, 1], [], []>} : vector<64x1152xbf16>, vector<1152x128xbf16>, vector<64x128xf32> -> vector<64x128xf32>
    %c0_3 = arith.constant 0 : index
    %c0_4 = arith.constant 0 : index
    %3 = vector.load %arg4[%c0_3, %c0_4] : memref<1x128xf32, #tpu.memory_space<vmem>>, vector<1x128xf32>
    %4 = vector.broadcast %3 : vector<1x128xf32> to vector<64x128xf32>
    %5 = arith.addf %2, %4 : vector<64x128xf32>
    %c0_5 = arith.constant 0 : index
    %c0_6 = arith.constant 0 : index
    %6 = vector.load %arg5[%c0_5, %c0_6] : memref<64x128xbf16, #tpu.memory_space<vmem>>, vector<64x128xbf16>
    %7 = arith.extf %6 : vector<64x128xbf16> to vector<64x128xf32>
    %8 = arith.addf %5, %7 : vector<64x128xf32>
    %cst_7 = arith.constant 0.000000e+00 : f32
    %9 = vector.broadcast %cst_7 : f32 to vector<64x128xf32>
    %10 = arith.maximumf %8, %9 : vector<64x128xf32>
    %11 = arith.truncf %10 : vector<64x128xf32> to vector<64x128xbf16>
    %c0_8 = arith.constant 0 : index
    %c0_9 = arith.constant 0 : index
    %12 = vector.load %arg6[%c0_8, %c0_9] : memref<64x128xbf16, #tpu.memory_space<vmem>>, vector<64x128xbf16>
    tpu.vector_store %arg6[%c0_8, %c0_9], %11 {strides = array<i32>} : memref<64x128xbf16, #tpu.memory_space<vmem>>, vector<64x128xbf16>,
    return
  }
  func.func @transform_0(%arg0: i32, %arg1: i32) -> (i32, i32) {
    %c0_i32 = arith.constant 0 : i32
    %c0_i32_0 = arith.constant 0 : i32
    return %arg0, %c0_i32 : i32, i32
  }
  func.func @transform_1(%arg0: i32, %arg1: i32) -> (i32, i32) {
    %c0_i32 = arith.constant 0 : i32
    %c0_i32_0 = arith.constant 0 : i32
    return %c0_i32, %arg1 : i32, i32
  }
  func.func @transform_2(%arg0: i32, %arg1: i32) -> (i32, i32) {
    %c0_i32 = arith.constant 0 : i32
    %c0_i32_0 = arith.constant 0 : i32
    return %c0_i32, %arg1 : i32, i32
  }
  func.func @transform_3(%arg0: i32, %arg1: i32) -> (i32, i32) {
    %c0_i32 = arith.constant 0 : i32
    return %arg0, %arg1 : i32, i32
  }
  func.func @transform_4(%arg0: i32, %arg1: i32) -> (i32, i32) {
    %c0_i32 = arith.constant 0 : i32
    return %arg0, %arg1 : i32, i32
  }
}

module attributes {stable_mosaic.version = 11 : i64} {
  func.func @_gemm_kernel(%arg0: i32, %arg1: i32, %arg2: memref<16x1152xbf16, #tpu.memory_space<vmem>>, %arg3: memref<1152x128xbf16, #tpu.memory_space<vmem>>, %arg4: memref<1x128xf32, #tpu.memory_space<vmem>>, %arg5: memref<16x128xbf16, #tpu.memory_space<vmem>>) attributes {dimension_semantics = [#tpu.dimension_semantics<parallel>, #tpu.dimension_semantics<parallel>], iteration_bounds = array<i64: 2, 1>, scalar_prefetch = 0 : i64, scratch_operands = 0 : i64, tpu.core_type = #tpu.core_type<tc>, window_params = [{transform_indices = @transform_0, window_bounds = array<i64: 16, 1152>}, {transform_indices = @transform_1, window_bounds = array<i64: 1152, 128>}, {transform_indices = @transform_2, window_bounds = array<i64: 1, 128>}, {transform_indices = @transform_3, window_bounds = array<i64: 16, 128>}]} {
    %c0 = arith.constant 0 : index
    %c0_0 = arith.constant 0 : index
    %0 = vector.load %arg2[%c0, %c0_0] : memref<16x1152xbf16, #tpu.memory_space<vmem>>, vector<16x1152xbf16>
    %c0_1 = arith.constant 0 : index
    %c0_2 = arith.constant 0 : index
    %1 = vector.load %arg3[%c0_1, %c0_2] : memref<1152x128xbf16, #tpu.memory_space<vmem>>, vector<1152x128xbf16>
    %cst = arith.constant dense<0.000000e+00> : vector<16x128xf32>
    %2 = tpu.matmul %0, %1, %cst {dimension_numbers = #tpu.dot_dimension_numbers<[1], [0], [0], [1], [0, 0, 1, 1], [], []>} : vector<16x1152xbf16>, vector<1152x128xbf16>, vector<16x128xf32> -> vector<16x128xf32>
    %c0_3 = arith.constant 0 : index
    %c0_4 = arith.constant 0 : index
    %3 = vector.load %arg4[%c0_3, %c0_4] : memref<1x128xf32, #tpu.memory_space<vmem>>, vector<1x128xf32>
    %4 = vector.broadcast %3 : vector<1x128xf32> to vector<16x128xf32>
    %5 = arith.addf %2, %4 : vector<16x128xf32>
    %cst_5 = arith.constant 0.000000e+00 : f32
    %6 = vector.broadcast %cst_5 : f32 to vector<16x128xf32>
    %7 = arith.maximumf %5, %6 : vector<16x128xf32>
    %8 = arith.truncf %7 : vector<16x128xf32> to vector<16x128xbf16>
    %c0_6 = arith.constant 0 : index
    %c0_7 = arith.constant 0 : index
    %9 = vector.load %arg5[%c0_6, %c0_7] : memref<16x128xbf16, #tpu.memory_space<vmem>>, vector<16x128xbf16>
    tpu.vector_store %arg5[%c0_6, %c0_7], %8 {strides = array<i32>} : memref<16x128xbf16, #tpu.memory_space<vmem>>, vector<16x128xbf16>,
    return
  }
  func.func @transform_0(%arg0: i32, %arg1: i32) -> (i32, i32) {
    %c0_i32 = arith.constant 0 : i32
    %c0_i32_0 = arith.constant 0 : i32
    return %arg0, %c0_i32 : i32, i32
  }
  func.func @transform_1(%arg0: i32, %arg1: i32) -> (i32, i32) {
    %c0_i32 = arith.constant 0 : i32
    %c0_i32_0 = arith.constant 0 : i32
    return %c0_i32, %arg1 : i32, i32
  }
  func.func @transform_2(%arg0: i32, %arg1: i32) -> (i32, i32) {
    %c0_i32 = arith.constant 0 : i32
    %c0_i32_0 = arith.constant 0 : i32
    return %c0_i32, %arg1 : i32, i32
  }
  func.func @transform_3(%arg0: i32, %arg1: i32) -> (i32, i32) {
    %c0_i32 = arith.constant 0 : i32
    return %arg0, %arg1 : i32, i32
  }
}

module attributes {stable_mosaic.version = 11 : i64} {
  func.func @_gemm_res_kernel(%arg0: i32, %arg1: i32, %arg2: memref<16x1152xbf16, #tpu.memory_space<vmem>>, %arg3: memref<1152x128xbf16, #tpu.memory_space<vmem>>, %arg4: memref<1x128xf32, #tpu.memory_space<vmem>>, %arg5: memref<16x128xbf16, #tpu.memory_space<vmem>>, %arg6: memref<16x128xbf16, #tpu.memory_space<vmem>>) attributes {dimension_semantics = [#tpu.dimension_semantics<parallel>, #tpu.dimension_semantics<parallel>], iteration_bounds = array<i64: 2, 1>, scalar_prefetch = 0 : i64, scratch_operands = 0 : i64, tpu.core_type = #tpu.core_type<tc>, window_params = [{transform_indices = @transform_0, window_bounds = array<i64: 16, 1152>}, {transform_indices = @transform_1, window_bounds = array<i64: 1152, 128>}, {transform_indices = @transform_2, window_bounds = array<i64: 1, 128>}, {transform_indices = @transform_3, window_bounds = array<i64: 16, 128>}, {transform_indices = @transform_4, window_bounds = array<i64: 16, 128>}]} {
    %c0 = arith.constant 0 : index
    %c0_0 = arith.constant 0 : index
    %0 = vector.load %arg2[%c0, %c0_0] : memref<16x1152xbf16, #tpu.memory_space<vmem>>, vector<16x1152xbf16>
    %c0_1 = arith.constant 0 : index
    %c0_2 = arith.constant 0 : index
    %1 = vector.load %arg3[%c0_1, %c0_2] : memref<1152x128xbf16, #tpu.memory_space<vmem>>, vector<1152x128xbf16>
    %cst = arith.constant dense<0.000000e+00> : vector<16x128xf32>
    %2 = tpu.matmul %0, %1, %cst {dimension_numbers = #tpu.dot_dimension_numbers<[1], [0], [0], [1], [0, 0, 1, 1], [], []>} : vector<16x1152xbf16>, vector<1152x128xbf16>, vector<16x128xf32> -> vector<16x128xf32>
    %c0_3 = arith.constant 0 : index
    %c0_4 = arith.constant 0 : index
    %3 = vector.load %arg4[%c0_3, %c0_4] : memref<1x128xf32, #tpu.memory_space<vmem>>, vector<1x128xf32>
    %4 = vector.broadcast %3 : vector<1x128xf32> to vector<16x128xf32>
    %5 = arith.addf %2, %4 : vector<16x128xf32>
    %c0_5 = arith.constant 0 : index
    %c0_6 = arith.constant 0 : index
    %6 = vector.load %arg5[%c0_5, %c0_6] : memref<16x128xbf16, #tpu.memory_space<vmem>>, vector<16x128xbf16>
    %7 = arith.extf %6 : vector<16x128xbf16> to vector<16x128xf32>
    %8 = arith.addf %5, %7 : vector<16x128xf32>
    %cst_7 = arith.constant 0.000000e+00 : f32
    %9 = vector.broadcast %cst_7 : f32 to vector<16x128xf32>
    %10 = arith.maximumf %8, %9 : vector<16x128xf32>
    %11 = arith.truncf %10 : vector<16x128xf32> to vector<16x128xbf16>
    %c0_8 = arith.constant 0 : index
    %c0_9 = arith.constant 0 : index
    %12 = vector.load %arg6[%c0_8, %c0_9] : memref<16x128xbf16, #tpu.memory_space<vmem>>, vector<16x128xbf16>
    tpu.vector_store %arg6[%c0_8, %c0_9], %11 {strides = array<i32>} : memref<16x128xbf16, #tpu.memory_space<vmem>>, vector<16x128xbf16>,
    return
  }
  func.func @transform_0(%arg0: i32, %arg1: i32) -> (i32, i32) {
    %c0_i32 = arith.constant 0 : i32
    %c0_i32_0 = arith.constant 0 : i32
    return %arg0, %c0_i32 : i32, i32
  }
  func.func @transform_1(%arg0: i32, %arg1: i32) -> (i32, i32) {
    %c0_i32 = arith.constant 0 : i32
    %c0_i32_0 = arith.constant 0 : i32
    return %c0_i32, %arg1 : i32, i32
  }
  func.func @transform_2(%arg0: i32, %arg1: i32) -> (i32, i32) {
    %c0_i32 = arith.constant 0 : i32
    %c0_i32_0 = arith.constant 0 : i32
    return %c0_i32, %arg1 : i32, i32
  }
  func.func @transform_3(%arg0: i32, %arg1: i32) -> (i32, i32) {
    %c0_i32 = arith.constant 0 : i32
    return %arg0, %arg1 : i32, i32
  }
  func.func @transform_4(%arg0: i32, %arg1: i32) -> (i32, i32) {
    %c0_i32 = arith.constant 0 : i32
    return %arg0, %arg1 : i32, i32
  }
}

module attributes {stable_mosaic.version = 11 : i64} {
  func.func @_gemm_kernel(%arg0: i32, %arg1: i32, %arg2: memref<16x128xbf16, #tpu.memory_space<vmem>>, %arg3: memref<128x128xbf16, #tpu.memory_space<vmem>>, %arg4: memref<1x128xf32, #tpu.memory_space<vmem>>, %arg5: memref<16x128xbf16, #tpu.memory_space<vmem>>) attributes {dimension_semantics = [#tpu.dimension_semantics<parallel>, #tpu.dimension_semantics<parallel>], iteration_bounds = array<i64: 2, 1>, scalar_prefetch = 0 : i64, scratch_operands = 0 : i64, tpu.core_type = #tpu.core_type<tc>, window_params = [{transform_indices = @transform_0, window_bounds = array<i64: 16, 128>}, {transform_indices = @transform_1, window_bounds = array<i64: 128, 128>}, {transform_indices = @transform_2, window_bounds = array<i64: 1, 128>}, {transform_indices = @transform_3, window_bounds = array<i64: 16, 128>}]} {
    %c0 = arith.constant 0 : index
    %c0_0 = arith.constant 0 : index
    %0 = vector.load %arg2[%c0, %c0_0] : memref<16x128xbf16, #tpu.memory_space<vmem>>, vector<16x128xbf16>
    %c0_1 = arith.constant 0 : index
    %c0_2 = arith.constant 0 : index
    %1 = vector.load %arg3[%c0_1, %c0_2] : memref<128x128xbf16, #tpu.memory_space<vmem>>, vector<128x128xbf16>
    %cst = arith.constant dense<0.000000e+00> : vector<16x128xf32>
    %2 = tpu.matmul %0, %1, %cst {dimension_numbers = #tpu.dot_dimension_numbers<[1], [0], [0], [1], [0, 0, 1, 1], [], []>} : vector<16x128xbf16>, vector<128x128xbf16>, vector<16x128xf32> -> vector<16x128xf32>
    %c0_3 = arith.constant 0 : index
    %c0_4 = arith.constant 0 : index
    %3 = vector.load %arg4[%c0_3, %c0_4] : memref<1x128xf32, #tpu.memory_space<vmem>>, vector<1x128xf32>
    %4 = vector.broadcast %3 : vector<1x128xf32> to vector<16x128xf32>
    %5 = arith.addf %2, %4 : vector<16x128xf32>
    %6 = arith.truncf %5 : vector<16x128xf32> to vector<16x128xbf16>
    %c0_5 = arith.constant 0 : index
    %c0_6 = arith.constant 0 : index
    %7 = vector.load %arg5[%c0_5, %c0_6] : memref<16x128xbf16, #tpu.memory_space<vmem>>, vector<16x128xbf16>
    tpu.vector_store %arg5[%c0_5, %c0_6], %6 {strides = array<i32>} : memref<16x128xbf16, #tpu.memory_space<vmem>>, vector<16x128xbf16>,
    return
  }
  func.func @transform_0(%arg0: i32, %arg1: i32) -> (i32, i32) {
    %c0_i32 = arith.constant 0 : i32
    %c0_i32_0 = arith.constant 0 : i32
    return %arg0, %c0_i32 : i32, i32
  }
  func.func @transform_1(%arg0: i32, %arg1: i32) -> (i32, i32) {
    %c0_i32 = arith.constant 0 : i32
    %c0_i32_0 = arith.constant 0 : i32
    return %c0_i32, %arg1 : i32, i32
  }
  func.func @transform_2(%arg0: i32, %arg1: i32) -> (i32, i32) {
    %c0_i32 = arith.constant 0 : i32
    %c0_i32_0 = arith.constant 0 : i32
    return %c0_i32, %arg1 : i32, i32
  }
  func.func @transform_3(%arg0: i32, %arg1: i32) -> (i32, i32) {
    %c0_i32 = arith.constant 0 : i32
    return %arg0, %arg1 : i32, i32
  }
}

module attributes {stable_mosaic.version = 11 : i64} {
  func.func @_gemm_kernel(%arg0: i32, %arg1: i32, %arg2: memref<8x1152xbf16, #tpu.memory_space<vmem>>, %arg3: memref<1152x128xbf16, #tpu.memory_space<vmem>>, %arg4: memref<1x128xf32, #tpu.memory_space<vmem>>, %arg5: memref<8x128xbf16, #tpu.memory_space<vmem>>) attributes {dimension_semantics = [#tpu.dimension_semantics<parallel>, #tpu.dimension_semantics<parallel>], iteration_bounds = array<i64: 1, 1>, scalar_prefetch = 0 : i64, scratch_operands = 0 : i64, tpu.core_type = #tpu.core_type<tc>, window_params = [{transform_indices = @transform_0, window_bounds = array<i64: 8, 1152>}, {transform_indices = @transform_1, window_bounds = array<i64: 1152, 128>}, {transform_indices = @transform_2, window_bounds = array<i64: 1, 128>}, {transform_indices = @transform_3, window_bounds = array<i64: 8, 128>}]} {
    %c0 = arith.constant 0 : index
    %c0_0 = arith.constant 0 : index
    %0 = vector.load %arg2[%c0, %c0_0] : memref<8x1152xbf16, #tpu.memory_space<vmem>>, vector<8x1152xbf16>
    %c0_1 = arith.constant 0 : index
    %c0_2 = arith.constant 0 : index
    %1 = vector.load %arg3[%c0_1, %c0_2] : memref<1152x128xbf16, #tpu.memory_space<vmem>>, vector<1152x128xbf16>
    %cst = arith.constant dense<0.000000e+00> : vector<8x128xf32>
    %2 = tpu.matmul %0, %1, %cst {dimension_numbers = #tpu.dot_dimension_numbers<[1], [0], [0], [1], [0, 0, 1, 1], [], []>} : vector<8x1152xbf16>, vector<1152x128xbf16>, vector<8x128xf32> -> vector<8x128xf32>
    %c0_3 = arith.constant 0 : index
    %c0_4 = arith.constant 0 : index
    %3 = vector.load %arg4[%c0_3, %c0_4] : memref<1x128xf32, #tpu.memory_space<vmem>>, vector<1x128xf32>
    %4 = vector.broadcast %3 : vector<1x128xf32> to vector<8x128xf32>
    %5 = arith.addf %2, %4 : vector<8x128xf32>
    %cst_5 = arith.constant 0.000000e+00 : f32
    %6 = vector.broadcast %cst_5 : f32 to vector<8x128xf32>
    %7 = arith.maximumf %5, %6 : vector<8x128xf32>
    %8 = arith.truncf %7 : vector<8x128xf32> to vector<8x128xbf16>
    %c0_6 = arith.constant 0 : index
    %c0_7 = arith.constant 0 : index
    %9 = vector.load %arg5[%c0_6, %c0_7] : memref<8x128xbf16, #tpu.memory_space<vmem>>, vector<8x128xbf16>
    tpu.vector_store %arg5[%c0_6, %c0_7], %8 {strides = array<i32>} : memref<8x128xbf16, #tpu.memory_space<vmem>>, vector<8x128xbf16>,
    return
  }
  func.func @transform_0(%arg0: i32, %arg1: i32) -> (i32, i32) {
    %c0_i32 = arith.constant 0 : i32
    %c0_i32_0 = arith.constant 0 : i32
    return %arg0, %c0_i32 : i32, i32
  }
  func.func @transform_1(%arg0: i32, %arg1: i32) -> (i32, i32) {
    %c0_i32 = arith.constant 0 : i32
    %c0_i32_0 = arith.constant 0 : i32
    return %c0_i32, %arg1 : i32, i32
  }
  func.func @transform_2(%arg0: i32, %arg1: i32) -> (i32, i32) {
    %c0_i32 = arith.constant 0 : i32
    %c0_i32_0 = arith.constant 0 : i32
    return %c0_i32, %arg1 : i32, i32
  }
  func.func @transform_3(%arg0: i32, %arg1: i32) -> (i32, i32) {
    %c0_i32 = arith.constant 0 : i32
    return %arg0, %arg1 : i32, i32
  }
}

module attributes {stable_mosaic.version = 11 : i64} {
  func.func @_gemm_kernel(%arg0: i32, %arg1: i32, %arg2: memref<8x128xbf16, #tpu.memory_space<vmem>>, %arg3: memref<128x128xbf16, #tpu.memory_space<vmem>>, %arg4: memref<1x128xf32, #tpu.memory_space<vmem>>, %arg5: memref<8x128xbf16, #tpu.memory_space<vmem>>) attributes {dimension_semantics = [#tpu.dimension_semantics<parallel>, #tpu.dimension_semantics<parallel>], iteration_bounds = array<i64: 1, 1>, scalar_prefetch = 0 : i64, scratch_operands = 0 : i64, tpu.core_type = #tpu.core_type<tc>, window_params = [{transform_indices = @transform_0, window_bounds = array<i64: 8, 128>}, {transform_indices = @transform_1, window_bounds = array<i64: 128, 128>}, {transform_indices = @transform_2, window_bounds = array<i64: 1, 128>}, {transform_indices = @transform_3, window_bounds = array<i64: 8, 128>}]} {
    %c0 = arith.constant 0 : index
    %c0_0 = arith.constant 0 : index
    %0 = vector.load %arg2[%c0, %c0_0] : memref<8x128xbf16, #tpu.memory_space<vmem>>, vector<8x128xbf16>
    %c0_1 = arith.constant 0 : index
    %c0_2 = arith.constant 0 : index
    %1 = vector.load %arg3[%c0_1, %c0_2] : memref<128x128xbf16, #tpu.memory_space<vmem>>, vector<128x128xbf16>
    %cst = arith.constant dense<0.000000e+00> : vector<8x128xf32>
    %2 = tpu.matmul %0, %1, %cst {dimension_numbers = #tpu.dot_dimension_numbers<[1], [0], [0], [1], [0, 0, 1, 1], [], []>} : vector<8x128xbf16>, vector<128x128xbf16>, vector<8x128xf32> -> vector<8x128xf32>
    %c0_3 = arith.constant 0 : index
    %c0_4 = arith.constant 0 : index
    %3 = vector.load %arg4[%c0_3, %c0_4] : memref<1x128xf32, #tpu.memory_space<vmem>>, vector<1x128xf32>
    %4 = vector.broadcast %3 : vector<1x128xf32> to vector<8x128xf32>
    %5 = arith.addf %2, %4 : vector<8x128xf32>
    %6 = arith.truncf %5 : vector<8x128xf32> to vector<8x128xbf16>
    %c0_5 = arith.constant 0 : index
    %c0_6 = arith.constant 0 : index
    %7 = vector.load %arg5[%c0_5, %c0_6] : memref<8x128xbf16, #tpu.memory_space<vmem>>, vector<8x128xbf16>
    tpu.vector_store %arg5[%c0_5, %c0_6], %6 {strides = array<i32>} : memref<8x128xbf16, #tpu.memory_space<vmem>>, vector<8x128xbf16>,
    return
  }
  func.func @transform_0(%arg0: i32, %arg1: i32) -> (i32, i32) {
    %c0_i32 = arith.constant 0 : i32
    %c0_i32_0 = arith.constant 0 : i32
    return %arg0, %c0_i32 : i32, i32
  }
  func.func @transform_1(%arg0: i32, %arg1: i32) -> (i32, i32) {
    %c0_i32 = arith.constant 0 : i32
    %c0_i32_0 = arith.constant 0 : i32
    return %c0_i32, %arg1 : i32, i32
  }
  func.func @transform_2(%arg0: i32, %arg1: i32) -> (i32, i32) {
    %c0_i32 = arith.constant 0 : i32
    %c0_i32_0 = arith.constant 0 : i32
    return %c0_i32, %arg1 : i32, i32
  }
  func.func @transform_3(%arg0: i32, %arg1: i32) -> (i32, i32) {
    %c0_i32 = arith.constant 0 : i32
    return %arg0, %arg1 : i32, i32
  }
}

module attributes {stable_mosaic.version = 11 : i64} {
  func.func @_gemm_res_kernel(%arg0: i32, %arg1: i32, %arg2: memref<8x1152xbf16, #tpu.memory_space<vmem>>, %arg3: memref<1152x128xbf16, #tpu.memory_space<vmem>>, %arg4: memref<1x128xf32, #tpu.memory_space<vmem>>, %arg5: memref<8x128xbf16, #tpu.memory_space<vmem>>, %arg6: memref<8x128xbf16, #tpu.memory_space<vmem>>) attributes {dimension_semantics = [#tpu.dimension_semantics<parallel>, #tpu.dimension_semantics<parallel>], iteration_bounds = array<i64: 1, 1>, scalar_prefetch = 0 : i64, scratch_operands = 0 : i64, tpu.core_type = #tpu.core_type<tc>, window_params = [{transform_indices = @transform_0, window_bounds = array<i64: 8, 1152>}, {transform_indices = @transform_1, window_bounds = array<i64: 1152, 128>}, {transform_indices = @transform_2, window_bounds = array<i64: 1, 128>}, {transform_indices = @transform_3, window_bounds = array<i64: 8, 128>}, {transform_indices = @transform_4, window_bounds = array<i64: 8, 128>}]} {
    %c0 = arith.constant 0 : index
    %c0_0 = arith.constant 0 : index
    %0 = vector.load %arg2[%c0, %c0_0] : memref<8x1152xbf16, #tpu.memory_space<vmem>>, vector<8x1152xbf16>
    %c0_1 = arith.constant 0 : index
    %c0_2 = arith.constant 0 : index
    %1 = vector.load %arg3[%c0_1, %c0_2] : memref<1152x128xbf16, #tpu.memory_space<vmem>>, vector<1152x128xbf16>
    %cst = arith.constant dense<0.000000e+00> : vector<8x128xf32>
    %2 = tpu.matmul %0, %1, %cst {dimension_numbers = #tpu.dot_dimension_numbers<[1], [0], [0], [1], [0, 0, 1, 1], [], []>} : vector<8x1152xbf16>, vector<1152x128xbf16>, vector<8x128xf32> -> vector<8x128xf32>
    %c0_3 = arith.constant 0 : index
    %c0_4 = arith.constant 0 : index
    %3 = vector.load %arg4[%c0_3, %c0_4] : memref<1x128xf32, #tpu.memory_space<vmem>>, vector<1x128xf32>
    %4 = vector.broadcast %3 : vector<1x128xf32> to vector<8x128xf32>
    %5 = arith.addf %2, %4 : vector<8x128xf32>
    %c0_5 = arith.constant 0 : index
    %c0_6 = arith.constant 0 : index
    %6 = vector.load %arg5[%c0_5, %c0_6] : memref<8x128xbf16, #tpu.memory_space<vmem>>, vector<8x128xbf16>
    %7 = arith.extf %6 : vector<8x128xbf16> to vector<8x128xf32>
    %8 = arith.addf %5, %7 : vector<8x128xf32>
    %cst_7 = arith.constant 0.000000e+00 : f32
    %9 = vector.broadcast %cst_7 : f32 to vector<8x128xf32>
    %10 = arith.maximumf %8, %9 : vector<8x128xf32>
    %11 = arith.truncf %10 : vector<8x128xf32> to vector<8x128xbf16>
    %c0_8 = arith.constant 0 : index
    %c0_9 = arith.constant 0 : index
    %12 = vector.load %arg6[%c0_8, %c0_9] : memref<8x128xbf16, #tpu.memory_space<vmem>>, vector<8x128xbf16>
    tpu.vector_store %arg6[%c0_8, %c0_9], %11 {strides = array<i32>} : memref<8x128xbf16, #tpu.memory_space<vmem>>, vector<8x128xbf16>,
    return
  }
  func.func @transform_0(%arg0: i32, %arg1: i32) -> (i32, i32) {
    %c0_i32 = arith.constant 0 : i32
    %c0_i32_0 = arith.constant 0 : i32
    return %arg0, %c0_i32 : i32, i32
  }
  func.func @transform_1(%arg0: i32, %arg1: i32) -> (i32, i32) {
    %c0_i32 = arith.constant 0 : i32
    %c0_i32_0 = arith.constant 0 : i32
    return %c0_i32, %arg1 : i32, i32
  }
  func.func @transform_2(%arg0: i32, %arg1: i32) -> (i32, i32) {
    %c0_i32 = arith.constant 0 : i32
    %c0_i32_0 = arith.constant 0 : i32
    return %c0_i32, %arg1 : i32, i32
  }
  func.func @transform_3(%arg0: i32, %arg1: i32) -> (i32, i32) {
    %c0_i32 = arith.constant 0 : i32
    return %arg0, %arg1 : i32, i32
  }
  func.func @transform_4(%arg0: i32, %arg1: i32) -> (i32, i32) {
    %c0_i32 = arith.constant 0 : i32
    return %arg0, %arg1 : i32, i32
  }
}

module attributes {stable_mosaic.version = 11 : i64} {
  func.func @_gemm_kernel(%arg0: i32, %arg1: i32, %arg2: memref<2x1152xbf16, #tpu.memory_space<vmem>>, %arg3: memref<1152x128xbf16, #tpu.memory_space<vmem>>, %arg4: memref<1x128xf32, #tpu.memory_space<vmem>>, %arg5: memref<2x128xbf16, #tpu.memory_space<vmem>>) attributes {dimension_semantics = [#tpu.dimension_semantics<parallel>, #tpu.dimension_semantics<parallel>], iteration_bounds = array<i64: 1, 1>, scalar_prefetch = 0 : i64, scratch_operands = 0 : i64, tpu.core_type = #tpu.core_type<tc>, window_params = [{transform_indices = @transform_0, window_bounds = array<i64: 2, 1152>}, {transform_indices = @transform_1, window_bounds = array<i64: 1152, 128>}, {transform_indices = @transform_2, window_bounds = array<i64: 1, 128>}, {transform_indices = @transform_3, window_bounds = array<i64: 2, 128>}]} {
    %c0 = arith.constant 0 : index
    %c0_0 = arith.constant 0 : index
    %0 = vector.load %arg2[%c0, %c0_0] : memref<2x1152xbf16, #tpu.memory_space<vmem>>, vector<2x1152xbf16>
    %c0_1 = arith.constant 0 : index
    %c0_2 = arith.constant 0 : index
    %1 = vector.load %arg3[%c0_1, %c0_2] : memref<1152x128xbf16, #tpu.memory_space<vmem>>, vector<1152x128xbf16>
    %cst = arith.constant dense<0.000000e+00> : vector<2x128xf32>
    %2 = tpu.matmul %0, %1, %cst {dimension_numbers = #tpu.dot_dimension_numbers<[1], [0], [0], [1], [0, 0, 1, 1], [], []>} : vector<2x1152xbf16>, vector<1152x128xbf16>, vector<2x128xf32> -> vector<2x128xf32>
    %c0_3 = arith.constant 0 : index
    %c0_4 = arith.constant 0 : index
    %3 = vector.load %arg4[%c0_3, %c0_4] : memref<1x128xf32, #tpu.memory_space<vmem>>, vector<1x128xf32>
    %4 = vector.broadcast %3 : vector<1x128xf32> to vector<2x128xf32>
    %5 = arith.addf %2, %4 : vector<2x128xf32>
    %cst_5 = arith.constant 0.000000e+00 : f32
    %6 = vector.broadcast %cst_5 : f32 to vector<2x128xf32>
    %7 = arith.maximumf %5, %6 : vector<2x128xf32>
    %8 = arith.truncf %7 : vector<2x128xf32> to vector<2x128xbf16>
    %c0_6 = arith.constant 0 : index
    %c0_7 = arith.constant 0 : index
    %9 = vector.load %arg5[%c0_6, %c0_7] : memref<2x128xbf16, #tpu.memory_space<vmem>>, vector<2x128xbf16>
    tpu.vector_store %arg5[%c0_6, %c0_7], %8 {strides = array<i32>} : memref<2x128xbf16, #tpu.memory_space<vmem>>, vector<2x128xbf16>,
    return
  }
  func.func @transform_0(%arg0: i32, %arg1: i32) -> (i32, i32) {
    %c0_i32 = arith.constant 0 : i32
    %c0_i32_0 = arith.constant 0 : i32
    return %arg0, %c0_i32 : i32, i32
  }
  func.func @transform_1(%arg0: i32, %arg1: i32) -> (i32, i32) {
    %c0_i32 = arith.constant 0 : i32
    %c0_i32_0 = arith.constant 0 : i32
    return %c0_i32, %arg1 : i32, i32
  }
  func.func @transform_2(%arg0: i32, %arg1: i32) -> (i32, i32) {
    %c0_i32 = arith.constant 0 : i32
    %c0_i32_0 = arith.constant 0 : i32
    return %c0_i32, %arg1 : i32, i32
  }
  func.func @transform_3(%arg0: i32, %arg1: i32) -> (i32, i32) {
    %c0_i32 = arith.constant 0 : i32
    return %arg0, %arg1 : i32, i32
  }
}

module attributes {stable_mosaic.version = 11 : i64} {
  func.func @_gemm_kernel(%arg0: i32, %arg1: i32, %arg2: memref<2x128xbf16, #tpu.memory_space<vmem>>, %arg3: memref<128x128xbf16, #tpu.memory_space<vmem>>, %arg4: memref<1x128xf32, #tpu.memory_space<vmem>>, %arg5: memref<2x128xbf16, #tpu.memory_space<vmem>>) attributes {dimension_semantics = [#tpu.dimension_semantics<parallel>, #tpu.dimension_semantics<parallel>], iteration_bounds = array<i64: 1, 1>, scalar_prefetch = 0 : i64, scratch_operands = 0 : i64, tpu.core_type = #tpu.core_type<tc>, window_params = [{transform_indices = @transform_0, window_bounds = array<i64: 2, 128>}, {transform_indices = @transform_1, window_bounds = array<i64: 128, 128>}, {transform_indices = @transform_2, window_bounds = array<i64: 1, 128>}, {transform_indices = @transform_3, window_bounds = array<i64: 2, 128>}]} {
    %c0 = arith.constant 0 : index
    %c0_0 = arith.constant 0 : index
    %0 = vector.load %arg2[%c0, %c0_0] : memref<2x128xbf16, #tpu.memory_space<vmem>>, vector<2x128xbf16>
    %c0_1 = arith.constant 0 : index
    %c0_2 = arith.constant 0 : index
    %1 = vector.load %arg3[%c0_1, %c0_2] : memref<128x128xbf16, #tpu.memory_space<vmem>>, vector<128x128xbf16>
    %cst = arith.constant dense<0.000000e+00> : vector<2x128xf32>
    %2 = tpu.matmul %0, %1, %cst {dimension_numbers = #tpu.dot_dimension_numbers<[1], [0], [0], [1], [0, 0, 1, 1], [], []>} : vector<2x128xbf16>, vector<128x128xbf16>, vector<2x128xf32> -> vector<2x128xf32>
    %c0_3 = arith.constant 0 : index
    %c0_4 = arith.constant 0 : index
    %3 = vector.load %arg4[%c0_3, %c0_4] : memref<1x128xf32, #tpu.memory_space<vmem>>, vector<1x128xf32>
    %4 = vector.broadcast %3 : vector<1x128xf32> to vector<2x128xf32>
    %5 = arith.addf %2, %4 : vector<2x128xf32>
    %6 = arith.truncf %5 : vector<2x128xf32> to vector<2x128xbf16>
    %c0_5 = arith.constant 0 : index
    %c0_6 = arith.constant 0 : index
    %7 = vector.load %arg5[%c0_5, %c0_6] : memref<2x128xbf16, #tpu.memory_space<vmem>>, vector<2x128xbf16>
    tpu.vector_store %arg5[%c0_5, %c0_6], %6 {strides = array<i32>} : memref<2x128xbf16, #tpu.memory_space<vmem>>, vector<2x128xbf16>,
    return
  }
  func.func @transform_0(%arg0: i32, %arg1: i32) -> (i32, i32) {
    %c0_i32 = arith.constant 0 : i32
    %c0_i32_0 = arith.constant 0 : i32
    return %arg0, %c0_i32 : i32, i32
  }
  func.func @transform_1(%arg0: i32, %arg1: i32) -> (i32, i32) {
    %c0_i32 = arith.constant 0 : i32
    %c0_i32_0 = arith.constant 0 : i32
    return %c0_i32, %arg1 : i32, i32
  }
  func.func @transform_2(%arg0: i32, %arg1: i32) -> (i32, i32) {
    %c0_i32 = arith.constant 0 : i32
    %c0_i32_0 = arith.constant 0 : i32
    return %c0_i32, %arg1 : i32, i32
  }
  func.func @transform_3(%arg0: i32, %arg1: i32) -> (i32, i32) {
    %c0_i32 = arith.constant 0 : i32
    return %arg0, %arg1 : i32, i32
  }
}

module attributes {stable_mosaic.version = 11 : i64} {
  func.func @_gemm_res_kernel(%arg0: i32, %arg1: i32, %arg2: memref<2x1152xbf16, #tpu.memory_space<vmem>>, %arg3: memref<1152x128xbf16, #tpu.memory_space<vmem>>, %arg4: memref<1x128xf32, #tpu.memory_space<vmem>>, %arg5: memref<2x128xbf16, #tpu.memory_space<vmem>>, %arg6: memref<2x128xbf16, #tpu.memory_space<vmem>>) attributes {dimension_semantics = [#tpu.dimension_semantics<parallel>, #tpu.dimension_semantics<parallel>], iteration_bounds = array<i64: 1, 1>, scalar_prefetch = 0 : i64, scratch_operands = 0 : i64, tpu.core_type = #tpu.core_type<tc>, window_params = [{transform_indices = @transform_0, window_bounds = array<i64: 2, 1152>}, {transform_indices = @transform_1, window_bounds = array<i64: 1152, 128>}, {transform_indices = @transform_2, window_bounds = array<i64: 1, 128>}, {transform_indices = @transform_3, window_bounds = array<i64: 2, 128>}, {transform_indices = @transform_4, window_bounds = array<i64: 2, 128>}]} {
    %c0 = arith.constant 0 : index
    %c0_0 = arith.constant 0 : index
    %0 = vector.load %arg2[%c0, %c0_0] : memref<2x1152xbf16, #tpu.memory_space<vmem>>, vector<2x1152xbf16>
    %c0_1 = arith.constant 0 : index
    %c0_2 = arith.constant 0 : index
    %1 = vector.load %arg3[%c0_1, %c0_2] : memref<1152x128xbf16, #tpu.memory_space<vmem>>, vector<1152x128xbf16>
    %cst = arith.constant dense<0.000000e+00> : vector<2x128xf32>
    %2 = tpu.matmul %0, %1, %cst {dimension_numbers = #tpu.dot_dimension_numbers<[1], [0], [0], [1], [0, 0, 1, 1], [], []>} : vector<2x1152xbf16>, vector<1152x128xbf16>, vector<2x128xf32> -> vector<2x128xf32>
    %c0_3 = arith.constant 0 : index
    %c0_4 = arith.constant 0 : index
    %3 = vector.load %arg4[%c0_3, %c0_4] : memref<1x128xf32, #tpu.memory_space<vmem>>, vector<1x128xf32>
    %4 = vector.broadcast %3 : vector<1x128xf32> to vector<2x128xf32>
    %5 = arith.addf %2, %4 : vector<2x128xf32>
    %c0_5 = arith.constant 0 : index
    %c0_6 = arith.constant 0 : index
    %6 = vector.load %arg5[%c0_5, %c0_6] : memref<2x128xbf16, #tpu.memory_space<vmem>>, vector<2x128xbf16>
    %7 = arith.extf %6 : vector<2x128xbf16> to vector<2x128xf32>
    %8 = arith.addf %5, %7 : vector<2x128xf32>
    %cst_7 = arith.constant 0.000000e+00 : f32
    %9 = vector.broadcast %cst_7 : f32 to vector<2x128xf32>
    %10 = arith.maximumf %8, %9 : vector<2x128xf32>
    %11 = arith.truncf %10 : vector<2x128xf32> to vector<2x128xbf16>
    %c0_8 = arith.constant 0 : index
    %c0_9 = arith.constant 0 : index
    %12 = vector.load %arg6[%c0_8, %c0_9] : memref<2x128xbf16, #tpu.memory_space<vmem>>, vector<2x128xbf16>
    tpu.vector_store %arg6[%c0_8, %c0_9], %11 {strides = array<i32>} : memref<2x128xbf16, #tpu.memory_space<vmem>>, vector<2x128xbf16>,
    return
  }
  func.func @transform_0(%arg0: i32, %arg1: i32) -> (i32, i32) {
    %c0_i32 = arith.constant 0 : i32
    %c0_i32_0 = arith.constant 0 : i32
    return %arg0, %c0_i32 : i32, i32
  }
  func.func @transform_1(%arg0: i32, %arg1: i32) -> (i32, i32) {
    %c0_i32 = arith.constant 0 : i32
    %c0_i32_0 = arith.constant 0 : i32
    return %c0_i32, %arg1 : i32, i32
  }
  func.func @transform_2(%arg0: i32, %arg1: i32) -> (i32, i32) {
    %c0_i32 = arith.constant 0 : i32
    %c0_i32_0 = arith.constant 0 : i32
    return %c0_i32, %arg1 : i32, i32
  }
  func.func @transform_3(%arg0: i32, %arg1: i32) -> (i32, i32) {
    %c0_i32 = arith.constant 0 : i32
    return %arg0, %arg1 : i32, i32
  }
  func.func @transform_4(%arg0: i32, %arg1: i32) -> (i32, i32) {
    %c0_i32 = arith.constant 0 : i32
    return %arg0, %arg1 : i32, i32
  }
}

module attributes {stable_mosaic.version = 11 : i64} {
  func.func @_avgpool_fc_kernel(%arg0: i32, %arg1: memref<2x1x128xbf16, #tpu.memory_space<vmem>>, %arg2: memref<128x128xf32, #tpu.memory_space<vmem>>, %arg3: memref<1x128xf32, #tpu.memory_space<vmem>>, %arg4: memref<2x128xf32, #tpu.memory_space<vmem>>) attributes {dimension_semantics = [#tpu.dimension_semantics<arbitrary>], iteration_bounds = array<i64: 1>, scalar_prefetch = 0 : i64, scratch_operands = 0 : i64, tpu.core_type = #tpu.core_type<tc>, window_params = [{pipeline_mode = #tpu.pipeline_mode<synchronous>, transform_indices = @transform_0, window_bounds = array<i64: 2, 1, 128>}, {pipeline_mode = #tpu.pipeline_mode<synchronous>, transform_indices = @transform_1, window_bounds = array<i64: 128, 128>}, {pipeline_mode = #tpu.pipeline_mode<synchronous>, transform_indices = @transform_2, window_bounds = array<i64: 1, 128>}, {pipeline_mode = #tpu.pipeline_mode<synchronous>, transform_indices = @transform_3, window_bounds = array<i64: 2, 128>}]} {
    %c0 = arith.constant 0 : index
    %c0_0 = arith.constant 0 : index
    %c0_1 = arith.constant 0 : index
    %0 = vector.load %arg1[%c0, %c0_0, %c0_1] : memref<2x1x128xbf16, #tpu.memory_space<vmem>>, vector<2x1x128xbf16>
    %1 = arith.extf %0 : vector<2x1x128xbf16> to vector<2x1x128xf32>
    %cst = arith.constant dense<0.000000e+00> : vector<2x128xf32>
    %2 = vector.multi_reduction <add>, %1, %cst [1] : vector<2x1x128xf32> to vector<2x128xf32>
    %cst_2 = arith.constant 1.000000e+00 : f32
    %3 = vector.broadcast %cst_2 : f32 to vector<2x128xf32>
    %4 = arith.divf %2, %3 : vector<2x128xf32>
    %c0_3 = arith.constant 0 : index
    %c0_4 = arith.constant 0 : index
    %5 = vector.load %arg2[%c0_3, %c0_4] : memref<128x128xf32, #tpu.memory_space<vmem>>, vector<128x128xf32>
    %cst_5 = arith.constant dense<0.000000e+00> : vector<2x128xf32>
    %6 = tpu.matmul %4, %5, %cst_5 {dimension_numbers = #tpu.dot_dimension_numbers<[1], [0], [0], [1], [0, 0, 1, 1], [], []>} : vector<2x128xf32>, vector<128x128xf32>, vector<2x128xf32> -> vector<2x128xf32>
    %c0_6 = arith.constant 0 : index
    %c0_7 = arith.constant 0 : index
    %7 = vector.load %arg3[%c0_6, %c0_7] : memref<1x128xf32, #tpu.memory_space<vmem>>, vector<1x128xf32>
    %8 = vector.broadcast %7 : vector<1x128xf32> to vector<2x128xf32>
    %9 = arith.addf %6, %8 : vector<2x128xf32>
    %c0_8 = arith.constant 0 : index
    %c0_9 = arith.constant 0 : index
    %10 = vector.load %arg4[%c0_8, %c0_9] : memref<2x128xf32, #tpu.memory_space<vmem>>, vector<2x128xf32>
    tpu.vector_store %arg4[%c0_8, %c0_9], %9 {strides = array<i32>} : memref<2x128xf32, #tpu.memory_space<vmem>>, vector<2x128xf32>,
    return
  }
  func.func @transform_0(%arg0: i32) -> (i32, i32, i32) {
    %c0_i32 = arith.constant 0 : i32
    %c0_i32_0 = arith.constant 0 : i32
    %c0_i32_1 = arith.constant 0 : i32
    %c0_i32_2 = arith.constant 0 : i32
    return %c0_i32, %c0_i32_0, %c0_i32_1 : i32, i32, i32
  }
  func.func @transform_1(%arg0: i32) -> (i32, i32) {
    %c0_i32 = arith.constant 0 : i32
    %c0_i32_0 = arith.constant 0 : i32
    %c0_i32_1 = arith.constant 0 : i32
    return %c0_i32, %c0_i32_0 : i32, i32
  }
  func.func @transform_2(%arg0: i32) -> (i32, i32) {
    %c0_i32 = arith.constant 0 : i32
    %c0_i32_0 = arith.constant 0 : i32
    %c0_i32_1 = arith.constant 0 : i32
    return %c0_i32, %c0_i32_0 : i32, i32
  }
  func.func @transform_3(%arg0: i32) -> (i32, i32) {
    %c0_i32 = arith.constant 0 : i32
    %c0_i32_0 = arith.constant 0 : i32
    %c0_i32_1 = arith.constant 0 : i32
    return %c0_i32, %c0_i32_0 : i32, i32
  }
}

</mosaic_0001>

<bundles_post_ra>
// kernel: _lambda_.24
= control target key start
LH: loop header
LB: loop body
LE: loop exit
PB: predicated region body
PF: predicated region fallthrough
CT: control target
= control target key end

     0   :  { %s1382_s12 = smov 0   ;;  %s1384_s13 = smov 0   ;;  %s1554_s0 = inlined_call_operand.vmem [shape: bf16[512,147], index: 0, kind: input, shape index: {}]   ;;  %s1555_s1 = inlined_call_operand.vmem [shape: bf16[147,128], index: 1, kind: input, shape index: {}]   ;;  %s1556_s2 = inlined_call_operand.vmem [shape: f32[1,128], index: 2, kind: input, shape index: {}]   ;;  %s1557_s3 = inlined_call_operand.vmem [shape: bf16[512,128], index: 3, kind: output, shape index: {}]  }
   0x1   :  { %s1386_s14 = smov 0  }
   0x2 LB: > { %s25_s15 = sadd.s32 1, %s1354_s13  ;;  %p1005_p0 = scmp.ge.s32.totalorder %s1358_s14, 1  ;;  %s1358_s14 = sphi %s1386_s14, %s13_s14   ;;  %s1354_s13 = sphi %s1384_s13, %s1559_s13   ;;  %s1350_s12 = sphi %s1382_s12, %s1558_s12  }
   0x3   : > { %p27_p1 = scmp.ge.s32.totalorder %s25_s15, 2  ;;  %p170_p2 = scmp.lt.s32.totalorder %s1358_s14, 3 }
   0x5   : > { %s1561_s15 = smov (%p27_p1, %s25_s15), 0  ;;  %p171_p3 = pnand %p1005_p0, %p170_p2 }
   0x6   : > { %v1278_v0 = vld [vmem:[%s1555_s1] sm:$0xff] (!%p171_p3)   ;;  %v1360_v1 = vmov (!%p171_p3), 0   ;;  %v1279_v2 = vld [vmem:[%s1555_s1 + $0x8] sm:$0xff] (!%p171_p3)   ;;  %v1280_v3 = vld [vmem:[%s1555_s1 + $0x10] sm:$0xff] (!%p171_p3)   ;;  %s1006_s22 = sshll.u32 (!%p171_p3), %s1350_s12, 5  ;;  %vm488_vm0 = vcmask (!%p171_p3), 154624  }
   0x7   : > { %174 = sbr.rel (%p171_p3) target bundleno = 324 (0x144), region = 32  ;;  %544 = vmatprep.subr.bf16.mxu0 (!%p171_p3), %v1360_v1  ;;  %1232 = vmatprep.subr.bf16.mxu1 (!%p171_p3), %v1360_v1  ;;  %p206_p4 = scmp.lt.s32.totalorder (!%p171_p3), %s1006_s22, 63  ;;  %v1281_v4 = vld [vmem:[%s1555_s1 + $0x18] sm:$0xff] (!%p171_p3)   ;;  %v1282_v5 = vld [vmem:[%s1555_s1 + $0x20] sm:$0xff] (!%p171_p3)   ;;  %v1283_v8 = vld [vmem:[%s1555_s1 + $0x28] sm:$0xff] (!%p171_p3)   ;;  %vm537_vm1 = vcmask (!%p171_p3), 1040384  }
   0x8   : > { %545 = vmatpush1.bf16.msra.mxu0 (!%p171_p3), %v1278_v0  ;;  %1242 = vmatpush1.bf16.msra.mxu1 (!%p171_p3), %v1278_v0  ;;  %v1284_v9 = vld [vmem:[%s1555_s1 + $0x30] sm:$0xff] (!%p171_p3)   ;;  %v1285_v10 = vld [vmem:[%s1555_s1 + $0x38] sm:$0xff] (!%p171_p3)   ;;  %vm538_vm2 = vcmask (!%p171_p3), 1041408   ;;  %v1361_v11 = vmov (!%p171_p3), 65535   ;;  %v1286_v13 = vld [vmem:[%s1555_s1 + $0x40] sm:$0xff] (!%p171_p3)  }
   0x9   : > { %546 = vmatprep.subr.bf16.mxu0 (!%p171_p3), %v1360_v1  ;;  %1233 = vmatprep.subr.bf16.mxu1 (!%p171_p3), %v1360_v1  ;;  %v539_v12 = vsel (!%p171_p3), %vm537_vm1, 4294967295, %v1361_v11  ;;  %v1287_v14 = vld [vmem:[%s1555_s1 + $0x48] ss:$0 sps:$4 sm:$0x33] (!%p171_p3)   ;;  %v1489_v47 = vld [vmem:[%s1556_s2] ss:$0 sm:$0xff] (!%p171_p3) }
   0xa   : > { %v540_v15 = vsel (!%p171_p3), %vm538_vm2, %v539_v12, 0 }
   0xb   : > { %v542_v16 = vand.u32 (!%p171_p3), %v1287_v14, %v540_v15 }
   0xc   : > { %547 = vmatpush1.bf16.msra.mxu0 (!%p171_p3), %v1279_v2  ;;  %1243 = vmatpush1.bf16.msra.mxu1 (!%p171_p3), %v1279_v2 }
   0xd   : > { %548 = vmatprep.subr.bf16.mxu0 (!%p171_p3), %v1360_v1  ;;  %1234 = vmatprep.subr.bf16.mxu1 (!%p171_p3), %v1360_v1 }
   0xe   : > { %s1563_s22 = smov (!%p206_p4, %s1006_s22), 63 }
   0xf   : > { %s1104_s25 = sshll.u32 %s1563_s22, 3  ;;  %s1010_s19 = sshll.u32 %s1563_s22, 2 }
  0x10   : > { %549 = vmatpush1.bf16.msra.mxu0 %v1280_v3  ;;  %1244 = vmatpush1.bf16.msra.mxu1 %v1280_v3  ;;  %s1418_s28 = scalar_lea.vmem %s1554_s0, %s1104_s25  ;;  %s1499_s23 = scalar_lea.vmem %s1557_s3, %s1010_s19 }
  0x11   : > { %550 = vmatprep.subr.bf16.mxu0 %v1360_v1  ;;  %1235 = vmatprep.subr.bf16.mxu1 %v1360_v1  ;;  %v1290_v6 = vld [vmem:[%s1418_s28 + $0x4] ss:$8 sps:$4 sm:$0xff]   ;;  %v1288_v17 = vld [vmem:[%s1418_s28] ss:$8 sps:$4 sm:$0xff]   ;;  %v1294_v19 = vld [vmem:[%s1418_s28 + $0x14] ss:$8 sps:$4 sm:$0xff]  }
  0x12   : > { %v1293_v7 = vld [vmem:[%s1418_s28 + $0x84] ss:$8 sps:$4 sm:$0xff]   ;;  %1054 = vmatprep.mubr.msk.bf16.mxu0 %vm488_vm0, %v1290_v6  ;;  %v1291_v18 = vld [vmem:[%s1418_s28 + $0x80] ss:$8 sps:$4 sm:$0xff]   ;;  %v1296_v20 = vld [vmem:[%s1418_s28 + $0x94] ss:$8 sps:$4 sm:$0xff]  }
  0x13   : > { %1062 = vmatprep.mubr.msk.bf16.mxu1 %vm488_vm0, %v1293_v7  ;;  %v1298_v21 = vld [vmem:[%s1418_s28 + $0x10] ss:$8 sps:$4 sm:$0xff]   ;;  %v1300_v23 = vld [vmem:[%s1418_s28 + $0x24] ss:$8 sps:$4 sm:$0xff]   ;;  %v1304_v25 = vld [vmem:[%s1418_s28 + $0x20] ss:$8 sps:$4 sm:$0xff]  }
  0x14   : > { %551 = vmatpush1.bf16.msra.mxu0 %v1281_v4  ;;  %1245 = vmatpush1.bf16.msra.mxu1 %v1281_v4  ;;  %v1299_v22 = vld [vmem:[%s1418_s28 + $0x90] ss:$8 sps:$4 sm:$0xff]   ;;  %v1302_v24 = vld [vmem:[%s1418_s28 + $0xa4] ss:$8 sps:$4 sm:$0xff]   ;;  %v1305_v26 = vld [vmem:[%s1418_s28 + $0xa0] ss:$8 sps:$4 sm:$0xff]  }
  0x15   : > { %552 = vmatprep.subr.bf16.mxu0 %v1360_v1  ;;  %1236 = vmatprep.subr.bf16.mxu1 %v1360_v1  ;;  %v1306_v27 = vld [vmem:[%s1418_s28 + $0x34] ss:$8 sps:$4 sm:$0xff]   ;;  %v1310_v29 = vld [vmem:[%s1418_s28 + $0x30] ss:$8 sps:$4 sm:$0xff]   ;;  %v1312_v31 = vld [vmem:[%s1418_s28 + $0x44] ss:$8 sps:$4 sm:$0xff]  }
  0x16   : > { %v1308_v28 = vld [vmem:[%s1418_s28 + $0xb4] ss:$8 sps:$4 sm:$0xff]   ;;  %v1311_v30 = vld [vmem:[%s1418_s28 + $0xb0] ss:$8 sps:$4 sm:$0xff]   ;;  %v1314_v32 = vld [vmem:[%s1418_s28 + $0xc4] ss:$8 sps:$4 sm:$0xff]  }
  0x17   : > { %v1316_v33 = vld [vmem:[%s1418_s28 + $0x40] ss:$8 sps:$4 sm:$0xff]   ;;  %v1318_v35 = vld [vmem:[%s1418_s28 + $0x54] ss:$8 sps:$4 sm:$0xff]   ;;  %v1322_v37 = vld [vmem:[%s1418_s28 + $0x50] ss:$8 sps:$4 sm:$0xff]  }
  0x18   : > { %553 = vmatpush1.bf16.msra.mxu0 %v1282_v5  ;;  %1246 = vmatpush1.bf16.msra.mxu1 %v1282_v5  ;;  %v1317_v34 = vld [vmem:[%s1418_s28 + $0xc0] ss:$8 sps:$4 sm:$0xff]   ;;  %v1320_v36 = vld [vmem:[%s1418_s28 + $0xd4] ss:$8 sps:$4 sm:$0xff]   ;;  %v1323_v38 = vld [vmem:[%s1418_s28 + $0xd0] ss:$8 sps:$4 sm:$0xff]  }
  0x19   : > { %554 = vmatprep.subr.bf16.mxu0 %v1360_v1  ;;  %1237 = vmatprep.subr.bf16.mxu1 %v1360_v1  ;;  %v1324_v39 = vld [vmem:[%s1418_s28 + $0x64] ss:$8 sps:$4 sm:$0xff]   ;;  %v1328_v41 = vld [vmem:[%s1418_s28 + $0x60] ss:$8 sps:$4 sm:$0xff]   ;;  %v1330_v43 = vld [vmem:[%s1418_s28 + $0x74] ss:$8 sps:$4 sm:$0xff]  }
  0x1a   : > { %v1326_v40 = vld [vmem:[%s1418_s28 + $0xe4] ss:$8 sps:$4 sm:$0xff]   ;;  %v1329_v42 = vld [vmem:[%s1418_s28 + $0xe0] ss:$8 sps:$4 sm:$0xff]   ;;  %v1332_v44 = vld [vmem:[%s1418_s28 + $0xf4] ss:$8 sps:$4 sm:$0xff]  }
  0x1b   : > { %v1334_v45 = vld [vmem:[%s1418_s28 + $0x70] ss:$8 sps:$4 sm:$0xff]  }
  0x1c   : > { %555 = vmatpush1.bf16.msra.mxu0 %v1283_v8  ;;  %1247 = vmatpush1.bf16.msra.mxu1 %v1283_v8  ;;  %v1335_v46 = vld [vmem:[%s1418_s28 + $0xf0] ss:$8 sps:$4 sm:$0xff]  }
  0x1d   : > { %556 = vmatprep.subr.bf16.mxu0 %v1360_v1  ;;  %1238 = vmatprep.subr.bf16.mxu1 %v1360_v1 }
  0x20   : > { %557 = vmatpush1.bf16.msra.mxu0 %v1284_v9  ;;  %1248 = vmatpush1.bf16.msra.mxu1 %v1284_v9 }
  0x21   : > { %558 = vmatprep.subr.bf16.mxu0 %v1360_v1  ;;  %1239 = vmatprep.subr.bf16.mxu1 %v1360_v1 }
  0x24   : > { %559 = vmatpush1.bf16.msra.mxu0 %v1285_v10  ;;  %1249 = vmatpush1.bf16.msra.mxu1 %v1285_v10 }
  0x25   : > { %560 = vmatprep.subr.bf16.mxu0 %v1360_v1  ;;  %1240 = vmatprep.subr.bf16.mxu1 %v1360_v1 }
  0x28   : > { %561 = vmatpush1.bf16.msra.mxu0 %v1286_v13  ;;  %1250 = vmatpush1.bf16.msra.mxu1 %v1286_v13 }
  0x29   : > { %562 = vmatprep.subr.bf16.mxu0 %v1360_v1  ;;  %1241 = vmatprep.subr.bf16.mxu1 %v1360_v1 }
  0x2c   : > { %563 = vmatpush1.bf16.msra.mxu0 %v542_v16  ;;  %1251 = vmatpush1.bf16.msra.mxu1 %v542_v16 }
  0x2f   : > { %577 = vmatmul.mubr.bf16.vlgmr.msra.gmra.mrb[0].mxu0 %v1288_v17  ;;  %641 = vmatmul.mubr.bf16.vlgmr.msra.gmra.mrb[0].mxu1 %v1291_v18 }
  0x30   : > { %1055 = vmatprep.mubr.msk.bf16.mxu0 %vm488_vm0, %v1294_v19  ;;  %1063 = vmatprep.mubr.msk.bf16.mxu1 %vm488_vm0, %v1296_v20 }
  0x37   : > { %585 = vmatmul.mubr.bf16.gmra.mrb[4].mxu0 %v1298_v21  ;;  %649 = vmatmul.mubr.bf16.gmra.mrb[4].mxu1 %v1299_v22 }
  0x38   : > { %1056 = vmatprep.mubr.msk.bf16.mxu0 %vm488_vm0, %v1300_v23  ;;  %1064 = vmatprep.mubr.msk.bf16.mxu1 %vm488_vm0, %v1302_v24 }
  0x3f   : > { %593 = vmatmul.mubr.bf16.gmra.mrb[8].mxu0 %v1304_v25  ;;  %657 = vmatmul.mubr.bf16.gmra.mrb[8].mxu1 %v1305_v26 }
  0x40   : > { %1057 = vmatprep.mubr.msk.bf16.mxu0 %vm488_vm0, %v1306_v27  ;;  %1065 = vmatprep.mubr.msk.bf16.mxu1 %vm488_vm0, %v1308_v28 }
  0x47   : > { %601 = vmatmul.mubr.bf16.gmra.mrb[12].mxu0 %v1310_v29  ;;  %665 = vmatmul.mubr.bf16.gmra.mrb[12].mxu1 %v1311_v30 }
  0x48   : > { %1058 = vmatprep.mubr.msk.bf16.mxu0 %vm488_vm0, %v1312_v31  ;;  %1066 = vmatprep.mubr.msk.bf16.mxu1 %vm488_vm0, %v1314_v32 }
  0x4f   : > { %609 = vmatmul.mubr.bf16.gmra.mrb[16].mxu0 %v1316_v33  ;;  %673 = vmatmul.mubr.bf16.gmra.mrb[16].mxu1 %v1317_v34 }
  0x50   : > { %1059 = vmatprep.mubr.msk.bf16.mxu0 %vm488_vm0, %v1318_v35  ;;  %1067 = vmatprep.mubr.msk.bf16.mxu1 %vm488_vm0, %v1320_v36 }
  0x57   : > { %617 = vmatmul.mubr.bf16.gmra.mrb[20].mxu0 %v1322_v37  ;;  %681 = vmatmul.mubr.bf16.gmra.mrb[20].mxu1 %v1323_v38 }
  0x58   : > { %1060 = vmatprep.mubr.msk.bf16.mxu0 %vm488_vm0, %v1324_v39  ;;  %1068 = vmatprep.mubr.msk.bf16.mxu1 %vm488_vm0, %v1326_v40 }
  0x5f   : > { %625 = vmatmul.mubr.bf16.gmra.mrb[24].mxu0 %v1328_v41  ;;  %689 = vmatmul.mubr.bf16.gmra.mrb[24].mxu1 %v1329_v42 }
  0x60   : > { %1061 = vmatprep.mubr.msk.bf16.mxu0 %vm488_vm0, %v1330_v43  ;;  %1069 = vmatprep.mubr.msk.bf16.mxu1 %vm488_vm0, %v1332_v44 }
  0x67   : > { %633 = vmatmul.mubr.bf16.gmra.mrb[28].mxu0 %v1334_v45  ;;  %697 = vmatmul.mubr.bf16.gmra.mrb[28].mxu1 %v1335_v46 }
 0x102   : > { %v578_v48 = vpop.f32.mrb[0].mxu0  ;;  %v642_v49 = vpop.f32.mrb[0].mxu1 }
 0x103   : > { %v579_v50 = vadd.f32 %v1489_v47, %v578_v48  ;;  %v643_v51 = vadd.f32 %v1489_v47, %v642_v49  ;;  %v580_v52 = vpop.f32.mrb[1].mxu0  ;;  %v644_v53 = vpop.f32.mrb[1].mxu1 }
 0x104   : > { %v581_v54 = vpop.f32.mrb[2].mxu0  ;;  %v645_v55 = vpop.f32.mrb[2].mxu1 }
 0x105   : > { %v582_v56 = vadd.f32 %v1489_v47, %v581_v54  ;;  %v646_v57 = vadd.f32 %v1489_v47, %v645_v55  ;;  %v583_v58 = vpop.f32.mrb[3].mxu0  ;;  %v647_v59 = vpop.f32.mrb[3].mxu1  ;;  %v705_v60 = vmax.f32 %v579_v50, 0.0  ;;  %v721_v61 = vmax.f32 %v643_v51, 0.0 }
 0x107   : > { %v706_v62 = vmax.f32 %v582_v56, 0.0  ;;  %v722_v63 = vmax.f32 %v646_v57, 0.0 }
 0x109   : > { %v1140_v0 = vpack.c.bf16 %v706_v62, %v705_v60  ;;  %v1180_v1 = vpack.c.bf16 %v722_v63, %v721_v61 }
 0x10a   : > { %v586_v2 = vpop.f32.mrb[4].mxu0  ;;  %v650_v3 = vpop.f32.mrb[4].mxu1 }
 0x10b   : > { %1141 = vst [vmem:[%s1499_s23] sm:$0xff] %v1140_v0   ;;  %1224 = vst [vmem:[%s1499_s23 + $0x40] sm:$0xff] %v1180_v1   ;;  %v587_v4 = vadd.f32 %v1489_v47, %v586_v2  ;;  %v651_v5 = vadd.f32 %v1489_v47, %v650_v3  ;;  %v588_v6 = vpop.f32.mrb[5].mxu0  ;;  %v652_v7 = vpop.f32.mrb[5].mxu1 }
 0x10c   : > { %v589_v8 = vpop.f32.mrb[6].mxu0  ;;  %v653_v9 = vpop.f32.mrb[6].mxu1 }
 0x10d   : > { %v590_v10 = vadd.f32 %v1489_v47, %v589_v8  ;;  %v654_v11 = vadd.f32 %v1489_v47, %v653_v9  ;;  %v591_v12 = vpop.f32.mrb[7].mxu0  ;;  %v655_v13 = vpop.f32.mrb[7].mxu1  ;;  %v707_v14 = vmax.f32 %v587_v4, 0.0  ;;  %v723_v15 = vmax.f32 %v651_v5, 0.0 }
 0x10f   : > { %v708_v16 = vmax.f32 %v590_v10, 0.0  ;;  %v724_v17 = vmax.f32 %v654_v11, 0.0 }
 0x111   : > { %v1145_v18 = vpack.c.bf16 %v708_v16, %v707_v14  ;;  %v1185_v19 = vpack.c.bf16 %v724_v17, %v723_v15 }
 0x112   : > { %v594_v20 = vpop.f32.mrb[8].mxu0  ;;  %v658_v21 = vpop.f32.mrb[8].mxu1 }
 0x113   : > { %1217 = vst [vmem:[%s1499_s23 + $0x8] sm:$0xff] %v1145_v18   ;;  %1225 = vst [vmem:[%s1499_s23 + $0x48] sm:$0xff] %v1185_v19   ;;  %v595_v22 = vadd.f32 %v1489_v47, %v594_v20  ;;  %v659_v23 = vadd.f32 %v1489_v47, %v658_v21  ;;  %v596_v24 = vpop.f32.mrb[9].mxu0  ;;  %v660_v25 = vpop.f32.mrb[9].mxu1 }
 0x114   : > { %v597_v26 = vpop.f32.mrb[10].mxu0  ;;  %v661_v27 = vpop.f32.mrb[10].mxu1 }
 0x115   : > { %v598_v28 = vadd.f32 %v1489_v47, %v597_v26  ;;  %v662_v29 = vadd.f32 %v1489_v47, %v661_v27  ;;  %v599_v30 = vpop.f32.mrb[11].mxu0  ;;  %v663_v31 = vpop.f32.mrb[11].mxu1  ;;  %v709_v32 = vmax.f32 %v595_v22, 0.0  ;;  %v725_v33 = vmax.f32 %v659_v23, 0.0 }
 0x117   : > { %v710_v34 = vmax.f32 %v598_v28, 0.0  ;;  %v726_v35 = vmax.f32 %v662_v29, 0.0 }
 0x119   : > { %v1150_v36 = vpack.c.bf16 %v710_v34, %v709_v32  ;;  %v1190_v37 = vpack.c.bf16 %v726_v35, %v725_v33 }
 0x11a   : > { %v602_v38 = vpop.f32.mrb[12].mxu0  ;;  %v666_v39 = vpop.f32.mrb[12].mxu1 }
 0x11b   : > { %1218 = vst [vmem:[%s1499_s23 + $0x10] sm:$0xff] %v1150_v36   ;;  %1226 = vst [vmem:[%s1499_s23 + $0x50] sm:$0xff] %v1190_v37   ;;  %v603_v40 = vadd.f32 %v1489_v47, %v602_v38  ;;  %v667_v41 = vadd.f32 %v1489_v47, %v666_v39  ;;  %v604_v42 = vpop.f32.mrb[13].mxu0  ;;  %v668_v43 = vpop.f32.mrb[13].mxu1 }
 0x11c   : > { %v605_v44 = vpop.f32.mrb[14].mxu0  ;;  %v669_v45 = vpop.f32.mrb[14].mxu1 }
 0x11d   : > { %v606_v46 = vadd.f32 %v1489_v47, %v605_v44  ;;  %v670_v48 = vadd.f32 %v1489_v47, %v669_v45  ;;  %v607_v49 = vpop.f32.mrb[15].mxu0  ;;  %v671_v50 = vpop.f32.mrb[15].mxu1  ;;  %v711_v51 = vmax.f32 %v603_v40, 0.0  ;;  %v727_v52 = vmax.f32 %v667_v41, 0.0 }
 0x11f   : > { %v712_v53 = vmax.f32 %v606_v46, 0.0  ;;  %v728_v54 = vmax.f32 %v670_v48, 0.0 }
 0x121   : > { %v1155_v55 = vpack.c.bf16 %v712_v53, %v711_v51  ;;  %v1195_v56 = vpack.c.bf16 %v728_v54, %v727_v52 }
 0x122   : > { %v610_v57 = vpop.f32.mrb[16].mxu0  ;;  %v674_v58 = vpop.f32.mrb[16].mxu1 }
 0x123   : > { %1219 = vst [vmem:[%s1499_s23 + $0x18] sm:$0xff] %v1155_v55   ;;  %1227 = vst [vmem:[%s1499_s23 + $0x58] sm:$0xff] %v1195_v56   ;;  %v611_v59 = vadd.f32 %v1489_v47, %v610_v57  ;;  %v675_v60 = vadd.f32 %v1489_v47, %v674_v58  ;;  %v612_v61 = vpop.f32.mrb[17].mxu0  ;;  %v676_v62 = vpop.f32.mrb[17].mxu1 }
 0x124   : > { %v613_v63 = vpop.f32.mrb[18].mxu0  ;;  %v677_v0 = vpop.f32.mrb[18].mxu1 }
 0x125   : > { %v614_v1 = vadd.f32 %v1489_v47, %v613_v63  ;;  %v678_v2 = vadd.f32 %v1489_v47, %v677_v0  ;;  %v615_v3 = vpop.f32.mrb[19].mxu0  ;;  %v679_v4 = vpop.f32.mrb[19].mxu1  ;;  %v713_v5 = vmax.f32 %v611_v59, 0.0  ;;  %v729_v6 = vmax.f32 %v675_v60, 0.0 }
 0x127   : > { %v714_v7 = vmax.f32 %v614_v1, 0.0  ;;  %v730_v8 = vmax.f32 %v678_v2, 0.0 }
 0x129   : > { %v1160_v9 = vpack.c.bf16 %v714_v7, %v713_v5  ;;  %v1200_v10 = vpack.c.bf16 %v730_v8, %v729_v6 }
 0x12a   : > { %v618_v11 = vpop.f32.mrb[20].mxu0  ;;  %v682_v12 = vpop.f32.mrb[20].mxu1 }
 0x12b   : > { %1220 = vst [vmem:[%s1499_s23 + $0x20] sm:$0xff] %v1160_v9   ;;  %1228 = vst [vmem:[%s1499_s23 + $0x60] sm:$0xff] %v1200_v10   ;;  %v619_v13 = vadd.f32 %v1489_v47, %v618_v11  ;;  %v683_v14 = vadd.f32 %v1489_v47, %v682_v12  ;;  %v620_v15 = vpop.f32.mrb[21].mxu0  ;;  %v684_v16 = vpop.f32.mrb[21].mxu1 }
 0x12c   : > { %v621_v17 = vpop.f32.mrb[22].mxu0  ;;  %v685_v18 = vpop.f32.mrb[22].mxu1 }
 0x12d   : > { %v622_v19 = vadd.f32 %v1489_v47, %v621_v17  ;;  %v686_v20 = vadd.f32 %v1489_v47, %v685_v18  ;;  %v623_v21 = vpop.f32.mrb[23].mxu0  ;;  %v687_v22 = vpop.f32.mrb[23].mxu1  ;;  %v715_v23 = vmax.f32 %v619_v13, 0.0  ;;  %v731_v24 = vmax.f32 %v683_v14, 0.0 }
 0x12f   : > { %v716_v25 = vmax.f32 %v622_v19, 0.0  ;;  %v732_v26 = vmax.f32 %v686_v20, 0.0 }
 0x131   : > { %v1165_v27 = vpack.c.bf16 %v716_v25, %v715_v23  ;;  %v1205_v28 = vpack.c.bf16 %v732_v26, %v731_v24 }
 0x132   : > { %v626_v29 = vpop.f32.mrb[24].mxu0  ;;  %v690_v30 = vpop.f32.mrb[24].mxu1 }
 0x133   : > { %1221 = vst [vmem:[%s1499_s23 + $0x28] sm:$0xff] %v1165_v27   ;;  %1229 = vst [vmem:[%s1499_s23 + $0x68] sm:$0xff] %v1205_v28   ;;  %v627_v31 = vadd.f32 %v1489_v47, %v626_v29  ;;  %v691_v32 = vadd.f32 %v1489_v47, %v690_v30  ;;  %v628_v33 = vpop.f32.mrb[25].mxu0  ;;  %v692_v34 = vpop.f32.mrb[25].mxu1 }
 0x134   : > { %v629_v35 = vpop.f32.mrb[26].mxu0  ;;  %v693_v36 = vpop.f32.mrb[26].mxu1 }
 0x135   : > { %v630_v37 = vadd.f32 %v1489_v47, %v629_v35  ;;  %v694_v38 = vadd.f32 %v1489_v47, %v693_v36  ;;  %v631_v39 = vpop.f32.mrb[27].mxu0  ;;  %v695_v40 = vpop.f32.mrb[27].mxu1  ;;  %v717_v41 = vmax.f32 %v627_v31, 0.0  ;;  %v733_v42 = vmax.f32 %v691_v32, 0.0 }
 0x137   : > { %v718_v43 = vmax.f32 %v630_v37, 0.0  ;;  %v734_v44 = vmax.f32 %v694_v38, 0.0 }
 0x139   : > { %v1170_v45 = vpack.c.bf16 %v718_v43, %v717_v41  ;;  %v1210_v46 = vpack.c.bf16 %v734_v44, %v733_v42 }
 0x13a   : > { %v634_v48 = vpop.f32.mrb[28].mxu0  ;;  %v698_v49 = vpop.f32.mrb[28].mxu1 }
 0x13b   : > { %1222 = vst [vmem:[%s1499_s23 + $0x30] sm:$0xff] %v1170_v45   ;;  %1230 = vst [vmem:[%s1499_s23 + $0x70] sm:$0xff] %v1210_v46   ;;  %v635_v50 = vadd.f32 %v1489_v47, %v634_v48  ;;  %v699_v51 = vadd.f32 %v1489_v47, %v698_v49  ;;  %v636_v52 = vpop.f32.mrb[29].mxu0  ;;  %v700_v53 = vpop.f32.mrb[29].mxu1 }
 0x13c   : > { %v637_v54 = vpop.f32.mrb[30].mxu0  ;;  %v701_v55 = vpop.f32.mrb[30].mxu1 }
 0x13d   : > { %v638_v56 = vadd.f32 %v1489_v47, %v637_v54  ;;  %v702_v57 = vadd.f32 %v1489_v47, %v701_v55  ;;  %v639_v58 = vpop.f32.mrb[31].mxu0  ;;  %v703_v59 = vpop.f32.mrb[31].mxu1  ;;  %v719_v60 = vmax.f32 %v635_v50, 0.0  ;;  %v735_v61 = vmax.f32 %v699_v51, 0.0 }
 0x13f   : > { %v720_v62 = vmax.f32 %v638_v56, 0.0  ;;  %v736_v63 = vmax.f32 %v702_v57, 0.0 }
 0x141   : > { %v1175_v0 = vpack.c.bf16 %v720_v62, %v719_v60  ;;  %v1215_v1 = vpack.c.bf16 %v736_v63, %v735_v61 }
 0x143   : > { %1223 = vst [vmem:[%s1499_s23 + $0x38] sm:$0xff] %v1175_v0   ;;  %1231 = vst [vmem:[%s1499_s23 + $0x78] sm:$0xff] %v1215_v1  }
 0x144 PF: > { %s13_s14 = sadd.s32 1, %s1358_s14   ;;  %s1558_s12 = smov %s1354_s13 }
 0x145   : > { %p10_p5 = scmp.ge.s32.totalorder %s13_s14, 4   ;;  %s1559_s13 = smov %s1561_s15 }
 0x147   :  { %12 = sbr.rel (!%p10_p5) target bundleno = 2 (0x2), region = 68 }

// kernel: _lambda_.25
= control target key start
LH: loop header
LB: loop body
LE: loop exit
PB: predicated region body
PF: predicated region fallthrough
CT: control target
= control target key end

     0   :  { %vm135_vm0 = vsmask.f32 3328  ;;  %vm136_vm1 = vsmask.f32 7440  ;;  %s1802_s0 = inlined_call_operand.vmem [shape: bf16[2,9,9,128], index: 0, kind: input, shape index: {}]   ;;  %s1803_s1 = inlined_call_operand.vmem [shape: bf16[2,9,9,128], index: 1, kind: input, shape index: {}]   ;;  %s1804_s2 = inlined_call_operand.vmem [shape: bf16[2,9,9,128], index: 2, kind: input, shape index: {}]   ;;  %s1805_s3 = inlined_call_operand.vmem [shape: bf16[2,9,9,128], index: 3, kind: input, shape index: {}]   ;;  %s1806_s4 = inlined_call_operand.vmem [shape: bf16[2,8,8,128], index: 4, kind: output, shape index: {}]  }
   0x1   :  { %v863_v0 = vld [vmem:[%s1802_s0 + $0x48] sm:$0xf]  ;;  %v868_v1 = vld [vmem:[%s1802_s0 + $0x50] sm:$0xf]  ;;  %v878_v3 = vld [vmem:[%s1802_s0 + $0x38] sm:$0xf] }
   0x2   :  { %v873_v2 = vld [vmem:[%s1802_s0 + $0x30] sm:$0xf]  ;;  %v885_v5 = vld [vmem:[%s1802_s0 + $0x58] sm:$0xf]  ;;  %v127_v6 = vmax.bf16 %v868_v1, %v863_v0  ;;  %v62_v9 = vld [vmem:[%s1803_s1 + $0x48] sm:$0xf] }
   0x3   :  { %1823 = vst [vmem:[#allocation2_spill] sm:$0xff] %v873_v2  ;;  %v125_v4 = vmax.bf16 %v878_v3, %v873_v2  ;;  %v128_v7 = vmax.bf16 %v885_v5, %v868_v1  ;;  %v894_v8 = vld [vmem:[%s1803_s1 + $0x30] sm:$0xf]  ;;  %v906_v12 = vld [vmem:[%s1803_s1 + $0x38] sm:$0xf]  ;;  %vm1133_vm2 = vmor %vm135_vm0, %vm136_vm1 }
   0x4   :  { %1824 = vst [vmem:[#allocation3_spill] sm:$0xff] %v894_v8  ;;  %v63_v10 = vld [vmem:[%s1803_s1 + $0x50] sm:$0xf]  ;;  %1825 = vst [vmem:[#allocation4_spill] sm:$0xff] %v906_v12  ;;  %v386_v13 = vmax.bf16 %v127_v6, %v62_v9  ;;  %v911_v15 = vld [vmem:[%s1803_s1 + $0x58] sm:$0xf] }
   0x5   :  { %v384_v11 = vmax.bf16 %v125_v4, %v894_v8  ;;  %v387_v14 = vmax.bf16 %v128_v7, %v63_v10  ;;  %1826 = vst [vmem:[#allocation5_spill] sm:$0xff] %v911_v15  ;;  %v918_v19 = vld [vmem:[%s1804_s2 + $0x30] sm:$0xf]  ;;  %v923_v20 = vld [vmem:[%s1804_s2 + $0x48] sm:$0xf] }
   0x6   :  { %v402_v17 = vmax.bf16 %v386_v13, %v63_v10  ;;  %1827 = vst [vmem:[#allocation6_spill] sm:$0xff] %v918_v19  ;;  %1828 = vst [vmem:[#allocation7_spill] sm:$0xff] %v923_v20  ;;  %v928_v21 = vld [vmem:[%s1804_s2 + $0x50] sm:$0xf]  ;;  %v933_v22 = vld [vmem:[%s1802_s0] sm:$0xf] }
   0x7   :  { %v400_v16 = vmax.bf16 %v384_v11, %v906_v12  ;;  %v403_v18 = vmax.bf16 %v387_v14, %v911_v15  ;;  %1829 = vst [vmem:[#allocation8_spill] sm:$0xff] %v928_v21  ;;  %v941_v24 = vld [vmem:[%s1802_s0 + $0x8] sm:$0xf]  ;;  %v946_v25 = vld [vmem:[%s1802_s0 + $0x10] sm:$0xf]  ;;  %v139_v13 = vshrl.u32 %v933_v22, 16 }
   0x8   :  { %v951_v26 = vld [vmem:[%s1802_s0 + $0x18] sm:$0xf]  ;;  %v954_v27 = vmax.bf16 %v402_v17, %v923_v20  ;;  %v962_v29 = vld [vmem:[%s1805_s3] sm:$0xf]  ;;  %v972_v31 = vld [vmem:[%s1802_s0 + $0x28] sm:$0xf] }
   0x9   :  { %v936_v23 = vmax.bf16 %v400_v16, %v918_v19  ;;  %v957_v28 = vmax.bf16 %v403_v18, %v928_v21  ;;  %v967_v30 = vld [vmem:[%s1802_s0 + $0x20] sm:$0xf]  ;;  %v977_v32 = vld [vmem:[%s1805_s3 + $0x8] sm:$0xf]  ;;  %v982_v33 = vld [vmem:[%s1805_s3 + $0x10] sm:$0xf] }
   0xa   :  { %v987_v34 = vld [vmem:[%s1805_s3 + $0x18] sm:$0xf]  ;;  %v18_v35 = vld [vmem:[%s1802_s0 + $0x4] sm:$0x1]  ;;  %v995_v36 = vld [vmem:[%s1802_s0 + $0x60] sm:$0xf] }
   0xb   :  { %v1000_v37 = vld [vmem:[%s1802_s0 + $0x68] sm:$0xf]  ;;  %v1005_v38 = vld [vmem:[%s1805_s3 + $0x20] sm:$0xf]  ;;  %v1015_v40 = vld [vmem:[%s1805_s3 + $0x30] sm:$0xf] }
   0xc   :  { %v1010_v39 = vld [vmem:[%s1805_s3 + $0x28] sm:$0xf]  ;;  %v20_v42 = vld [vmem:[%s1802_s0 + $0xc] sm:$0x1]  ;;  %v1025_v43 = vld [vmem:[%s1802_s0 + $0x70] sm:$0xf] }
   0xd   :  { %v1030_v44 = vld [vmem:[%s1802_s0 + $0x78] sm:$0xf]  ;;  %v1035_v45 = vld [vmem:[%s1802_s0 + $0x80] sm:$0xf]  ;;  %v1047_v48 = vld [vmem:[%s1805_s3 + $0x48] sm:$0xf] }
   0xe   :  { %v1042_v47 = vld [vmem:[%s1805_s3 + $0x38] sm:$0xf]  ;;  %v1052_v49 = vld [vmem:[%s1805_s3 + $0x50] sm:$0xf]  ;;  %v1072_v56 = vld [vmem:[%s1805_s3 + $0x60] sm:$0xf] }
   0xf   :  { %v1067_v55 = vld [vmem:[%s1805_s3 + $0x58] sm:$0xf]  ;;  %v1077_v57 = vld [vmem:[%s1805_s3 + $0x68] sm:$0xf]  ;;  %v1086_v60 = vld [vmem:[%s1805_s3 + $0x70] sm:$0xf] }
  0x10   :  { %v1091_v61 = vld [vmem:[%s1805_s3 + $0x78] sm:$0xf]  ;;  %v1096_v62 = vld [vmem:[%s1805_s3 + $0x80] sm:$0xf]  ;;  %v22_v14 = vld [vmem:[%s1802_s0 + $0x14] sm:$0x1] }
  0x11   :  { %1830 = vst [vmem:[#allocation9_spill] sm:$0xff] %v1096_v62  ;;  %v142_v16 = vshll.u32 %v933_v22, 16  ;;  %v148_v17 = vshll.u32 %v18_v35, 16  ;;  %v153_v18 = vshrl.u32 %v941_v24, 16  ;;  %v156_v7 = vshll.u32 %v941_v24, 16 }
  0x12   :  { %v141_v9 = vrot.slane %v139_v13, 4  ;;  %v162_v6 = vshll.u32 %v20_v42, 16  ;;  %v167_v10 = vshrl.u32 %v946_v25, 16  ;;  %v170_v4 = vshll.u32 %v946_v25, 16  ;;  %v24_v11 = vld [vmem:[%s1802_s0 + $0x1c] sm:$0x1] }
  0x13   :  { %v144_v63 = vrot.slane %v142_v16, 5  ;;  %v1124_v59 = vrot.slane %v148_v17, 5  ;;  %v155_v58 = vrot.slane %v153_v18, 4  ;;  %v158_v52 = vrot.slane %v156_v7, 5  ;;  %v26_v46 = vld [vmem:[%s1802_s0 + $0x24] sm:$0x1] }
  0x14   :  { %v164_v35 = vrot.slane %v162_v6, 5  ;;  %v169_v51 = vrot.slane %v167_v10, 4  ;;  %v172_v50 = vrot.slane %v170_v4, 5  ;;  %v176_v41 = vshll.u32 %v22_v14, 16  ;;  %v28_v14 = vld [vmem:[%s1802_s0 + $0x2c] sm:$0x1] }
  0x15   :  { %v145_v54 = vor.u32 %v144_v63, %v141_v9  ;;  %v159_v13 = vor.u32 %v158_v52, %v155_v58  ;;  %v181_v42 = vshrl.u32 %v951_v26, 16  ;;  %v184_v53 = vshll.u32 %v951_v26, 16 }
  0x16   :  { %v173_v6 = vor.u32 %v172_v50, %v169_v51  ;;  %v178_v7 = vrot.slane %v176_v41, 5  ;;  %v190_v4 = vshll.u32 %v24_v11, 16  ;;  %v195_v63 = vshrl.u32 %v967_v30, 16 }
  0x17   :  { %v1138_v52 = vrot.slane %v145_v54, 4  ;;  %v160_v58 = vrot.slane %v159_v13, 4  ;;  %v183_v9 = vrot.slane %v181_v42, 4  ;;  %v186_v10 = vrot.slane %v184_v53, 5  ;;  %v30_v54 = vld [vmem:[%s1802_s0 + $0x34] sm:$0x1] }
  0x18   :  { %v174_v17 = vrot.slane %v173_v6, 4  ;;  %v192_v18 = vrot.slane %v190_v4, 5  ;;  %v197_v21 = vrot.slane %v195_v63, 4  ;;  %v198_v20 = vshll.u32 %v967_v30, 16 }
  0x19   :  { %v1150_v50 = vsel %vm1133_vm2, %v160_v58, %v164_v35  ;;  %v187_v51 = vor.u32 %v186_v10, %v183_v9  ;;  %v204_v53 = vshll.u32 %v26_v46, 16  ;;  %v209_v42 = vshrl.u32 %v972_v31, 16  ;;  %v32_v46 = vld [vmem:[%s1802_s0 + $0x3c] sm:$0x1] }
  0x1a   :  { %v1157_v11 = vsel %vm1133_vm2, %v174_v17, %v178_v7  ;;  %v200_v13 = vrot.slane %v198_v20, 5  ;;  %v212_v6 = vshll.u32 %v972_v31, 16  ;;  %v218_v41 = vshll.u32 %v28_v14, 16 }
  0x1b   :  { %v188_v4 = vrot.slane %v187_v51, 4  ;;  %v206_v63 = vrot.slane %v204_v53, 5  ;;  %v223_v35 = vshrl.u32 %v873_v2, 16  ;;  %v211_v9 = vrot.slane %v209_v42, 4 }
  0x1c   :  { %v201_v58 = vor.u32 %v200_v13, %v197_v21  ;;  %v214_v10 = vrot.slane %v212_v6, 5  ;;  %v226_v7 = vshll.u32 %v873_v2, 16  ;;  %v220_v17 = vrot.slane %v218_v41, 5  ;;  %v36_v21 = vld [vmem:[%s1802_s0 + $0x4c] sm:$0x1] }
  0x1d   :  { %v1168_v20 = vsel %vm1133_vm2, %v188_v4, %v192_v18  ;;  %v225_v19 = vrot.slane %v223_v35, 4  ;;  %v232_v51 = vshll.u32 %v30_v54, 16  ;;  %v237_v12 = vshrl.u32 %v878_v3, 16  ;;  %v38_v18 = vld [vmem:[%s1802_s0 + $0x54] sm:$0x1] }
  0x1e   :  { %v202_v53 = vrot.slane %v201_v58, 4  ;;  %v215_v14 = vor.u32 %v214_v10, %v211_v9  ;;  %v228_v8 = vrot.slane %v226_v7, 5  ;;  %v240_v42 = vshll.u32 %v878_v3, 16 }
  0x1f   :  { %v234_v13 = vrot.slane %v232_v51, 5  ;;  %v246_v6 = vshll.u32 %v32_v46, 16  ;;  %v251_v15 = vshrl.u32 %v863_v0, 16  ;;  %v239_v35 = vrot.slane %v237_v12, 4 }
  0x20   :  { %v1181_v41 = vsel %vm1133_vm2, %v202_v53, %v206_v63  ;;  %v216_v54 = vrot.slane %v215_v14, 4  ;;  %v229_v4 = vor.u32 %v228_v8, %v225_v19  ;;  %v242_v58 = vrot.slane %v240_v42, 5  ;;  %v40_v63 = vld [vmem:[%s1802_s0 + $0x5c] sm:$0x1] }
  0x21   :  { %v248_v9 = vrot.slane %v246_v6, 5  ;;  %v253_v10 = vrot.slane %v251_v15, 4  ;;  %v254_v7 = vshll.u32 %v863_v0, 16  ;;  %v260_v62 = vshll.u32 %v36_v21, 16 }
  0x22   :  { %v1186_v46 = vsel %vm1133_vm2, %v216_v54, %v220_v17  ;;  %v230_v51 = vrot.slane %v229_v4, 4  ;;  %v265_v2 = vshrl.u32 %v868_v1, 16  ;;  %v243_v53 = vor.u32 %v242_v58, %v239_v35 }
  0x23   :  { %v256_v8 = vrot.slane %v254_v7, 5  ;;  %v268_v12 = vshll.u32 %v868_v1, 16  ;;  %v274_v19 = vshll.u32 %v38_v18, 16  ;;  %v262_v15 = vrot.slane %v260_v62, 5  ;;  %v42_v1 = vld [vmem:[%s1802_s0 + $0x64] sm:$0x1] }
  0x24   :  { %v1195_v0 = vsel %vm1133_vm2, %v230_v51, %v234_v13  ;;  %v267_v17 = vrot.slane %v265_v2, 4  ;;  %v279_v14 = vshrl.u32 %v885_v5, 16  ;;  %v1833_v21 = vmax.bf16 %v936_v23, %v1015_v40 }
  0x25   :  { %v244_v6 = vrot.slane %v243_v53, 4  ;;  %v257_v54 = vor.u32 %v256_v8, %v253_v10  ;;  %v270_v4 = vrot.slane %v268_v12, 5  ;;  %v276_v18 = vrot.slane %v274_v19, 5  ;;  %v44_v10 = vld [vmem:[%s1802_s0 + $0x6c] sm:$0x1] }
  0x26   :  { %v1202_v42 = vmax.bf16 %v1833_v21, %v1195_v0  ;;  %v281_v13 = vrot.slane %v279_v14, 4  ;;  %v282_v62 = vshll.u32 %v885_v5, 16  ;;  %v288_v2 = vshll.u32 %v40_v63, 16 }
  0x27   :  { %v1210_v35 = vsel %vm1133_vm2, %v244_v6, %v248_v9  ;;  %v258_v58 = vrot.slane %v257_v54, 4  ;;  %v271_v23 = vor.u32 %v270_v4, %v267_v17  ;;  %v293_v40 = vshrl.u32 %v995_v36, 16  ;;  %v46_v4 = vld [vmem:[%s1802_s0 + $0x74] sm:$0x1] }
  0x28   :  { %v284_v51 = vrot.slane %v282_v62, 5  ;;  %v290_v53 = vrot.slane %v288_v2, 5  ;;  %v296_v8 = vshll.u32 %v995_v36, 16  ;;  %v302_v19 = vshll.u32 %v42_v1, 16 }
  0x29   :  { %v263_v63 = vsel %vm1133_vm2, %v258_v58, %v262_v15  ;;  %v272_v9 = vrot.slane %v271_v23, 4  ;;  %v295_v12 = vrot.slane %v293_v40, 4  ;;  %v1834_v17 = vmax.bf16 %v954_v27, %v1047_v48 }
  0x2a   :  { %v285_v21 = vor.u32 %v284_v51, %v281_v13  ;;  %v298_v6 = vrot.slane %v296_v8, 5  ;;  %v307_v54 = vshrl.u32 %v1000_v37, 16  ;;  %v304_v15 = vrot.slane %v302_v19, 5 }
  0x2b   :  { %v1224_v14 = vmax.bf16 %v1834_v17, %v263_v63  ;;  %v1232_v62 = vsel %vm1133_vm2, %v272_v9, %v276_v18  ;;  %v310_v1 = vshll.u32 %v1000_v37, 16  ;;  %v316_v2 = vshll.u32 %v44_v10, 16  ;;  %v48_v10 = vld [vmem:[%s1802_s0 + $0x7c] sm:$0x1] }
  0x2c   :  { %v1835_v27 = vmax.bf16 %v957_v28, %v1052_v49  ;;  %v286_v58 = vrot.slane %v285_v21, 4  ;;  %v299_v23 = vor.u32 %v298_v6, %v295_v12  ;;  %v309_v40 = vrot.slane %v307_v54, 4  ;;  %v50_v12 = vld [vmem:[%s1802_s0 + $0x84] sm:$0x1] }
  0x2d   :  { %v312_v51 = vrot.slane %v310_v1, 5  ;;  %v318_v8 = vrot.slane %v316_v2, 5  ;;  %v321_v18 = vshrl.u32 %v1025_v43, 16  ;;  %v324_v49 = vshll.u32 %v1025_v43, 16 }
  0x2e   :  { %v1239_v48 = vmax.bf16 %v1835_v27, %v1232_v62  ;;  %v1249_v63 = vsel %vm1133_vm2, %v286_v58, %v290_v53  ;;  %v300_v28 = vrot.slane %v299_v23, 4  ;;  %v330_v9 = vshll.u32 %v46_v4, 16 }
  0x2f   :  { %v313_v17 = vor.u32 %v312_v51, %v309_v40  ;;  %v323_v21 = vrot.slane %v321_v18, 4  ;;  %v335_v6 = vshrl.u32 %v1030_v44, 16  ;;  %v326_v53 = vrot.slane %v324_v49, 5 }
  0x30   :  { %v1260_v54 = vsel %vm1133_vm2, %v300_v28, %v304_v15  ;;  %v332_v1 = vrot.slane %v330_v9, 5  ;;  %v338_v2 = vshll.u32 %v1030_v44, 16  ;;  %v344_v58 = vshll.u32 %v48_v10, 16 }
  0x31   :  { %v314_v4 = vrot.slane %v313_v17, 4  ;;  %v337_v27 = vrot.slane %v335_v6, 4  ;;  %v349_v23 = vshrl.u32 %v1035_v45, 16  ;;  %v327_v13 = vor.u32 %v326_v53, %v323_v21 }
  0x32   :  { %v340_v7 = vrot.slane %v338_v2, 5  ;;  %v352_v40 = vshll.u32 %v1035_v45, 16  ;;  %v358_v51 = vshll.u32 %v50_v12, 16  ;;  %v346_v15 = vrot.slane %v344_v58, 5 }
  0x33   :  { %v1267_v18 = vsel %vm1133_vm2, %v314_v4, %v318_v8  ;;  %v351_v28 = vrot.slane %v349_v23, 4  ;;  %v1836_v49 = vmax.bf16 %v962_v29, %v933_v22  ;;  %v1837_v10 = vsel %vm1133_vm2, %v1138_v52, %v1124_v59 }
  0x34   :  { %v328_v17 = vrot.slane %v327_v13, 4  ;;  %v341_v21 = vor.u32 %v340_v7, %v337_v27  ;;  %v354_v6 = vrot.slane %v352_v40, 5  ;;  %v360_v53 = vrot.slane %v358_v51, 5 }
  0x35   :  { %v378_v9 = vmax.bf16 %v1837_v10, %v1836_v49  ;;  %v1838_v12 = vmax.bf16 %v977_v32, %v941_v24  ;;  %v1839_v2 = vmax.bf16 %v982_v33, %v946_v25  ;;  %v1840_v29 = vmax.bf16 %v987_v34, %v951_v26 }
  0x36   :  { %v1841_v52 = vmax.bf16 %v1005_v38, %v967_v30  ;;  %v333_v32 = vsel %vm1133_vm2, %v328_v17, %v332_v1  ;;  %v342_v13 = vrot.slane %v341_v21, 4  ;;  %v355_v4 = vor.u32 %v354_v6, %v351_v28  ;;  %v1849_v21 = vld [vmem:[#allocation2_spill] sm:$0xff]  ;;  %v1850_v6 = vld [vmem:[#allocation9_spill] sm:$0xff] }
  0x37   :  { %v379_v8 = vmax.bf16 %v1150_v50, %v1838_v12  ;;  %v380_v22 = vmax.bf16 %v1157_v11, %v1839_v2  ;;  %v381_v59 = vmax.bf16 %v1168_v20, %v1840_v29  ;;  %v1842_v33 = vmax.bf16 %v1010_v39, %v972_v31 }
  0x38   :  { %v382_v7 = vmax.bf16 %v1181_v41, %v1841_v52  ;;  %v1843_v34 = vmax.bf16 %v1042_v47, %v878_v3  ;;  %v1844_v38 = vmax.bf16 %v1067_v55, %v885_v5  ;;  %v1845_v1 = vmax.bf16 %v1072_v56, %v995_v36  ;;  %v1326_v56 = vld [vmem:[%s1802_s0 + $0x40] sm:$0xf] }
  0x39   :  { %v383_v27 = vmax.bf16 %v1186_v46, %v1842_v33  ;;  %v1846_v39 = vmax.bf16 %v1077_v57, %v1000_v37  ;;  %v347_v3 = vsel %vm1133_vm2, %v342_v13, %v346_v15  ;;  %v356_v47 = vrot.slane %v355_v4, 4 }
  0x3a   :  { %v1303_v58 = vmax.bf16 %v1210_v35, %v1843_v34  ;;  %v388_v23 = vmax.bf16 %v1249_v63, %v1844_v38  ;;  %v389_v40 = vmax.bf16 %v1260_v54, %v1845_v1  ;;  %v1847_v28 = vmax.bf16 %v1086_v60, %v1025_v43  ;;  %v34_v60 = vld [vmem:[%s1802_s0 + $0x44] sm:$0x1]  ;;  %v53_v38 = vld [vmem:[%s1803_s1] sm:$0xf] }
  0x3b   :  { %v390_v51 = vmax.bf16 %v1267_v18, %v1846_v39  ;;  %v394_v55 = vmax.bf16 %v378_v9, %v941_v24  ;;  %v1848_v57 = vmax.bf16 %v1091_v61, %v1030_v44  ;;  %v395_v10 = vmax.bf16 %v379_v8, %v946_v25  ;;  %v1340_v24 = vld [vmem:[%s1802_s0 + $0x88] sm:$0xf] }
  0x3c   :  { %v391_v5 = vmax.bf16 %v333_v32, %v1847_v28  ;;  %v396_v15 = vmax.bf16 %v380_v22, %v951_v26  ;;  %v397_v17 = vmax.bf16 %v381_v59, %v967_v30  ;;  %v361_v9 = vsel %vm1133_vm2, %v356_v47, %v360_v53  ;;  %v52_v30 = vld [vmem:[%s1802_s0 + $0x8c] sm:$0x1]  ;;  %v57_v47 = vld [vmem:[%s1803_s1 + $0x20] sm:$0xf] }
  0x3d   :  { %v392_v49 = vmax.bf16 %v347_v3, %v1848_v57  ;;  %v398_v61 = vmax.bf16 %v382_v7, %v972_v31  ;;  %v399_v25 = vmax.bf16 %v383_v27, %v1849_v21  ;;  %v401_v26 = vmax.bf16 %v1303_v58, %v1326_v56 }
  0x3e   :  { %v1851_v12 = vmax.bf16 %v1850_v6, %v1035_v45  ;;  %v404_v2 = vmax.bf16 %v388_v23, %v995_v36  ;;  %v405_v22 = vmax.bf16 %v389_v40, %v1000_v37  ;;  %v406_v53 = vmax.bf16 %v390_v51, %v1025_v43  ;;  %v54_v23 = vld [vmem:[%s1803_s1 + $0x8] sm:$0xf] }
  0x3f   :  { %v407_v31 = vmax.bf16 %v391_v5, %v1030_v44  ;;  %v408_v29 = vmax.bf16 %v392_v49, %v1035_v45  ;;  %v411_v59 = vshrl.u32 %v1326_v56, 16  ;;  %v414_v52 = vshll.u32 %v1326_v56, 16  ;;  %v65_v56 = vld [vmem:[%s1803_s1 + $0x60] sm:$0xf] }
  0x40   :  { %v393_v8 = vmax.bf16 %v361_v9, %v1851_v12  ;;  %v420_v13 = vshll.u32 %v34_v60, 16  ;;  %v425_v4 = vshrl.u32 %v1340_v24, 16  ;;  %v428_v33 = vshll.u32 %v1340_v24, 16  ;;  %v1852_v12 = vld [vmem:[#allocation5_spill] sm:$0xff] }
  0x41   :  { %v413_v36 = vrot.slane %v411_v59, 4  ;;  %v416_v27 = vrot.slane %v414_v52, 5  ;;  %v434_v37 = vshll.u32 %v52_v30, 16  ;;  %v440_v43 = vmax.bf16 %v394_v55, %v1150_v50  ;;  %v55_v50 = vld [vmem:[%s1803_s1 + $0x10] sm:$0xf] }
  0x42   :  { %v409_v7 = vmax.bf16 %v393_v8, %v1340_v24  ;;  %v422_v34 = vrot.slane %v420_v13, 5  ;;  %v427_v44 = vrot.slane %v425_v4, 4  ;;  %v430_v58 = vrot.slane %v428_v33, 5  ;;  %v70_v59 = vld [vmem:[%s1803_s1 + $0x88] sm:$0xf]  ;;  %v1853_v52 = vld [vmem:[#allocation4_spill] sm:$0xff] }
  0x43   :  { %v441_v45 = vmax.bf16 %v395_v10, %v1157_v11  ;;  %v417_v1 = vor.u32 %v416_v27, %v413_v36  ;;  %v436_v40 = vrot.slane %v434_v37, 5  ;;  %v442_v39 = vmax.bf16 %v396_v15, %v1168_v20  ;;  %v56_v11 = vld [vmem:[%s1803_s1 + $0x18] sm:$0xf]  ;;  %v1424_v36 = vld [vmem:[%s1804_s2] sm:$0xf] }
  0x44   :  { %v443_v51 = vmax.bf16 %v397_v17, %v1181_v41  ;;  %v431_v28 = vor.u32 %v430_v58, %v427_v44  ;;  %v444_v5 = vmax.bf16 %v398_v61, %v1186_v46  ;;  %v445_v55 = vmax.bf16 %v399_v25, %v1195_v0  ;;  %v58_v41 = vld [vmem:[%s1803_s1 + $0x28] sm:$0xf]  ;;  %v67_v0 = vld [vmem:[%s1803_s1 + $0x70] sm:$0xf]  ;;  %v68_v61 = vld [vmem:[%s1803_s1 + $0x78] sm:$0xf] }
  0x45   :  { %v450_v20 = vmax.bf16 %v404_v2, %v1260_v54  ;;  %v418_v57 = vrot.slane %v417_v1, 4  ;;  %v451_v49 = vmax.bf16 %v405_v22, %v1267_v18  ;;  %v452_v10 = vmax.bf16 %v406_v53, %v333_v32  ;;  %v66_v46 = vld [vmem:[%s1803_s1 + $0x68] sm:$0xf]  ;;  %v69_v25 = vld [vmem:[%s1803_s1 + $0x80] sm:$0xf] }
  0x46   :  { %v453_v15 = vmax.bf16 %v407_v31, %v347_v3  ;;  %v432_v54 = vrot.slane %v431_v28, 4  ;;  %v454_v17 = vmax.bf16 %v408_v29, %v361_v9  ;;  %v456_v60 = vmax.bf16 %v440_v43, %v53_v38  ;;  %v61_v2 = vld [vmem:[%s1803_s1 + $0x40] sm:$0xf]  ;;  %v1438_v44 = vld [vmem:[%s1804_s2 + $0x8] sm:$0xf] }
  0x47   :  { %v457_v24 = vmax.bf16 %v441_v45, %v54_v23  ;;  %v423_v18 = vsel %vm1133_vm2, %v418_v57, %v422_v34  ;;  %v458_v32 = vmax.bf16 %v442_v39, %v55_v50  ;;  %v459_v3 = vmax.bf16 %v443_v51, %v56_v11  ;;  %v72_v34 = vld [vmem:[%s1804_s2 + $0x4] sm:$0x1]  ;;  %v1443_v58 = vld [vmem:[%s1804_s2 + $0x10] sm:$0xf]  ;;  %v1854_v45 = vld [vmem:[#allocation3_spill] sm:$0xff] }
  0x48   :  { %v460_v21 = vmax.bf16 %v444_v5, %v57_v47  ;;  %v437_v30 = vsel %vm1133_vm2, %v432_v54, %v436_v40  ;;  %v447_v9 = vmax.bf16 %v423_v18, %v401_v26  ;;  %v461_v6 = vmax.bf16 %v445_v55, %v58_v41  ;;  %v74_v39 = vld [vmem:[%s1804_s2 + $0xc] sm:$0x1]  ;;  %v1460_v51 = vld [vmem:[%s1804_s2 + $0x18] sm:$0xf]  ;;  %v1529_v18 = vld [vmem:[%s1804_s2 + $0x80] sm:$0xf] }
  0x49   :  { %v466_v8 = vmax.bf16 %v450_v20, %v1852_v12  ;;  %v455_v22 = vmax.bf16 %v437_v30, %v409_v7  ;;  %v467_v53 = vmax.bf16 %v451_v49, %v65_v56  ;;  %v468_v31 = vmax.bf16 %v452_v10, %v66_v46  ;;  %v1483_v20 = vld [vmem:[%s1804_s2 + $0x38] sm:$0xf]  ;;  %v1861_v57 = vld [vmem:[#allocation7_spill] sm:$0xff] }
  0x4a   :  { %v469_v29 = vmax.bf16 %v453_v15, %v67_v0  ;;  %v463_v13 = vmax.bf16 %v447_v9, %v1853_v52  ;;  %v470_v4 = vmax.bf16 %v454_v17, %v68_v61  ;;  %v1417_v33 = vmax.bf16 %v456_v60, %v54_v23  ;;  %v1516_v54 = vld [vmem:[%s1804_s2 + $0x78] sm:$0xf]  ;;  %v1860_v15 = vld [vmem:[#allocation6_spill] sm:$0xff] }
  0x4b   :  { %v1419_v26 = vmax.bf16 %v457_v24, %v55_v50  ;;  %v471_v7 = vmax.bf16 %v455_v22, %v69_v25  ;;  %v1426_v27 = vmax.bf16 %v458_v32, %v56_v11  ;;  %v1428_v37 = vmax.bf16 %v459_v3, %v57_v47  ;;  %v1465_v50 = vld [vmem:[%s1804_s2 + $0x20] sm:$0xf]  ;;  %v1470_v11 = vld [vmem:[%s1804_s2 + $0x28] sm:$0xf]  ;;  %v80_v32 = vld [vmem:[%s1804_s2 + $0x24] sm:$0x1] }
  0x4c   :  { %v1430_v43 = vmax.bf16 %v460_v21, %v58_v41  ;;  %v1446_v38 = vmax.bf16 %v461_v6, %v1854_v45  ;;  %v1448_v23 = vmax.bf16 %v463_v13, %v61_v2  ;;  %v1450_v1 = vmax.bf16 %v466_v8, %v65_v56  ;;  %v1488_v41 = vld [vmem:[%s1804_s2 + $0x58] sm:$0xf]  ;;  %v1493_v56 = vld [vmem:[%s1804_s2 + $0x60] sm:$0xf]  ;;  %v76_v8 = vld [vmem:[%s1804_s2 + $0x14] sm:$0x1] }
  0x4d   :  { %v1452_v40 = vmax.bf16 %v467_v53, %v66_v46  ;;  %v1472_v47 = vmax.bf16 %v468_v31, %v67_v0  ;;  %v1474_v28 = vmax.bf16 %v469_v29, %v68_v61  ;;  %v1476_v5 = vmax.bf16 %v470_v4, %v69_v25  ;;  %v1506_v46 = vld [vmem:[%s1804_s2 + $0x68] sm:$0xf]  ;;  %v1511_v0 = vld [vmem:[%s1804_s2 + $0x70] sm:$0xf]  ;;  %v78_v29 = vld [vmem:[%s1804_s2 + $0x1c] sm:$0x1] }
  0x4e   :  { %v1478_v55 = vmax.bf16 %v471_v7, %v70_v59  ;;  %v505_v9 = vshrl.u32 %v1424_v36, 16  ;;  %v508_v6 = vshll.u32 %v1424_v36, 16  ;;  %v514_v12 = vshll.u32 %v72_v34, 16 }
  0x4f   :  { %1855 = vst [vmem:[#allocation2_spill] sm:$0xff] %v1452_v40  ;;  %1856 = vst [vmem:[#allocation9_spill] sm:$0xff] %v1472_v47  ;;  %v519_v2 = vshrl.u32 %v1438_v44, 16  ;;  %v522_v22 = vshll.u32 %v1438_v44, 16  ;;  %v528_v53 = vshll.u32 %v74_v39, 16  ;;  %v533_v31 = vshrl.u32 %v1443_v58, 16 }
  0x50   :  { %1857 = vst [vmem:[#allocation5_spill] sm:$0xff] %v1474_v28  ;;  %1858 = vst [vmem:[#allocation4_spill] sm:$0xff] %v1476_v5  ;;  %v507_v59 = vrot.slane %v505_v9, 4  ;;  %v510_v52 = vrot.slane %v508_v6, 5  ;;  %v1552_v13 = vrot.slane %v514_v12, 5  ;;  %v536_v4 = vshll.u32 %v1443_v58, 16 }
  0x51   :  { %1859 = vst [vmem:[#allocation3_spill] sm:$0xff] %v1478_v55  ;;  %v521_v7 = vrot.slane %v519_v2, 4  ;;  %v524_v34 = vrot.slane %v522_v22, 5  ;;  %v1555_v45 = vrot.slane %v528_v53, 5  ;;  %v535_v30 = vrot.slane %v533_v31, 4  ;;  %v1862_v28 = vld [vmem:[#allocation8_spill] sm:$0xff] }
  0x52   :  { %v511_v25 = vor.u32 %v510_v52, %v507_v59  ;;  %v538_v21 = vrot.slane %v536_v4, 5  ;;  %v542_v39 = vshll.u32 %v76_v8, 16  ;;  %v547_v3 = vshrl.u32 %v1460_v51, 16  ;;  %v82_v8 = vld [vmem:[%s1804_s2 + $0x2c] sm:$0x1] }
  0x53   :  { %v525_v9 = vor.u32 %v524_v34, %v521_v7  ;;  %v550_v6 = vshll.u32 %v1460_v51, 16  ;;  %v556_v12 = vshll.u32 %v78_v29, 16  ;;  %v561_v61 = vshrl.u32 %v1465_v50, 16 }
  0x54   :  { %v1563_v2 = vrot.slane %v511_v25, 4  ;;  %v539_v22 = vor.u32 %v538_v21, %v535_v30  ;;  %v1565_v53 = vrot.slane %v542_v39, 5  ;;  %v549_v31 = vrot.slane %v547_v3, 4  ;;  %v84_v30 = vld [vmem:[%s1804_s2 + $0x34] sm:$0x1] }
  0x55   :  { %v1570_v59 = vrot.slane %v525_v9, 4  ;;  %v552_v52 = vrot.slane %v550_v6, 5  ;;  %v1572_v4 = vrot.slane %v556_v12, 5  ;;  %v563_v7 = vrot.slane %v561_v61, 4 }
  0x56   :  { %v1578_v29 = vrot.slane %v539_v22, 4  ;;  %v564_v21 = vshll.u32 %v1465_v50, 16  ;;  %v570_v3 = vshll.u32 %v80_v32, 16  ;;  %v575_v39 = vshrl.u32 %v1470_v11, 16 }
  0x57   :  { %v553_v61 = vor.u32 %v552_v52, %v549_v31  ;;  %v578_v9 = vshll.u32 %v1470_v11, 16  ;;  %v584_v22 = vshll.u32 %v82_v8, 16  ;;  %v589_v10 = vshrl.u32 %v1860_v15, 16  ;;  %v86_v31 = vld [vmem:[%s1804_s2 + $0x3c] sm:$0x1] }
  0x58   :  { %v566_v32 = vrot.slane %v564_v21, 5  ;;  %v1594_v12 = vrot.slane %v570_v3, 5  ;;  %v577_v60 = vrot.slane %v575_v39, 4  ;;  %v592_v49 = vshll.u32 %v1860_v15, 16  ;;  %v88_v39 = vld [vmem:[%s1804_s2 + $0x4c] sm:$0x1] }
  0x59   :  { %v1596_v24 = vrot.slane %v553_v61, 4  ;;  %v580_v17 = vrot.slane %v578_v9, 5  ;;  %v1602_v34 = vrot.slane %v584_v22, 5  ;;  %v598_v6 = vshll.u32 %v84_v30, 16 }
  0x5a   :  { %v567_v52 = vor.u32 %v566_v32, %v563_v7  ;;  %v591_v3 = vrot.slane %v589_v10, 4  ;;  %v603_v61 = vshrl.u32 %v1483_v20, 16  ;;  %v594_v7 = vrot.slane %v592_v49, 5  ;;  %v90_v10 = vld [vmem:[%s1804_s2 + $0x54] sm:$0x1] }
  0x5b   :  { %v581_v21 = vor.u32 %v580_v17, %v577_v60  ;;  %v600_v32 = vrot.slane %v598_v6, 5  ;;  %v606_v15 = vshll.u32 %v1483_v20, 16  ;;  %v612_v25 = vshll.u32 %v86_v31, 16 }
  0x5c   :  { %v1613_v9 = vrot.slane %v567_v52, 4  ;;  %v605_v22 = vrot.slane %v603_v61, 4  ;;  %v617_v8 = vshrl.u32 %v1861_v57, 16  ;;  %v595_v60 = vor.u32 %v594_v7, %v591_v3  ;;  %v92_v3 = vld [vmem:[%s1804_s2 + $0x5c] sm:$0x1] }
  0x5d   :  { %v1616_v30 = vrot.slane %v581_v21, 4  ;;  %v608_v49 = vrot.slane %v606_v15, 5  ;;  %v620_v6 = vshll.u32 %v1861_v57, 16  ;;  %v1631_v52 = vrot.slane %v612_v25, 5  ;;  %v94_v25 = vld [vmem:[%s1804_s2 + $0x64] sm:$0x1] }
  0x5e   :  { %v619_v21 = vrot.slane %v617_v8, 4  ;;  %v626_v61 = vshll.u32 %v88_v39, 16  ;;  %v596_v19 = vrot.slane %v595_v60, 4  ;;  %v631_v47 = vshrl.u32 %v1862_v28, 16 }
  0x5f   :  { %v609_v55 = vor.u32 %v608_v49, %v605_v22  ;;  %v622_v5 = vrot.slane %v620_v6, 5  ;;  %v634_v57 = vshll.u32 %v1862_v28, 16  ;;  %v640_v15 = vshll.u32 %v90_v10, 16 }
  0x60   :  { %v628_v7 = vrot.slane %v626_v61, 5  ;;  %v645_v17 = vshrl.u32 %v1488_v41, 16  ;;  %v601_v8 = vsel %vm1133_vm2, %v596_v19, %v600_v32  ;;  %v633_v60 = vrot.slane %v631_v47, 4 }
  0x61   :  { %v1644_v39 = vrot.slane %v609_v55, 4  ;;  %v623_v22 = vor.u32 %v622_v5, %v619_v21  ;;  %v1863_v49 = vmax.bf16 %v1202_v42, %v1210_v35  ;;  %v636_v28 = vrot.slane %v634_v57, 5  ;;  %v96_v35 = vld [vmem:[%s1804_s2 + $0x6c] sm:$0x1] }
  0x62   :  { %v642_v10 = vrot.slane %v640_v15, 5  ;;  %v647_v61 = vrot.slane %v645_v17, 4  ;;  %v648_v19 = vshll.u32 %v1488_v41, 16  ;;  %v654_v55 = vshll.u32 %v92_v3, 16 }
  0x63   :  { %v1649_v6 = vmax.bf16 %v601_v8, %v1863_v49  ;;  %v624_v40 = vrot.slane %v623_v22, 4  ;;  %v637_v32 = vor.u32 %v636_v28, %v633_v60  ;;  %v659_v47 = vshrl.u32 %v1493_v56, 16 }
  0x64   :  { %v662_v5 = vshll.u32 %v1493_v56, 16  ;;  %v668_v42 = vshll.u32 %v94_v25, 16  ;;  %v650_v21 = vrot.slane %v648_v19, 5  ;;  %v656_v57 = vrot.slane %v654_v55, 5  ;;  %v98_v25 = vld [vmem:[%s1804_s2 + $0x74] sm:$0x1] }
  0x65   :  { %1864 = vst [vmem:[#allocation6_spill] sm:$0xff] %v1649_v6  ;;  %v629_v17 = vsel %vm1133_vm2, %v624_v40, %v628_v7  ;;  %v673_v15 = vshrl.u32 %v1506_v46, 16  ;;  %v1865_v3 = vmax.bf16 %v1224_v14, %v1232_v62  ;;  %v638_v22 = vrot.slane %v637_v32, 4  ;;  %v100_v62 = vld [vmem:[%s1804_s2 + $0x7c] sm:$0x1] }
  0x66   :  { %v661_v60 = vrot.slane %v659_v47, 4  ;;  %v664_v49 = vrot.slane %v662_v5, 5  ;;  %v651_v28 = vor.u32 %v650_v21, %v647_v61  ;;  %v670_v31 = vrot.slane %v668_v42, 5 }
  0x67   :  { %v1667_v8 = vmax.bf16 %v629_v17, %v1865_v3  ;;  %v675_v6 = vrot.slane %v673_v15, 4  ;;  %v676_v40 = vshll.u32 %v1506_v46, 16  ;;  %v643_v7 = vsel %vm1133_vm2, %v638_v22, %v642_v10 }
  0x68   :  { %v665_v19 = vor.u32 %v664_v49, %v661_v60  ;;  %v682_v55 = vshll.u32 %v96_v35, 16  ;;  %v687_v14 = vshrl.u32 %v1511_v0, 16  ;;  %v1866_v32 = vmax.bf16 %v1239_v48, %v1249_v63  ;;  %v102_v35 = vld [vmem:[%s1804_s2 + $0x84] sm:$0x1] }
  0x69   :  { %v652_v61 = vrot.slane %v651_v28, 4  ;;  %v678_v5 = vrot.slane %v676_v40, 5  ;;  %v690_v42 = vshll.u32 %v1511_v0, 16  ;;  %v696_v10 = vshll.u32 %v98_v25, 16 }
  0x6a   :  { %v753_v47 = vmax.bf16 %v643_v7, %v1866_v32  ;;  %v666_v17 = vrot.slane %v665_v19, 4  ;;  %v684_v21 = vrot.slane %v682_v55, 5  ;;  %v689_v15 = vrot.slane %v687_v14, 4 }
  0x6b   :  { %v657_v3 = vsel %vm1133_vm2, %v652_v61, %v656_v57  ;;  %v679_v22 = vor.u32 %v678_v5, %v675_v6  ;;  %v692_v60 = vrot.slane %v690_v42, 5  ;;  %v701_v48 = vshrl.u32 %v1516_v54, 16 }
  0x6c   :  { %v671_v63 = vsel %vm1133_vm2, %v666_v17, %v670_v31  ;;  %v698_v49 = vrot.slane %v696_v10, 5  ;;  %v704_v28 = vshll.u32 %v1516_v54, 16  ;;  %v710_v40 = vshll.u32 %v100_v62, 16 }
  0x6d   :  { %v680_v7 = vrot.slane %v679_v22, 4  ;;  %v693_v25 = vor.u32 %v692_v60, %v689_v15  ;;  %v703_v19 = vrot.slane %v701_v48, 4  ;;  %v715_v55 = vshrl.u32 %v1529_v18, 16 }
  0x6e   :  { %v706_v14 = vrot.slane %v704_v28, 5  ;;  %v712_v32 = vrot.slane %v710_v40, 5  ;;  %v718_v57 = vshll.u32 %v1529_v18, 16  ;;  %v724_v6 = vshll.u32 %v102_v35, 16  ;;  %v1886_v28 = vld [vmem:[#allocation5_spill] sm:$0xff] }
  0x6f   :  { %v685_v61 = vsel %vm1133_vm2, %v680_v7, %v684_v21  ;;  %v694_v5 = vrot.slane %v693_v25, 4  ;;  %v717_v42 = vrot.slane %v715_v55, 4  ;;  %v1867_v31 = vmax.bf16 %v1417_v33, %v1424_v36 }
  0x70   :  { %v1868_v62 = vsel %vm1133_vm2, %v1563_v2, %v1552_v13  ;;  %v707_v15 = vor.u32 %v706_v14, %v703_v19  ;;  %v720_v10 = vrot.slane %v718_v57, 5  ;;  %v726_v22 = vrot.slane %v724_v6, 5 }
  0x71   :  { %v744_v17 = vmax.bf16 %v1868_v62, %v1867_v31  ;;  %v1869_v35 = vmax.bf16 %v1419_v26, %v1438_v44  ;;  %v1870_v21 = vsel %vm1133_vm2, %v1570_v59, %v1555_v45  ;;  %v699_v33 = vsel %vm1133_vm2, %v694_v5, %v698_v49  ;;  %v1884_v49 = vld [vmem:[#allocation9_spill] sm:$0xff] }
  0x72   :  { %v1871_v36 = vmax.bf16 %v1426_v27, %v1443_v58  ;;  %v1872_v13 = vsel %vm1133_vm2, %v1578_v29, %v1565_v53  ;;  %v1873_v26 = vmax.bf16 %v1428_v37, %v1460_v51  ;;  %v1874_v44 = vsel %vm1133_vm2, %v1596_v24, %v1572_v4 }
  0x73   :  { %v745_v60 = vmax.bf16 %v1870_v21, %v1869_v35  ;;  %v1875_v59 = vmax.bf16 %v1430_v43, %v1465_v50  ;;  %v1876_v27 = vsel %vm1133_vm2, %v1613_v9, %v1594_v12  ;;  %v708_v53 = vrot.slane %v707_v15, 4 }
  0x74   :  { %v746_v2 = vmax.bf16 %v1872_v13, %v1871_v36  ;;  %v747_v45 = vmax.bf16 %v1874_v44, %v1873_v26  ;;  %v721_v29 = vor.u32 %v720_v10, %v717_v42  ;;  %v1877_v37 = vmax.bf16 %v1446_v38, %v1470_v11  ;;  %v1882_v38 = vld [vmem:[#allocation2_spill] sm:$0xff] }
  0x75   :  { %v748_v58 = vmax.bf16 %v1876_v27, %v1875_v59  ;;  %v1878_v51 = vsel %vm1133_vm2, %v1616_v30, %v1602_v34  ;;  %v1879_v43 = vmax.bf16 %v1448_v23, %v1483_v20  ;;  %v1880_v50 = vsel %vm1133_vm2, %v1644_v39, %v1631_v52 }
  0x76   :  { %v749_v24 = vmax.bf16 %v1878_v51, %v1877_v37  ;;  %v1881_v12 = vmax.bf16 %v1450_v1, %v1488_v41  ;;  %v1883_v11 = vmax.bf16 %v1882_v38, %v1493_v56  ;;  %v1885_v34 = vmax.bf16 %v1884_v49, %v1506_v46  ;;  %v1888_v1 = vld [vmem:[#allocation4_spill] sm:$0xff] }
  0x77   :  { %v751_v4 = vmax.bf16 %v1880_v50, %v1879_v43  ;;  %v1887_v23 = vmax.bf16 %v1886_v28, %v1511_v0  ;;  %v713_v52 = vsel %vm1133_vm2, %v708_v53, %v712_v32  ;;  %v722_v39 = vrot.slane %v721_v29, 4 }
  0x78   :  { %v754_v9 = vmax.bf16 %v657_v3, %v1881_v12  ;;  %v755_v48 = vmax.bf16 %v671_v63, %v1883_v11  ;;  %v756_v30 = vmax.bf16 %v685_v61, %v1885_v34  ;;  %v820_v40 = vcombine.low %v744_v17, %v745_v60  ;;  %v1890_v63 = vld [vmem:[#allocation6_spill] sm:$0xff] }
  0x79   :  { %v757_v20 = vmax.bf16 %v699_v33, %v1887_v23  ;;  %v821_v7 = vcombine.low %v746_v2, %v747_v45  ;;  %v1889_v41 = vmax.bf16 %v1888_v1, %v1516_v54  ;;  %v823_v56 = vcombine.low %v748_v58, %v749_v24  ;;  %v1891_v54 = vld [vmem:[#allocation3_spill] sm:$0xff] }
  0x7a   :  { %v825_v25 = vcombine.low %v1890_v63, %v751_v4  ;;  %v827_v46 = vcombine.low %v1667_v8, %v753_v47  ;;  %v727_v19 = vsel %vm1133_vm2, %v722_v39, %v726_v22  ;;  %784 = vst [vmem:[%s1806_s4] sm:$0xff] %v820_v40   ;;  %v829_v0 = vcombine.low %v754_v9, %v755_v48 }
  0x7b   :  { %v758_v3 = vmax.bf16 %v713_v52, %v1889_v41  ;;  %822 = vst [vmem:[%s1806_s4 + $0x8] sm:$0xff] %v821_v7   ;;  %v831_v55 = vcombine.low %v756_v30, %v757_v20  ;;  %v1892_v14 = vmax.bf16 %v1891_v54, %v1529_v18  ;;  %824 = vst [vmem:[%s1806_s4 + $0x10] sm:$0xff] %v823_v56  }
  0x7c   :  { %826 = vst [vmem:[%s1806_s4 + $0x18] sm:$0xff] %v825_v25   ;;  %828 = vst [vmem:[%s1806_s4 + $0x20] sm:$0xff] %v827_v46  }
  0x7d   :  { %v759_v32 = vmax.bf16 %v727_v19, %v1892_v14  ;;  %830 = vst [vmem:[%s1806_s4 + $0x28] sm:$0xff] %v829_v0   ;;  %832 = vst [vmem:[%s1806_s4 + $0x30] sm:$0xff] %v831_v55  }
  0x7f   :  { %v833_v16 = vcombine.low %v758_v3, %v759_v32 }
  0x81   :  { %834 = vst [vmem:[%s1806_s4 + $0x38] sm:$0xff] %v833_v16  }

// kernel: _lambda_.26
= control target key start
LH: loop header
LB: loop body
LE: loop exit
PB: predicated region body
PF: predicated region fallthrough
CT: control target
= control target key end

     0   :  { %s2077_s12 = smov 0   ;;  %s2079_s13 = smov 0   ;;  %s2374_s0 = inlined_call_operand.vmem [shape: bf16[128,1152], index: 0, kind: input, shape index: {}]   ;;  %s2375_s1 = inlined_call_operand.vmem [shape: bf16[1152,128], index: 1, kind: input, shape index: {}]   ;;  %s2376_s2 = inlined_call_operand.vmem [shape: f32[1,128], index: 2, kind: input, shape index: {}]   ;;  %s2377_s3 = inlined_call_operand.vmem [shape: bf16[128,128], index: 3, kind: output, shape index: {}]  }
   0x1   :  { %s2081_s14 = smov 0  }
   0x2 LB: > { %s25_s15 = sadd.s32 1, %s2051_s13  ;;  %p1517_p0 = scmp.ge.s32.totalorder %s2055_s14, 1  ;;  %s2055_s14 = sphi %s2081_s14, %s13_s14   ;;  %s2051_s13 = sphi %s2079_s13, %s2379_s13   ;;  %s2047_s12 = sphi %s2077_s12, %s2378_s12  }
   0x3   : > { %p27_p1 = scmp.ge.s32.totalorder %s25_s15, 2  ;;  %p170_p2 = scmp.lt.s32.totalorder %s2055_s14, 3 }
   0x5   : > { %s2381_s15 = smov (%p27_p1, %s25_s15), 0  ;;  %p171_p3 = pnand %p1517_p0, %p170_p2 }
   0x6   : > { %v1909_v0 = vld [vmem:[%s2375_s1 + $0x40] sm:$0xff] (!%p171_p3)   ;;  %v1913_v4 = vld [vmem:[%s2375_s1 + $0x48] sm:$0xff] (!%p171_p3)   ;;  %v1917_v8 = vld [vmem:[%s2375_s1 + $0x50] sm:$0xff] (!%p171_p3)   ;;  %s1518_s23 = sshll.u32 (!%p171_p3), %s2047_s12, 3 }
   0x7   : > { %174 = sbr.rel (%p171_p3) target bundleno = 328 (0x148), region = 32  ;;  %v1910_v1 = vld [vmem:[%s2375_s1 + $0xc0] sm:$0xff] (!%p171_p3)   ;;  %1672 = vmatprep.subr.bf16.mxu0 (!%p171_p3), %v1909_v0  ;;  %v1914_v5 = vld [vmem:[%s2375_s1 + $0xc8] sm:$0xff] (!%p171_p3)   ;;  %v1918_v9 = vld [vmem:[%s2375_s1 + $0xd0] sm:$0xff] (!%p171_p3)   ;;  %p206_p4 = scmp.lt.s32.totalorder (!%p171_p3), %s1518_s23, 15 }
   0x8   : > { %v1911_v2 = vld [vmem:[%s2375_s1] sm:$0xff] (!%p171_p3)   ;;  %1712 = vmatprep.subr.bf16.mxu1 (!%p171_p3), %v1910_v1  ;;  %v1915_v6 = vld [vmem:[%s2375_s1 + $0x8] sm:$0xff] (!%p171_p3)   ;;  %v1919_v10 = vld [vmem:[%s2375_s1 + $0x10] sm:$0xff] (!%p171_p3)  }
   0x9   : > { %v1912_v3 = vld [vmem:[%s2375_s1 + $0x80] sm:$0xff] (!%p171_p3)   ;;  %1673 = vmatpush3.bf16.msra.mxu0 (!%p171_p3), %v1911_v2  ;;  %v1916_v7 = vld [vmem:[%s2375_s1 + $0x88] sm:$0xff] (!%p171_p3)   ;;  %v1920_v11 = vld [vmem:[%s2375_s1 + $0x90] sm:$0xff] (!%p171_p3)  }
   0xa   : > { %1713 = vmatpush3.bf16.msra.mxu1 (!%p171_p3), %v1912_v3  ;;  %1674 = vmatprep.subr.bf16.mxu0 (!%p171_p3), %v1913_v4  ;;  %v1921_v12 = vld [vmem:[%s2375_s1 + $0x58] sm:$0xff] (!%p171_p3)   ;;  %v1925_v16 = vld [vmem:[%s2375_s1 + $0x60] sm:$0xff] (!%p171_p3)   ;;  %v1929_v20 = vld [vmem:[%s2375_s1 + $0x68] sm:$0xff] (!%p171_p3)  }
   0xb   : > { %1714 = vmatprep.subr.bf16.mxu1 (!%p171_p3), %v1914_v5  ;;  %v1922_v13 = vld [vmem:[%s2375_s1 + $0xd8] sm:$0xff] (!%p171_p3)   ;;  %v1926_v17 = vld [vmem:[%s2375_s1 + $0xe0] sm:$0xff] (!%p171_p3)   ;;  %v1930_v21 = vld [vmem:[%s2375_s1 + $0xe8] sm:$0xff] (!%p171_p3)  }
   0xc   : > { %v1923_v14 = vld [vmem:[%s2375_s1 + $0x18] sm:$0xff] (!%p171_p3)   ;;  %v1927_v18 = vld [vmem:[%s2375_s1 + $0x20] sm:$0xff] (!%p171_p3)   ;;  %v1931_v22 = vld [vmem:[%s2375_s1 + $0x28] sm:$0xff] (!%p171_p3)  }
   0xd   : > { %1675 = vmatpush3.bf16.msra.mxu0 (!%p171_p3), %v1915_v6  ;;  %v1924_v15 = vld [vmem:[%s2375_s1 + $0x98] sm:$0xff] (!%p171_p3)   ;;  %v1928_v19 = vld [vmem:[%s2375_s1 + $0xa0] sm:$0xff] (!%p171_p3)   ;;  %v1932_v23 = vld [vmem:[%s2375_s1 + $0xa8] sm:$0xff] (!%p171_p3)  }
   0xe   : > { %1715 = vmatpush3.bf16.msra.mxu1 %v1916_v7  ;;  %1676 = vmatprep.subr.bf16.mxu0 %v1917_v8  ;;  %s2383_s23 = smov (!%p206_p4, %s1518_s23), 15  ;;  %v1933_v24 = vld [vmem:[%s2375_s1 + $0x70] sm:$0xff]   ;;  %v1937_v28 = vld [vmem:[%s2375_s1 + $0x78] sm:$0xff]   ;;  %v1947_v36 = vld [vmem:[%s2375_s1 + $0x140] sm:$0xff]  }
   0xf   : > { %1716 = vmatprep.subr.bf16.mxu1 %v1918_v9  ;;  %v1934_v25 = vld [vmem:[%s2375_s1 + $0xf0] sm:$0xff]   ;;  %s1884_s22 = smul.u32 36, %s2383_s23  ;;  %v1938_v29 = vld [vmem:[%s2375_s1 + $0xf8] sm:$0xff]   ;;  %v1948_v37 = vld [vmem:[%s2375_s1 + $0x1c0] sm:$0xff]  }
  0x10   : > { %v1935_v26 = vld [vmem:[%s2375_s1 + $0x30] sm:$0xff]   ;;  %v1939_v30 = vld [vmem:[%s2375_s1 + $0x38] sm:$0xff]   ;;  %v1949_v38 = vld [vmem:[%s2375_s1 + $0x100] sm:$0xff]  }
  0x11   : > { %1677 = vmatpush3.bf16.msra.mxu0 %v1919_v10  ;;  %v1936_v27 = vld [vmem:[%s2375_s1 + $0xb0] sm:$0xff]   ;;  %s2194_s6 = scalar_lea.vmem %s2374_s0, %s1884_s22  ;;  %v1940_v31 = vld [vmem:[%s2375_s1 + $0xb8] sm:$0xff]   ;;  %v1950_v39 = vld [vmem:[%s2375_s1 + $0x180] sm:$0xff]  }
  0x12   : > { %1717 = vmatpush3.bf16.msra.mxu1 %v1920_v11  ;;  %1678 = vmatprep.subr.bf16.mxu0 %v1921_v12  ;;  %v1941_v32 = vld [vmem:[%s2194_s6] ss:$36 sps:$4 sm:$0xff]   ;;  %v1944_v34 = vld [vmem:[%s2194_s6 + $0x8] ss:$36 sps:$4 sm:$0xff]   ;;  %v1957_v45 = vld [vmem:[%s2194_s6 + $0x54] ss:$36 sps:$4 sm:$0xff]  }
  0x13   : > { %1718 = vmatprep.subr.bf16.mxu1 %v1922_v13  ;;  %v1943_v33 = vld [vmem:[%s2194_s6 + $0x4] ss:$36 sps:$4 sm:$0xff]   ;;  %v1946_v35 = vld [vmem:[%s2194_s6 + $0xc] ss:$36 sps:$4 sm:$0xff]   ;;  %v1965_v52 = vld [vmem:[%s2375_s1 + $0x158] sm:$0xff]  }
  0x14   : > { %1068 = vmatprep.mubr.bf16.mxu0 %v1943_v33  ;;  %1133 = vmatprep.mubr.bf16.mxu1 %v1946_v35  ;;  %v1951_v40 = vld [vmem:[%s2375_s1 + $0x148] sm:$0xff]   ;;  %v1960_v47 = vld [vmem:[%s2194_s6 + $0x50] ss:$36 sps:$4 sm:$0xff]   ;;  %v1966_v53 = vld [vmem:[%s2375_s1 + $0x1d8] sm:$0xff]  }
  0x15   : > { %1679 = vmatpush3.bf16.msra.mxu0 %v1923_v14  ;;  %v1952_v41 = vld [vmem:[%s2375_s1 + $0x1c8] sm:$0xff]   ;;  %v1961_v48 = vld [vmem:[%s2375_s1 + $0x150] sm:$0xff]   ;;  %v1967_v54 = vld [vmem:[%s2375_s1 + $0x118] sm:$0xff]  }
  0x16   : > { %1719 = vmatpush3.bf16.msra.mxu1 %v1924_v15  ;;  %1680 = vmatprep.subr.bf16.mxu0 %v1925_v16  ;;  %v1953_v42 = vld [vmem:[%s2375_s1 + $0x108] sm:$0xff]   ;;  %v1962_v49 = vld [vmem:[%s2375_s1 + $0x1d0] sm:$0xff]   ;;  %v1968_v55 = vld [vmem:[%s2375_s1 + $0x198] sm:$0xff]  }
  0x17   : > { %1720 = vmatprep.subr.bf16.mxu1 %v1926_v17  ;;  %v1954_v43 = vld [vmem:[%s2375_s1 + $0x188] sm:$0xff]   ;;  %v1963_v50 = vld [vmem:[%s2375_s1 + $0x110] sm:$0xff]   ;;  %v1971_v57 = vld [vmem:[%s2194_s6 + $0x9c] ss:$36 sps:$4 sm:$0xff]  }
  0x18   : > { %v1955_v44 = vld [vmem:[%s2194_s6 + $0x4c] ss:$36 sps:$4 sm:$0xff]   ;;  %v1969_v56 = vld [vmem:[%s2194_s6 + $0x94] ss:$36 sps:$4 sm:$0xff]   ;;  %v1975_v60 = vld [vmem:[%s2375_s1 + $0x160] sm:$0xff]  }
  0x19   : > { %1681 = vmatpush3.bf16.msra.mxu0 %v1927_v18  ;;  %v1959_v46 = vld [vmem:[%s2194_s6 + $0x48] ss:$36 sps:$4 sm:$0xff]   ;;  %v1964_v51 = vld [vmem:[%s2375_s1 + $0x190] sm:$0xff]   ;;  %v1974_v59 = vld [vmem:[%s2194_s6 + $0x98] ss:$36 sps:$4 sm:$0xff]  }
  0x1a   : > { %1721 = vmatpush3.bf16.msra.mxu1 %v1928_v19  ;;  %1682 = vmatprep.subr.bf16.mxu0 %v1929_v20  ;;  %v1973_v58 = vld [vmem:[%s2194_s6 + $0x90] ss:$36 sps:$4 sm:$0xff]   ;;  %v1976_v61 = vld [vmem:[%s2375_s1 + $0x1e0] sm:$0xff]   ;;  %v1979_v0 = vld [vmem:[%s2375_s1 + $0x168] sm:$0xff]  }
  0x1b   : > { %1722 = vmatprep.subr.bf16.mxu1 %v1930_v21  ;;  %v1977_v62 = vld [vmem:[%s2375_s1 + $0x120] sm:$0xff]   ;;  %v1980_v1 = vld [vmem:[%s2375_s1 + $0x1e8] sm:$0xff]   ;;  %v1987_v6 = vld [vmem:[%s2194_s6 + $0xd8] ss:$36 sps:$4 sm:$0xff]  }
  0x1c   : > { %v1978_v63 = vld [vmem:[%s2375_s1 + $0x1a0] sm:$0xff]   ;;  %v1981_v2 = vld [vmem:[%s2375_s1 + $0x128] sm:$0xff]   ;;  %v1989_v8 = vld [vmem:[%s2375_s1 + $0x170] sm:$0xff]  }
  0x1d   : > { %1683 = vmatpush3.bf16.msra.mxu0 %v1931_v22  ;;  %v1982_v3 = vld [vmem:[%s2375_s1 + $0x1a8] sm:$0xff]   ;;  %v1983_v4 = vld [vmem:[%s2194_s6 + $0xdc] ss:$36 sps:$4 sm:$0xff]   ;;  %v1990_v9 = vld [vmem:[%s2375_s1 + $0x1f0] sm:$0xff]  }
  0x1e   : > { %1723 = vmatpush3.bf16.msra.mxu1 %v1932_v23  ;;  %1684 = vmatprep.subr.bf16.mxu0 %v1933_v24  ;;  %v1985_v5 = vld [vmem:[%s2194_s6 + $0xe4] ss:$36 sps:$4 sm:$0xff]   ;;  %v1991_v10 = vld [vmem:[%s2375_s1 + $0x130] sm:$0xff]   ;;  %v1993_v12 = vld [vmem:[%s2375_s1 + $0x178] sm:$0xff]  }
  0x1f   : > { %1724 = vmatprep.subr.bf16.mxu1 %v1934_v25  ;;  %v1988_v7 = vld [vmem:[%s2194_s6 + $0xe0] ss:$36 sps:$4 sm:$0xff]   ;;  %v1992_v11 = vld [vmem:[%s2375_s1 + $0x1b0] sm:$0xff]   ;;  %v1994_v13 = vld [vmem:[%s2375_s1 + $0x1f8] sm:$0xff]  }
  0x20   : > { %v1995_v14 = vld [vmem:[%s2375_s1 + $0x138] sm:$0xff]   ;;  %v1997_v16 = vld [vmem:[%s2194_s6 + $0x10] ss:$36 sps:$4 sm:$0xff]   ;;  %v2003_v20 = vld [vmem:[%s2375_s1 + $0x200] sm:$0xff]  }
  0x21   : > { %1685 = vmatpush3.bf16.msra.mxu0 %v1935_v26  ;;  %v1996_v15 = vld [vmem:[%s2375_s1 + $0x1b8] sm:$0xff]   ;;  %v2004_v21 = vld [vmem:[%s2375_s1 + $0x208] sm:$0xff]   ;;  %v2010_v25 = vld [vmem:[%s2194_s6 + $0x60] ss:$36 sps:$4 sm:$0xff]  }
  0x22   : > { %1725 = vmatpush3.bf16.msra.mxu1 %v1936_v27  ;;  %1686 = vmatprep.subr.bf16.mxu0 %v1937_v28  ;;  %v1999_v17 = vld [vmem:[%s2194_s6 + $0x14] ss:$36 sps:$4 sm:$0xff]   ;;  %v2002_v19 = vld [vmem:[%s2194_s6 + $0x1c] ss:$36 sps:$4 sm:$0xff]   ;;  %v2007_v23 = vld [vmem:[%s2194_s6 + $0x64] ss:$36 sps:$4 sm:$0xff]  }
  0x23   : > { %1726 = vmatprep.subr.bf16.mxu1 %v1938_v29  ;;  %v2000_v18 = vld [vmem:[%s2194_s6 + $0x18] ss:$36 sps:$4 sm:$0xff]   ;;  %v2011_v26 = vld [vmem:[%s2375_s1 + $0x210] sm:$0xff]   ;;  %v2013_v27 = vld [vmem:[%s2194_s6 + $0xa4] ss:$36 sps:$4 sm:$0xff]  }
  0x24   : > { %v2005_v22 = vld [vmem:[%s2194_s6 + $0x5c] ss:$36 sps:$4 sm:$0xff]   ;;  %v2015_v28 = vld [vmem:[%s2194_s6 + $0xac] ss:$36 sps:$4 sm:$0xff]  }
  0x25   : > { %1687 = vmatpush3.bf16.msra.mxu0 %v1939_v30  ;;  %v2009_v24 = vld [vmem:[%s2194_s6 + $0x58] ss:$36 sps:$4 sm:$0xff]   ;;  %v2017_v30 = vld [vmem:[%s2194_s6 + $0xa0] ss:$36 sps:$4 sm:$0xff]   ;;  %v2021_v33 = vld [vmem:[%s2194_s6 + $0xec] ss:$36 sps:$4 sm:$0xff]  }
  0x26   : > { %1727 = vmatpush3.bf16.msra.mxu1 %v1940_v31  ;;  %1752 = vmatprep.subr.bf16.mxu0 %v1947_v36  ;;  %v2012_v29 = vld [vmem:[%s2375_s1 + $0x218] sm:$0xff]   ;;  %v2018_v31 = vld [vmem:[%s2194_s6 + $0xa8] ss:$36 sps:$4 sm:$0xff]  }
  0x27   : > { %1792 = vmatprep.subr.bf16.mxu1 %v1948_v37  ;;  %v2020_v35 = vld [vmem:[%s2375_s1 + $0x228] sm:$0xff]   ;;  %v2027_v37 = vld [vmem:[%s2375_s1 + $0x230] sm:$0xff]  }
  0x28   : > { %1069 = vmatmul.mubr.bf16.vlgmr.msra.gmra.mrb[0].mxu0 %v1941_v32  ;;  %v2019_v32 = vld [vmem:[%s2375_s1 + $0x220] sm:$0xff]   ;;  %v2025_v36 = vld [vmem:[%s2194_s6 + $0xe8] ss:$36 sps:$4 sm:$0xff]  }
  0x29   : > { %1134 = vmatmul.mubr.bf16.vlgmr.msra.gmra.mrb[0].mxu1 %v1944_v34  ;;  %1753 = vmatpush3.bf16.msra.mxu0 %v1949_v38  ;;  %v2023_v34 = vld [vmem:[%s2194_s6 + $0xf4] ss:$36 sps:$4 sm:$0xff]  }
  0x2a   : > { %1793 = vmatpush3.bf16.msra.mxu1 %v1950_v39  ;;  %1754 = vmatprep.subr.bf16.mxu0 %v1951_v40  ;;  %v2026_v38 = vld [vmem:[%s2194_s6 + $0xf0] ss:$36 sps:$4 sm:$0xff]   ;;  %v2029_v39 = vld [vmem:[%s2194_s6 + $0x20] ss:$36 sps:$4 sm:$0xff]  }
  0x2b   : > { %1794 = vmatprep.subr.bf16.mxu1 %v1952_v41  ;;  %1076 = vmatprep.mubr.bf16.mxu0 %v1955_v44  ;;  %v2030_v40 = vld [vmem:[%s2194_s6 + $0xb0] ss:$36 sps:$4 sm:$0xff]   ;;  %v2028_v41 = vld [vmem:[%s2375_s1 + $0x238] sm:$0xff]  }
  0x2c   : > { %1141 = vmatprep.mubr.bf16.mxu1 %v1957_v45 }
  0x2d   : > { %1755 = vmatpush3.bf16.msra.mxu0 %v1953_v42  ;;  %v2031_v42 = vld [vmem:[%s2194_s6 + $0x68] ss:$36 sps:$4 sm:$0xff]  }
  0x2e   : > { %1795 = vmatpush3.bf16.msra.mxu1 %v1954_v43  ;;  %1756 = vmatprep.subr.bf16.mxu0 %v1961_v48  ;;  %v2032_v43 = vld [vmem:[%s2194_s6 + $0xf8] ss:$36 sps:$4 sm:$0xff]   ;;  %s1521_s6 = sshll.u32 %s2383_s23, 2 }
  0x2f   : > { %1796 = vmatprep.subr.bf16.mxu1 %v1962_v49  ;;  %s226_s7 = scalar_lea.vmem %s2377_s3, %s1521_s6 }
  0x30   : > { %1077 = vmatmul.mubr.bf16.gmra.mrb[4].mxu0 %v1959_v46  ;;  %v1522_v46 = vld [vmem:[%s2376_s2] ss:$0 sm:$0xff] }
  0x31   : > { %1142 = vmatmul.mubr.bf16.gmra.mrb[4].mxu1 %v1960_v47  ;;  %1757 = vmatpush3.bf16.msra.mxu0 %v1963_v50 }
  0x32   : > { %1797 = vmatpush3.bf16.msra.mxu1 %v1964_v51  ;;  %1758 = vmatprep.subr.bf16.mxu0 %v1965_v52 }
  0x33   : > { %1798 = vmatprep.subr.bf16.mxu1 %v1966_v53  ;;  %1084 = vmatprep.mubr.bf16.mxu0 %v1969_v56 }
  0x34   : > { %1149 = vmatprep.mubr.bf16.mxu1 %v1971_v57 }
  0x35   : > { %1759 = vmatpush3.bf16.msra.mxu0 %v1967_v54 }
  0x36   : > { %1799 = vmatpush3.bf16.msra.mxu1 %v1968_v55  ;;  %1760 = vmatprep.subr.bf16.mxu0 %v1975_v60 }
  0x37   : > { %1800 = vmatprep.subr.bf16.mxu1 %v1976_v61 }
  0x38   : > { %1085 = vmatmul.mubr.bf16.gmra.mrb[8].mxu0 %v1973_v58 }
  0x39   : > { %1150 = vmatmul.mubr.bf16.gmra.mrb[8].mxu1 %v1974_v59  ;;  %1761 = vmatpush3.bf16.msra.mxu0 %v1977_v62 }
  0x3a   : > { %1801 = vmatpush3.bf16.msra.mxu1 %v1978_v63  ;;  %1762 = vmatprep.subr.bf16.mxu0 %v1979_v0 }
  0x3b   : > { %1802 = vmatprep.subr.bf16.mxu1 %v1980_v1  ;;  %1092 = vmatprep.mubr.bf16.mxu0 %v1983_v4 }
  0x3c   : > { %1157 = vmatprep.mubr.bf16.mxu1 %v1985_v5 }
  0x3d   : > { %1763 = vmatpush3.bf16.msra.mxu0 %v1981_v2 }
  0x3e   : > { %1803 = vmatpush3.bf16.msra.mxu1 %v1982_v3  ;;  %1764 = vmatprep.subr.bf16.mxu0 %v1989_v8 }
  0x3f   : > { %1804 = vmatprep.subr.bf16.mxu1 %v1990_v9 }
  0x40   : > { %1093 = vmatmul.mubr.bf16.gmra.mrb[12].mxu0 %v1987_v6 }
  0x41   : > { %1158 = vmatmul.mubr.bf16.gmra.mrb[12].mxu1 %v1988_v7  ;;  %1765 = vmatpush3.bf16.msra.mxu0 %v1991_v10 }
  0x42   : > { %1805 = vmatpush3.bf16.msra.mxu1 %v1992_v11  ;;  %1766 = vmatprep.subr.bf16.mxu0 %v1993_v12 }
  0x43   : > { %1806 = vmatprep.subr.bf16.mxu1 %v1994_v13  ;;  %1198 = vmatprep.mubr.bf16.mxu0 %v1999_v17 }
  0x44   : > { %1263 = vmatprep.mubr.bf16.mxu1 %v2002_v19 }
  0x45   : > { %1767 = vmatpush3.bf16.msra.mxu0 %v1995_v14 }
  0x46   : > { %1807 = vmatpush3.bf16.msra.mxu1 %v1996_v15  ;;  %1844 = vmatprep.subr.bf16.mxu0 %v2003_v20 }
  0x47   : > { %1868 = vmatprep.subr.bf16.mxu1 %v2003_v20 }
  0x48   : > { %1199 = vmatmul.mubr.bf16.vlgmr.msra.gmra.mrb[16].mxu0 %v1997_v16 }
  0x49   : > { %1264 = vmatmul.mubr.bf16.vlgmr.msra.gmra.mrb[16].mxu1 %v2000_v18  ;;  %1845 = vmatpush3.bf16.msra.mxu0 %v2003_v20 }
  0x4a   : > { %1876 = vmatpush3.bf16.msra.mxu1 %v2003_v20  ;;  %1846 = vmatprep.subr.bf16.mxu0 %v2004_v21 }
  0x4b   : > { %1869 = vmatprep.subr.bf16.mxu1 %v2004_v21  ;;  %1206 = vmatprep.mubr.bf16.mxu0 %v2005_v22 }
  0x4c   : > { %1271 = vmatprep.mubr.bf16.mxu1 %v2007_v23 }
  0x4d   : > { %1847 = vmatpush3.bf16.msra.mxu0 %v2004_v21 }
  0x4e   : > { %1877 = vmatpush3.bf16.msra.mxu1 %v2004_v21  ;;  %1848 = vmatprep.subr.bf16.mxu0 %v2011_v26 }
  0x4f   : > { %1870 = vmatprep.subr.bf16.mxu1 %v2011_v26 }
  0x50   : > { %1207 = vmatmul.mubr.bf16.gmra.mrb[20].mxu0 %v2009_v24 }
  0x51   : > { %1272 = vmatmul.mubr.bf16.gmra.mrb[20].mxu1 %v2010_v25  ;;  %1214 = vmatprep.mubr.bf16.mxu0 %v2013_v27 }
  0x52   : > { %1849 = vmatpush3.bf16.msra.mxu0 %v2011_v26  ;;  %1279 = vmatprep.mubr.bf16.mxu1 %v2015_v28 }
  0x53   : > { %1878 = vmatpush3.bf16.msra.mxu1 %v2011_v26  ;;  %1850 = vmatprep.subr.bf16.mxu0 %v2012_v29 }
  0x54   : > { %1871 = vmatprep.subr.bf16.mxu1 %v2012_v29 }
  0x56   : > { %1851 = vmatpush3.bf16.msra.mxu0 %v2012_v29 }
  0x57   : > { %1879 = vmatpush3.bf16.msra.mxu1 %v2012_v29  ;;  %1852 = vmatprep.subr.bf16.mxu0 %v2019_v32 }
  0x58   : > { %1215 = vmatmul.mubr.bf16.gmra.mrb[24].mxu0 %v2017_v30  ;;  %1872 = vmatprep.subr.bf16.mxu1 %v2019_v32 }
  0x59   : > { %1280 = vmatmul.mubr.bf16.gmra.mrb[24].mxu1 %v2018_v31  ;;  %1222 = vmatprep.mubr.bf16.mxu0 %v2021_v33 }
  0x5a   : > { %1853 = vmatpush3.bf16.msra.mxu0 %v2019_v32  ;;  %1287 = vmatprep.mubr.bf16.mxu1 %v2023_v34 }
  0x5b   : > { %1880 = vmatpush3.bf16.msra.mxu1 %v2019_v32  ;;  %1854 = vmatprep.subr.bf16.mxu0 %v2020_v35 }
  0x5c   : > { %1873 = vmatprep.subr.bf16.mxu1 %v2020_v35 }
  0x5e   : > { %1855 = vmatpush3.bf16.msra.mxu0 %v2020_v35 }
  0x5f   : > { %1881 = vmatpush3.bf16.msra.mxu1 %v2020_v35  ;;  %1856 = vmatprep.subr.bf16.mxu0 %v2027_v37 }
  0x60   : > { %1223 = vmatmul.mubr.bf16.gmra.mrb[28].mxu0 %v2025_v36  ;;  %1874 = vmatprep.subr.bf16.mxu1 %v2027_v37 }
  0x61   : > { %1288 = vmatmul.mubr.bf16.gmra.mrb[28].mxu1 %v2026_v38  ;;  %1860 = vmatprep.mubr.bf16.mxu0 %v2029_v39 }
  0x62   : > { %1857 = vmatpush3.bf16.msra.mxu0 %v2027_v37  ;;  %1864 = vmatprep.mubr.bf16.mxu1 %v2030_v40 }
  0x63   : > { %1882 = vmatpush3.bf16.msra.mxu1 %v2027_v37  ;;  %1858 = vmatprep.subr.bf16.mxu0 %v2028_v41 }
  0x64   : > { %1875 = vmatprep.subr.bf16.mxu1 %v2028_v41 }
  0x66   : > { %1859 = vmatpush3.bf16.msra.mxu0 %v2028_v41 }
  0x67   : > { %1883 = vmatpush3.bf16.msra.mxu1 %v2028_v41 }
  0x69   : > { %1861 = vmatmul.mubr.bf16.vlgmr.msra.gmra.mrb[32].mxu0 %v2031_v42 }
  0x6a   : > { %1865 = vmatmul.mubr.bf16.vlgmr.msra.gmra.mrb[32].mxu1 %v2032_v43 }
  0xfb   : > { %v1688_v44 = vpop.f32.mrb[0].mxu0 }
  0xfc   : > { %v1728_v45 = vpop.f32.mrb[0].mxu1  ;;  %v1689_v47 = vpop.f32.mrb[1].mxu0 }
  0xfd   : > { %v1690_v48 = vadd.f32 %v1689_v47, %v1688_v44  ;;  %v1729_v49 = vpop.f32.mrb[1].mxu1  ;;  %v1691_v50 = vpop.f32.mrb[2].mxu0 }
  0xfe   : > { %v1730_v51 = vadd.f32 %v1729_v49, %v1728_v45  ;;  %v1731_v52 = vpop.f32.mrb[2].mxu1  ;;  %v1692_v53 = vpop.f32.mrb[3].mxu0 }
  0xff   : > { %v1071_v54 = vadd.f32 %v1690_v48, %v1522_v46  ;;  %v1693_v55 = vadd.f32 %v1692_v53, %v1691_v50  ;;  %v1732_v56 = vpop.f32.mrb[3].mxu1 }
 0x100   : > { %v1733_v57 = vadd.f32 %v1732_v56, %v1731_v52 }
 0x101   : > { %v1136_v58 = vadd.f32 %v1730_v51, %v1071_v54  ;;  %v1074_v59 = vadd.f32 %v1693_v55, %v1522_v46 }
 0x103   : > { %v1139_v60 = vadd.f32 %v1733_v57, %v1074_v59  ;;  %v1694_v61 = vpop.f32.mrb[4].mxu0 }
 0x104   : > { %v1734_v62 = vpop.f32.mrb[4].mxu1  ;;  %v1695_v63 = vpop.f32.mrb[5].mxu0 }
 0x105   : > { %v1696_v0 = vadd.f32 %v1695_v63, %v1694_v61  ;;  %v1735_v1 = vpop.f32.mrb[5].mxu1  ;;  %v1697_v2 = vpop.f32.mrb[6].mxu0 }
 0x106   : > { %v1736_v3 = vadd.f32 %v1735_v1, %v1734_v62  ;;  %v1737_v4 = vpop.f32.mrb[6].mxu1  ;;  %v1698_v5 = vpop.f32.mrb[7].mxu0 }
 0x107   : > { %v1079_v6 = vadd.f32 %v1696_v0, %v1522_v46  ;;  %v1699_v7 = vadd.f32 %v1698_v5, %v1697_v2  ;;  %v1738_v8 = vpop.f32.mrb[7].mxu1 }
 0x108   : > { %v1739_v9 = vadd.f32 %v1738_v8, %v1737_v4 }
 0x109   : > { %v1144_v10 = vadd.f32 %v1736_v3, %v1079_v6  ;;  %v1082_v11 = vadd.f32 %v1699_v7, %v1522_v46 }
 0x10b   : > { %v1147_v12 = vadd.f32 %v1739_v9, %v1082_v11  ;;  %v1700_v13 = vpop.f32.mrb[8].mxu0 }
 0x10c   : > { %v1740_v14 = vpop.f32.mrb[8].mxu1  ;;  %v1701_v15 = vpop.f32.mrb[9].mxu0 }
 0x10d   : > { %v1702_v16 = vadd.f32 %v1701_v15, %v1700_v13  ;;  %v1741_v17 = vpop.f32.mrb[9].mxu1  ;;  %v1703_v18 = vpop.f32.mrb[10].mxu0 }
 0x10e   : > { %v1742_v19 = vadd.f32 %v1741_v17, %v1740_v14  ;;  %v1743_v20 = vpop.f32.mrb[10].mxu1  ;;  %v1704_v21 = vpop.f32.mrb[11].mxu0 }
 0x10f   : > { %v1087_v22 = vadd.f32 %v1702_v16, %v1522_v46  ;;  %v1705_v23 = vadd.f32 %v1704_v21, %v1703_v18  ;;  %v1744_v24 = vpop.f32.mrb[11].mxu1 }
 0x110   : > { %v1745_v25 = vadd.f32 %v1744_v24, %v1743_v20 }
 0x111   : > { %v1152_v26 = vadd.f32 %v1742_v19, %v1087_v22  ;;  %v1090_v27 = vadd.f32 %v1705_v23, %v1522_v46 }
 0x113   : > { %v1155_v28 = vadd.f32 %v1745_v25, %v1090_v27  ;;  %v1706_v29 = vpop.f32.mrb[12].mxu0 }
 0x114   : > { %v1746_v30 = vpop.f32.mrb[12].mxu1  ;;  %v1707_v31 = vpop.f32.mrb[13].mxu0 }
 0x115   : > { %v1747_v32 = vpop.f32.mrb[13].mxu1  ;;  %v1708_v33 = vadd.f32 %v1707_v31, %v1706_v29  ;;  %v1709_v35 = vpop.f32.mrb[14].mxu0 }
 0x116   : > { %v1748_v34 = vadd.f32 %v1747_v32, %v1746_v30  ;;  %v1749_v36 = vpop.f32.mrb[14].mxu1  ;;  %v1710_v37 = vpop.f32.mrb[15].mxu0 }
 0x117   : > { %v1750_v38 = vpop.f32.mrb[15].mxu1  ;;  %v1095_v39 = vadd.f32 %v1708_v33, %v1522_v46  ;;  %v1711_v40 = vadd.f32 %v1710_v37, %v1709_v35 }
 0x118   : > { %v1751_v41 = vadd.f32 %v1750_v38, %v1749_v36 }
 0x119   : > { %v1160_v42 = vadd.f32 %v1748_v34, %v1095_v39  ;;  %v1098_v43 = vadd.f32 %v1711_v40, %v1522_v46 }
 0x11b   : > { %v1163_v44 = vadd.f32 %v1751_v41, %v1098_v43  ;;  %v1768_v45 = vpop.f32.mrb[16].mxu0 }
 0x11c   : > { %v1769_v47 = vpop.f32.mrb[17].mxu0  ;;  %v1808_v48 = vpop.f32.mrb[16].mxu1 }
 0x11d   : > { %v1770_v49 = vadd.f32 %v1769_v47, %v1768_v45  ;;  %v1771_v50 = vpop.f32.mrb[18].mxu0  ;;  %v1809_v51 = vpop.f32.mrb[17].mxu1 }
 0x11e   : > { %v1772_v52 = vpop.f32.mrb[19].mxu0  ;;  %v1810_v54 = vadd.f32 %v1809_v51, %v1808_v48  ;;  %v1811_v55 = vpop.f32.mrb[18].mxu1 }
 0x11f   : > { %v1201_v53 = vadd.f32 %v1770_v49, %v1136_v58  ;;  %v1773_v56 = vadd.f32 %v1772_v52, %v1771_v50  ;;  %v1812_v57 = vpop.f32.mrb[19].mxu1 }
 0x120   : > { %v1813_v61 = vadd.f32 %v1812_v57, %v1811_v55 }
 0x121   : > { %v1204_v59 = vadd.f32 %v1773_v56, %v1139_v60  ;;  %v1266_v62 = vadd.f32 %v1810_v54, %v1201_v53 }
 0x123   : > { %v1774_v63 = vpop.f32.mrb[20].mxu0  ;;  %v1269_v0 = vadd.f32 %v1813_v61, %v1204_v59 }
 0x124   : > { %v1775_v1 = vpop.f32.mrb[21].mxu0  ;;  %v1814_v46 = vpop.f32.mrb[20].mxu1 }
 0x125   : > { %v1776_v2 = vadd.f32 %v1775_v1, %v1774_v63  ;;  %v1777_v3 = vpop.f32.mrb[22].mxu0  ;;  %v1815_v4 = vpop.f32.mrb[21].mxu1 }
 0x126   : > { %v1778_v5 = vpop.f32.mrb[23].mxu0  ;;  %v1816_v7 = vadd.f32 %v1815_v4, %v1814_v46  ;;  %v1817_v8 = vpop.f32.mrb[22].mxu1 }
 0x127   : > { %v1209_v6 = vadd.f32 %v1776_v2, %v1144_v10  ;;  %v1779_v9 = vadd.f32 %v1778_v5, %v1777_v3  ;;  %v1818_v58 = vpop.f32.mrb[23].mxu1 }
 0x128   : > { %v1819_v13 = vadd.f32 %v1818_v58, %v1817_v8 }
 0x129   : > { %v1212_v11 = vadd.f32 %v1779_v9, %v1147_v12  ;;  %v1274_v14 = vadd.f32 %v1816_v7, %v1209_v6 }
 0x12b   : > { %v1780_v15 = vpop.f32.mrb[24].mxu0  ;;  %v1277_v60 = vadd.f32 %v1819_v13, %v1212_v11 }
 0x12c   : > { %v1781_v16 = vpop.f32.mrb[25].mxu0  ;;  %v1820_v17 = vpop.f32.mrb[24].mxu1 }
 0x12d   : > { %v1782_v18 = vadd.f32 %v1781_v16, %v1780_v15  ;;  %v1783_v19 = vpop.f32.mrb[26].mxu0  ;;  %v1821_v20 = vpop.f32.mrb[25].mxu1 }
 0x12e   : > { %v1784_v21 = vpop.f32.mrb[27].mxu0  ;;  %v1822_v23 = vadd.f32 %v1821_v20, %v1820_v17  ;;  %v1823_v24 = vpop.f32.mrb[26].mxu1 }
 0x12f   : > { %v1217_v22 = vadd.f32 %v1782_v18, %v1152_v26  ;;  %v1785_v25 = vadd.f32 %v1784_v21, %v1783_v19  ;;  %v1824_v10 = vpop.f32.mrb[27].mxu1 }
 0x130   : > { %v1825_v29 = vadd.f32 %v1824_v10, %v1823_v24 }
 0x131   : > { %v1220_v27 = vadd.f32 %v1785_v25, %v1155_v28  ;;  %v1282_v30 = vadd.f32 %v1822_v23, %v1217_v22 }
 0x133   : > { %v1786_v31 = vpop.f32.mrb[28].mxu0  ;;  %v1285_v12 = vadd.f32 %v1825_v29, %v1220_v27 }
 0x134   : > { %v1787_v32 = vpop.f32.mrb[29].mxu0  ;;  %v1826_v33 = vpop.f32.mrb[28].mxu1 }
 0x135   : > { %v1788_v34 = vadd.f32 %v1787_v32, %v1786_v31  ;;  %v1789_v35 = vpop.f32.mrb[30].mxu0  ;;  %v1827_v36 = vpop.f32.mrb[29].mxu1 }
 0x136   : > { %v1790_v37 = vpop.f32.mrb[31].mxu0  ;;  %v1828_v39 = vadd.f32 %v1827_v36, %v1826_v33  ;;  %v1829_v40 = vpop.f32.mrb[30].mxu1 }
 0x137   : > { %v1225_v38 = vadd.f32 %v1788_v34, %v1160_v42  ;;  %v1791_v26 = vadd.f32 %v1790_v37, %v1789_v35  ;;  %v1830_v41 = vpop.f32.mrb[31].mxu1 }
 0x138   : > { %v1831_v45 = vadd.f32 %v1830_v41, %v1829_v40 }
 0x139   : > { %v1228_v43 = vadd.f32 %v1791_v26, %v1163_v44  ;;  %v1290_v47 = vadd.f32 %v1828_v39, %v1225_v38 }
 0x13b   : > { %v1293_v28 = vadd.f32 %v1831_v45, %v1228_v43 }
 0x13c   : > { %v1862_v48 = vpop.f32.mrb[32].mxu0 }
 0x13d   : > { %v1339_v49 = vadd.f32 %v1862_v48, %v1274_v14  ;;  %v1866_v50 = vpop.f32.mrb[32].mxu1  ;;  %v1330_v51 = vpop.f32.mrb[33].mxu0 }
 0x13e   : > { %v1355_v52 = vadd.f32 %v1866_v50, %v1290_v47  ;;  %v1331_v53 = vadd.f32 %v1330_v51, %v1266_v62  ;;  %v1346_v54 = vpop.f32.mrb[33].mxu1  ;;  %v1863_v55 = vpop.f32.mrb[34].mxu0 }
 0x13f   : > { %v1347_v56 = vadd.f32 %v1346_v54, %v1282_v30  ;;  %v1342_v42 = vadd.f32 %v1863_v55, %v1277_v60  ;;  %v1867_v57 = vpop.f32.mrb[34].mxu1  ;;  %v1333_v59 = vpop.f32.mrb[35].mxu0  ;;  %v1363_v44 = vmax.f32 %v1339_v49, 0.0 }
 0x140   : > { %v1358_v61 = vadd.f32 %v1867_v57, %v1293_v28  ;;  %v1334_v63 = vadd.f32 %v1333_v59, %v1269_v0  ;;  %v1349_v1 = vpop.f32.mrb[35].mxu1  ;;  %v1367_v3 = vmax.f32 %v1355_v52, 0.0  ;;  %v1361_v4 = vmax.f32 %v1331_v53, 0.0 }
 0x141   : > { %v1364_v46 = vmax.f32 %v1342_v42, 0.0  ;;  %v1350_v2 = vadd.f32 %v1349_v1, %v1285_v12  ;;  %v1365_v6 = vmax.f32 %v1347_v56, 0.0 }
 0x142   : > { %v1368_v62 = vmax.f32 %v1358_v61, 0.0  ;;  %v1362_v5 = vmax.f32 %v1334_v63, 0.0 }
 0x143   : > { %v1657_v7 = vpack.c.bf16 %v1364_v46, %v1363_v44  ;;  %v1366_v8 = vmax.f32 %v1350_v2, 0.0 }
 0x144   : > { %v1667_v9 = vpack.c.bf16 %v1368_v62, %v1367_v3  ;;  %v1652_v58 = vpack.c.bf16 %v1362_v5, %v1361_v4 }
 0x145   : > { %1669 = vst [vmem:[%s226_s7 + $0x8] sm:$0xff] %v1657_v7   ;;  %v1662_v11 = vpack.c.bf16 %v1366_v8, %v1365_v6 }
 0x146   : > { %1671 = vst [vmem:[%s226_s7 + $0x18] sm:$0xff] %v1667_v9   ;;  %1653 = vst [vmem:[%s226_s7] sm:$0xff] %v1652_v58  }
 0x147   : > { %1670 = vst [vmem:[%s226_s7 + $0x10] sm:$0xff] %v1662_v11  }
 0x148 PF: > { %s13_s14 = sadd.s32 1, %s2055_s14   ;;  %s2378_s12 = smov %s2051_s13 }
 0x149   : > { %p10_p5 = scmp.ge.s32.totalorder %s13_s14, 4   ;;  %s2379_s13 = smov %s2381_s15 }
 0x14b   :  { %12 = sbr.rel (!%p10_p5) target bundleno = 2 (0x2), region = 68 }

// kernel: _lambda_.27
= control target key start
LH: loop header
LB: loop body
LE: loop exit
PB: predicated region body
PF: predicated region fallthrough
CT: control target
= control target key end

     0   :  { %s2202_s15 = smov 0   ;;  %s2204_s16 = smov 0   ;;  %s2515_s0 = inlined_call_operand.vmem [shape: bf16[128,1152], index: 0, kind: input, shape index: {}]   ;;  %s2516_s1 = inlined_call_operand.vmem [shape: bf16[1152,128], index: 1, kind: input, shape index: {}]   ;;  %s2517_s2 = inlined_call_operand.vmem [shape: f32[1,128], index: 2, kind: input, shape index: {}]   ;;  %s2518_s3 = inlined_call_operand.vmem [shape: bf16[128,128], index: 3, kind: input, shape index: {}]   ;;  %s2519_s4 = inlined_call_operand.vmem [shape: bf16[128,128], index: 4, kind: output, shape index: {}]  }
   0x1   :  { %s2206_s17 = smov 0  }
   0x2 LB: > { %s26_s18 = sadd.s32 1, %s2171_s16  ;;  %p1616_p0 = scmp.ge.s32.totalorder %s2175_s17, 1  ;;  %s2175_s17 = sphi %s2206_s17, %s14_s17   ;;  %s2171_s16 = sphi %s2204_s16, %s2521_s16   ;;  %s2167_s15 = sphi %s2202_s15, %s2520_s15  }
   0x3   : > { %p28_p1 = scmp.ge.s32.totalorder %s26_s18, 2  ;;  %p211_p2 = scmp.lt.s32.totalorder %s2175_s17, 3 }
   0x5   : > { %s2523_s18 = smov (%p28_p1, %s26_s18), 0  ;;  %p212_p3 = pnand %p1616_p0, %p211_p2 }
   0x6   : > { %v2029_v0 = vld [vmem:[%s2516_s1 + $0x40] sm:$0xff] (!%p212_p3)   ;;  %v2033_v4 = vld [vmem:[%s2516_s1 + $0x48] sm:$0xff] (!%p212_p3)   ;;  %v2037_v8 = vld [vmem:[%s2516_s1 + $0x50] sm:$0xff] (!%p212_p3)   ;;  %s1617_s27 = sshll.u32 (!%p212_p3), %s2167_s15, 3 }
   0x7   : > { %215 = sbr.rel (%p212_p3) target bundleno = 330 (0x14a), region = 36  ;;  %v2030_v1 = vld [vmem:[%s2516_s1 + $0xc0] sm:$0xff] (!%p212_p3)   ;;  %1792 = vmatprep.subr.bf16.mxu0 (!%p212_p3), %v2029_v0  ;;  %v2034_v5 = vld [vmem:[%s2516_s1 + $0xc8] sm:$0xff] (!%p212_p3)   ;;  %v2038_v9 = vld [vmem:[%s2516_s1 + $0xd0] sm:$0xff] (!%p212_p3)   ;;  %p257_p4 = scmp.lt.s32.totalorder (!%p212_p3), %s1617_s27, 15 }
   0x8   : > { %v2031_v2 = vld [vmem:[%s2516_s1] sm:$0xff] (!%p212_p3)   ;;  %1832 = vmatprep.subr.bf16.mxu1 (!%p212_p3), %v2030_v1  ;;  %v2035_v6 = vld [vmem:[%s2516_s1 + $0x8] sm:$0xff] (!%p212_p3)   ;;  %v2039_v10 = vld [vmem:[%s2516_s1 + $0x10] sm:$0xff] (!%p212_p3)  }
   0x9   : > { %v2032_v3 = vld [vmem:[%s2516_s1 + $0x80] sm:$0xff] (!%p212_p3)   ;;  %1793 = vmatpush3.bf16.msra.mxu0 (!%p212_p3), %v2031_v2  ;;  %v2036_v7 = vld [vmem:[%s2516_s1 + $0x88] sm:$0xff] (!%p212_p3)   ;;  %v2040_v11 = vld [vmem:[%s2516_s1 + $0x90] sm:$0xff] (!%p212_p3)  }
   0xa   : > { %1833 = vmatpush3.bf16.msra.mxu1 (!%p212_p3), %v2032_v3  ;;  %1794 = vmatprep.subr.bf16.mxu0 (!%p212_p3), %v2033_v4  ;;  %v2041_v12 = vld [vmem:[%s2516_s1 + $0x58] sm:$0xff] (!%p212_p3)   ;;  %v2045_v16 = vld [vmem:[%s2516_s1 + $0x60] sm:$0xff] (!%p212_p3)   ;;  %v2049_v20 = vld [vmem:[%s2516_s1 + $0x68] sm:$0xff] (!%p212_p3)  }
   0xb   : > { %1834 = vmatprep.subr.bf16.mxu1 (!%p212_p3), %v2034_v5  ;;  %v2042_v13 = vld [vmem:[%s2516_s1 + $0xd8] sm:$0xff] (!%p212_p3)   ;;  %v2046_v17 = vld [vmem:[%s2516_s1 + $0xe0] sm:$0xff] (!%p212_p3)   ;;  %v2050_v21 = vld [vmem:[%s2516_s1 + $0xe8] sm:$0xff] (!%p212_p3)  }
   0xc   : > { %v2043_v14 = vld [vmem:[%s2516_s1 + $0x18] sm:$0xff] (!%p212_p3)   ;;  %v2047_v18 = vld [vmem:[%s2516_s1 + $0x20] sm:$0xff] (!%p212_p3)   ;;  %v2051_v22 = vld [vmem:[%s2516_s1 + $0x28] sm:$0xff] (!%p212_p3)  }
   0xd   : > { %1795 = vmatpush3.bf16.msra.mxu0 (!%p212_p3), %v2035_v6  ;;  %v2044_v15 = vld [vmem:[%s2516_s1 + $0x98] sm:$0xff] (!%p212_p3)   ;;  %v2048_v19 = vld [vmem:[%s2516_s1 + $0xa0] sm:$0xff] (!%p212_p3)   ;;  %v2052_v23 = vld [vmem:[%s2516_s1 + $0xa8] sm:$0xff] (!%p212_p3)  }
   0xe   : > { %1835 = vmatpush3.bf16.msra.mxu1 %v2036_v7  ;;  %1796 = vmatprep.subr.bf16.mxu0 %v2037_v8  ;;  %s2525_s27 = smov (!%p257_p4, %s1617_s27), 15  ;;  %v2053_v24 = vld [vmem:[%s2516_s1 + $0x70] sm:$0xff]   ;;  %v2057_v28 = vld [vmem:[%s2516_s1 + $0x78] sm:$0xff]   ;;  %v2067_v36 = vld [vmem:[%s2516_s1 + $0x140] sm:$0xff]  }
   0xf   : > { %1836 = vmatprep.subr.bf16.mxu1 %v2038_v9  ;;  %v2054_v25 = vld [vmem:[%s2516_s1 + $0xf0] sm:$0xff]   ;;  %s2004_s28 = smul.u32 36, %s2525_s27  ;;  %v2058_v29 = vld [vmem:[%s2516_s1 + $0xf8] sm:$0xff]   ;;  %v2068_v37 = vld [vmem:[%s2516_s1 + $0x1c0] sm:$0xff]  }
  0x10   : > { %v2055_v26 = vld [vmem:[%s2516_s1 + $0x30] sm:$0xff]   ;;  %v2059_v30 = vld [vmem:[%s2516_s1 + $0x38] sm:$0xff]   ;;  %v2069_v38 = vld [vmem:[%s2516_s1 + $0x100] sm:$0xff]  }
  0x11   : > { %1797 = vmatpush3.bf16.msra.mxu0 %v2039_v10  ;;  %v2056_v27 = vld [vmem:[%s2516_s1 + $0xb0] sm:$0xff]   ;;  %s2319_s12 = scalar_lea.vmem %s2515_s0, %s2004_s28  ;;  %v2060_v31 = vld [vmem:[%s2516_s1 + $0xb8] sm:$0xff]   ;;  %v2070_v39 = vld [vmem:[%s2516_s1 + $0x180] sm:$0xff]  }
  0x12   : > { %1837 = vmatpush3.bf16.msra.mxu1 %v2040_v11  ;;  %1798 = vmatprep.subr.bf16.mxu0 %v2041_v12  ;;  %v2061_v32 = vld [vmem:[%s2319_s12] ss:$36 sps:$4 sm:$0xff]   ;;  %v2064_v34 = vld [vmem:[%s2319_s12 + $0x8] ss:$36 sps:$4 sm:$0xff]   ;;  %v2077_v45 = vld [vmem:[%s2319_s12 + $0x54] ss:$36 sps:$4 sm:$0xff]  }
  0x13   : > { %1838 = vmatprep.subr.bf16.mxu1 %v2042_v13  ;;  %v2063_v33 = vld [vmem:[%s2319_s12 + $0x4] ss:$36 sps:$4 sm:$0xff]   ;;  %v2066_v35 = vld [vmem:[%s2319_s12 + $0xc] ss:$36 sps:$4 sm:$0xff]   ;;  %v2085_v52 = vld [vmem:[%s2516_s1 + $0x158] sm:$0xff]  }
  0x14   : > { %1128 = vmatprep.mubr.bf16.mxu0 %v2063_v33  ;;  %1193 = vmatprep.mubr.bf16.mxu1 %v2066_v35  ;;  %v2071_v40 = vld [vmem:[%s2516_s1 + $0x148] sm:$0xff]   ;;  %v2080_v47 = vld [vmem:[%s2319_s12 + $0x50] ss:$36 sps:$4 sm:$0xff]   ;;  %v2086_v53 = vld [vmem:[%s2516_s1 + $0x1d8] sm:$0xff]  }
  0x15   : > { %1799 = vmatpush3.bf16.msra.mxu0 %v2043_v14  ;;  %v2072_v41 = vld [vmem:[%s2516_s1 + $0x1c8] sm:$0xff]   ;;  %v2081_v48 = vld [vmem:[%s2516_s1 + $0x150] sm:$0xff]   ;;  %v2087_v54 = vld [vmem:[%s2516_s1 + $0x118] sm:$0xff]  }
  0x16   : > { %1839 = vmatpush3.bf16.msra.mxu1 %v2044_v15  ;;  %1800 = vmatprep.subr.bf16.mxu0 %v2045_v16  ;;  %v2073_v42 = vld [vmem:[%s2516_s1 + $0x108] sm:$0xff]   ;;  %v2082_v49 = vld [vmem:[%s2516_s1 + $0x1d0] sm:$0xff]   ;;  %v2088_v55 = vld [vmem:[%s2516_s1 + $0x198] sm:$0xff]  }
  0x17   : > { %1840 = vmatprep.subr.bf16.mxu1 %v2046_v17  ;;  %v2074_v43 = vld [vmem:[%s2516_s1 + $0x188] sm:$0xff]   ;;  %v2083_v50 = vld [vmem:[%s2516_s1 + $0x110] sm:$0xff]   ;;  %v2091_v57 = vld [vmem:[%s2319_s12 + $0x9c] ss:$36 sps:$4 sm:$0xff]  }
  0x18   : > { %v2075_v44 = vld [vmem:[%s2319_s12 + $0x4c] ss:$36 sps:$4 sm:$0xff]   ;;  %v2089_v56 = vld [vmem:[%s2319_s12 + $0x94] ss:$36 sps:$4 sm:$0xff]   ;;  %v2095_v60 = vld [vmem:[%s2516_s1 + $0x160] sm:$0xff]  }
  0x19   : > { %1801 = vmatpush3.bf16.msra.mxu0 %v2047_v18  ;;  %v2079_v46 = vld [vmem:[%s2319_s12 + $0x48] ss:$36 sps:$4 sm:$0xff]   ;;  %v2084_v51 = vld [vmem:[%s2516_s1 + $0x190] sm:$0xff]   ;;  %v2094_v59 = vld [vmem:[%s2319_s12 + $0x98] ss:$36 sps:$4 sm:$0xff]  }
  0x1a   : > { %1841 = vmatpush3.bf16.msra.mxu1 %v2048_v19  ;;  %1802 = vmatprep.subr.bf16.mxu0 %v2049_v20  ;;  %v2093_v58 = vld [vmem:[%s2319_s12 + $0x90] ss:$36 sps:$4 sm:$0xff]   ;;  %v2096_v61 = vld [vmem:[%s2516_s1 + $0x1e0] sm:$0xff]   ;;  %v2099_v0 = vld [vmem:[%s2516_s1 + $0x168] sm:$0xff]  }
  0x1b   : > { %1842 = vmatprep.subr.bf16.mxu1 %v2050_v21  ;;  %v2097_v62 = vld [vmem:[%s2516_s1 + $0x120] sm:$0xff]   ;;  %v2100_v1 = vld [vmem:[%s2516_s1 + $0x1e8] sm:$0xff]   ;;  %v2107_v6 = vld [vmem:[%s2319_s12 + $0xd8] ss:$36 sps:$4 sm:$0xff]  }
  0x1c   : > { %v2098_v63 = vld [vmem:[%s2516_s1 + $0x1a0] sm:$0xff]   ;;  %v2101_v2 = vld [vmem:[%s2516_s1 + $0x128] sm:$0xff]   ;;  %v2109_v8 = vld [vmem:[%s2516_s1 + $0x170] sm:$0xff]  }
  0x1d   : > { %1803 = vmatpush3.bf16.msra.mxu0 %v2051_v22  ;;  %v2102_v3 = vld [vmem:[%s2516_s1 + $0x1a8] sm:$0xff]   ;;  %v2103_v4 = vld [vmem:[%s2319_s12 + $0xdc] ss:$36 sps:$4 sm:$0xff]   ;;  %v2110_v9 = vld [vmem:[%s2516_s1 + $0x1f0] sm:$0xff]  }
  0x1e   : > { %1843 = vmatpush3.bf16.msra.mxu1 %v2052_v23  ;;  %1804 = vmatprep.subr.bf16.mxu0 %v2053_v24  ;;  %v2105_v5 = vld [vmem:[%s2319_s12 + $0xe4] ss:$36 sps:$4 sm:$0xff]   ;;  %v2111_v10 = vld [vmem:[%s2516_s1 + $0x130] sm:$0xff]   ;;  %v2113_v12 = vld [vmem:[%s2516_s1 + $0x178] sm:$0xff]  }
  0x1f   : > { %1844 = vmatprep.subr.bf16.mxu1 %v2054_v25  ;;  %v2108_v7 = vld [vmem:[%s2319_s12 + $0xe0] ss:$36 sps:$4 sm:$0xff]   ;;  %v2112_v11 = vld [vmem:[%s2516_s1 + $0x1b0] sm:$0xff]   ;;  %v2114_v13 = vld [vmem:[%s2516_s1 + $0x1f8] sm:$0xff]  }
  0x20   : > { %v2115_v14 = vld [vmem:[%s2516_s1 + $0x138] sm:$0xff]   ;;  %v2117_v16 = vld [vmem:[%s2319_s12 + $0x10] ss:$36 sps:$4 sm:$0xff]   ;;  %v2123_v20 = vld [vmem:[%s2516_s1 + $0x200] sm:$0xff]  }
  0x21   : > { %1805 = vmatpush3.bf16.msra.mxu0 %v2055_v26  ;;  %v2116_v15 = vld [vmem:[%s2516_s1 + $0x1b8] sm:$0xff]   ;;  %v2124_v21 = vld [vmem:[%s2516_s1 + $0x208] sm:$0xff]   ;;  %v2130_v25 = vld [vmem:[%s2319_s12 + $0x60] ss:$36 sps:$4 sm:$0xff]  }
  0x22   : > { %1845 = vmatpush3.bf16.msra.mxu1 %v2056_v27  ;;  %1806 = vmatprep.subr.bf16.mxu0 %v2057_v28  ;;  %v2119_v17 = vld [vmem:[%s2319_s12 + $0x14] ss:$36 sps:$4 sm:$0xff]   ;;  %v2122_v19 = vld [vmem:[%s2319_s12 + $0x1c] ss:$36 sps:$4 sm:$0xff]   ;;  %v2127_v23 = vld [vmem:[%s2319_s12 + $0x64] ss:$36 sps:$4 sm:$0xff]  }
  0x23   : > { %1846 = vmatprep.subr.bf16.mxu1 %v2058_v29  ;;  %v2120_v18 = vld [vmem:[%s2319_s12 + $0x18] ss:$36 sps:$4 sm:$0xff]   ;;  %v2131_v26 = vld [vmem:[%s2516_s1 + $0x210] sm:$0xff]   ;;  %v2133_v27 = vld [vmem:[%s2319_s12 + $0xa4] ss:$36 sps:$4 sm:$0xff]  }
  0x24   : > { %v2125_v22 = vld [vmem:[%s2319_s12 + $0x5c] ss:$36 sps:$4 sm:$0xff]   ;;  %v2135_v28 = vld [vmem:[%s2319_s12 + $0xac] ss:$36 sps:$4 sm:$0xff]  }
  0x25   : > { %1807 = vmatpush3.bf16.msra.mxu0 %v2059_v30  ;;  %v2129_v24 = vld [vmem:[%s2319_s12 + $0x58] ss:$36 sps:$4 sm:$0xff]   ;;  %v2137_v30 = vld [vmem:[%s2319_s12 + $0xa0] ss:$36 sps:$4 sm:$0xff]   ;;  %v2141_v33 = vld [vmem:[%s2319_s12 + $0xec] ss:$36 sps:$4 sm:$0xff]  }
  0x26   : > { %1847 = vmatpush3.bf16.msra.mxu1 %v2060_v31  ;;  %1872 = vmatprep.subr.bf16.mxu0 %v2067_v36  ;;  %v2132_v29 = vld [vmem:[%s2516_s1 + $0x218] sm:$0xff]   ;;  %v2138_v31 = vld [vmem:[%s2319_s12 + $0xa8] ss:$36 sps:$4 sm:$0xff]  }
  0x27   : > { %1912 = vmatprep.subr.bf16.mxu1 %v2068_v37  ;;  %v2140_v35 = vld [vmem:[%s2516_s1 + $0x228] sm:$0xff]   ;;  %v2147_v37 = vld [vmem:[%s2516_s1 + $0x230] sm:$0xff]  }
  0x28   : > { %1129 = vmatmul.mubr.bf16.vlgmr.msra.gmra.mrb[0].mxu0 %v2061_v32  ;;  %v2139_v32 = vld [vmem:[%s2516_s1 + $0x220] sm:$0xff]   ;;  %v2145_v36 = vld [vmem:[%s2319_s12 + $0xe8] ss:$36 sps:$4 sm:$0xff]  }
  0x29   : > { %1194 = vmatmul.mubr.bf16.vlgmr.msra.gmra.mrb[0].mxu1 %v2064_v34  ;;  %1873 = vmatpush3.bf16.msra.mxu0 %v2069_v38  ;;  %v2143_v34 = vld [vmem:[%s2319_s12 + $0xf4] ss:$36 sps:$4 sm:$0xff]  }
  0x2a   : > { %1913 = vmatpush3.bf16.msra.mxu1 %v2070_v39  ;;  %1874 = vmatprep.subr.bf16.mxu0 %v2071_v40  ;;  %v2146_v38 = vld [vmem:[%s2319_s12 + $0xf0] ss:$36 sps:$4 sm:$0xff]   ;;  %v2149_v39 = vld [vmem:[%s2319_s12 + $0x20] ss:$36 sps:$4 sm:$0xff]  }
  0x2b   : > { %1914 = vmatprep.subr.bf16.mxu1 %v2072_v41  ;;  %1136 = vmatprep.mubr.bf16.mxu0 %v2075_v44  ;;  %v2150_v40 = vld [vmem:[%s2319_s12 + $0xb0] ss:$36 sps:$4 sm:$0xff]   ;;  %v2148_v41 = vld [vmem:[%s2516_s1 + $0x238] sm:$0xff]  }
  0x2c   : > { %1201 = vmatprep.mubr.bf16.mxu1 %v2077_v45 }
  0x2d   : > { %1875 = vmatpush3.bf16.msra.mxu0 %v2073_v42  ;;  %v2151_v42 = vld [vmem:[%s2319_s12 + $0x68] ss:$36 sps:$4 sm:$0xff]  }
  0x2e   : > { %1915 = vmatpush3.bf16.msra.mxu1 %v2074_v43  ;;  %1876 = vmatprep.subr.bf16.mxu0 %v2081_v48  ;;  %v2152_v43 = vld [vmem:[%s2319_s12 + $0xf8] ss:$36 sps:$4 sm:$0xff]   ;;  %s1620_s12 = sshll.u32 %s2525_s27, 2 }
  0x2f   : > { %1916 = vmatprep.subr.bf16.mxu1 %v2082_v49  ;;  %s277_s21 = scalar_lea.vmem %s2518_s3, %s1620_s12  ;;  %s286_s24 = scalar_lea.vmem %s2519_s4, %s1620_s12 }
  0x30   : > { %1137 = vmatmul.mubr.bf16.gmra.mrb[4].mxu0 %v2079_v46  ;;  %v1623_v46 = vld [vmem:[%s2517_s2] ss:$0 sm:$0xff] }
  0x31   : > { %1202 = vmatmul.mubr.bf16.gmra.mrb[4].mxu1 %v2080_v47  ;;  %1877 = vmatpush3.bf16.msra.mxu0 %v2083_v50 }
  0x32   : > { %1917 = vmatpush3.bf16.msra.mxu1 %v2084_v51  ;;  %1878 = vmatprep.subr.bf16.mxu0 %v2085_v52 }
  0x33   : > { %1918 = vmatprep.subr.bf16.mxu1 %v2086_v53  ;;  %1144 = vmatprep.mubr.bf16.mxu0 %v2089_v56 }
  0x34   : > { %1209 = vmatprep.mubr.bf16.mxu1 %v2091_v57 }
  0x35   : > { %1879 = vmatpush3.bf16.msra.mxu0 %v2087_v54 }
  0x36   : > { %1919 = vmatpush3.bf16.msra.mxu1 %v2088_v55  ;;  %1880 = vmatprep.subr.bf16.mxu0 %v2095_v60 }
  0x37   : > { %1920 = vmatprep.subr.bf16.mxu1 %v2096_v61 }
  0x38   : > { %1145 = vmatmul.mubr.bf16.gmra.mrb[8].mxu0 %v2093_v58 }
  0x39   : > { %1210 = vmatmul.mubr.bf16.gmra.mrb[8].mxu1 %v2094_v59  ;;  %1881 = vmatpush3.bf16.msra.mxu0 %v2097_v62 }
  0x3a   : > { %1921 = vmatpush3.bf16.msra.mxu1 %v2098_v63  ;;  %1882 = vmatprep.subr.bf16.mxu0 %v2099_v0 }
  0x3b   : > { %1922 = vmatprep.subr.bf16.mxu1 %v2100_v1  ;;  %1152 = vmatprep.mubr.bf16.mxu0 %v2103_v4 }
  0x3c   : > { %1217 = vmatprep.mubr.bf16.mxu1 %v2105_v5 }
  0x3d   : > { %1883 = vmatpush3.bf16.msra.mxu0 %v2101_v2 }
  0x3e   : > { %1923 = vmatpush3.bf16.msra.mxu1 %v2102_v3  ;;  %1884 = vmatprep.subr.bf16.mxu0 %v2109_v8 }
  0x3f   : > { %1924 = vmatprep.subr.bf16.mxu1 %v2110_v9 }
  0x40   : > { %1153 = vmatmul.mubr.bf16.gmra.mrb[12].mxu0 %v2107_v6 }
  0x41   : > { %1218 = vmatmul.mubr.bf16.gmra.mrb[12].mxu1 %v2108_v7  ;;  %1885 = vmatpush3.bf16.msra.mxu0 %v2111_v10 }
  0x42   : > { %1925 = vmatpush3.bf16.msra.mxu1 %v2112_v11  ;;  %1886 = vmatprep.subr.bf16.mxu0 %v2113_v12 }
  0x43   : > { %1926 = vmatprep.subr.bf16.mxu1 %v2114_v13  ;;  %1258 = vmatprep.mubr.bf16.mxu0 %v2119_v17 }
  0x44   : > { %1323 = vmatprep.mubr.bf16.mxu1 %v2122_v19 }
  0x45   : > { %1887 = vmatpush3.bf16.msra.mxu0 %v2115_v14 }
  0x46   : > { %1927 = vmatpush3.bf16.msra.mxu1 %v2116_v15  ;;  %1964 = vmatprep.subr.bf16.mxu0 %v2123_v20 }
  0x47   : > { %1988 = vmatprep.subr.bf16.mxu1 %v2123_v20 }
  0x48   : > { %1259 = vmatmul.mubr.bf16.vlgmr.msra.gmra.mrb[16].mxu0 %v2117_v16 }
  0x49   : > { %1324 = vmatmul.mubr.bf16.vlgmr.msra.gmra.mrb[16].mxu1 %v2120_v18  ;;  %1965 = vmatpush3.bf16.msra.mxu0 %v2123_v20 }
  0x4a   : > { %1996 = vmatpush3.bf16.msra.mxu1 %v2123_v20  ;;  %1966 = vmatprep.subr.bf16.mxu0 %v2124_v21 }
  0x4b   : > { %1989 = vmatprep.subr.bf16.mxu1 %v2124_v21  ;;  %1266 = vmatprep.mubr.bf16.mxu0 %v2125_v22 }
  0x4c   : > { %1331 = vmatprep.mubr.bf16.mxu1 %v2127_v23 }
  0x4d   : > { %1967 = vmatpush3.bf16.msra.mxu0 %v2124_v21 }
  0x4e   : > { %1997 = vmatpush3.bf16.msra.mxu1 %v2124_v21  ;;  %1968 = vmatprep.subr.bf16.mxu0 %v2131_v26 }
  0x4f   : > { %1990 = vmatprep.subr.bf16.mxu1 %v2131_v26 }
  0x50   : > { %1267 = vmatmul.mubr.bf16.gmra.mrb[20].mxu0 %v2129_v24 }
  0x51   : > { %1332 = vmatmul.mubr.bf16.gmra.mrb[20].mxu1 %v2130_v25  ;;  %1274 = vmatprep.mubr.bf16.mxu0 %v2133_v27 }
  0x52   : > { %1969 = vmatpush3.bf16.msra.mxu0 %v2131_v26  ;;  %1339 = vmatprep.mubr.bf16.mxu1 %v2135_v28 }
  0x53   : > { %1998 = vmatpush3.bf16.msra.mxu1 %v2131_v26  ;;  %1970 = vmatprep.subr.bf16.mxu0 %v2132_v29 }
  0x54   : > { %1991 = vmatprep.subr.bf16.mxu1 %v2132_v29 }
  0x56   : > { %1971 = vmatpush3.bf16.msra.mxu0 %v2132_v29 }
  0x57   : > { %1999 = vmatpush3.bf16.msra.mxu1 %v2132_v29  ;;  %1972 = vmatprep.subr.bf16.mxu0 %v2139_v32 }
  0x58   : > { %1275 = vmatmul.mubr.bf16.gmra.mrb[24].mxu0 %v2137_v30  ;;  %1992 = vmatprep.subr.bf16.mxu1 %v2139_v32 }
  0x59   : > { %1340 = vmatmul.mubr.bf16.gmra.mrb[24].mxu1 %v2138_v31  ;;  %1282 = vmatprep.mubr.bf16.mxu0 %v2141_v33 }
  0x5a   : > { %1973 = vmatpush3.bf16.msra.mxu0 %v2139_v32  ;;  %1347 = vmatprep.mubr.bf16.mxu1 %v2143_v34 }
  0x5b   : > { %2000 = vmatpush3.bf16.msra.mxu1 %v2139_v32  ;;  %1974 = vmatprep.subr.bf16.mxu0 %v2140_v35 }
  0x5c   : > { %1993 = vmatprep.subr.bf16.mxu1 %v2140_v35 }
  0x5e   : > { %1975 = vmatpush3.bf16.msra.mxu0 %v2140_v35 }
  0x5f   : > { %2001 = vmatpush3.bf16.msra.mxu1 %v2140_v35  ;;  %1976 = vmatprep.subr.bf16.mxu0 %v2147_v37 }
  0x60   : > { %1283 = vmatmul.mubr.bf16.gmra.mrb[28].mxu0 %v2145_v36  ;;  %1994 = vmatprep.subr.bf16.mxu1 %v2147_v37 }
  0x61   : > { %1348 = vmatmul.mubr.bf16.gmra.mrb[28].mxu1 %v2146_v38  ;;  %1980 = vmatprep.mubr.bf16.mxu0 %v2149_v39 }
  0x62   : > { %1977 = vmatpush3.bf16.msra.mxu0 %v2147_v37  ;;  %1984 = vmatprep.mubr.bf16.mxu1 %v2150_v40 }
  0x63   : > { %2002 = vmatpush3.bf16.msra.mxu1 %v2147_v37  ;;  %1978 = vmatprep.subr.bf16.mxu0 %v2148_v41 }
  0x64   : > { %1995 = vmatprep.subr.bf16.mxu1 %v2148_v41 }
  0x66   : > { %1979 = vmatpush3.bf16.msra.mxu0 %v2148_v41 }
  0x67   : > { %2003 = vmatpush3.bf16.msra.mxu1 %v2148_v41 }
  0x69   : > { %1981 = vmatmul.mubr.bf16.vlgmr.msra.gmra.mrb[32].mxu0 %v2151_v42 }
  0x6a   : > { %1985 = vmatmul.mubr.bf16.vlgmr.msra.gmra.mrb[32].mxu1 %v2152_v43 }
  0xfb   : > { %v1808_v44 = vpop.f32.mrb[0].mxu0 }
  0xfc   : > { %v1848_v45 = vpop.f32.mrb[0].mxu1  ;;  %v1809_v47 = vpop.f32.mrb[1].mxu0 }
  0xfd   : > { %v1810_v48 = vadd.f32 %v1809_v47, %v1808_v44  ;;  %v1849_v49 = vpop.f32.mrb[1].mxu1  ;;  %v1811_v50 = vpop.f32.mrb[2].mxu0 }
  0xfe   : > { %v1850_v51 = vadd.f32 %v1849_v49, %v1848_v45  ;;  %v1851_v52 = vpop.f32.mrb[2].mxu1  ;;  %v1812_v53 = vpop.f32.mrb[3].mxu0 }
  0xff   : > { %v1131_v54 = vadd.f32 %v1810_v48, %v1623_v46  ;;  %v1813_v55 = vadd.f32 %v1812_v53, %v1811_v50  ;;  %v1852_v56 = vpop.f32.mrb[3].mxu1 }
 0x100   : > { %v1853_v57 = vadd.f32 %v1852_v56, %v1851_v52 }
 0x101   : > { %v1196_v58 = vadd.f32 %v1850_v51, %v1131_v54  ;;  %v1134_v59 = vadd.f32 %v1813_v55, %v1623_v46 }
 0x103   : > { %v1199_v60 = vadd.f32 %v1853_v57, %v1134_v59  ;;  %v1814_v61 = vpop.f32.mrb[4].mxu0 }
 0x104   : > { %v1854_v62 = vpop.f32.mrb[4].mxu1  ;;  %v1815_v63 = vpop.f32.mrb[5].mxu0 }
 0x105   : > { %v1816_v0 = vadd.f32 %v1815_v63, %v1814_v61  ;;  %v1855_v1 = vpop.f32.mrb[5].mxu1  ;;  %v1817_v2 = vpop.f32.mrb[6].mxu0 }
 0x106   : > { %v1856_v3 = vadd.f32 %v1855_v1, %v1854_v62  ;;  %v1857_v4 = vpop.f32.mrb[6].mxu1  ;;  %v1818_v5 = vpop.f32.mrb[7].mxu0 }
 0x107   : > { %v1139_v6 = vadd.f32 %v1816_v0, %v1623_v46  ;;  %v1819_v7 = vadd.f32 %v1818_v5, %v1817_v2  ;;  %v1858_v8 = vpop.f32.mrb[7].mxu1 }
 0x108   : > { %v1859_v9 = vadd.f32 %v1858_v8, %v1857_v4 }
 0x109   : > { %v1204_v10 = vadd.f32 %v1856_v3, %v1139_v6  ;;  %v1142_v11 = vadd.f32 %v1819_v7, %v1623_v46 }
 0x10b   : > { %v1207_v12 = vadd.f32 %v1859_v9, %v1142_v11  ;;  %v1820_v13 = vpop.f32.mrb[8].mxu0 }
 0x10c   : > { %v1860_v14 = vpop.f32.mrb[8].mxu1  ;;  %v1821_v15 = vpop.f32.mrb[9].mxu0 }
 0x10d   : > { %v1822_v16 = vadd.f32 %v1821_v15, %v1820_v13  ;;  %v1861_v17 = vpop.f32.mrb[9].mxu1  ;;  %v1823_v18 = vpop.f32.mrb[10].mxu0 }
 0x10e   : > { %v1862_v19 = vadd.f32 %v1861_v17, %v1860_v14  ;;  %v1863_v20 = vpop.f32.mrb[10].mxu1  ;;  %v1824_v21 = vpop.f32.mrb[11].mxu0 }
 0x10f   : > { %v1147_v22 = vadd.f32 %v1822_v16, %v1623_v46  ;;  %v1825_v23 = vadd.f32 %v1824_v21, %v1823_v18  ;;  %v1864_v24 = vpop.f32.mrb[11].mxu1 }
 0x110   : > { %v1865_v25 = vadd.f32 %v1864_v24, %v1863_v20 }
 0x111   : > { %v1212_v26 = vadd.f32 %v1862_v19, %v1147_v22  ;;  %v1150_v27 = vadd.f32 %v1825_v23, %v1623_v46 }
 0x113   : > { %v1215_v28 = vadd.f32 %v1865_v25, %v1150_v27  ;;  %v1826_v29 = vpop.f32.mrb[12].mxu0 }
 0x114   : > { %v1866_v30 = vpop.f32.mrb[12].mxu1  ;;  %v1827_v31 = vpop.f32.mrb[13].mxu0 }
 0x115   : > { %v1867_v32 = vpop.f32.mrb[13].mxu1  ;;  %v1828_v33 = vadd.f32 %v1827_v31, %v1826_v29  ;;  %v1829_v35 = vpop.f32.mrb[14].mxu0 }
 0x116   : > { %v1868_v34 = vadd.f32 %v1867_v32, %v1866_v30  ;;  %v1869_v36 = vpop.f32.mrb[14].mxu1  ;;  %v1830_v37 = vpop.f32.mrb[15].mxu0 }
 0x117   : > { %v1870_v38 = vpop.f32.mrb[15].mxu1  ;;  %v1155_v39 = vadd.f32 %v1828_v33, %v1623_v46  ;;  %v1831_v40 = vadd.f32 %v1830_v37, %v1829_v35 }
 0x118   : > { %v1871_v41 = vadd.f32 %v1870_v38, %v1869_v36 }
 0x119   : > { %v1220_v42 = vadd.f32 %v1868_v34, %v1155_v39  ;;  %v1158_v43 = vadd.f32 %v1831_v40, %v1623_v46 }
 0x11b   : > { %v2486_v44 = vadd.f32 %v1871_v41, %v1158_v43  ;;  %v1888_v45 = vpop.f32.mrb[16].mxu0 }
 0x11c   : > { %v1889_v47 = vpop.f32.mrb[17].mxu0  ;;  %v1928_v48 = vpop.f32.mrb[16].mxu1 }
 0x11d   : > { %v1890_v49 = vadd.f32 %v1889_v47, %v1888_v45  ;;  %v1891_v50 = vpop.f32.mrb[18].mxu0  ;;  %v1929_v51 = vpop.f32.mrb[17].mxu1  ;;  %v1786_v45 = vld [vmem:[%s277_s21 + $0x8] sm:$0xff]  }
 0x11e   : > { %v1892_v52 = vpop.f32.mrb[19].mxu0  ;;  %v1930_v54 = vadd.f32 %v1929_v51, %v1928_v48  ;;  %v1931_v55 = vpop.f32.mrb[18].mxu1  ;;  %v1788_v48 = vld [vmem:[%s277_s21 + $0x18] sm:$0xff]  }
 0x11f   : > { %v1261_v53 = vadd.f32 %v1890_v49, %v1196_v58  ;;  %v1893_v56 = vadd.f32 %v1892_v52, %v1891_v50  ;;  %v1932_v57 = vpop.f32.mrb[19].mxu1  ;;  %v1751_v49 = vld [vmem:[%s277_s21] sm:$0xff]   ;;  %v1787_v50 = vld [vmem:[%s277_s21 + $0x10] sm:$0xff]   ;;  %v1756_v52 = vunpack.c.l.bf16 %v1786_v45 }
 0x120   : > { %v1933_v61 = vadd.f32 %v1932_v57, %v1931_v55  ;;  %v1752_v55 = vunpack.c.l.bf16 %v1751_v49 }
 0x121   : > { %v1264_v59 = vadd.f32 %v1893_v56, %v1199_v60  ;;  %v2488_v62 = vadd.f32 %v1930_v54, %v1261_v53  ;;  %v1764_v54 = vunpack.c.l.bf16 %v1788_v48 }
 0x123   : > { %v1894_v63 = vpop.f32.mrb[20].mxu0  ;;  %v2490_v46 = vadd.f32 %v1933_v61, %v1264_v59  ;;  %v1760_v59 = vunpack.c.l.bf16 %v1787_v50  ;;  %v1757_v61 = vunpack.c.h.bf16 %v1786_v45 }
 0x124   : > { %v1895_v0 = vpop.f32.mrb[21].mxu0  ;;  %v1934_v1 = vpop.f32.mrb[20].mxu1 }
 0x125   : > { %v1896_v2 = vadd.f32 %v1895_v0, %v1894_v63  ;;  %v1897_v3 = vpop.f32.mrb[22].mxu0  ;;  %v1935_v4 = vpop.f32.mrb[21].mxu1 }
 0x126   : > { %v1898_v5 = vpop.f32.mrb[23].mxu0  ;;  %v1936_v7 = vadd.f32 %v1935_v4, %v1934_v1  ;;  %v1937_v58 = vpop.f32.mrb[22].mxu1 }
 0x127   : > { %v1269_v6 = vadd.f32 %v1896_v2, %v1204_v10  ;;  %v1899_v8 = vadd.f32 %v1898_v5, %v1897_v3  ;;  %v1938_v9 = vpop.f32.mrb[23].mxu1  ;;  %v1765_v2 = vunpack.c.h.bf16 %v1788_v48  ;;  %v1753_v3 = vunpack.c.h.bf16 %v1751_v49 }
 0x128   : > { %v1939_v13 = vadd.f32 %v1938_v9, %v1937_v58 }
 0x129   : > { %v1272_v11 = vadd.f32 %v1899_v8, %v1207_v12  ;;  %v1334_v60 = vadd.f32 %v1936_v7, %v1269_v6  ;;  %v1761_v8 = vunpack.c.h.bf16 %v1787_v50 }
 0x12b   : > { %v1900_v14 = vpop.f32.mrb[24].mxu0  ;;  %v1337_v15 = vadd.f32 %v1939_v13, %v1272_v11 }
 0x12c   : > { %v1901_v16 = vpop.f32.mrb[25].mxu0  ;;  %v1940_v17 = vpop.f32.mrb[24].mxu1 }
 0x12d   : > { %v1902_v18 = vadd.f32 %v1901_v16, %v1900_v14  ;;  %v1903_v19 = vpop.f32.mrb[26].mxu0  ;;  %v1941_v20 = vpop.f32.mrb[25].mxu1 }
 0x12e   : > { %v1904_v21 = vpop.f32.mrb[27].mxu0  ;;  %v1942_v23 = vadd.f32 %v1941_v20, %v1940_v17  ;;  %v1943_v10 = vpop.f32.mrb[26].mxu1 }
 0x12f   : > { %v1277_v22 = vadd.f32 %v1902_v18, %v1212_v26  ;;  %v1905_v24 = vadd.f32 %v1904_v21, %v1903_v19  ;;  %v1944_v25 = vpop.f32.mrb[27].mxu1 }
 0x130   : > { %v1945_v29 = vadd.f32 %v1944_v25, %v1943_v10 }
 0x131   : > { %v1280_v27 = vadd.f32 %v1905_v24, %v1215_v28  ;;  %v1342_v12 = vadd.f32 %v1942_v23, %v1277_v22 }
 0x133   : > { %v1906_v30 = vpop.f32.mrb[28].mxu0  ;;  %v1345_v31 = vadd.f32 %v1945_v29, %v1280_v27 }
 0x134   : > { %v1907_v32 = vpop.f32.mrb[29].mxu0  ;;  %v1946_v33 = vpop.f32.mrb[28].mxu1 }
 0x135   : > { %v1908_v34 = vadd.f32 %v1907_v32, %v1906_v30  ;;  %v1909_v35 = vpop.f32.mrb[30].mxu0  ;;  %v1947_v36 = vpop.f32.mrb[29].mxu1 }
 0x136   : > { %v1910_v37 = vpop.f32.mrb[31].mxu0  ;;  %v1948_v38 = vadd.f32 %v1947_v36, %v1946_v33  ;;  %v1949_v39 = vpop.f32.mrb[30].mxu1 }
 0x137   : > { %v1285_v26 = vadd.f32 %v1908_v34, %v1220_v42  ;;  %v1911_v28 = vadd.f32 %v1910_v37, %v1909_v35  ;;  %v1950_v40 = vpop.f32.mrb[31].mxu1 }
 0x138   : > { %v1951_v43 = vadd.f32 %v1950_v40, %v1949_v39 }
 0x139   : > { %v1288_v41 = vadd.f32 %v1911_v28, %v2486_v44  ;;  %v1350_v47 = vadd.f32 %v1948_v38, %v1285_v26 }
 0x13b   : > { %v1353_v51 = vadd.f32 %v1951_v43, %v1288_v41 }
 0x13c   : > { %v1982_v53 = vpop.f32.mrb[32].mxu0 }
 0x13d   : > { %v1399_v56 = vadd.f32 %v1982_v53, %v1334_v60  ;;  %v1986_v57 = vpop.f32.mrb[32].mxu1  ;;  %v1390_v42 = vpop.f32.mrb[33].mxu0 }
 0x13e   : > { %v1415_v63 = vadd.f32 %v1986_v57, %v1350_v47  ;;  %v1391_v0 = vadd.f32 %v1390_v42, %v2488_v62  ;;  %v1406_v44 = vpop.f32.mrb[33].mxu1  ;;  %v1983_v1 = vpop.f32.mrb[34].mxu0 }
 0x13f   : > { %v1439_v4 = vadd.f32 %v1756_v52, %v1399_v56  ;;  %v1407_v5 = vadd.f32 %v1406_v44, %v1342_v12  ;;  %v1402_v6 = vadd.f32 %v1983_v1, %v1337_v15  ;;  %v1987_v7 = vpop.f32.mrb[34].mxu1  ;;  %v1393_v58 = vpop.f32.mrb[35].mxu0 }
 0x140   : > { %v1443_v9 = vadd.f32 %v1764_v54, %v1415_v63  ;;  %v1437_v11 = vadd.f32 %v1752_v55, %v1391_v0  ;;  %v1418_v13 = vadd.f32 %v1987_v7, %v1353_v51  ;;  %v1394_v60 = vadd.f32 %v1393_v58, %v2490_v46  ;;  %v1409_v14 = vpop.f32.mrb[35].mxu1 }
 0x141   : > { %v1441_v16 = vadd.f32 %v1760_v59, %v1407_v5  ;;  %v1440_v17 = vadd.f32 %v1757_v61, %v1402_v6  ;;  %v1410_v62 = vadd.f32 %v1409_v14, %v1345_v31  ;;  %v1447_v20 = vmax.f32 %v1439_v4, 0.0 }
 0x142   : > { %v1444_v18 = vadd.f32 %v1765_v2, %v1418_v13  ;;  %v1438_v19 = vadd.f32 %v1753_v3, %v1394_v60  ;;  %v1451_v23 = vmax.f32 %v1443_v9, 0.0  ;;  %v1445_v15 = vmax.f32 %v1437_v11, 0.0 }
 0x143   : > { %v1448_v21 = vmax.f32 %v1440_v17, 0.0  ;;  %v1442_v22 = vadd.f32 %v1761_v8, %v1410_v62  ;;  %v1449_v25 = vmax.f32 %v1441_v16, 0.0 }
 0x144   : > { %v1452_v10 = vmax.f32 %v1444_v18, 0.0  ;;  %v1446_v24 = vmax.f32 %v1438_v19, 0.0 }
 0x145   : > { %v1774_v46 = vpack.c.bf16 %v1448_v21, %v1447_v20  ;;  %v1450_v27 = vmax.f32 %v1442_v22, 0.0 }
 0x146   : > { %v1784_v29 = vpack.c.bf16 %v1452_v10, %v1451_v23  ;;  %v1769_v12 = vpack.c.bf16 %v1446_v24, %v1445_v15 }
 0x147   : > { %1789 = vst [vmem:[%s286_s24 + $0x8] sm:$0xff] %v1774_v46   ;;  %v1779_v30 = vpack.c.bf16 %v1450_v27, %v1449_v25 }
 0x148   : > { %1791 = vst [vmem:[%s286_s24 + $0x18] sm:$0xff] %v1784_v29   ;;  %1770 = vst [vmem:[%s286_s24] sm:$0xff] %v1769_v12  }
 0x149   : > { %1790 = vst [vmem:[%s286_s24 + $0x10] sm:$0xff] %v1779_v30  }
 0x14a PF: > { %s14_s17 = sadd.s32 1, %s2175_s17   ;;  %s2520_s15 = smov %s2171_s16 }
 0x14b   : > { %p11_p5 = scmp.ge.s32.totalorder %s14_s17, 4   ;;  %s2521_s16 = smov %s2523_s18 }
 0x14d   :  { %13 = sbr.rel (!%p11_p5) target bundleno = 2 (0x2), region = 75 }

// kernel: _lambda_.30
= control target key start
LH: loop header
LB: loop body
LE: loop exit
PB: predicated region body
PF: predicated region fallthrough
CT: control target
= control target key end

     0   :  { %s1566_s12 = smov 0   ;;  %s1568_s13 = smov 0   ;;  %s1836_s0 = inlined_call_operand.vmem [shape: bf16[32,1152], index: 0, kind: input, shape index: {}]   ;;  %s1837_s1 = inlined_call_operand.vmem [shape: bf16[1152,128], index: 1, kind: input, shape index: {}]   ;;  %s1838_s2 = inlined_call_operand.vmem [shape: f32[1,128], index: 2, kind: input, shape index: {}]   ;;  %s1839_s3 = inlined_call_operand.vmem [shape: bf16[32,128], index: 3, kind: output, shape index: {}]  }
   0x1   :  { %s1570_s14 = smov 0  }
   0x2 LB: > { %s25_s15 = sadd.s32 1, %s1538_s13  ;;  %p1193_p0 = scmp.ge.s32.totalorder %s1542_s14, 1  ;;  %s1542_s14 = sphi %s1570_s14, %s13_s14   ;;  %s1538_s13 = sphi %s1568_s13, %s1841_s13   ;;  %s1534_s12 = sphi %s1566_s12, %s1840_s12  }
   0x3   : > { %p27_p1 = scmp.ge.s32.totalorder %s25_s15, 2  ;;  %p170_p2 = scmp.lt.s32.totalorder %s1542_s14, 3 }
   0x5   : > { %s1843_s15 = smov (%p27_p1, %s25_s15), 0  ;;  %p171_p3 = pnand %p1193_p0, %p170_p2 }
   0x6   : > { %v1435_v0 = vld [vmem:[%s1837_s1 + $0x40] sm:$0xff] (!%p171_p3)   ;;  %v1439_v4 = vld [vmem:[%s1837_s1 + $0x48] sm:$0xff] (!%p171_p3)   ;;  %v1443_v8 = vld [vmem:[%s1837_s1 + $0x50] sm:$0xff] (!%p171_p3)   ;;  %s1194_s21 = sshll.u32 (!%p171_p3), %s1534_s12, 1  ;;  %vm1545_vm0 = vmmov (!%p171_p3), 0  }
   0x7   : > { %174 = sbr.rel (%p171_p3) target bundleno = 324 (0x144), region = 32  ;;  %v1436_v1 = vld [vmem:[%s1837_s1] sm:$0xff] (!%p171_p3)   ;;  %1291 = vmatprep.subr.bf16.mxu0 (!%p171_p3), %v1435_v0  ;;  %v1440_v5 = vld [vmem:[%s1837_s1 + $0x8] sm:$0xff] (!%p171_p3)   ;;  %v1444_v9 = vld [vmem:[%s1837_s1 + $0x10] sm:$0xff] (!%p171_p3)   ;;  %p206_p4 = scmp.lt.s32.totalorder (!%p171_p3), %s1194_s21, 3 }
   0x8   : > { %v1437_v2 = vld [vmem:[%s1837_s1 + $0xc0] sm:$0xff] (!%p171_p3)   ;;  %1292 = vmatpush3.bf16.msra.mxu0 (!%p171_p3), %v1436_v1  ;;  %v1441_v6 = vld [vmem:[%s1837_s1 + $0xc8] sm:$0xff] (!%p171_p3)   ;;  %v1445_v10 = vld [vmem:[%s1837_s1 + $0xd0] sm:$0xff] (!%p171_p3)  }
   0x9   : > { %v1438_v3 = vld [vmem:[%s1837_s1 + $0x80] sm:$0xff] (!%p171_p3)   ;;  %1313 = vmatprep.subr.bf16.mxu1 (!%p171_p3), %v1437_v2  ;;  %1293 = vmatprep.subr.bf16.mxu0 (!%p171_p3), %v1439_v4  ;;  %v1442_v7 = vld [vmem:[%s1837_s1 + $0x88] sm:$0xff] (!%p171_p3)   ;;  %v1446_v11 = vld [vmem:[%s1837_s1 + $0x90] sm:$0xff] (!%p171_p3)  }
   0xa   : > { %1314 = vmatpush3.bf16.msra.mxu1 (!%p171_p3), %v1438_v3  ;;  %v1447_v12 = vld [vmem:[%s1837_s1 + $0x58] sm:$0xff] (!%p171_p3)   ;;  %v1451_v16 = vld [vmem:[%s1837_s1 + $0x60] sm:$0xff] (!%p171_p3)   ;;  %v1455_v20 = vld [vmem:[%s1837_s1 + $0x68] sm:$0xff] (!%p171_p3)  }
   0xb   : > { %1315 = vmatprep.subr.bf16.mxu1 (!%p171_p3), %v1441_v6  ;;  %v1448_v13 = vld [vmem:[%s1837_s1 + $0x18] sm:$0xff] (!%p171_p3)   ;;  %v1452_v17 = vld [vmem:[%s1837_s1 + $0x20] sm:$0xff] (!%p171_p3)   ;;  %v1456_v21 = vld [vmem:[%s1837_s1 + $0x28] sm:$0xff] (!%p171_p3)   ;;  %v1544_v6 = vmov (!%p171_p3), 0.0  }
   0xc   : > { %1294 = vmatpush3.bf16.msra.mxu0 (!%p171_p3), %v1440_v5  ;;  %v1449_v14 = vld [vmem:[%s1837_s1 + $0xd8] sm:$0xff] (!%p171_p3)   ;;  %v1453_v18 = vld [vmem:[%s1837_s1 + $0xe0] sm:$0xff] (!%p171_p3)   ;;  %v1457_v22 = vld [vmem:[%s1837_s1 + $0xe8] sm:$0xff] (!%p171_p3)  }
   0xd   : > { %1295 = vmatprep.subr.bf16.mxu0 (!%p171_p3), %v1443_v8  ;;  %v1450_v15 = vld [vmem:[%s1837_s1 + $0x98] sm:$0xff] (!%p171_p3)   ;;  %v1454_v19 = vld [vmem:[%s1837_s1 + $0xa0] sm:$0xff] (!%p171_p3)   ;;  %v1458_v23 = vld [vmem:[%s1837_s1 + $0xa8] sm:$0xff] (!%p171_p3)  }
   0xe   : > { %1316 = vmatpush3.bf16.msra.mxu1 %v1442_v7  ;;  %s1845_s21 = smov (!%p206_p4, %s1194_s21), 3  ;;  %v1459_v24 = vld [vmem:[%s1837_s1 + $0x70] sm:$0xff]   ;;  %v1463_v28 = vld [vmem:[%s1837_s1 + $0x78] sm:$0xff]   ;;  %v1470_v34 = vld [vmem:[%s1837_s1 + $0x140] sm:$0xff]  }
   0xf   : > { %1317 = vmatprep.subr.bf16.mxu1 %v1445_v10  ;;  %s1408_s20 = smul.u32 36, %s1845_s21  ;;  %v1460_v25 = vld [vmem:[%s1837_s1 + $0x30] sm:$0xff]   ;;  %v1464_v29 = vld [vmem:[%s1837_s1 + $0x38] sm:$0xff]   ;;  %v1474_v37 = vld [vmem:[%s1837_s1 + $0x100] sm:$0xff]  }
  0x10   : > { %1296 = vmatpush3.bf16.msra.mxu0 %v1444_v9  ;;  %v1461_v26 = vld [vmem:[%s1837_s1 + $0xf0] sm:$0xff]   ;;  %v1465_v30 = vld [vmem:[%s1837_s1 + $0xf8] sm:$0xff]   ;;  %v1475_v38 = vld [vmem:[%s1837_s1 + $0x1c0] sm:$0xff]  }
  0x11   : > { %1297 = vmatprep.subr.bf16.mxu0 %v1447_v12  ;;  %v1462_v27 = vld [vmem:[%s1837_s1 + $0xb0] sm:$0xff]   ;;  %s1680_s4 = scalar_lea.vmem %s1836_s0, %s1408_s20  ;;  %v1469_v33 = vld [vmem:[%s1837_s1 + $0xb8] sm:$0xff]   ;;  %v1476_v39 = vld [vmem:[%s1837_s1 + $0x180] sm:$0xff]  }
  0x12   : > { %1318 = vmatpush3.bf16.msra.mxu1 %v1446_v11  ;;  %v1466_v31 = vld [vmem:[%s1680_s4] ss:$36 sps:$4 sm:$0xff]   ;;  %v1471_v35 = vld [vmem:[%s1680_s4 + $0x8] ss:$36 sps:$4 sm:$0xff]   ;;  %v1481_v44 = vld [vmem:[%s1837_s1 + $0x150] sm:$0xff]  }
  0x13   : > { %1319 = vmatprep.subr.bf16.mxu1 %v1449_v14  ;;  %v1468_v32 = vld [vmem:[%s1680_s4 + $0x4] ss:$36 sps:$4 sm:$0xff]   ;;  %v1473_v36 = vld [vmem:[%s1680_s4 + $0xc] ss:$36 sps:$4 sm:$0xff]   ;;  %v1485_v48 = vld [vmem:[%s1837_s1 + $0x158] sm:$0xff]  }
  0x14   : > { %1298 = vmatpush3.bf16.msra.mxu0 %v1448_v13  ;;  %900 = vmatprep.mubr.bf16.mxu0 %v1468_v32  ;;  %v1477_v40 = vld [vmem:[%s1837_s1 + $0x148] sm:$0xff]   ;;  %v1482_v45 = vld [vmem:[%s1837_s1 + $0x110] sm:$0xff]   ;;  %v1486_v49 = vld [vmem:[%s1837_s1 + $0x118] sm:$0xff]  }
  0x15   : > { %1299 = vmatprep.subr.bf16.mxu0 %v1451_v16  ;;  %941 = vmatprep.mubr.bf16.mxu1 %v1473_v36  ;;  %v1478_v41 = vld [vmem:[%s1837_s1 + $0x108] sm:$0xff]   ;;  %v1483_v46 = vld [vmem:[%s1837_s1 + $0x1d0] sm:$0xff]   ;;  %v1487_v50 = vld [vmem:[%s1837_s1 + $0x1d8] sm:$0xff]  }
  0x16   : > { %1320 = vmatpush3.bf16.msra.mxu1 %v1450_v15  ;;  %v1479_v42 = vld [vmem:[%s1837_s1 + $0x1c8] sm:$0xff]   ;;  %v1484_v47 = vld [vmem:[%s1837_s1 + $0x190] sm:$0xff]   ;;  %v1488_v51 = vld [vmem:[%s1837_s1 + $0x198] sm:$0xff]  }
  0x17   : > { %1321 = vmatprep.subr.bf16.mxu1 %v1453_v18  ;;  %v1480_v43 = vld [vmem:[%s1837_s1 + $0x188] sm:$0xff]   ;;  %v1489_v52 = vld [vmem:[%s1837_s1 + $0x160] sm:$0xff]   ;;  %v1497_v60 = vld [vmem:[%s1837_s1 + $0x170] sm:$0xff]  }
  0x18   : > { %1300 = vmatpush3.bf16.msra.mxu0 %v1452_v17  ;;  %v1490_v53 = vld [vmem:[%s1837_s1 + $0x120] sm:$0xff]   ;;  %v1493_v56 = vld [vmem:[%s1837_s1 + $0x168] sm:$0xff]   ;;  %v1498_v61 = vld [vmem:[%s1837_s1 + $0x130] sm:$0xff]  }
  0x19   : > { %1301 = vmatprep.subr.bf16.mxu0 %v1455_v20  ;;  %v1491_v54 = vld [vmem:[%s1837_s1 + $0x1e0] sm:$0xff]   ;;  %v1494_v57 = vld [vmem:[%s1837_s1 + $0x128] sm:$0xff]   ;;  %v1499_v62 = vld [vmem:[%s1837_s1 + $0x1f0] sm:$0xff]  }
  0x1a   : > { %1322 = vmatpush3.bf16.msra.mxu1 %v1454_v19  ;;  %v1492_v55 = vld [vmem:[%s1837_s1 + $0x1a0] sm:$0xff]   ;;  %v1495_v58 = vld [vmem:[%s1837_s1 + $0x1e8] sm:$0xff]   ;;  %v1500_v63 = vld [vmem:[%s1837_s1 + $0x1b0] sm:$0xff]  }
  0x1b   : > { %1323 = vmatprep.subr.bf16.mxu1 %v1457_v22  ;;  %v1496_v59 = vld [vmem:[%s1837_s1 + $0x1a8] sm:$0xff]   ;;  %v1501_v0 = vld [vmem:[%s1837_s1 + $0x178] sm:$0xff]   ;;  %v1504_v3 = vld [vmem:[%s1680_s4 + $0x10] ss:$36 sps:$4 sm:$0xff]  }
  0x1c   : > { %1302 = vmatpush3.bf16.msra.mxu0 %v1456_v21  ;;  %v1502_v1 = vld [vmem:[%s1837_s1 + $0x138] sm:$0xff]   ;;  %v1511_v9 = vld [vmem:[%s1837_s1 + $0x200] sm:$0xff]   ;;  %v1512_v10 = vld [vmem:[%s1837_s1 + $0x208] sm:$0xff]  }
  0x1d   : > { %1303 = vmatprep.subr.bf16.mxu0 %v1459_v24  ;;  %v1503_v2 = vld [vmem:[%s1837_s1 + $0x1f8] sm:$0xff]   ;;  %v1513_v11 = vld [vmem:[%s1837_s1 + $0x210] sm:$0xff]   ;;  %v1515_v13 = vld [vmem:[%s1837_s1 + $0x220] sm:$0xff]  }
  0x1e   : > { %1324 = vmatpush3.bf16.msra.mxu1 %v1458_v23  ;;  %v1506_v4 = vld [vmem:[%s1680_s4 + $0x14] ss:$36 sps:$4 sm:$0xff]   ;;  %v1510_v8 = vld [vmem:[%s1680_s4 + $0x1c] ss:$36 sps:$4 sm:$0xff]   ;;  %v1516_v14 = vld [vmem:[%s1837_s1 + $0x228] sm:$0xff]  }
  0x1f   : > { %1325 = vmatprep.subr.bf16.mxu1 %v1461_v26  ;;  %v1507_v5 = vld [vmem:[%s1837_s1 + $0x1b8] sm:$0xff]   ;;  %v1517_v15 = vld [vmem:[%s1837_s1 + $0x230] sm:$0xff]   ;;  %v1519_v17 = vld [vmem:[%s1680_s4 + $0x20] ss:$36 sps:$4 sm:$0xff]  }
  0x20   : > { %1304 = vmatpush3.bf16.msra.mxu0 %v1460_v25  ;;  %v1508_v7 = vld [vmem:[%s1680_s4 + $0x18] ss:$36 sps:$4 sm:$0xff]   ;;  %v1198_v19 = vld [vmem:[%s1838_s2] ss:$0 sm:$0xff]  ;;  %s1197_s4 = sshll.u32 %s1845_s21, 2 }
  0x21   : > { %1305 = vmatprep.subr.bf16.mxu0 %v1463_v28  ;;  %v1514_v12 = vld [vmem:[%s1837_s1 + $0x218] sm:$0xff]   ;;  %s226_s7 = scalar_lea.vmem %s1839_s3, %s1197_s4 }
  0x22   : > { %1326 = vmatpush3.bf16.msra.mxu1 %v1462_v27  ;;  %v1518_v16 = vld [vmem:[%s1837_s1 + $0x238] sm:$0xff]  }
  0x23   : > { %1327 = vmatprep.subr.bf16.mxu1 %v1465_v30 }
  0x24   : > { %1306 = vmatpush3.bf16.msra.mxu0 %v1464_v29 }
  0x25   : > { %1335 = vmatprep.subr.bf16.mxu0 %v1470_v34 }
  0x26   : > { %1328 = vmatpush3.bf16.msra.mxu1 %v1469_v33 }
  0x27   : > { %901 = vmatmul.mubr.bf16.vlgmr.msra.gmra.mrb[0].mxu0 %v1466_v31  ;;  %1357 = vmatprep.subr.bf16.mxu1 %v1475_v38 }
  0x28   : > { %1336 = vmatpush3.bf16.msra.mxu0 %v1474_v37  ;;  %982 = vmatprep.mubr.bf16.mxu0 %v1506_v4 }
  0x29   : > { %942 = vmatmul.mubr.bf16.vlgmr.msra.gmra.mrb[0].mxu1 %v1471_v35  ;;  %1337 = vmatprep.subr.bf16.mxu0 %v1477_v40 }
  0x2a   : > { %1358 = vmatpush3.bf16.msra.mxu1 %v1476_v39  ;;  %1023 = vmatprep.mubr.bf16.mxu1 %v1510_v8 }
  0x2b   : > { %1359 = vmatprep.subr.bf16.mxu1 %v1479_v42 }
  0x2c   : > { %1338 = vmatpush3.bf16.msra.mxu0 %v1478_v41 }
  0x2d   : > { %1339 = vmatprep.subr.bf16.mxu0 %v1481_v44 }
  0x2e   : > { %1360 = vmatpush3.bf16.msra.mxu1 %v1480_v43 }
  0x2f   : > { %1361 = vmatprep.subr.bf16.mxu1 %v1483_v46 }
  0x30   : > { %1340 = vmatpush3.bf16.msra.mxu0 %v1482_v45 }
  0x31   : > { %1341 = vmatprep.subr.bf16.mxu0 %v1485_v48 }
  0x32   : > { %1362 = vmatpush3.bf16.msra.mxu1 %v1484_v47 }
  0x33   : > { %1363 = vmatprep.subr.bf16.mxu1 %v1487_v50 }
  0x34   : > { %1342 = vmatpush3.bf16.msra.mxu0 %v1486_v49 }
  0x35   : > { %1343 = vmatprep.subr.bf16.mxu0 %v1489_v52 }
  0x36   : > { %1364 = vmatpush3.bf16.msra.mxu1 %v1488_v51 }
  0x37   : > { %1365 = vmatprep.subr.bf16.mxu1 %v1491_v54 }
  0x38   : > { %1344 = vmatpush3.bf16.msra.mxu0 %v1490_v53 }
  0x39   : > { %1345 = vmatprep.subr.bf16.mxu0 %v1493_v56 }
  0x3a   : > { %1366 = vmatpush3.bf16.msra.mxu1 %v1492_v55 }
  0x3b   : > { %1367 = vmatprep.subr.bf16.mxu1 %v1495_v58 }
  0x3c   : > { %1346 = vmatpush3.bf16.msra.mxu0 %v1494_v57 }
  0x3d   : > { %1347 = vmatprep.subr.bf16.mxu0 %v1497_v60 }
  0x3e   : > { %1368 = vmatpush3.bf16.msra.mxu1 %v1496_v59 }
  0x3f   : > { %1369 = vmatprep.subr.bf16.mxu1 %v1499_v62 }
  0x40   : > { %1348 = vmatpush3.bf16.msra.mxu0 %v1498_v61 }
  0x41   : > { %1349 = vmatprep.subr.bf16.mxu0 %v1501_v0 }
  0x42   : > { %1370 = vmatpush3.bf16.msra.mxu1 %v1500_v63 }
  0x43   : > { %1371 = vmatprep.subr.bf16.mxu1 %v1503_v2 }
  0x44   : > { %1350 = vmatpush3.bf16.msra.mxu0 %v1502_v1 }
  0x45   : > { %1388 = vmatprep.subr.bf16.mxu0 %v1544_v6 }
  0x46   : > { %1372 = vmatpush3.bf16.msra.mxu1 %v1507_v5 }
  0x47   : > { %983 = vmatmul.mubr.bf16.vlgmr.msra.gmra.mrb[4].mxu0 %v1504_v3 }
  0x48   : > { %1404 = vmatprep.mubr.msk.bf16.mxu0 %vm1545_vm0, %v1544_v6  ;;  %1389 = vmatpush3.bf16.msra.mxu0 %v1511_v9 }
  0x49   : > { %1024 = vmatmul.mubr.bf16.vlgmr.msra.gmra.mrb[4].mxu1 %v1508_v7  ;;  %1390 = vmatprep.subr.bf16.mxu0 %v1544_v6 }
  0x4c   : > { %1391 = vmatpush3.bf16.msra.mxu0 %v1512_v10 }
  0x4d   : > { %1392 = vmatprep.subr.bf16.mxu0 %v1544_v6 }
  0x50   : > { %1393 = vmatpush3.bf16.msra.mxu0 %v1513_v11 }
  0x51   : > { %1394 = vmatprep.subr.bf16.mxu0 %v1544_v6 }
  0x54   : > { %1395 = vmatpush3.bf16.msra.mxu0 %v1514_v12 }
  0x55   : > { %1396 = vmatprep.subr.bf16.mxu0 %v1544_v6 }
  0x58   : > { %1397 = vmatpush3.bf16.msra.mxu0 %v1515_v13 }
  0x59   : > { %1398 = vmatprep.subr.bf16.mxu0 %v1544_v6 }
  0x5c   : > { %1399 = vmatpush3.bf16.msra.mxu0 %v1516_v14 }
  0x5d   : > { %1400 = vmatprep.subr.bf16.mxu0 %v1544_v6 }
  0x60   : > { %1401 = vmatpush3.bf16.msra.mxu0 %v1517_v15 }
  0x61   : > { %1402 = vmatprep.subr.bf16.mxu0 %v1544_v6 }
  0x64   : > { %1403 = vmatpush3.bf16.msra.mxu0 %v1518_v16 }
  0x67   : > { %1405 = vmatmul.mubr.bf16.vlgmr.msra.gmra.mrb[8].mxu0 %v1519_v17 }
  0xfa   : > { %v1307_v18 = vpop.f32.mrb[0].mxu0 }
  0xfb   : > { %v1308_v20 = vpop.f32.mrb[1].mxu0 }
  0xfc   : > { %v1309_v21 = vadd.f32 %v1308_v20, %v1307_v18  ;;  %v1310_v22 = vpop.f32.mrb[2].mxu0  ;;  %v1329_v23 = vpop.f32.mrb[0].mxu1 }
  0xfd   : > { %v1311_v24 = vpop.f32.mrb[3].mxu0  ;;  %v1330_v27 = vpop.f32.mrb[1].mxu1 }
  0xfe   : > { %v903_v25 = vadd.f32 %v1309_v21, %v1198_v19  ;;  %v1312_v26 = vadd.f32 %v1311_v24, %v1310_v22  ;;  %v1331_v28 = vadd.f32 %v1330_v27, %v1329_v23  ;;  %v1332_v29 = vpop.f32.mrb[2].mxu1 }
  0xff   : > { %v1333_v31 = vpop.f32.mrb[3].mxu1 }
 0x100   : > { %v906_v30 = vadd.f32 %v1312_v26, %v1198_v19  ;;  %v944_v32 = vadd.f32 %v1331_v28, %v903_v25  ;;  %v1334_v33 = vadd.f32 %v1333_v31, %v1332_v29 }
 0x102   : > { %v947_v34 = vadd.f32 %v1334_v33, %v906_v30 }
 0x11a   : > { %v1351_v35 = vpop.f32.mrb[4].mxu0 }
 0x11b   : > { %v1352_v36 = vpop.f32.mrb[5].mxu0 }
 0x11c   : > { %v1353_v37 = vadd.f32 %v1352_v36, %v1351_v35  ;;  %v1354_v38 = vpop.f32.mrb[6].mxu0  ;;  %v1373_v39 = vpop.f32.mrb[4].mxu1 }
 0x11d   : > { %v1355_v40 = vpop.f32.mrb[7].mxu0  ;;  %v1374_v43 = vpop.f32.mrb[5].mxu1 }
 0x11e   : > { %v985_v41 = vadd.f32 %v1353_v37, %v944_v32  ;;  %v1356_v42 = vadd.f32 %v1355_v40, %v1354_v38  ;;  %v1375_v44 = vadd.f32 %v1374_v43, %v1373_v39  ;;  %v1376_v45 = vpop.f32.mrb[6].mxu1 }
 0x11f   : > { %v1377_v47 = vpop.f32.mrb[7].mxu1 }
 0x120   : > { %v988_v46 = vadd.f32 %v1356_v42, %v947_v34  ;;  %v1378_v48 = vadd.f32 %v1377_v47, %v1376_v45  ;;  %v1026_v49 = vadd.f32 %v1375_v44, %v985_v41 }
 0x122   : > { %v1029_v50 = vadd.f32 %v1378_v48, %v988_v46 }
 0x13a   : > { %v1066_v51 = vpop.f32.mrb[8].mxu0 }
 0x13b   : > { %v1067_v52 = vadd.f32 %v1066_v51, %v1026_v49  ;;  %v1406_v53 = vpop.f32.mrb[9].mxu0 }
 0x13c   : > { %v1069_v54 = vpop.f32.mrb[10].mxu0 }
 0x13d   : > { %v1070_v55 = vadd.f32 %v1069_v54, %v1029_v50  ;;  %v1407_v56 = vpop.f32.mrb[11].mxu0  ;;  %v1073_v57 = vmax.f32 %v1067_v52, 0.0 }
 0x13f   : > { %v1074_v58 = vmax.f32 %v1070_v55, 0.0 }
 0x141   : > { %v1289_v59 = vpack.c.bf16 %v1074_v58, %v1073_v57 }
 0x143   : > { %1290 = vst [vmem:[%s226_s7] sm:$0xff] %v1289_v59  }
 0x144 PF: > { %s13_s14 = sadd.s32 1, %s1542_s14   ;;  %s1840_s12 = smov %s1538_s13 }
 0x145   : > { %p10_p5 = scmp.ge.s32.totalorder %s13_s14, 4   ;;  %s1841_s13 = smov %s1843_s15 }
 0x147   :  { %12 = sbr.rel (!%p10_p5) target bundleno = 2 (0x2), region = 68 }

// kernel: _lambda_.31
= control target key start
LH: loop header
LB: loop body
LE: loop exit
PB: predicated region body
PF: predicated region fallthrough
CT: control target
= control target key end

     0   :  { %s600_s12 = smov 0   ;;  %s602_s13 = smov 0   ;;  %s663_s0 = inlined_call_operand.vmem [shape: bf16[32,128], index: 0, kind: input, shape index: {}]   ;;  %s664_s1 = inlined_call_operand.vmem [shape: bf16[128,128], index: 1, kind: input, shape index: {}]   ;;  %s665_s2 = inlined_call_operand.vmem [shape: f32[1,128], index: 2, kind: input, shape index: {}]   ;;  %s666_s3 = inlined_call_operand.vmem [shape: bf16[32,128], index: 3, kind: output, shape index: {}]  }
   0x1   :  { %s604_s14 = smov 0  }
   0x2 LB: > { %s25_s15 = sadd.s32 1, %s572_s13  ;;  %p464_p0 = scmp.ge.s32.totalorder %s576_s14, 1  ;;  %s576_s14 = sphi %s604_s14, %s13_s14   ;;  %s572_s13 = sphi %s602_s13, %s668_s13   ;;  %s568_s12 = sphi %s600_s12, %s667_s12  }
   0x3   : > { %p27_p1 = scmp.ge.s32.totalorder %s25_s15, 2  ;;  %p169_p2 = scmp.lt.s32.totalorder %s576_s14, 3 }
   0x5   : > { %s670_s15 = smov (%p27_p1, %s25_s15), 0  ;;  %p170_p3 = pnand %p464_p0, %p169_p2 }
   0x6   : > { %v545_v0 = vld [vmem:[%s664_s1] sm:$0xff] (!%p170_p3)   ;;  %v578_v1 = vmov (!%p170_p3), 0.0   ;;  %v546_v2 = vld [vmem:[%s664_s1 + $0x8] sm:$0xff] (!%p170_p3)   ;;  %vm579_vm0 = vmmov (!%p170_p3), 0   ;;  %s465_s20 = sshll.u32 (!%p170_p3), %s568_s12, 1  ;;  %v547_v3 = vld [vmem:[%s664_s1 + $0x10] sm:$0xff] (!%p170_p3)  }
   0x7   : > { %173 = sbr.rel (%p170_p3) target bundleno = 258 (0x102), region = 32  ;;  %499 = vmatprep.subr.bf16.mxu0 (!%p170_p3), %v578_v1  ;;  %515 = vmatprep.mubr.msk.bf16.mxu0 (!%p170_p3), %vm579_vm0, %v578_v1  ;;  %p204_p4 = scmp.lt.s32.totalorder (!%p170_p3), %s465_s20, 3  ;;  %v548_v4 = vld [vmem:[%s664_s1 + $0x18] sm:$0xff] (!%p170_p3)   ;;  %v549_v5 = vld [vmem:[%s664_s1 + $0x20] sm:$0xff] (!%p170_p3)   ;;  %v550_v6 = vld [vmem:[%s664_s1 + $0x28] sm:$0xff] (!%p170_p3)  }
   0x8   : > { %500 = vmatpush3.bf16.msra.mxu0 (!%p170_p3), %v545_v0  ;;  %v551_v7 = vld [vmem:[%s664_s1 + $0x30] sm:$0xff] (!%p170_p3)   ;;  %v552_v8 = vld [vmem:[%s664_s1 + $0x38] sm:$0xff] (!%p170_p3)   ;;  %v469_v10 = vld [vmem:[%s665_s2] ss:$0 sm:$0xff] (!%p170_p3) }
   0x9   : > { %501 = vmatprep.subr.bf16.mxu0 (!%p170_p3), %v578_v1 }
   0xc   : > { %502 = vmatpush3.bf16.msra.mxu0 (!%p170_p3), %v546_v2 }
   0xd   : > { %503 = vmatprep.subr.bf16.mxu0 (!%p170_p3), %v578_v1 }
   0xe   : > { %s672_s20 = smov (!%p204_p4, %s465_s20), 3 }
   0xf   : > { %s466_s23 = sshll.u32 %s672_s20, 2 }
  0x10   : > { %s207_s26 = scalar_lea.vmem %s663_s0, %s466_s23  ;;  %504 = vmatpush3.bf16.msra.mxu0 %v547_v3  ;;  %s223_s17 = scalar_lea.vmem %s666_s3, %s466_s23 }
  0x11   : > { %505 = vmatprep.subr.bf16.mxu0 %v578_v1  ;;  %v553_v9 = vld [vmem:[%s207_s26] sm:$0xff]  }
  0x14   : > { %506 = vmatpush3.bf16.msra.mxu0 %v548_v4 }
  0x15   : > { %507 = vmatprep.subr.bf16.mxu0 %v578_v1 }
  0x18   : > { %508 = vmatpush3.bf16.msra.mxu0 %v549_v5 }
  0x19   : > { %509 = vmatprep.subr.bf16.mxu0 %v578_v1 }
  0x1c   : > { %510 = vmatpush3.bf16.msra.mxu0 %v550_v6 }
  0x1d   : > { %511 = vmatprep.subr.bf16.mxu0 %v578_v1 }
  0x20   : > { %512 = vmatpush3.bf16.msra.mxu0 %v551_v7 }
  0x21   : > { %513 = vmatprep.subr.bf16.mxu0 %v578_v1 }
  0x24   : > { %514 = vmatpush3.bf16.msra.mxu0 %v552_v8 }
  0x27   : > { %516 = vmatmul.mubr.bf16.vlgmr.msra.gmra.mrb[0].mxu0 %v553_v9 }
  0xfa   : > { %v339_v11 = vpop.f32.mrb[0].mxu0 }
  0xfb   : > { %v517_v12 = vpop.f32.mrb[1].mxu0  ;;  %v340_v14 = vadd.f32 %v469_v10, %v339_v11 }
  0xfc   : > { %v342_v13 = vpop.f32.mrb[2].mxu0 }
  0xfd   : > { %v343_v15 = vadd.f32 %v469_v10, %v342_v13  ;;  %v518_v16 = vpop.f32.mrb[3].mxu0 }
  0xff   : > { %v488_v17 = vpack.c.bf16 %v343_v15, %v340_v14 }
 0x101   : > { %489 = vst [vmem:[%s223_s17] sm:$0xff] %v488_v17  }
 0x102 PF: > { %s13_s14 = sadd.s32 1, %s576_s14   ;;  %s667_s12 = smov %s572_s13 }
 0x103   : > { %p10_p5 = scmp.ge.s32.totalorder %s13_s14, 4   ;;  %s668_s13 = smov %s670_s15 }
 0x105   :  { %12 = sbr.rel (!%p10_p5) target bundleno = 2 (0x2), region = 68 }

// kernel: _lambda_.32
= control target key start
LH: loop header
LB: loop body
LE: loop exit
PB: predicated region body
PF: predicated region fallthrough
CT: control target
= control target key end

     0   :  { %s1658_s15 = smov 0   ;;  %s1660_s16 = smov 0   ;;  %s1931_s0 = inlined_call_operand.vmem [shape: bf16[32,1152], index: 0, kind: input, shape index: {}]   ;;  %s1932_s1 = inlined_call_operand.vmem [shape: bf16[1152,128], index: 1, kind: input, shape index: {}]   ;;  %s1933_s2 = inlined_call_operand.vmem [shape: f32[1,128], index: 2, kind: input, shape index: {}]   ;;  %s1934_s3 = inlined_call_operand.vmem [shape: bf16[32,128], index: 3, kind: input, shape index: {}]   ;;  %s1935_s4 = inlined_call_operand.vmem [shape: bf16[32,128], index: 4, kind: output, shape index: {}]  }
   0x1   :  { %s1662_s17 = smov 0  }
   0x2 LB: > { %s26_s18 = sadd.s32 1, %s1625_s16  ;;  %p1274_p0 = scmp.ge.s32.totalorder %s1629_s17, 1  ;;  %s1629_s17 = sphi %s1662_s17, %s14_s17   ;;  %s1625_s16 = sphi %s1660_s16, %s1937_s16   ;;  %s1621_s15 = sphi %s1658_s15, %s1936_s15  }
   0x3   : > { %p28_p1 = scmp.ge.s32.totalorder %s26_s18, 2  ;;  %p211_p2 = scmp.lt.s32.totalorder %s1629_s17, 3 }
   0x5   : > { %s1939_s18 = smov (%p28_p1, %s26_s18), 0  ;;  %p212_p3 = pnand %p1274_p0, %p211_p2 }
   0x6   : > { %v1522_v0 = vld [vmem:[%s1932_s1 + $0x40] sm:$0xff] (!%p212_p3)   ;;  %v1526_v4 = vld [vmem:[%s1932_s1 + $0x48] sm:$0xff] (!%p212_p3)   ;;  %v1530_v8 = vld [vmem:[%s1932_s1 + $0x50] sm:$0xff] (!%p212_p3)   ;;  %s1275_s25 = sshll.u32 (!%p212_p3), %s1621_s15, 1  ;;  %vm1632_vm0 = vmmov (!%p212_p3), 0  }
   0x7   : > { %215 = sbr.rel (%p212_p3) target bundleno = 326 (0x146), region = 36  ;;  %v1523_v1 = vld [vmem:[%s1932_s1] sm:$0xff] (!%p212_p3)   ;;  %1378 = vmatprep.subr.bf16.mxu0 (!%p212_p3), %v1522_v0  ;;  %v1527_v5 = vld [vmem:[%s1932_s1 + $0x8] sm:$0xff] (!%p212_p3)   ;;  %v1531_v9 = vld [vmem:[%s1932_s1 + $0x10] sm:$0xff] (!%p212_p3)   ;;  %p257_p4 = scmp.lt.s32.totalorder (!%p212_p3), %s1275_s25, 3 }
   0x8   : > { %v1524_v2 = vld [vmem:[%s1932_s1 + $0xc0] sm:$0xff] (!%p212_p3)   ;;  %1379 = vmatpush3.bf16.msra.mxu0 (!%p212_p3), %v1523_v1  ;;  %v1528_v6 = vld [vmem:[%s1932_s1 + $0xc8] sm:$0xff] (!%p212_p3)   ;;  %v1532_v10 = vld [vmem:[%s1932_s1 + $0xd0] sm:$0xff] (!%p212_p3)  }
   0x9   : > { %v1525_v3 = vld [vmem:[%s1932_s1 + $0x80] sm:$0xff] (!%p212_p3)   ;;  %1400 = vmatprep.subr.bf16.mxu1 (!%p212_p3), %v1524_v2  ;;  %1380 = vmatprep.subr.bf16.mxu0 (!%p212_p3), %v1526_v4  ;;  %v1529_v7 = vld [vmem:[%s1932_s1 + $0x88] sm:$0xff] (!%p212_p3)   ;;  %v1533_v11 = vld [vmem:[%s1932_s1 + $0x90] sm:$0xff] (!%p212_p3)  }
   0xa   : > { %1401 = vmatpush3.bf16.msra.mxu1 (!%p212_p3), %v1525_v3  ;;  %v1534_v12 = vld [vmem:[%s1932_s1 + $0x58] sm:$0xff] (!%p212_p3)   ;;  %v1538_v16 = vld [vmem:[%s1932_s1 + $0x60] sm:$0xff] (!%p212_p3)   ;;  %v1542_v20 = vld [vmem:[%s1932_s1 + $0x68] sm:$0xff] (!%p212_p3)  }
   0xb   : > { %1402 = vmatprep.subr.bf16.mxu1 (!%p212_p3), %v1528_v6  ;;  %v1535_v13 = vld [vmem:[%s1932_s1 + $0x18] sm:$0xff] (!%p212_p3)   ;;  %v1539_v17 = vld [vmem:[%s1932_s1 + $0x20] sm:$0xff] (!%p212_p3)   ;;  %v1543_v21 = vld [vmem:[%s1932_s1 + $0x28] sm:$0xff] (!%p212_p3)   ;;  %v1631_v6 = vmov (!%p212_p3), 0.0  }
   0xc   : > { %1381 = vmatpush3.bf16.msra.mxu0 (!%p212_p3), %v1527_v5  ;;  %v1536_v14 = vld [vmem:[%s1932_s1 + $0xd8] sm:$0xff] (!%p212_p3)   ;;  %v1540_v18 = vld [vmem:[%s1932_s1 + $0xe0] sm:$0xff] (!%p212_p3)   ;;  %v1544_v22 = vld [vmem:[%s1932_s1 + $0xe8] sm:$0xff] (!%p212_p3)  }
   0xd   : > { %1382 = vmatprep.subr.bf16.mxu0 (!%p212_p3), %v1530_v8  ;;  %v1537_v15 = vld [vmem:[%s1932_s1 + $0x98] sm:$0xff] (!%p212_p3)   ;;  %v1541_v19 = vld [vmem:[%s1932_s1 + $0xa0] sm:$0xff] (!%p212_p3)   ;;  %v1545_v23 = vld [vmem:[%s1932_s1 + $0xa8] sm:$0xff] (!%p212_p3)  }
   0xe   : > { %1403 = vmatpush3.bf16.msra.mxu1 %v1529_v7  ;;  %s1941_s25 = smov (!%p257_p4, %s1275_s25), 3  ;;  %v1546_v24 = vld [vmem:[%s1932_s1 + $0x70] sm:$0xff]   ;;  %v1550_v28 = vld [vmem:[%s1932_s1 + $0x78] sm:$0xff]   ;;  %v1557_v34 = vld [vmem:[%s1932_s1 + $0x140] sm:$0xff]  }
   0xf   : > { %1404 = vmatprep.subr.bf16.mxu1 %v1532_v10  ;;  %s1495_s26 = smul.u32 36, %s1941_s25  ;;  %v1547_v25 = vld [vmem:[%s1932_s1 + $0x30] sm:$0xff]   ;;  %v1551_v29 = vld [vmem:[%s1932_s1 + $0x38] sm:$0xff]   ;;  %v1561_v37 = vld [vmem:[%s1932_s1 + $0x100] sm:$0xff]  }
  0x10   : > { %1383 = vmatpush3.bf16.msra.mxu0 %v1531_v9  ;;  %v1548_v26 = vld [vmem:[%s1932_s1 + $0xf0] sm:$0xff]   ;;  %v1552_v30 = vld [vmem:[%s1932_s1 + $0xf8] sm:$0xff]   ;;  %v1562_v38 = vld [vmem:[%s1932_s1 + $0x1c0] sm:$0xff]  }
  0x11   : > { %1384 = vmatprep.subr.bf16.mxu0 %v1534_v12  ;;  %v1549_v27 = vld [vmem:[%s1932_s1 + $0xb0] sm:$0xff]   ;;  %s1772_s10 = scalar_lea.vmem %s1931_s0, %s1495_s26  ;;  %v1556_v33 = vld [vmem:[%s1932_s1 + $0xb8] sm:$0xff]   ;;  %v1563_v39 = vld [vmem:[%s1932_s1 + $0x180] sm:$0xff]  }
  0x12   : > { %1405 = vmatpush3.bf16.msra.mxu1 %v1533_v11  ;;  %v1553_v31 = vld [vmem:[%s1772_s10] ss:$36 sps:$4 sm:$0xff]   ;;  %v1558_v35 = vld [vmem:[%s1772_s10 + $0x8] ss:$36 sps:$4 sm:$0xff]   ;;  %v1568_v44 = vld [vmem:[%s1932_s1 + $0x150] sm:$0xff]  }
  0x13   : > { %1406 = vmatprep.subr.bf16.mxu1 %v1536_v14  ;;  %v1555_v32 = vld [vmem:[%s1772_s10 + $0x4] ss:$36 sps:$4 sm:$0xff]   ;;  %v1560_v36 = vld [vmem:[%s1772_s10 + $0xc] ss:$36 sps:$4 sm:$0xff]   ;;  %v1572_v48 = vld [vmem:[%s1932_s1 + $0x158] sm:$0xff]  }
  0x14   : > { %1385 = vmatpush3.bf16.msra.mxu0 %v1535_v13  ;;  %960 = vmatprep.mubr.bf16.mxu0 %v1555_v32  ;;  %v1564_v40 = vld [vmem:[%s1932_s1 + $0x148] sm:$0xff]   ;;  %v1569_v45 = vld [vmem:[%s1932_s1 + $0x110] sm:$0xff]   ;;  %v1573_v49 = vld [vmem:[%s1932_s1 + $0x118] sm:$0xff]  }
  0x15   : > { %1386 = vmatprep.subr.bf16.mxu0 %v1538_v16  ;;  %1001 = vmatprep.mubr.bf16.mxu1 %v1560_v36  ;;  %v1565_v41 = vld [vmem:[%s1932_s1 + $0x108] sm:$0xff]   ;;  %v1570_v46 = vld [vmem:[%s1932_s1 + $0x1d0] sm:$0xff]   ;;  %v1574_v50 = vld [vmem:[%s1932_s1 + $0x1d8] sm:$0xff]  }
  0x16   : > { %1407 = vmatpush3.bf16.msra.mxu1 %v1537_v15  ;;  %v1566_v42 = vld [vmem:[%s1932_s1 + $0x1c8] sm:$0xff]   ;;  %v1571_v47 = vld [vmem:[%s1932_s1 + $0x190] sm:$0xff]   ;;  %v1575_v51 = vld [vmem:[%s1932_s1 + $0x198] sm:$0xff]  }
  0x17   : > { %1408 = vmatprep.subr.bf16.mxu1 %v1540_v18  ;;  %v1567_v43 = vld [vmem:[%s1932_s1 + $0x188] sm:$0xff]   ;;  %v1576_v52 = vld [vmem:[%s1932_s1 + $0x160] sm:$0xff]   ;;  %v1584_v60 = vld [vmem:[%s1932_s1 + $0x170] sm:$0xff]  }
  0x18   : > { %1387 = vmatpush3.bf16.msra.mxu0 %v1539_v17  ;;  %v1577_v53 = vld [vmem:[%s1932_s1 + $0x120] sm:$0xff]   ;;  %v1580_v56 = vld [vmem:[%s1932_s1 + $0x168] sm:$0xff]   ;;  %v1585_v61 = vld [vmem:[%s1932_s1 + $0x130] sm:$0xff]  }
  0x19   : > { %1388 = vmatprep.subr.bf16.mxu0 %v1542_v20  ;;  %v1578_v54 = vld [vmem:[%s1932_s1 + $0x1e0] sm:$0xff]   ;;  %v1581_v57 = vld [vmem:[%s1932_s1 + $0x128] sm:$0xff]   ;;  %v1586_v62 = vld [vmem:[%s1932_s1 + $0x1f0] sm:$0xff]  }
  0x1a   : > { %1409 = vmatpush3.bf16.msra.mxu1 %v1541_v19  ;;  %v1579_v55 = vld [vmem:[%s1932_s1 + $0x1a0] sm:$0xff]   ;;  %v1582_v58 = vld [vmem:[%s1932_s1 + $0x1e8] sm:$0xff]   ;;  %v1587_v63 = vld [vmem:[%s1932_s1 + $0x1b0] sm:$0xff]  }
  0x1b   : > { %1410 = vmatprep.subr.bf16.mxu1 %v1544_v22  ;;  %v1583_v59 = vld [vmem:[%s1932_s1 + $0x1a8] sm:$0xff]   ;;  %v1588_v0 = vld [vmem:[%s1932_s1 + $0x178] sm:$0xff]   ;;  %v1591_v3 = vld [vmem:[%s1772_s10 + $0x10] ss:$36 sps:$4 sm:$0xff]  }
  0x1c   : > { %1389 = vmatpush3.bf16.msra.mxu0 %v1543_v21  ;;  %v1589_v1 = vld [vmem:[%s1932_s1 + $0x138] sm:$0xff]   ;;  %v1598_v9 = vld [vmem:[%s1932_s1 + $0x200] sm:$0xff]   ;;  %v1599_v10 = vld [vmem:[%s1932_s1 + $0x208] sm:$0xff]  }
  0x1d   : > { %1390 = vmatprep.subr.bf16.mxu0 %v1546_v24  ;;  %v1590_v2 = vld [vmem:[%s1932_s1 + $0x1f8] sm:$0xff]   ;;  %v1600_v11 = vld [vmem:[%s1932_s1 + $0x210] sm:$0xff]   ;;  %v1602_v13 = vld [vmem:[%s1932_s1 + $0x220] sm:$0xff]  }
  0x1e   : > { %1411 = vmatpush3.bf16.msra.mxu1 %v1545_v23  ;;  %v1593_v4 = vld [vmem:[%s1772_s10 + $0x14] ss:$36 sps:$4 sm:$0xff]   ;;  %v1597_v8 = vld [vmem:[%s1772_s10 + $0x1c] ss:$36 sps:$4 sm:$0xff]   ;;  %v1603_v14 = vld [vmem:[%s1932_s1 + $0x228] sm:$0xff]  }
  0x1f   : > { %1412 = vmatprep.subr.bf16.mxu1 %v1548_v26  ;;  %v1594_v5 = vld [vmem:[%s1932_s1 + $0x1b8] sm:$0xff]   ;;  %v1604_v15 = vld [vmem:[%s1932_s1 + $0x230] sm:$0xff]   ;;  %v1606_v17 = vld [vmem:[%s1772_s10 + $0x20] ss:$36 sps:$4 sm:$0xff]  }
  0x20   : > { %1391 = vmatpush3.bf16.msra.mxu0 %v1547_v25  ;;  %v1595_v7 = vld [vmem:[%s1772_s10 + $0x18] ss:$36 sps:$4 sm:$0xff]   ;;  %v1281_v19 = vld [vmem:[%s1933_s2] ss:$0 sm:$0xff]  ;;  %s1278_s10 = sshll.u32 %s1941_s25, 2 }
  0x21   : > { %1392 = vmatprep.subr.bf16.mxu0 %v1550_v28  ;;  %v1601_v12 = vld [vmem:[%s1932_s1 + $0x218] sm:$0xff]   ;;  %s277_s21 = scalar_lea.vmem %s1934_s3, %s1278_s10  ;;  %s286_s25 = scalar_lea.vmem %s1935_s4, %s1278_s10 }
  0x22   : > { %1413 = vmatpush3.bf16.msra.mxu1 %v1549_v27  ;;  %v1605_v16 = vld [vmem:[%s1932_s1 + $0x238] sm:$0xff]  }
  0x23   : > { %1414 = vmatprep.subr.bf16.mxu1 %v1552_v30 }
  0x24   : > { %1393 = vmatpush3.bf16.msra.mxu0 %v1551_v29 }
  0x25   : > { %1422 = vmatprep.subr.bf16.mxu0 %v1557_v34 }
  0x26   : > { %1415 = vmatpush3.bf16.msra.mxu1 %v1556_v33 }
  0x27   : > { %961 = vmatmul.mubr.bf16.vlgmr.msra.gmra.mrb[0].mxu0 %v1553_v31  ;;  %1444 = vmatprep.subr.bf16.mxu1 %v1562_v38 }
  0x28   : > { %1423 = vmatpush3.bf16.msra.mxu0 %v1561_v37  ;;  %1042 = vmatprep.mubr.bf16.mxu0 %v1593_v4 }
  0x29   : > { %1002 = vmatmul.mubr.bf16.vlgmr.msra.gmra.mrb[0].mxu1 %v1558_v35  ;;  %1424 = vmatprep.subr.bf16.mxu0 %v1564_v40 }
  0x2a   : > { %1445 = vmatpush3.bf16.msra.mxu1 %v1563_v39  ;;  %1083 = vmatprep.mubr.bf16.mxu1 %v1597_v8 }
  0x2b   : > { %1446 = vmatprep.subr.bf16.mxu1 %v1566_v42 }
  0x2c   : > { %1425 = vmatpush3.bf16.msra.mxu0 %v1565_v41 }
  0x2d   : > { %1426 = vmatprep.subr.bf16.mxu0 %v1568_v44 }
  0x2e   : > { %1447 = vmatpush3.bf16.msra.mxu1 %v1567_v43 }
  0x2f   : > { %1448 = vmatprep.subr.bf16.mxu1 %v1570_v46 }
  0x30   : > { %1427 = vmatpush3.bf16.msra.mxu0 %v1569_v45 }
  0x31   : > { %1428 = vmatprep.subr.bf16.mxu0 %v1572_v48 }
  0x32   : > { %1449 = vmatpush3.bf16.msra.mxu1 %v1571_v47 }
  0x33   : > { %1450 = vmatprep.subr.bf16.mxu1 %v1574_v50 }
  0x34   : > { %1429 = vmatpush3.bf16.msra.mxu0 %v1573_v49 }
  0x35   : > { %1430 = vmatprep.subr.bf16.mxu0 %v1576_v52 }
  0x36   : > { %1451 = vmatpush3.bf16.msra.mxu1 %v1575_v51  ;;  %v1370_v51 = vld [vmem:[%s277_s21] sm:$0xff]  }
  0x37   : > { %1452 = vmatprep.subr.bf16.mxu1 %v1578_v54  ;;  %v1371_v52 = vunpack.c.l.bf16 %v1370_v51 }
  0x38   : > { %1431 = vmatpush3.bf16.msra.mxu0 %v1577_v53 }
  0x39   : > { %1432 = vmatprep.subr.bf16.mxu0 %v1580_v56  ;;  %v1372_v56 = vunpack.c.h.bf16 %v1370_v51 }
  0x3a   : > { %1453 = vmatpush3.bf16.msra.mxu1 %v1579_v55 }
  0x3b   : > { %1454 = vmatprep.subr.bf16.mxu1 %v1582_v58 }
  0x3c   : > { %1433 = vmatpush3.bf16.msra.mxu0 %v1581_v57 }
  0x3d   : > { %1434 = vmatprep.subr.bf16.mxu0 %v1584_v60 }
  0x3e   : > { %1455 = vmatpush3.bf16.msra.mxu1 %v1583_v59 }
  0x3f   : > { %1456 = vmatprep.subr.bf16.mxu1 %v1586_v62 }
  0x40   : > { %1435 = vmatpush3.bf16.msra.mxu0 %v1585_v61 }
  0x41   : > { %1436 = vmatprep.subr.bf16.mxu0 %v1588_v0 }
  0x42   : > { %1457 = vmatpush3.bf16.msra.mxu1 %v1587_v63 }
  0x43   : > { %1458 = vmatprep.subr.bf16.mxu1 %v1590_v2 }
  0x44   : > { %1437 = vmatpush3.bf16.msra.mxu0 %v1589_v1 }
  0x45   : > { %1475 = vmatprep.subr.bf16.mxu0 %v1631_v6 }
  0x46   : > { %1459 = vmatpush3.bf16.msra.mxu1 %v1594_v5 }
  0x47   : > { %1043 = vmatmul.mubr.bf16.vlgmr.msra.gmra.mrb[4].mxu0 %v1591_v3 }
  0x48   : > { %1491 = vmatprep.mubr.msk.bf16.mxu0 %vm1632_vm0, %v1631_v6  ;;  %1476 = vmatpush3.bf16.msra.mxu0 %v1598_v9 }
  0x49   : > { %1084 = vmatmul.mubr.bf16.vlgmr.msra.gmra.mrb[4].mxu1 %v1595_v7  ;;  %1477 = vmatprep.subr.bf16.mxu0 %v1631_v6 }
  0x4c   : > { %1478 = vmatpush3.bf16.msra.mxu0 %v1599_v10 }
  0x4d   : > { %1479 = vmatprep.subr.bf16.mxu0 %v1631_v6 }
  0x50   : > { %1480 = vmatpush3.bf16.msra.mxu0 %v1600_v11 }
  0x51   : > { %1481 = vmatprep.subr.bf16.mxu0 %v1631_v6 }
  0x54   : > { %1482 = vmatpush3.bf16.msra.mxu0 %v1601_v12 }
  0x55   : > { %1483 = vmatprep.subr.bf16.mxu0 %v1631_v6 }
  0x58   : > { %1484 = vmatpush3.bf16.msra.mxu0 %v1602_v13 }
  0x59   : > { %1485 = vmatprep.subr.bf16.mxu0 %v1631_v6 }
  0x5c   : > { %1486 = vmatpush3.bf16.msra.mxu0 %v1603_v14 }
  0x5d   : > { %1487 = vmatprep.subr.bf16.mxu0 %v1631_v6 }
  0x60   : > { %1488 = vmatpush3.bf16.msra.mxu0 %v1604_v15 }
  0x61   : > { %1489 = vmatprep.subr.bf16.mxu0 %v1631_v6 }
  0x64   : > { %1490 = vmatpush3.bf16.msra.mxu0 %v1605_v16 }
  0x67   : > { %1492 = vmatmul.mubr.bf16.vlgmr.msra.gmra.mrb[8].mxu0 %v1606_v17 }
  0xfa   : > { %v1394_v18 = vpop.f32.mrb[0].mxu0 }
  0xfb   : > { %v1395_v20 = vpop.f32.mrb[1].mxu0 }
  0xfc   : > { %v1396_v21 = vadd.f32 %v1395_v20, %v1394_v18  ;;  %v1397_v22 = vpop.f32.mrb[2].mxu0  ;;  %v1416_v23 = vpop.f32.mrb[0].mxu1 }
  0xfd   : > { %v1398_v24 = vpop.f32.mrb[3].mxu0  ;;  %v1417_v27 = vpop.f32.mrb[1].mxu1 }
  0xfe   : > { %v963_v25 = vadd.f32 %v1396_v21, %v1281_v19  ;;  %v1399_v26 = vadd.f32 %v1398_v24, %v1397_v22  ;;  %v1418_v28 = vadd.f32 %v1417_v27, %v1416_v23  ;;  %v1419_v29 = vpop.f32.mrb[2].mxu1 }
  0xff   : > { %v1420_v31 = vpop.f32.mrb[3].mxu1 }
 0x100   : > { %v966_v30 = vadd.f32 %v1399_v26, %v1281_v19  ;;  %v1004_v32 = vadd.f32 %v1418_v28, %v963_v25  ;;  %v1421_v33 = vadd.f32 %v1420_v31, %v1419_v29 }
 0x102   : > { %v1007_v34 = vadd.f32 %v1421_v33, %v966_v30 }
 0x11a   : > { %v1438_v35 = vpop.f32.mrb[4].mxu0 }
 0x11b   : > { %v1439_v36 = vpop.f32.mrb[5].mxu0 }
 0x11c   : > { %v1440_v37 = vadd.f32 %v1439_v36, %v1438_v35  ;;  %v1441_v38 = vpop.f32.mrb[6].mxu0  ;;  %v1460_v39 = vpop.f32.mrb[4].mxu1 }
 0x11d   : > { %v1442_v40 = vpop.f32.mrb[7].mxu0  ;;  %v1461_v43 = vpop.f32.mrb[5].mxu1 }
 0x11e   : > { %v1045_v41 = vadd.f32 %v1440_v37, %v1004_v32  ;;  %v1443_v42 = vadd.f32 %v1442_v40, %v1441_v38  ;;  %v1462_v44 = vadd.f32 %v1461_v43, %v1460_v39  ;;  %v1463_v45 = vpop.f32.mrb[6].mxu1 }
 0x11f   : > { %v1464_v47 = vpop.f32.mrb[7].mxu1 }
 0x120   : > { %v1048_v46 = vadd.f32 %v1443_v42, %v1007_v34  ;;  %v1465_v48 = vadd.f32 %v1464_v47, %v1463_v45  ;;  %v1086_v49 = vadd.f32 %v1462_v44, %v1045_v41 }
 0x122   : > { %v1089_v50 = vadd.f32 %v1465_v48, %v1048_v46 }
 0x13a   : > { %v1126_v53 = vpop.f32.mrb[8].mxu0 }
 0x13b   : > { %v1127_v54 = vadd.f32 %v1126_v53, %v1086_v49  ;;  %v1493_v55 = vpop.f32.mrb[9].mxu0 }
 0x13c   : > { %v1129_v57 = vpop.f32.mrb[10].mxu0 }
 0x13d   : > { %v1137_v58 = vadd.f32 %v1371_v52, %v1127_v54  ;;  %v1130_v59 = vadd.f32 %v1129_v57, %v1089_v50  ;;  %v1494_v60 = vpop.f32.mrb[11].mxu0 }
 0x13f   : > { %v1138_v61 = vadd.f32 %v1372_v56, %v1130_v59  ;;  %v1139_v62 = vmax.f32 %v1137_v58, 0.0 }
 0x141   : > { %v1140_v63 = vmax.f32 %v1138_v61, 0.0 }
 0x143   : > { %v1376_v0 = vpack.c.bf16 %v1140_v63, %v1139_v62 }
 0x145   : > { %1377 = vst [vmem:[%s286_s25] sm:$0xff] %v1376_v0  }
 0x146 PF: > { %s14_s17 = sadd.s32 1, %s1629_s17   ;;  %s1936_s15 = smov %s1625_s16 }
 0x147   : > { %p11_p5 = scmp.ge.s32.totalorder %s14_s17, 4   ;;  %s1937_s16 = smov %s1939_s18 }
 0x149   :  { %13 = sbr.rel (!%p11_p5) target bundleno = 2 (0x2), region = 75 }

// kernel: _lambda_.36
= control target key start
LH: loop header
LB: loop body
LE: loop exit
PB: predicated region body
PF: predicated region fallthrough
CT: control target
= control target key end

     0   :  { %v181_v0 = vmov 0.0   ;;  %vm182_vm0 = vmmov 0   ;;  %s236_s1 = inlined_call_operand.vmem [shape: bf16[128,128], index: 1, kind: input, shape index: {}]   ;;  %s237_s0 = inlined_call_operand.vmem [shape: bf16[8,128], index: 0, kind: input, shape index: {}]   ;;  %s238_s2 = inlined_call_operand.vmem [shape: f32[1,128], index: 2, kind: input, shape index: {}]   ;;  %s239_s3 = inlined_call_operand.vmem [shape: bf16[8,128], index: 3, kind: output, shape index: {}]  }
   0x1   :  { %151 = vmatprep.subr.bf16.mxu0 %v181_v0  ;;  %v173_v1 = vld [vmem:[%s236_s1] sm:$0xff]   ;;  %167 = vmatprep.mubr.msk.bf16.mxu0 %vm182_vm0, %v181_v0  ;;  %v174_v2 = vld [vmem:[%s236_s1 + $0x8] sm:$0xff]   ;;  %v175_v3 = vld [vmem:[%s236_s1 + $0x10] sm:$0xff]  }
   0x2   :  { %152 = vmatpush3.bf16.msra.mxu0 %v173_v1  ;;  %v176_v4 = vld [vmem:[%s236_s1 + $0x18] sm:$0xff]   ;;  %v177_v5 = vld [vmem:[%s236_s1 + $0x20] sm:$0xff]   ;;  %v178_v6 = vld [vmem:[%s236_s1 + $0x28] sm:$0xff]  }
   0x3   :  { %153 = vmatprep.subr.bf16.mxu0 %v181_v0  ;;  %v179_v7 = vld [vmem:[%s236_s1 + $0x30] sm:$0xff]   ;;  %v180_v8 = vld [vmem:[%s236_s1 + $0x38] sm:$0xff]   ;;  %v15_v9 = vld [vmem:[%s237_s0] sm:$0xf] }
   0x4   :  { %v133_v10 = vld [vmem:[%s238_s2] ss:$0 sm:$0xff] }
   0x6   :  { %154 = vmatpush3.bf16.msra.mxu0 %v174_v2 }
   0x7   :  { %155 = vmatprep.subr.bf16.mxu0 %v181_v0 }
   0xa   :  { %156 = vmatpush3.bf16.msra.mxu0 %v175_v3 }
   0xb   :  { %157 = vmatprep.subr.bf16.mxu0 %v181_v0 }
   0xe   :  { %158 = vmatpush3.bf16.msra.mxu0 %v176_v4 }
   0xf   :  { %159 = vmatprep.subr.bf16.mxu0 %v181_v0 }
  0x12   :  { %160 = vmatpush3.bf16.msra.mxu0 %v177_v5 }
  0x13   :  { %161 = vmatprep.subr.bf16.mxu0 %v181_v0 }
  0x16   :  { %162 = vmatpush3.bf16.msra.mxu0 %v178_v6 }
  0x17   :  { %163 = vmatprep.subr.bf16.mxu0 %v181_v0 }
  0x1a   :  { %164 = vmatpush3.bf16.msra.mxu0 %v179_v7 }
  0x1b   :  { %165 = vmatprep.subr.bf16.mxu0 %v181_v0 }
  0x1e   :  { %166 = vmatpush3.bf16.msra.mxu0 %v180_v8 }
  0x21   :  { %168 = vmatmul.mubr.bf16.vlgmr.msra.gmra.mrb[0].mxu0 %v15_v9 }
  0xf4   :  { %v121_v11 = vpop.f32.mrb[0].mxu0 }
  0xf5   :  { %v122_v12 = vadd.f32 %v133_v10, %v121_v11  ;;  %v169_v13 = vpop.f32.mrb[1].mxu0 }
  0xf6   :  { %v124_v14 = vpop.f32.mrb[2].mxu0 }
  0xf7   :  { %v127_v15 = vpack.c.bf16 %v122_v12, %v122_v12  ;;  %v170_v16 = vpop.f32.mrb[3].mxu0 }
  0xf9   :  { %128 = vst [vmem:[%s239_s3] sm:$0xf] %v127_v15 }

// kernel: _lambda_.35
= control target key start
LH: loop header
LB: loop body
LE: loop exit
PB: predicated region body
PF: predicated region fallthrough
CT: control target
= control target key end

     0   :  { %vm1125_vm0 = vmmov 0   ;;  %s1383_s1 = inlined_call_operand.vmem [shape: bf16[1152,128], index: 1, kind: input, shape index: {}]   ;;  %s1384_s0 = inlined_call_operand.vmem [shape: bf16[8,1152], index: 0, kind: input, shape index: {}]   ;;  %s1385_s2 = inlined_call_operand.vmem [shape: f32[1,128], index: 2, kind: input, shape index: {}]   ;;  %s1386_s3 = inlined_call_operand.vmem [shape: bf16[8,128], index: 3, kind: output, shape index: {}]  }
   0x1   :  { %v1043_v0 = vld [vmem:[%s1383_s1 + $0x40] sm:$0xff]   ;;  %v1047_v4 = vld [vmem:[%s1383_s1 + $0x48] sm:$0xff]   ;;  %v1051_v8 = vld [vmem:[%s1383_s1 + $0x50] sm:$0xff]  }
   0x2   :  { %v1044_v1 = vld [vmem:[%s1383_s1] sm:$0xff]   ;;  %924 = vmatprep.subr.bf16.mxu0 %v1043_v0  ;;  %v1048_v5 = vld [vmem:[%s1383_s1 + $0x8] sm:$0xff]   ;;  %v1052_v9 = vld [vmem:[%s1383_s1 + $0x10] sm:$0xff]  }
   0x3   :  { %v1045_v2 = vld [vmem:[%s1383_s1 + $0xc0] sm:$0xff]   ;;  %925 = vmatpush3.bf16.msra.mxu0 %v1044_v1  ;;  %v1049_v6 = vld [vmem:[%s1383_s1 + $0xc8] sm:$0xff]   ;;  %v1053_v10 = vld [vmem:[%s1383_s1 + $0xd0] sm:$0xff]  }
   0x4   :  { %v1046_v3 = vld [vmem:[%s1383_s1 + $0x80] sm:$0xff]   ;;  %946 = vmatprep.subr.bf16.mxu1 %v1045_v2  ;;  %926 = vmatprep.subr.bf16.mxu0 %v1047_v4  ;;  %v1050_v7 = vld [vmem:[%s1383_s1 + $0x88] sm:$0xff]   ;;  %v1054_v11 = vld [vmem:[%s1383_s1 + $0x90] sm:$0xff]  }
   0x5   :  { %947 = vmatpush3.bf16.msra.mxu1 %v1046_v3  ;;  %v1055_v12 = vld [vmem:[%s1383_s1 + $0x58] sm:$0xff]   ;;  %v1059_v16 = vld [vmem:[%s1383_s1 + $0x60] sm:$0xff]   ;;  %v1063_v20 = vld [vmem:[%s1383_s1 + $0x68] sm:$0xff]  }
   0x6   :  { %948 = vmatprep.subr.bf16.mxu1 %v1049_v6  ;;  %v1056_v13 = vld [vmem:[%s1383_s1 + $0x18] sm:$0xff]   ;;  %v1060_v17 = vld [vmem:[%s1383_s1 + $0x20] sm:$0xff]   ;;  %v1064_v21 = vld [vmem:[%s1383_s1 + $0x28] sm:$0xff]  }
   0x7   :  { %927 = vmatpush3.bf16.msra.mxu0 %v1048_v5  ;;  %v1057_v14 = vld [vmem:[%s1383_s1 + $0xd8] sm:$0xff]   ;;  %v1061_v18 = vld [vmem:[%s1383_s1 + $0xe0] sm:$0xff]   ;;  %v1065_v22 = vld [vmem:[%s1383_s1 + $0xe8] sm:$0xff]  }
   0x8   :  { %928 = vmatprep.subr.bf16.mxu0 %v1051_v8  ;;  %v1058_v15 = vld [vmem:[%s1383_s1 + $0x98] sm:$0xff]   ;;  %v1062_v19 = vld [vmem:[%s1383_s1 + $0xa0] sm:$0xff]   ;;  %v1066_v23 = vld [vmem:[%s1383_s1 + $0xa8] sm:$0xff]  }
   0x9   :  { %949 = vmatpush3.bf16.msra.mxu1 %v1050_v7  ;;  %v1067_v24 = vld [vmem:[%s1383_s1 + $0x70] sm:$0xff]   ;;  %v1071_v28 = vld [vmem:[%s1383_s1 + $0x78] sm:$0xff]   ;;  %v15_v31 = vld [vmem:[%s1384_s0] sm:$0xff] }
   0xa   :  { %950 = vmatprep.subr.bf16.mxu1 %v1053_v10  ;;  %v1068_v25 = vld [vmem:[%s1383_s1 + $0x30] sm:$0xff]   ;;  %v1072_v29 = vld [vmem:[%s1383_s1 + $0x38] sm:$0xff]   ;;  %v843_v32 = vcombine.low %v15_v31, %v15_v31  ;;  %v844_v33 = vcombine.high %v15_v31, %v15_v31  ;;  %v1077_v35 = vld [vmem:[%s1383_s1 + $0x140] sm:$0xff]  }
   0xb   :  { %929 = vmatpush3.bf16.msra.mxu0 %v1052_v9  ;;  %v1069_v26 = vld [vmem:[%s1383_s1 + $0xf0] sm:$0xff]   ;;  %v1073_v30 = vld [vmem:[%s1383_s1 + $0xf8] sm:$0xff]   ;;  %v16_v36 = vld [vmem:[%s1384_s0 + $0x8] sm:$0xff]  ;;  %v1124_v9 = vmov 0.0  }
   0xc   :  { %930 = vmatprep.subr.bf16.mxu0 %v1055_v12  ;;  %v1070_v27 = vld [vmem:[%s1383_s1 + $0xb0] sm:$0xff]   ;;  %v1076_v34 = vld [vmem:[%s1383_s1 + $0xb8] sm:$0xff]   ;;  %667 = vmatprep.mubr.bf16.mxu0 %v844_v33  ;;  %v845_v37 = vcombine.low %v16_v36, %v16_v36  ;;  %v846_v38 = vcombine.high %v16_v36, %v16_v36  ;;  %v1080_v39 = vld [vmem:[%s1383_s1 + $0x100] sm:$0xff]  }
   0xd   :  { %951 = vmatpush3.bf16.msra.mxu1 %v1054_v11  ;;  %v1081_v40 = vld [vmem:[%s1383_s1 + $0x1c0] sm:$0xff]   ;;  %v1083_v42 = vld [vmem:[%s1383_s1 + $0x148] sm:$0xff]   ;;  %v1087_v46 = vld [vmem:[%s1383_s1 + $0x150] sm:$0xff]  }
   0xe   :  { %952 = vmatprep.subr.bf16.mxu1 %v1057_v14  ;;  %707 = vmatprep.mubr.bf16.mxu1 %v846_v38  ;;  %v1082_v41 = vld [vmem:[%s1383_s1 + $0x180] sm:$0xff]   ;;  %v1084_v43 = vld [vmem:[%s1383_s1 + $0x108] sm:$0xff]   ;;  %v1088_v47 = vld [vmem:[%s1383_s1 + $0x110] sm:$0xff]  }
   0xf   :  { %931 = vmatpush3.bf16.msra.mxu0 %v1056_v13  ;;  %v1085_v44 = vld [vmem:[%s1383_s1 + $0x1c8] sm:$0xff]   ;;  %v1089_v48 = vld [vmem:[%s1383_s1 + $0x1d0] sm:$0xff]   ;;  %v1091_v50 = vld [vmem:[%s1383_s1 + $0x158] sm:$0xff]  }
  0x10   :  { %932 = vmatprep.subr.bf16.mxu0 %v1059_v16  ;;  %v1086_v45 = vld [vmem:[%s1383_s1 + $0x188] sm:$0xff]   ;;  %v1090_v49 = vld [vmem:[%s1383_s1 + $0x190] sm:$0xff]   ;;  %v1092_v51 = vld [vmem:[%s1383_s1 + $0x118] sm:$0xff]  }
  0x11   :  { %953 = vmatpush3.bf16.msra.mxu1 %v1058_v15  ;;  %v1093_v52 = vld [vmem:[%s1383_s1 + $0x1d8] sm:$0xff]   ;;  %v1095_v54 = vld [vmem:[%s1383_s1 + $0x160] sm:$0xff]   ;;  %v1099_v58 = vld [vmem:[%s1383_s1 + $0x168] sm:$0xff]  }
  0x12   :  { %954 = vmatprep.subr.bf16.mxu1 %v1061_v18  ;;  %v1094_v53 = vld [vmem:[%s1383_s1 + $0x198] sm:$0xff]   ;;  %v1096_v55 = vld [vmem:[%s1383_s1 + $0x120] sm:$0xff]   ;;  %v1100_v59 = vld [vmem:[%s1383_s1 + $0x128] sm:$0xff]  }
  0x13   :  { %933 = vmatpush3.bf16.msra.mxu0 %v1060_v17  ;;  %v1097_v56 = vld [vmem:[%s1383_s1 + $0x1e0] sm:$0xff]   ;;  %v1101_v60 = vld [vmem:[%s1383_s1 + $0x1e8] sm:$0xff]   ;;  %v1103_v62 = vld [vmem:[%s1383_s1 + $0x170] sm:$0xff]  }
  0x14   :  { %934 = vmatprep.subr.bf16.mxu0 %v1063_v20  ;;  %v1098_v57 = vld [vmem:[%s1383_s1 + $0x1a0] sm:$0xff]   ;;  %v1102_v61 = vld [vmem:[%s1383_s1 + $0x1a8] sm:$0xff]   ;;  %v1104_v63 = vld [vmem:[%s1383_s1 + $0x130] sm:$0xff]  }
  0x15   :  { %955 = vmatpush3.bf16.msra.mxu1 %v1062_v19  ;;  %v1105_v0 = vld [vmem:[%s1383_s1 + $0x1f0] sm:$0xff]   ;;  %v1107_v2 = vld [vmem:[%s1383_s1 + $0x178] sm:$0xff]   ;;  %v1115_v13 = vld [vmem:[%s1383_s1 + $0x200] sm:$0xff]  }
  0x16   :  { %956 = vmatprep.subr.bf16.mxu1 %v1065_v22  ;;  %v1106_v1 = vld [vmem:[%s1383_s1 + $0x1b0] sm:$0xff]   ;;  %v1108_v3 = vld [vmem:[%s1383_s1 + $0x138] sm:$0xff]   ;;  %v1116_v14 = vld [vmem:[%s1383_s1 + $0x208] sm:$0xff]  }
  0x17   :  { %935 = vmatpush3.bf16.msra.mxu0 %v1064_v21  ;;  %v1109_v4 = vld [vmem:[%s1383_s1 + $0x1f8] sm:$0xff]   ;;  %v17_v5 = vld [vmem:[%s1384_s0 + $0x10] sm:$0xff]  ;;  %v1119_v17 = vld [vmem:[%s1383_s1 + $0x220] sm:$0xff]  }
  0x18   :  { %936 = vmatprep.subr.bf16.mxu0 %v1067_v24  ;;  %v847_v6 = vcombine.low %v17_v5, %v17_v5  ;;  %v848_v7 = vcombine.high %v17_v5, %v17_v5  ;;  %v1112_v8 = vld [vmem:[%s1383_s1 + $0x1b8] sm:$0xff]   ;;  %v1117_v15 = vld [vmem:[%s1383_s1 + $0x210] sm:$0xff]   ;;  %v1120_v18 = vld [vmem:[%s1383_s1 + $0x228] sm:$0xff]  }
  0x19   :  { %957 = vmatpush3.bf16.msra.mxu1 %v1066_v23  ;;  %v18_v10 = vld [vmem:[%s1384_s0 + $0x18] sm:$0xff]  ;;  %v1121_v19 = vld [vmem:[%s1383_s1 + $0x230] sm:$0xff]   ;;  %v1123_v21 = vld [vmem:[%s1384_s0 + $0x20] ss:$0 sps:$4 sm:$0xff]  }
  0x1a   :  { %958 = vmatprep.subr.bf16.mxu1 %v1069_v26  ;;  %v849_v11 = vcombine.low %v18_v10, %v18_v10  ;;  %v850_v12 = vcombine.high %v18_v10, %v18_v10  ;;  %v1118_v16 = vld [vmem:[%s1383_s1 + $0x218] sm:$0xff]   ;;  %v842_v23 = vld [vmem:[%s1385_s2] ss:$0 sm:$0xff] }
  0x1b   :  { %937 = vmatpush3.bf16.msra.mxu0 %v1068_v25  ;;  %v1122_v20 = vld [vmem:[%s1383_s1 + $0x238] sm:$0xff]  }
  0x1c   :  { %938 = vmatprep.subr.bf16.mxu0 %v1071_v28 }
  0x1d   :  { %959 = vmatpush3.bf16.msra.mxu1 %v1070_v27 }
  0x1e   :  { %960 = vmatprep.subr.bf16.mxu1 %v1073_v30 }
  0x1f   :  { %939 = vmatpush3.bf16.msra.mxu0 %v1072_v29 }
  0x20   :  { %968 = vmatprep.subr.bf16.mxu0 %v1077_v35 }
  0x21   :  { %961 = vmatpush3.bf16.msra.mxu1 %v1076_v34 }
  0x22   :  { %668 = vmatmul.mubr.bf16.vlgmr.msra.gmra.mrb[0].mxu0 %v843_v32  ;;  %990 = vmatprep.subr.bf16.mxu1 %v1081_v40 }
  0x23   :  { %969 = vmatpush3.bf16.msra.mxu0 %v1080_v39  ;;  %747 = vmatprep.mubr.bf16.mxu0 %v848_v7 }
  0x24   :  { %708 = vmatmul.mubr.bf16.vlgmr.msra.gmra.mrb[0].mxu1 %v845_v37  ;;  %970 = vmatprep.subr.bf16.mxu0 %v1083_v42 }
  0x25   :  { %991 = vmatpush3.bf16.msra.mxu1 %v1082_v41  ;;  %787 = vmatprep.mubr.bf16.mxu1 %v850_v12 }
  0x26   :  { %992 = vmatprep.subr.bf16.mxu1 %v1085_v44 }
  0x27   :  { %971 = vmatpush3.bf16.msra.mxu0 %v1084_v43 }
  0x28   :  { %972 = vmatprep.subr.bf16.mxu0 %v1087_v46 }
  0x29   :  { %993 = vmatpush3.bf16.msra.mxu1 %v1086_v45 }
  0x2a   :  { %994 = vmatprep.subr.bf16.mxu1 %v1089_v48 }
  0x2b   :  { %973 = vmatpush3.bf16.msra.mxu0 %v1088_v47 }
  0x2c   :  { %974 = vmatprep.subr.bf16.mxu0 %v1091_v50 }
  0x2d   :  { %995 = vmatpush3.bf16.msra.mxu1 %v1090_v49 }
  0x2e   :  { %996 = vmatprep.subr.bf16.mxu1 %v1093_v52 }
  0x2f   :  { %975 = vmatpush3.bf16.msra.mxu0 %v1092_v51 }
  0x30   :  { %976 = vmatprep.subr.bf16.mxu0 %v1095_v54 }
  0x31   :  { %997 = vmatpush3.bf16.msra.mxu1 %v1094_v53 }
  0x32   :  { %998 = vmatprep.subr.bf16.mxu1 %v1097_v56 }
  0x33   :  { %977 = vmatpush3.bf16.msra.mxu0 %v1096_v55 }
  0x34   :  { %978 = vmatprep.subr.bf16.mxu0 %v1099_v58 }
  0x35   :  { %999 = vmatpush3.bf16.msra.mxu1 %v1098_v57 }
  0x36   :  { %1000 = vmatprep.subr.bf16.mxu1 %v1101_v60 }
  0x37   :  { %979 = vmatpush3.bf16.msra.mxu0 %v1100_v59 }
  0x38   :  { %980 = vmatprep.subr.bf16.mxu0 %v1103_v62 }
  0x39   :  { %1001 = vmatpush3.bf16.msra.mxu1 %v1102_v61 }
  0x3a   :  { %1002 = vmatprep.subr.bf16.mxu1 %v1105_v0 }
  0x3b   :  { %981 = vmatpush3.bf16.msra.mxu0 %v1104_v63 }
  0x3c   :  { %982 = vmatprep.subr.bf16.mxu0 %v1107_v2 }
  0x3d   :  { %1003 = vmatpush3.bf16.msra.mxu1 %v1106_v1 }
  0x3e   :  { %1004 = vmatprep.subr.bf16.mxu1 %v1109_v4 }
  0x3f   :  { %983 = vmatpush3.bf16.msra.mxu0 %v1108_v3 }
  0x40   :  { %1021 = vmatprep.subr.bf16.mxu0 %v1124_v9 }
  0x41   :  { %1005 = vmatpush3.bf16.msra.mxu1 %v1112_v8 }
  0x42   :  { %748 = vmatmul.mubr.bf16.vlgmr.msra.gmra.mrb[4].mxu0 %v847_v6 }
  0x43   :  { %1022 = vmatpush3.bf16.msra.mxu0 %v1115_v13  ;;  %1037 = vmatprep.mubr.msk.bf16.mxu0 %vm1125_vm0, %v1124_v9 }
  0x44   :  { %788 = vmatmul.mubr.bf16.vlgmr.msra.gmra.mrb[4].mxu1 %v849_v11  ;;  %1023 = vmatprep.subr.bf16.mxu0 %v1124_v9 }
  0x47   :  { %1024 = vmatpush3.bf16.msra.mxu0 %v1116_v14 }
  0x48   :  { %1025 = vmatprep.subr.bf16.mxu0 %v1124_v9 }
  0x4b   :  { %1026 = vmatpush3.bf16.msra.mxu0 %v1117_v15 }
  0x4c   :  { %1027 = vmatprep.subr.bf16.mxu0 %v1124_v9 }
  0x4f   :  { %1028 = vmatpush3.bf16.msra.mxu0 %v1118_v16 }
  0x50   :  { %1029 = vmatprep.subr.bf16.mxu0 %v1124_v9 }
  0x53   :  { %1030 = vmatpush3.bf16.msra.mxu0 %v1119_v17 }
  0x54   :  { %1031 = vmatprep.subr.bf16.mxu0 %v1124_v9 }
  0x57   :  { %1032 = vmatpush3.bf16.msra.mxu0 %v1120_v18 }
  0x58   :  { %1033 = vmatprep.subr.bf16.mxu0 %v1124_v9 }
  0x5b   :  { %1034 = vmatpush3.bf16.msra.mxu0 %v1121_v19 }
  0x5c   :  { %1035 = vmatprep.subr.bf16.mxu0 %v1124_v9 }
  0x5f   :  { %1036 = vmatpush3.bf16.msra.mxu0 %v1122_v20 }
  0x62   :  { %1038 = vmatmul.mubr.bf16.vlgmr.msra.gmra.mrb[8].mxu0 %v1123_v21 }
  0xf5   :  { %v940_v22 = vpop.f32.mrb[0].mxu0 }
  0xf6   :  { %v941_v24 = vpop.f32.mrb[1].mxu0 }
  0xf7   :  { %v942_v25 = vadd.f32 %v941_v24, %v940_v22  ;;  %v943_v26 = vpop.f32.mrb[2].mxu0  ;;  %v962_v27 = vpop.f32.mrb[0].mxu1 }
  0xf8   :  { %v944_v28 = vpop.f32.mrb[3].mxu0  ;;  %v963_v29 = vpop.f32.mrb[1].mxu1 }
  0xf9   :  { %v670_v30 = vadd.f32 %v942_v25, %v842_v23  ;;  %v964_v31 = vadd.f32 %v963_v29, %v962_v27  ;;  %v965_v32 = vpop.f32.mrb[2].mxu1 }
  0xfa   :  { %v966_v33 = vpop.f32.mrb[3].mxu1 }
  0xfb   :  { %v710_v34 = vadd.f32 %v964_v31, %v670_v30 }
 0x115   :  { %v984_v35 = vpop.f32.mrb[4].mxu0 }
 0x116   :  { %v985_v36 = vpop.f32.mrb[5].mxu0 }
 0x117   :  { %v986_v37 = vadd.f32 %v985_v36, %v984_v35  ;;  %v987_v38 = vpop.f32.mrb[6].mxu0  ;;  %v1006_v39 = vpop.f32.mrb[4].mxu1 }
 0x118   :  { %v988_v40 = vpop.f32.mrb[7].mxu0  ;;  %v1007_v41 = vpop.f32.mrb[5].mxu1 }
 0x119   :  { %v750_v42 = vadd.f32 %v986_v37, %v710_v34  ;;  %v1008_v43 = vadd.f32 %v1007_v41, %v1006_v39  ;;  %v1009_v44 = vpop.f32.mrb[6].mxu1 }
 0x11a   :  { %v1010_v45 = vpop.f32.mrb[7].mxu1 }
 0x11b   :  { %v790_v46 = vadd.f32 %v1008_v43, %v750_v42 }
 0x135   :  { %v829_v47 = vpop.f32.mrb[8].mxu0 }
 0x136   :  { %v830_v48 = vadd.f32 %v829_v47, %v790_v46  ;;  %v1039_v49 = vpop.f32.mrb[9].mxu0 }
 0x137   :  { %v832_v50 = vpop.f32.mrb[10].mxu0 }
 0x138   :  { %v835_v51 = vmax.f32 %v830_v48, 0.0  ;;  %v1040_v52 = vpop.f32.mrb[11].mxu0 }
 0x13a   :  { %v836_v53 = vpack.c.bf16 %v835_v51, %v835_v51 }
 0x13c   :  { %837 = vst [vmem:[%s1386_s3] sm:$0xf] %v836_v53 }

// kernel: _lambda_.37
= control target key start
LH: loop header
LB: loop body
LE: loop exit
PB: predicated region body
PF: predicated region fallthrough
CT: control target
= control target key end

     0   :  { %vm1131_vm0 = vmmov 0   ;;  %s1397_s1 = inlined_call_operand.vmem [shape: bf16[1152,128], index: 1, kind: input, shape index: {}]   ;;  %s1398_s0 = inlined_call_operand.vmem [shape: bf16[8,1152], index: 0, kind: input, shape index: {}]   ;;  %s1399_s2 = inlined_call_operand.vmem [shape: f32[1,128], index: 2, kind: input, shape index: {}]   ;;  %s1400_s3 = inlined_call_operand.vmem [shape: bf16[8,128], index: 3, kind: input, shape index: {}]   ;;  %s1401_s4 = inlined_call_operand.vmem [shape: bf16[8,128], index: 4, kind: output, shape index: {}]  }
   0x1   :  { %v1049_v0 = vld [vmem:[%s1397_s1 + $0x40] sm:$0xff]   ;;  %v1053_v4 = vld [vmem:[%s1397_s1 + $0x48] sm:$0xff]   ;;  %v1057_v8 = vld [vmem:[%s1397_s1 + $0x50] sm:$0xff]  }
   0x2   :  { %v1050_v1 = vld [vmem:[%s1397_s1] sm:$0xff]   ;;  %930 = vmatprep.subr.bf16.mxu0 %v1049_v0  ;;  %v1054_v5 = vld [vmem:[%s1397_s1 + $0x8] sm:$0xff]   ;;  %v1058_v9 = vld [vmem:[%s1397_s1 + $0x10] sm:$0xff]  }
   0x3   :  { %v1051_v2 = vld [vmem:[%s1397_s1 + $0xc0] sm:$0xff]   ;;  %931 = vmatpush3.bf16.msra.mxu0 %v1050_v1  ;;  %v1055_v6 = vld [vmem:[%s1397_s1 + $0xc8] sm:$0xff]   ;;  %v1059_v10 = vld [vmem:[%s1397_s1 + $0xd0] sm:$0xff]  }
   0x4   :  { %v1052_v3 = vld [vmem:[%s1397_s1 + $0x80] sm:$0xff]   ;;  %952 = vmatprep.subr.bf16.mxu1 %v1051_v2  ;;  %932 = vmatprep.subr.bf16.mxu0 %v1053_v4  ;;  %v1056_v7 = vld [vmem:[%s1397_s1 + $0x88] sm:$0xff]   ;;  %v1060_v11 = vld [vmem:[%s1397_s1 + $0x90] sm:$0xff]  }
   0x5   :  { %953 = vmatpush3.bf16.msra.mxu1 %v1052_v3  ;;  %v1061_v12 = vld [vmem:[%s1397_s1 + $0x58] sm:$0xff]   ;;  %v1065_v16 = vld [vmem:[%s1397_s1 + $0x60] sm:$0xff]   ;;  %v1069_v20 = vld [vmem:[%s1397_s1 + $0x68] sm:$0xff]  }
   0x6   :  { %954 = vmatprep.subr.bf16.mxu1 %v1055_v6  ;;  %v1062_v13 = vld [vmem:[%s1397_s1 + $0x18] sm:$0xff]   ;;  %v1066_v17 = vld [vmem:[%s1397_s1 + $0x20] sm:$0xff]   ;;  %v1070_v21 = vld [vmem:[%s1397_s1 + $0x28] sm:$0xff]  }
   0x7   :  { %933 = vmatpush3.bf16.msra.mxu0 %v1054_v5  ;;  %v1063_v14 = vld [vmem:[%s1397_s1 + $0xd8] sm:$0xff]   ;;  %v1067_v18 = vld [vmem:[%s1397_s1 + $0xe0] sm:$0xff]   ;;  %v1071_v22 = vld [vmem:[%s1397_s1 + $0xe8] sm:$0xff]  }
   0x8   :  { %934 = vmatprep.subr.bf16.mxu0 %v1057_v8  ;;  %v1064_v15 = vld [vmem:[%s1397_s1 + $0x98] sm:$0xff]   ;;  %v1068_v19 = vld [vmem:[%s1397_s1 + $0xa0] sm:$0xff]   ;;  %v1072_v23 = vld [vmem:[%s1397_s1 + $0xa8] sm:$0xff]  }
   0x9   :  { %955 = vmatpush3.bf16.msra.mxu1 %v1056_v7  ;;  %v1073_v24 = vld [vmem:[%s1397_s1 + $0x70] sm:$0xff]   ;;  %v1077_v28 = vld [vmem:[%s1397_s1 + $0x78] sm:$0xff]   ;;  %v18_v31 = vld [vmem:[%s1398_s0] sm:$0xff] }
   0xa   :  { %956 = vmatprep.subr.bf16.mxu1 %v1059_v10  ;;  %v1074_v25 = vld [vmem:[%s1397_s1 + $0x30] sm:$0xff]   ;;  %v1078_v29 = vld [vmem:[%s1397_s1 + $0x38] sm:$0xff]   ;;  %v849_v32 = vcombine.low %v18_v31, %v18_v31  ;;  %v850_v33 = vcombine.high %v18_v31, %v18_v31  ;;  %v1083_v35 = vld [vmem:[%s1397_s1 + $0x140] sm:$0xff]  }
   0xb   :  { %935 = vmatpush3.bf16.msra.mxu0 %v1058_v9  ;;  %v1075_v26 = vld [vmem:[%s1397_s1 + $0xf0] sm:$0xff]   ;;  %v1079_v30 = vld [vmem:[%s1397_s1 + $0xf8] sm:$0xff]   ;;  %v19_v36 = vld [vmem:[%s1398_s0 + $0x8] sm:$0xff]  ;;  %v1130_v9 = vmov 0.0  }
   0xc   :  { %936 = vmatprep.subr.bf16.mxu0 %v1061_v12  ;;  %v1076_v27 = vld [vmem:[%s1397_s1 + $0xb0] sm:$0xff]   ;;  %v1082_v34 = vld [vmem:[%s1397_s1 + $0xb8] sm:$0xff]   ;;  %670 = vmatprep.mubr.bf16.mxu0 %v850_v33  ;;  %v851_v37 = vcombine.low %v19_v36, %v19_v36  ;;  %v852_v38 = vcombine.high %v19_v36, %v19_v36  ;;  %v1086_v39 = vld [vmem:[%s1397_s1 + $0x100] sm:$0xff]  }
   0xd   :  { %957 = vmatpush3.bf16.msra.mxu1 %v1060_v11  ;;  %v1087_v40 = vld [vmem:[%s1397_s1 + $0x1c0] sm:$0xff]   ;;  %v1089_v42 = vld [vmem:[%s1397_s1 + $0x148] sm:$0xff]   ;;  %v1093_v46 = vld [vmem:[%s1397_s1 + $0x150] sm:$0xff]  }
   0xe   :  { %958 = vmatprep.subr.bf16.mxu1 %v1063_v14  ;;  %710 = vmatprep.mubr.bf16.mxu1 %v852_v38  ;;  %v1088_v41 = vld [vmem:[%s1397_s1 + $0x180] sm:$0xff]   ;;  %v1090_v43 = vld [vmem:[%s1397_s1 + $0x108] sm:$0xff]   ;;  %v1094_v47 = vld [vmem:[%s1397_s1 + $0x110] sm:$0xff]  }
   0xf   :  { %937 = vmatpush3.bf16.msra.mxu0 %v1062_v13  ;;  %v1091_v44 = vld [vmem:[%s1397_s1 + $0x1c8] sm:$0xff]   ;;  %v1095_v48 = vld [vmem:[%s1397_s1 + $0x1d0] sm:$0xff]   ;;  %v1097_v50 = vld [vmem:[%s1397_s1 + $0x158] sm:$0xff]  }
  0x10   :  { %938 = vmatprep.subr.bf16.mxu0 %v1065_v16  ;;  %v1092_v45 = vld [vmem:[%s1397_s1 + $0x188] sm:$0xff]   ;;  %v1096_v49 = vld [vmem:[%s1397_s1 + $0x190] sm:$0xff]   ;;  %v1098_v51 = vld [vmem:[%s1397_s1 + $0x118] sm:$0xff]  }
  0x11   :  { %959 = vmatpush3.bf16.msra.mxu1 %v1064_v15  ;;  %v1099_v52 = vld [vmem:[%s1397_s1 + $0x1d8] sm:$0xff]   ;;  %v1101_v54 = vld [vmem:[%s1397_s1 + $0x160] sm:$0xff]   ;;  %v1105_v58 = vld [vmem:[%s1397_s1 + $0x168] sm:$0xff]  }
  0x12   :  { %960 = vmatprep.subr.bf16.mxu1 %v1067_v18  ;;  %v1100_v53 = vld [vmem:[%s1397_s1 + $0x198] sm:$0xff]   ;;  %v1102_v55 = vld [vmem:[%s1397_s1 + $0x120] sm:$0xff]   ;;  %v1106_v59 = vld [vmem:[%s1397_s1 + $0x128] sm:$0xff]  }
  0x13   :  { %939 = vmatpush3.bf16.msra.mxu0 %v1066_v17  ;;  %v1103_v56 = vld [vmem:[%s1397_s1 + $0x1e0] sm:$0xff]   ;;  %v1107_v60 = vld [vmem:[%s1397_s1 + $0x1e8] sm:$0xff]   ;;  %v1109_v62 = vld [vmem:[%s1397_s1 + $0x170] sm:$0xff]  }
  0x14   :  { %940 = vmatprep.subr.bf16.mxu0 %v1069_v20  ;;  %v1104_v57 = vld [vmem:[%s1397_s1 + $0x1a0] sm:$0xff]   ;;  %v1108_v61 = vld [vmem:[%s1397_s1 + $0x1a8] sm:$0xff]   ;;  %v1110_v63 = vld [vmem:[%s1397_s1 + $0x130] sm:$0xff]  }
  0x15   :  { %961 = vmatpush3.bf16.msra.mxu1 %v1068_v19  ;;  %v1111_v0 = vld [vmem:[%s1397_s1 + $0x1f0] sm:$0xff]   ;;  %v1113_v2 = vld [vmem:[%s1397_s1 + $0x178] sm:$0xff]   ;;  %v1121_v13 = vld [vmem:[%s1397_s1 + $0x200] sm:$0xff]  }
  0x16   :  { %962 = vmatprep.subr.bf16.mxu1 %v1071_v22  ;;  %v1112_v1 = vld [vmem:[%s1397_s1 + $0x1b0] sm:$0xff]   ;;  %v1114_v3 = vld [vmem:[%s1397_s1 + $0x138] sm:$0xff]   ;;  %v1122_v14 = vld [vmem:[%s1397_s1 + $0x208] sm:$0xff]  }
  0x17   :  { %941 = vmatpush3.bf16.msra.mxu0 %v1070_v21  ;;  %v1115_v4 = vld [vmem:[%s1397_s1 + $0x1f8] sm:$0xff]   ;;  %v20_v5 = vld [vmem:[%s1398_s0 + $0x10] sm:$0xff]  ;;  %v1125_v17 = vld [vmem:[%s1397_s1 + $0x220] sm:$0xff]  }
  0x18   :  { %942 = vmatprep.subr.bf16.mxu0 %v1073_v24  ;;  %v853_v6 = vcombine.low %v20_v5, %v20_v5  ;;  %v854_v7 = vcombine.high %v20_v5, %v20_v5  ;;  %v1118_v8 = vld [vmem:[%s1397_s1 + $0x1b8] sm:$0xff]   ;;  %v1123_v15 = vld [vmem:[%s1397_s1 + $0x210] sm:$0xff]   ;;  %v1126_v18 = vld [vmem:[%s1397_s1 + $0x228] sm:$0xff]  }
  0x19   :  { %963 = vmatpush3.bf16.msra.mxu1 %v1072_v23  ;;  %v21_v10 = vld [vmem:[%s1398_s0 + $0x18] sm:$0xff]  ;;  %v1127_v19 = vld [vmem:[%s1397_s1 + $0x230] sm:$0xff]   ;;  %v1129_v21 = vld [vmem:[%s1398_s0 + $0x20] ss:$0 sps:$4 sm:$0xff]  }
  0x1a   :  { %964 = vmatprep.subr.bf16.mxu1 %v1075_v26  ;;  %v855_v11 = vcombine.low %v21_v10, %v21_v10  ;;  %v856_v12 = vcombine.high %v21_v10, %v21_v10  ;;  %v1124_v16 = vld [vmem:[%s1397_s1 + $0x218] sm:$0xff]   ;;  %v848_v23 = vld [vmem:[%s1399_s2] ss:$0 sm:$0xff] }
  0x1b   :  { %943 = vmatpush3.bf16.msra.mxu0 %v1074_v25  ;;  %v1128_v20 = vld [vmem:[%s1397_s1 + $0x238] sm:$0xff]  }
  0x1c   :  { %944 = vmatprep.subr.bf16.mxu0 %v1077_v28 }
  0x1d   :  { %965 = vmatpush3.bf16.msra.mxu1 %v1076_v27 }
  0x1e   :  { %966 = vmatprep.subr.bf16.mxu1 %v1079_v30 }
  0x1f   :  { %945 = vmatpush3.bf16.msra.mxu0 %v1078_v29 }
  0x20   :  { %974 = vmatprep.subr.bf16.mxu0 %v1083_v35 }
  0x21   :  { %967 = vmatpush3.bf16.msra.mxu1 %v1082_v34 }
  0x22   :  { %671 = vmatmul.mubr.bf16.vlgmr.msra.gmra.mrb[0].mxu0 %v849_v32  ;;  %996 = vmatprep.subr.bf16.mxu1 %v1087_v40 }
  0x23   :  { %975 = vmatpush3.bf16.msra.mxu0 %v1086_v39  ;;  %750 = vmatprep.mubr.bf16.mxu0 %v854_v7 }
  0x24   :  { %711 = vmatmul.mubr.bf16.vlgmr.msra.gmra.mrb[0].mxu1 %v851_v37  ;;  %976 = vmatprep.subr.bf16.mxu0 %v1089_v42 }
  0x25   :  { %997 = vmatpush3.bf16.msra.mxu1 %v1088_v41  ;;  %790 = vmatprep.mubr.bf16.mxu1 %v856_v12 }
  0x26   :  { %998 = vmatprep.subr.bf16.mxu1 %v1091_v44 }
  0x27   :  { %977 = vmatpush3.bf16.msra.mxu0 %v1090_v43 }
  0x28   :  { %978 = vmatprep.subr.bf16.mxu0 %v1093_v46 }
  0x29   :  { %999 = vmatpush3.bf16.msra.mxu1 %v1092_v45 }
  0x2a   :  { %1000 = vmatprep.subr.bf16.mxu1 %v1095_v48 }
  0x2b   :  { %979 = vmatpush3.bf16.msra.mxu0 %v1094_v47  ;;  %v838_v47 = vld [vmem:[%s1400_s3] sm:$0xf] }
  0x2c   :  { %980 = vmatprep.subr.bf16.mxu0 %v1097_v50  ;;  %v839_v48 = vunpack.c.l.bf16 %v838_v47 }
  0x2d   :  { %1001 = vmatpush3.bf16.msra.mxu1 %v1096_v49 }
  0x2e   :  { %1002 = vmatprep.subr.bf16.mxu1 %v1099_v52 }
  0x2f   :  { %981 = vmatpush3.bf16.msra.mxu0 %v1098_v51 }
  0x30   :  { %982 = vmatprep.subr.bf16.mxu0 %v1101_v54 }
  0x31   :  { %1003 = vmatpush3.bf16.msra.mxu1 %v1100_v53 }
  0x32   :  { %1004 = vmatprep.subr.bf16.mxu1 %v1103_v56 }
  0x33   :  { %983 = vmatpush3.bf16.msra.mxu0 %v1102_v55 }
  0x34   :  { %984 = vmatprep.subr.bf16.mxu0 %v1105_v58 }
  0x35   :  { %1005 = vmatpush3.bf16.msra.mxu1 %v1104_v57 }
  0x36   :  { %1006 = vmatprep.subr.bf16.mxu1 %v1107_v60 }
  0x37   :  { %985 = vmatpush3.bf16.msra.mxu0 %v1106_v59 }
  0x38   :  { %986 = vmatprep.subr.bf16.mxu0 %v1109_v62 }
  0x39   :  { %1007 = vmatpush3.bf16.msra.mxu1 %v1108_v61 }
  0x3a   :  { %1008 = vmatprep.subr.bf16.mxu1 %v1111_v0 }
  0x3b   :  { %987 = vmatpush3.bf16.msra.mxu0 %v1110_v63 }
  0x3c   :  { %988 = vmatprep.subr.bf16.mxu0 %v1113_v2 }
  0x3d   :  { %1009 = vmatpush3.bf16.msra.mxu1 %v1112_v1 }
  0x3e   :  { %1010 = vmatprep.subr.bf16.mxu1 %v1115_v4 }
  0x3f   :  { %989 = vmatpush3.bf16.msra.mxu0 %v1114_v3 }
  0x40   :  { %1027 = vmatprep.subr.bf16.mxu0 %v1130_v9 }
  0x41   :  { %1011 = vmatpush3.bf16.msra.mxu1 %v1118_v8 }
  0x42   :  { %751 = vmatmul.mubr.bf16.vlgmr.msra.gmra.mrb[4].mxu0 %v853_v6 }
  0x43   :  { %1028 = vmatpush3.bf16.msra.mxu0 %v1121_v13  ;;  %1043 = vmatprep.mubr.msk.bf16.mxu0 %vm1131_vm0, %v1130_v9 }
  0x44   :  { %791 = vmatmul.mubr.bf16.vlgmr.msra.gmra.mrb[4].mxu1 %v855_v11  ;;  %1029 = vmatprep.subr.bf16.mxu0 %v1130_v9 }
  0x47   :  { %1030 = vmatpush3.bf16.msra.mxu0 %v1122_v14 }
  0x48   :  { %1031 = vmatprep.subr.bf16.mxu0 %v1130_v9 }
  0x4b   :  { %1032 = vmatpush3.bf16.msra.mxu0 %v1123_v15 }
  0x4c   :  { %1033 = vmatprep.subr.bf16.mxu0 %v1130_v9 }
  0x4f   :  { %1034 = vmatpush3.bf16.msra.mxu0 %v1124_v16 }
  0x50   :  { %1035 = vmatprep.subr.bf16.mxu0 %v1130_v9 }
  0x53   :  { %1036 = vmatpush3.bf16.msra.mxu0 %v1125_v17 }
  0x54   :  { %1037 = vmatprep.subr.bf16.mxu0 %v1130_v9 }
  0x57   :  { %1038 = vmatpush3.bf16.msra.mxu0 %v1126_v18 }
  0x58   :  { %1039 = vmatprep.subr.bf16.mxu0 %v1130_v9 }
  0x5b   :  { %1040 = vmatpush3.bf16.msra.mxu0 %v1127_v19 }
  0x5c   :  { %1041 = vmatprep.subr.bf16.mxu0 %v1130_v9 }
  0x5f   :  { %1042 = vmatpush3.bf16.msra.mxu0 %v1128_v20 }
  0x62   :  { %1044 = vmatmul.mubr.bf16.vlgmr.msra.gmra.mrb[8].mxu0 %v1129_v21 }
  0xf5   :  { %v946_v22 = vpop.f32.mrb[0].mxu0 }
  0xf6   :  { %v947_v24 = vpop.f32.mrb[1].mxu0 }
  0xf7   :  { %v948_v25 = vadd.f32 %v947_v24, %v946_v22  ;;  %v949_v26 = vpop.f32.mrb[2].mxu0  ;;  %v968_v27 = vpop.f32.mrb[0].mxu1 }
  0xf8   :  { %v950_v28 = vpop.f32.mrb[3].mxu0  ;;  %v969_v29 = vpop.f32.mrb[1].mxu1 }
  0xf9   :  { %v673_v30 = vadd.f32 %v948_v25, %v848_v23  ;;  %v970_v31 = vadd.f32 %v969_v29, %v968_v27  ;;  %v971_v32 = vpop.f32.mrb[2].mxu1 }
  0xfa   :  { %v972_v33 = vpop.f32.mrb[3].mxu1 }
  0xfb   :  { %v713_v34 = vadd.f32 %v970_v31, %v673_v30 }
 0x115   :  { %v990_v35 = vpop.f32.mrb[4].mxu0 }
 0x116   :  { %v991_v36 = vpop.f32.mrb[5].mxu0 }
 0x117   :  { %v992_v37 = vadd.f32 %v991_v36, %v990_v35  ;;  %v993_v38 = vpop.f32.mrb[6].mxu0  ;;  %v1012_v39 = vpop.f32.mrb[4].mxu1 }
 0x118   :  { %v994_v40 = vpop.f32.mrb[7].mxu0  ;;  %v1013_v41 = vpop.f32.mrb[5].mxu1 }
 0x119   :  { %v753_v42 = vadd.f32 %v992_v37, %v713_v34  ;;  %v1014_v43 = vadd.f32 %v1013_v41, %v1012_v39  ;;  %v1015_v44 = vpop.f32.mrb[6].mxu1 }
 0x11a   :  { %v1016_v45 = vpop.f32.mrb[7].mxu1 }
 0x11b   :  { %v793_v46 = vadd.f32 %v1014_v43, %v753_v42 }
 0x135   :  { %v832_v49 = vpop.f32.mrb[8].mxu0 }
 0x136   :  { %v833_v50 = vadd.f32 %v832_v49, %v793_v46  ;;  %v1045_v51 = vpop.f32.mrb[9].mxu0 }
 0x137   :  { %v835_v52 = vpop.f32.mrb[10].mxu0 }
 0x138   :  { %v840_v53 = vadd.f32 %v839_v48, %v833_v50  ;;  %v1046_v54 = vpop.f32.mrb[11].mxu0 }
 0x13a   :  { %v841_v55 = vmax.f32 %v840_v53, 0.0 }
 0x13c   :  { %v842_v56 = vpack.c.bf16 %v841_v55, %v841_v55 }
 0x13e   :  { %843 = vst [vmem:[%s1401_s4] sm:$0xf] %v842_v56 }

// kernel: _lambda_.40
= control target key start
LH: loop header
LB: loop body
LE: loop exit
PB: predicated region body
PF: predicated region fallthrough
CT: control target
= control target key end

     0   :  { %v181_v0 = vmov 0.0   ;;  %vm182_vm0 = vmmov 0   ;;  %s236_s1 = inlined_call_operand.vmem [shape: bf16[128,128], index: 1, kind: input, shape index: {}]   ;;  %s237_s0 = inlined_call_operand.vmem [shape: bf16[2,128], index: 0, kind: input, shape index: {}]   ;;  %s238_s2 = inlined_call_operand.vmem [shape: f32[1,128], index: 2, kind: input, shape index: {}]   ;;  %s239_s3 = inlined_call_operand.vmem [shape: bf16[2,128], index: 3, kind: output, shape index: {}]  }
   0x1   :  { %151 = vmatprep.subr.bf16.mxu0 %v181_v0  ;;  %v173_v1 = vld [vmem:[%s236_s1] sm:$0xff]   ;;  %167 = vmatprep.mubr.msk.bf16.mxu0 %vm182_vm0, %v181_v0  ;;  %v174_v2 = vld [vmem:[%s236_s1 + $0x8] sm:$0xff]   ;;  %v175_v3 = vld [vmem:[%s236_s1 + $0x10] sm:$0xff]  }
   0x2   :  { %152 = vmatpush3.bf16.msra.mxu0 %v173_v1  ;;  %v176_v4 = vld [vmem:[%s236_s1 + $0x18] sm:$0xff]   ;;  %v177_v5 = vld [vmem:[%s236_s1 + $0x20] sm:$0xff]   ;;  %v178_v6 = vld [vmem:[%s236_s1 + $0x28] sm:$0xff]  }
   0x3   :  { %153 = vmatprep.subr.bf16.mxu0 %v181_v0  ;;  %v179_v7 = vld [vmem:[%s236_s1 + $0x30] sm:$0xff]   ;;  %v180_v8 = vld [vmem:[%s236_s1 + $0x38] sm:$0xff]   ;;  %v15_v9 = vld [vmem:[%s237_s0] sm:$0x1] }
   0x4   :  { %v133_v10 = vld [vmem:[%s238_s2] ss:$0 sm:$0xff] }
   0x6   :  { %154 = vmatpush3.bf16.msra.mxu0 %v174_v2 }
   0x7   :  { %155 = vmatprep.subr.bf16.mxu0 %v181_v0 }
   0xa   :  { %156 = vmatpush3.bf16.msra.mxu0 %v175_v3 }
   0xb   :  { %157 = vmatprep.subr.bf16.mxu0 %v181_v0 }
   0xe   :  { %158 = vmatpush3.bf16.msra.mxu0 %v176_v4 }
   0xf   :  { %159 = vmatprep.subr.bf16.mxu0 %v181_v0 }
  0x12   :  { %160 = vmatpush3.bf16.msra.mxu0 %v177_v5 }
  0x13   :  { %161 = vmatprep.subr.bf16.mxu0 %v181_v0 }
  0x16   :  { %162 = vmatpush3.bf16.msra.mxu0 %v178_v6 }
  0x17   :  { %163 = vmatprep.subr.bf16.mxu0 %v181_v0 }
  0x1a   :  { %164 = vmatpush3.bf16.msra.mxu0 %v179_v7 }
  0x1b   :  { %165 = vmatprep.subr.bf16.mxu0 %v181_v0 }
  0x1e   :  { %166 = vmatpush3.bf16.msra.mxu0 %v180_v8 }
  0x21   :  { %168 = vmatmul.mubr.bf16.vlgmr.msra.gmra.mrb[0].mxu0 %v15_v9 }
  0xf4   :  { %v121_v11 = vpop.f32.mrb[0].mxu0 }
  0xf5   :  { %v122_v12 = vadd.f32 %v133_v10, %v121_v11  ;;  %v169_v13 = vpop.f32.mrb[1].mxu0 }
  0xf6   :  { %v124_v14 = vpop.f32.mrb[2].mxu0 }
  0xf7   :  { %v127_v15 = vpack.c.bf16 %v122_v12, %v122_v12  ;;  %v170_v16 = vpop.f32.mrb[3].mxu0 }
  0xf9   :  { %128 = vst [vmem:[%s239_s3] sm:$0x1] %v127_v15 }

// kernel: _lambda_.44
= control target key start
LH: loop header
LB: loop body
LE: loop exit
PB: predicated region body
PF: predicated region fallthrough
CT: control target
= control target key end

     0   :  { %v104_v3 = vlaneseq  ;;  %v538_v6 = vmov 1966171168   ;;  %vm540_vm0 = vmmov 0   ;;  %s808_s0 = inlined_call_operand.vmem [shape: bf16[2,1,1,9,128], index: 0, kind: input, shape index: {}, may-alias: {0,4}]   ;;  %s809_s1 = inlined_call_operand.vmem [shape: bf16[2,1152], index: 1, kind: input, shape index: {}]   ;;  %s810_s2 = inlined_call_operand.vmem [shape: bf16[1152,128], index: 2, kind: input, shape index: {}]   ;;  %s811_s3 = inlined_call_operand.vmem [shape: f32[1,128], index: 3, kind: input, shape index: {}]   ;;  %s812_s4 = inlined_call_operand.vmem [shape: bf16[2,1,1,9,128], index: 4, kind: output, shape index: {}, may-alias: {0,4}]  }
   0x1   :  { %v27_v0 = vld [vmem:[%s810_s2 + $0x40] sm:$0xff]  ;;  %v28_v5 = vld [vmem:[%s810_s2 + $0x48] sm:$0xff]  ;;  %v102_v7 = vunpack.c.l.s4 %v538_v6  ;;  %v29_v13 = vld [vmem:[%s810_s2 + $0x50] sm:$0xff] }
   0x2   :  { %v19_v1 = vld [vmem:[%s810_s2] sm:$0xff]  ;;  %417 = vmatprep.subr.bf16.mxu0 %v27_v0  ;;  %v44_v8 = vld [vmem:[%s810_s2 + $0xc8] sm:$0xff]  ;;  %v105_v12 = vshrl.u32 %v104_v3, 7  ;;  %v45_v14 = vld [vmem:[%s810_s2 + $0xd0] sm:$0xff] }
   0x3   :  { %v43_v2 = vld [vmem:[%s810_s2 + $0xc0] sm:$0xff]  ;;  %418 = vmatpush3.bf16.msra.mxu0 %v19_v1  ;;  %v20_v9 = vld [vmem:[%s810_s2 + $0x8] sm:$0xff]  ;;  %v103_v11 = vunpack.c.0.s8 %v102_v7  ;;  %v21_v15 = vld [vmem:[%s810_s2 + $0x10] sm:$0xff] }
   0x4   :  { %439 = vmatprep.subr.bf16.mxu1 %v43_v2  ;;  %v35_v4 = vld [vmem:[%s810_s2 + $0x80] sm:$0xff]  ;;  %419 = vmatprep.subr.bf16.mxu0 %v28_v5  ;;  %v36_v10 = vld [vmem:[%s810_s2 + $0x88] sm:$0xff]  ;;  %v37_v16 = vld [vmem:[%s810_s2 + $0x90] sm:$0xff] }
   0x5   :  { %440 = vmatpush3.bf16.msra.mxu1 %v35_v4  ;;  %v602_v17 = vsub.s32 %v103_v11, %v105_v12  ;;  %v30_v18 = vld [vmem:[%s810_s2 + $0x58] sm:$0xff]  ;;  %v17_v20 = vld [vmem:[%s809_s1] sm:$0xff]  ;;  %v32_v30 = vld [vmem:[%s810_s2 + $0x68] sm:$0xff] }
   0x6   :  { %441 = vmatprep.subr.bf16.mxu1 %v44_v8  ;;  %v46_v19 = vld [vmem:[%s810_s2 + $0xd8] sm:$0xff]  ;;  %v31_v24 = vld [vmem:[%s810_s2 + $0x60] sm:$0xff]  ;;  %v48_v31 = vld [vmem:[%s810_s2 + $0xe8] sm:$0xff]  ;;  %v100_v32 = vcombine.high %v17_v20, %v17_v20 }
   0x7   :  { %420 = vmatpush3.bf16.msra.mxu0 %v20_v9  ;;  %v22_v21 = vld [vmem:[%s810_s2 + $0x18] sm:$0xff]  ;;  %v107_v23 = vrot.slane %v17_v20, %v602_v17  ;;  %v47_v25 = vld [vmem:[%s810_s2 + $0xe0] sm:$0xff]  ;;  %v24_v34 = vld [vmem:[%s810_s2 + $0x28] sm:$0xff] }
   0x8   :  { %421 = vmatprep.subr.bf16.mxu0 %v29_v13  ;;  %v38_v22 = vld [vmem:[%s810_s2 + $0x98] sm:$0xff]  ;;  %v23_v27 = vld [vmem:[%s810_s2 + $0x20] sm:$0xff]  ;;  %v40_v35 = vld [vmem:[%s810_s2 + $0xa8] sm:$0xff]  ;;  %v652_v38 = vrot.slane %v100_v32, %v602_v17 }
   0x9   :  { %442 = vmatpush3.bf16.msra.mxu1 %v36_v10  ;;  %v115_v26 = vcombine.high %v107_v23, %v107_v23  ;;  %v39_v28 = vld [vmem:[%s810_s2 + $0xa0] sm:$0xff]  ;;  %v33_v36 = vld [vmem:[%s810_s2 + $0x70] sm:$0xff]  ;;  %v34_v41 = vld [vmem:[%s810_s2 + $0x78] sm:$0xff]  ;;  %v123_v44 = vrot.slane %v107_v23, %v602_v17 }
   0xa   :  { %443 = vmatprep.subr.bf16.mxu1 %v45_v14  ;;  %v49_v37 = vld [vmem:[%s810_s2 + $0xf0] sm:$0xff]  ;;  %v50_v42 = vld [vmem:[%s810_s2 + $0xf8] sm:$0xff]  ;;  %v116_v43 = vcombine.high %v652_v38, %v652_v38  ;;  %v59_v47 = vld [vmem:[%s810_s2 + $0x140] sm:$0xff] }
   0xb   :  { %422 = vmatpush3.bf16.msra.mxu0 %v21_v15  ;;  %v137_v29 = vrot.slane %v115_v26, %v602_v17  ;;  %v25_v39 = vld [vmem:[%s810_s2 + $0x30] sm:$0xff]  ;;  %v26_v45 = vld [vmem:[%s810_s2 + $0x38] sm:$0xff]  ;;  %v75_v48 = vld [vmem:[%s810_s2 + $0x1c0] sm:$0xff]  ;;  %v145_v50 = vcombine.high %v123_v44, %v123_v44 }
   0xc   :  { %423 = vmatprep.subr.bf16.mxu0 %v30_v18  ;;  %v41_v40 = vld [vmem:[%s810_s2 + $0xb0] sm:$0xff]  ;;  %v42_v46 = vld [vmem:[%s810_s2 + $0xb8] sm:$0xff]  ;;  %v144_v49 = vrot.slane %v116_v43, %v602_v17  ;;  %v51_v51 = vld [vmem:[%s810_s2 + $0x100] sm:$0xff] }
   0xd   :  { %444 = vmatpush3.bf16.msra.mxu1 %v37_v16  ;;  %204 = vmatprep.mubr.bf16.mxu0 %v137_v29  ;;  %v147_v33 = vcombine.high %v137_v29, %v137_v29  ;;  %v67_v52 = vld [vmem:[%s810_s2 + $0x180] sm:$0xff]  ;;  %v60_v53 = vld [vmem:[%s810_s2 + $0x148] sm:$0xff]  ;;  %v61_v58 = vld [vmem:[%s810_s2 + $0x150] sm:$0xff]  ;;  %v130_v16 = vrot.slane %v652_v38, %v602_v17 }
   0xe   :  { %445 = vmatprep.subr.bf16.mxu1 %v46_v19  ;;  %v76_v54 = vld [vmem:[%s810_s2 + $0x1c8] sm:$0xff]  ;;  %v148_v55 = vcombine.high %v144_v49, %v144_v49  ;;  %v77_v59 = vld [vmem:[%s810_s2 + $0x1d0] sm:$0xff]  ;;  %v62_v62 = vld [vmem:[%s810_s2 + $0x158] sm:$0xff] }
   0xf   :  { %424 = vmatpush3.bf16.msra.mxu0 %v22_v21  ;;  %244 = vmatprep.mubr.bf16.mxu1 %v147_v33  ;;  %v52_v56 = vld [vmem:[%s810_s2 + $0x108] sm:$0xff]  ;;  %v53_v60 = vld [vmem:[%s810_s2 + $0x110] sm:$0xff]  ;;  %v78_v63 = vld [vmem:[%s810_s2 + $0x1d8] sm:$0xff]  ;;  %v146_v20 = vcombine.high %v130_v16, %v130_v16  ;;  %v539_v21 = vmov 0.0  }
  0x10   :  { %425 = vmatprep.subr.bf16.mxu0 %v31_v24  ;;  %v68_v57 = vld [vmem:[%s810_s2 + $0x188] sm:$0xff]  ;;  %v69_v61 = vld [vmem:[%s810_s2 + $0x190] sm:$0xff]  ;;  %v54_v0 = vld [vmem:[%s810_s2 + $0x118] sm:$0xff] }
  0x11   :  { %446 = vmatpush3.bf16.msra.mxu1 %v38_v22  ;;  %v70_v1 = vld [vmem:[%s810_s2 + $0x198] sm:$0xff]  ;;  %v63_v2 = vld [vmem:[%s810_s2 + $0x160] sm:$0xff]  ;;  %v64_v6 = vld [vmem:[%s810_s2 + $0x168] sm:$0xff] }
  0x12   :  { %447 = vmatprep.subr.bf16.mxu1 %v47_v25  ;;  %v79_v3 = vld [vmem:[%s810_s2 + $0x1e0] sm:$0xff]  ;;  %v80_v7 = vld [vmem:[%s810_s2 + $0x1e8] sm:$0xff]  ;;  %v65_v10 = vld [vmem:[%s810_s2 + $0x170] sm:$0xff] }
  0x13   :  { %426 = vmatpush3.bf16.msra.mxu0 %v23_v27  ;;  %v55_v4 = vld [vmem:[%s810_s2 + $0x120] sm:$0xff]  ;;  %v56_v8 = vld [vmem:[%s810_s2 + $0x128] sm:$0xff]  ;;  %v81_v11 = vld [vmem:[%s810_s2 + $0x1f0] sm:$0xff] }
  0x14   :  { %427 = vmatprep.subr.bf16.mxu0 %v32_v30  ;;  %v71_v5 = vld [vmem:[%s810_s2 + $0x1a0] sm:$0xff]  ;;  %v72_v9 = vld [vmem:[%s810_s2 + $0x1a8] sm:$0xff]  ;;  %v57_v12 = vld [vmem:[%s810_s2 + $0x130] sm:$0xff] }
  0x15   :  { %448 = vmatpush3.bf16.msra.mxu1 %v39_v28  ;;  %v73_v13 = vld [vmem:[%s810_s2 + $0x1b0] sm:$0xff]  ;;  %v66_v14 = vld [vmem:[%s810_s2 + $0x178] sm:$0xff]  ;;  %v83_v22 = vld [vmem:[%s810_s2 + $0x200] sm:$0xff] }
  0x16   :  { %449 = vmatprep.subr.bf16.mxu1 %v48_v31  ;;  %v82_v15 = vld [vmem:[%s810_s2 + $0x1f8] sm:$0xff]  ;;  %v84_v23 = vld [vmem:[%s810_s2 + $0x208] sm:$0xff]  ;;  %v85_v24 = vld [vmem:[%s810_s2 + $0x210] sm:$0xff] }
  0x17   :  { %428 = vmatpush3.bf16.msra.mxu0 %v24_v34  ;;  %v58_v18 = vld [vmem:[%s810_s2 + $0x138] sm:$0xff]  ;;  %v87_v26 = vld [vmem:[%s810_s2 + $0x220] sm:$0xff]  ;;  %v88_v27 = vld [vmem:[%s810_s2 + $0x228] sm:$0xff] }
  0x18   :  { %429 = vmatprep.subr.bf16.mxu0 %v33_v36  ;;  %v74_v19 = vld [vmem:[%s810_s2 + $0x1b8] sm:$0xff]  ;;  %v89_v28 = vld [vmem:[%s810_s2 + $0x230] sm:$0xff]  ;;  %v415_v29 = vld.sshfl [vmem:[%s809_s1 + $0x8] sm:$0x1 pattern:$0x75316420] }
  0x19   :  { %450 = vmatpush3.bf16.msra.mxu1 %v40_v35  ;;  %v86_v25 = vld [vmem:[%s810_s2 + $0x218] sm:$0xff]  ;;  %v162_v31 = vrot.slane %v415_v29, %v602_v17  ;;  %v414_v34 = vld [vmem:[%s811_s3] ss:$0 sm:$0xff] }
  0x1a   :  { %451 = vmatprep.subr.bf16.mxu1 %v49_v37  ;;  %v90_v30 = vld [vmem:[%s810_s2 + $0x238] sm:$0xff] }
  0x1b   :  { %430 = vmatpush3.bf16.msra.mxu0 %v25_v39 }
  0x1c   :  { %431 = vmatprep.subr.bf16.mxu0 %v34_v41 }
  0x1d   :  { %452 = vmatpush3.bf16.msra.mxu1 %v41_v40 }
  0x1e   :  { %453 = vmatprep.subr.bf16.mxu1 %v50_v42 }
  0x1f   :  { %432 = vmatpush3.bf16.msra.mxu0 %v26_v45 }
  0x20   :  { %461 = vmatprep.subr.bf16.mxu0 %v59_v47 }
  0x21   :  { %454 = vmatpush3.bf16.msra.mxu1 %v42_v46 }
  0x22   :  { %483 = vmatprep.subr.bf16.mxu1 %v75_v48  ;;  %205 = vmatmul.mubr.bf16.vlgmr.msra.gmra.mrb[0].mxu0 %v123_v44 }
  0x23   :  { %462 = vmatpush3.bf16.msra.mxu0 %v51_v51  ;;  %284 = vmatprep.mubr.bf16.mxu0 %v144_v49 }
  0x24   :  { %245 = vmatmul.mubr.bf16.vlgmr.msra.gmra.mrb[0].mxu1 %v145_v50  ;;  %463 = vmatprep.subr.bf16.mxu0 %v60_v53 }
  0x25   :  { %484 = vmatpush3.bf16.msra.mxu1 %v67_v52  ;;  %324 = vmatprep.mubr.bf16.mxu1 %v148_v55 }
  0x26   :  { %485 = vmatprep.subr.bf16.mxu1 %v76_v54 }
  0x27   :  { %464 = vmatpush3.bf16.msra.mxu0 %v52_v56 }
  0x28   :  { %465 = vmatprep.subr.bf16.mxu0 %v61_v58 }
  0x29   :  { %486 = vmatpush3.bf16.msra.mxu1 %v68_v57 }
  0x2a   :  { %487 = vmatprep.subr.bf16.mxu1 %v77_v59 }
  0x2b   :  { %466 = vmatpush3.bf16.msra.mxu0 %v53_v60 }
  0x2c   :  { %467 = vmatprep.subr.bf16.mxu0 %v62_v62 }
  0x2d   :  { %488 = vmatpush3.bf16.msra.mxu1 %v69_v61 }
  0x2e   :  { %489 = vmatprep.subr.bf16.mxu1 %v78_v63 }
  0x2f   :  { %468 = vmatpush3.bf16.msra.mxu0 %v54_v0 }
  0x30   :  { %469 = vmatprep.subr.bf16.mxu0 %v63_v2 }
  0x31   :  { %490 = vmatpush3.bf16.msra.mxu1 %v70_v1 }
  0x32   :  { %491 = vmatprep.subr.bf16.mxu1 %v79_v3 }
  0x33   :  { %470 = vmatpush3.bf16.msra.mxu0 %v55_v4 }
  0x34   :  { %471 = vmatprep.subr.bf16.mxu0 %v64_v6 }
  0x35   :  { %492 = vmatpush3.bf16.msra.mxu1 %v71_v5 }
  0x36   :  { %493 = vmatprep.subr.bf16.mxu1 %v80_v7 }
  0x37   :  { %472 = vmatpush3.bf16.msra.mxu0 %v56_v8 }
  0x38   :  { %473 = vmatprep.subr.bf16.mxu0 %v65_v10 }
  0x39   :  { %494 = vmatpush3.bf16.msra.mxu1 %v72_v9 }
  0x3a   :  { %495 = vmatprep.subr.bf16.mxu1 %v81_v11 }
  0x3b   :  { %474 = vmatpush3.bf16.msra.mxu0 %v57_v12 }
  0x3c   :  { %475 = vmatprep.subr.bf16.mxu0 %v66_v14 }
  0x3d   :  { %496 = vmatpush3.bf16.msra.mxu1 %v73_v13 }
  0x3e   :  { %497 = vmatprep.subr.bf16.mxu1 %v82_v15 }
  0x3f   :  { %476 = vmatpush3.bf16.msra.mxu0 %v58_v18 }
  0x40   :  { %514 = vmatprep.subr.bf16.mxu0 %v539_v21 }
  0x41   :  { %498 = vmatpush3.bf16.msra.mxu1 %v74_v19 }
  0x42   :  { %285 = vmatmul.mubr.bf16.vlgmr.msra.gmra.mrb[4].mxu0 %v130_v16 }
  0x43   :  { %515 = vmatpush3.bf16.msra.mxu0 %v83_v22  ;;  %530 = vmatprep.mubr.msk.bf16.mxu0 %vm540_vm0, %v539_v21 }
  0x44   :  { %325 = vmatmul.mubr.bf16.vlgmr.msra.gmra.mrb[4].mxu1 %v146_v20  ;;  %516 = vmatprep.subr.bf16.mxu0 %v539_v21 }
  0x47   :  { %517 = vmatpush3.bf16.msra.mxu0 %v84_v23 }
  0x48   :  { %518 = vmatprep.subr.bf16.mxu0 %v539_v21 }
  0x4b   :  { %519 = vmatpush3.bf16.msra.mxu0 %v85_v24 }
  0x4c   :  { %520 = vmatprep.subr.bf16.mxu0 %v539_v21 }
  0x4f   :  { %521 = vmatpush3.bf16.msra.mxu0 %v86_v25 }
  0x50   :  { %522 = vmatprep.subr.bf16.mxu0 %v539_v21 }
  0x53   :  { %523 = vmatpush3.bf16.msra.mxu0 %v87_v26 }
  0x54   :  { %524 = vmatprep.subr.bf16.mxu0 %v539_v21 }
  0x57   :  { %525 = vmatpush3.bf16.msra.mxu0 %v88_v27 }
  0x58   :  { %526 = vmatprep.subr.bf16.mxu0 %v539_v21 }
  0x5b   :  { %527 = vmatpush3.bf16.msra.mxu0 %v89_v28 }
  0x5c   :  { %528 = vmatprep.subr.bf16.mxu0 %v539_v21 }
  0x5f   :  { %529 = vmatpush3.bf16.msra.mxu0 %v90_v30 }
  0x62   :  { %531 = vmatmul.mubr.bf16.vlgmr.msra.gmra.mrb[8].mxu0 %v162_v31 }
  0xf5   :  { %v433_v32 = vpop.f32.mrb[0].mxu0 }
  0xf6   :  { %v434_v35 = vpop.f32.mrb[1].mxu0 }
  0xf7   :  { %v455_v33 = vpop.f32.mrb[0].mxu1  ;;  %v435_v37 = vadd.f32 %v434_v35, %v433_v32  ;;  %v436_v38 = vpop.f32.mrb[2].mxu0 }
  0xf8   :  { %v456_v36 = vpop.f32.mrb[1].mxu1  ;;  %v437_v41 = vpop.f32.mrb[3].mxu0 }
  0xf9   :  { %v457_v39 = vadd.f32 %v456_v36, %v455_v33  ;;  %v458_v40 = vpop.f32.mrb[2].mxu1  ;;  %v207_v43 = vadd.f32 %v435_v37, %v414_v34 }
  0xfa   :  { %v459_v42 = vpop.f32.mrb[3].mxu1 }
  0xfb   :  { %v247_v44 = vadd.f32 %v457_v39, %v207_v43 }
 0x115   :  { %v477_v45 = vpop.f32.mrb[4].mxu0 }
 0x116   :  { %v478_v46 = vpop.f32.mrb[5].mxu0 }
 0x117   :  { %v499_v17 = vpop.f32.mrb[4].mxu1  ;;  %v479_v48 = vadd.f32 %v478_v46, %v477_v45  ;;  %v480_v49 = vpop.f32.mrb[6].mxu0 }
 0x118   :  { %v500_v47 = vpop.f32.mrb[5].mxu1  ;;  %v481_v52 = vpop.f32.mrb[7].mxu0 }
 0x119   :  { %v501_v50 = vadd.f32 %v500_v47, %v499_v17  ;;  %v502_v51 = vpop.f32.mrb[6].mxu1  ;;  %v287_v54 = vadd.f32 %v479_v48, %v247_v44 }
 0x11a   :  { %v503_v53 = vpop.f32.mrb[7].mxu1 }
 0x11b   :  { %v327_v55 = vadd.f32 %v501_v50, %v287_v54 }
 0x135   :  { %v366_v56 = vpop.f32.mrb[8].mxu0 }
 0x136   :  { %v367_v57 = vadd.f32 %v366_v56, %v327_v55  ;;  %v532_v58 = vpop.f32.mrb[9].mxu0 }
 0x137   :  { %v369_v59 = vpop.f32.mrb[10].mxu0 }
 0x138   :  { %v372_v60 = vmax.f32 %v367_v57, 0.0  ;;  %v533_v61 = vpop.f32.mrb[11].mxu0 }
 0x13a   :  { %v373_v62 = vpack.c.bf16 %v372_v60, %v372_v60 }
 0x13c   :  { %374 = vst [vmem:[#allocation2] sm:$0x1] %v373_v62 }
 0x143   :  { %v392_v63 = vld [vmem:[#allocation2] sm:$0x1] }
 0x144   :  { %416 = vst [vmem:[%s812_s4 + $0x4] sm:$0x1] %v392_v63 }

// kernel: _lambda_.41
= control target key start
LH: loop header
LB: loop body
LE: loop exit
PB: predicated region body
PF: predicated region fallthrough
CT: control target
= control target key end

     0   :  { %v1154_v21 = vmov 1966171168   ;;  %v177_v23 = vlaneseq  ;;  %vm1156_vm0 = vmmov 0   ;;  %s1427_s1 = inlined_call_operand.vmem [shape: bf16[1152,128], index: 1, kind: input, shape index: {}]   ;;  %s1428_s0 = inlined_call_operand.vmem [shape: bf16[2,1152], index: 0, kind: input, shape index: {}]   ;;  %s1429_s2 = inlined_call_operand.vmem [shape: f32[1,128], index: 2, kind: input, shape index: {}]   ;;  %s1430_s3 = inlined_call_operand.vmem [shape: bf16[2,128], index: 3, kind: input, shape index: {}]   ;;  %s1431_s4 = inlined_call_operand.vmem [shape: bf16[2,128], index: 4, kind: output, shape index: {}]  }
   0x1   :  { %v1081_v0 = vld [vmem:[%s1427_s1 + $0x40] sm:$0xff]   ;;  %v1085_v4 = vld [vmem:[%s1427_s1 + $0x48] sm:$0xff]   ;;  %v1089_v8 = vld [vmem:[%s1427_s1 + $0x50] sm:$0xff]   ;;  %v175_v22 = vunpack.c.l.s4 %v1154_v21 }
   0x2   :  { %v1082_v1 = vld [vmem:[%s1427_s1] sm:$0xff]   ;;  %961 = vmatprep.subr.bf16.mxu0 %v1081_v0  ;;  %v1086_v5 = vld [vmem:[%s1427_s1 + $0x8] sm:$0xff]   ;;  %v1090_v9 = vld [vmem:[%s1427_s1 + $0x10] sm:$0xff]   ;;  %v178_v29 = vshrl.u32 %v177_v23, 7 }
   0x3   :  { %v1083_v2 = vld [vmem:[%s1427_s1 + $0xc0] sm:$0xff]   ;;  %962 = vmatpush3.bf16.msra.mxu0 %v1082_v1  ;;  %v1087_v6 = vld [vmem:[%s1427_s1 + $0xc8] sm:$0xff]   ;;  %v1091_v10 = vld [vmem:[%s1427_s1 + $0xd0] sm:$0xff]   ;;  %v176_v28 = vunpack.c.0.s8 %v175_v22 }
   0x4   :  { %v1084_v3 = vld [vmem:[%s1427_s1 + $0x80] sm:$0xff]   ;;  %983 = vmatprep.subr.bf16.mxu1 %v1083_v2  ;;  %963 = vmatprep.subr.bf16.mxu0 %v1085_v4  ;;  %v1088_v7 = vld [vmem:[%s1427_s1 + $0x88] sm:$0xff]   ;;  %v1092_v11 = vld [vmem:[%s1427_s1 + $0x90] sm:$0xff]  }
   0x5   :  { %984 = vmatpush3.bf16.msra.mxu1 %v1084_v3  ;;  %v1093_v12 = vld [vmem:[%s1427_s1 + $0x58] sm:$0xff]   ;;  %v1097_v16 = vld [vmem:[%s1427_s1 + $0x60] sm:$0xff]   ;;  %v1101_v20 = vld [vmem:[%s1427_s1 + $0x68] sm:$0xff]   ;;  %v1269_v34 = vsub.s32 %v176_v28, %v178_v29 }
   0x6   :  { %985 = vmatprep.subr.bf16.mxu1 %v1087_v6  ;;  %v1094_v13 = vld [vmem:[%s1427_s1 + $0x18] sm:$0xff]   ;;  %v1098_v17 = vld [vmem:[%s1427_s1 + $0x20] sm:$0xff]   ;;  %v1102_v24 = vld [vmem:[%s1427_s1 + $0x28] sm:$0xff]  }
   0x7   :  { %964 = vmatpush3.bf16.msra.mxu0 %v1086_v5  ;;  %v1095_v14 = vld [vmem:[%s1427_s1 + $0xd8] sm:$0xff]   ;;  %v1099_v18 = vld [vmem:[%s1427_s1 + $0xe0] sm:$0xff]   ;;  %v1103_v25 = vld [vmem:[%s1427_s1 + $0xe8] sm:$0xff]  }
   0x8   :  { %965 = vmatprep.subr.bf16.mxu0 %v1089_v8  ;;  %v1096_v15 = vld [vmem:[%s1427_s1 + $0x98] sm:$0xff]   ;;  %v1100_v19 = vld [vmem:[%s1427_s1 + $0xa0] sm:$0xff]   ;;  %v1104_v26 = vld [vmem:[%s1427_s1 + $0xa8] sm:$0xff]  }
   0x9   :  { %986 = vmatpush3.bf16.msra.mxu1 %v1088_v7  ;;  %v1105_v27 = vld [vmem:[%s1427_s1 + $0x70] sm:$0xff]   ;;  %v1109_v33 = vld [vmem:[%s1427_s1 + $0x78] sm:$0xff]   ;;  %v18_v37 = vld [vmem:[%s1428_s0] sm:$0xff] }
   0xa   :  { %987 = vmatprep.subr.bf16.mxu1 %v1091_v10  ;;  %v1106_v30 = vld [vmem:[%s1427_s1 + $0x30] sm:$0xff]   ;;  %v1110_v35 = vld [vmem:[%s1427_s1 + $0x38] sm:$0xff]   ;;  %v173_v38 = vcombine.high %v18_v37, %v18_v37  ;;  %v180_v39 = vrot.slane %v18_v37, %v1269_v34  ;;  %v1114_v41 = vld [vmem:[%s1427_s1 + $0x140] sm:$0xff]  }
   0xb   :  { %966 = vmatpush3.bf16.msra.mxu0 %v1090_v9  ;;  %v1107_v31 = vld [vmem:[%s1427_s1 + $0xf0] sm:$0xff]   ;;  %v1111_v36 = vld [vmem:[%s1427_s1 + $0xf8] sm:$0xff]   ;;  %v1116_v45 = vld [vmem:[%s1427_s1 + $0x1c0] sm:$0xff]  }
   0xc   :  { %967 = vmatprep.subr.bf16.mxu0 %v1093_v12  ;;  %v1108_v32 = vld [vmem:[%s1427_s1 + $0xb0] sm:$0xff]   ;;  %v1113_v40 = vld [vmem:[%s1427_s1 + $0xb8] sm:$0xff]   ;;  %v188_v42 = vcombine.high %v180_v39, %v180_v39  ;;  %v196_v43 = vrot.slane %v180_v39, %v1269_v34  ;;  %v1289_v44 = vrot.slane %v173_v38, %v1269_v34  ;;  %v1115_v47 = vld [vmem:[%s1427_s1 + $0x100] sm:$0xff]  }
   0xd   :  { %988 = vmatpush3.bf16.msra.mxu1 %v1092_v11  ;;  %v1118_v50 = vld [vmem:[%s1427_s1 + $0x148] sm:$0xff]   ;;  %v1117_v52 = vld [vmem:[%s1427_s1 + $0x180] sm:$0xff]   ;;  %v1122_v57 = vld [vmem:[%s1427_s1 + $0x150] sm:$0xff]  }
   0xe   :  { %989 = vmatprep.subr.bf16.mxu1 %v1095_v14  ;;  %v210_v46 = vrot.slane %v188_v42, %v1269_v34  ;;  %v189_v48 = vcombine.high %v1289_v44, %v1289_v44  ;;  %v218_v49 = vcombine.high %v196_v43, %v196_v43  ;;  %v1120_v54 = vld [vmem:[%s1427_s1 + $0x1c8] sm:$0xff]   ;;  %v1124_v59 = vld [vmem:[%s1427_s1 + $0x1d0] sm:$0xff]   ;;  %v1126_v61 = vld [vmem:[%s1427_s1 + $0x158] sm:$0xff]  }
   0xf   :  { %968 = vmatpush3.bf16.msra.mxu0 %v1094_v13  ;;  %v1119_v55 = vld [vmem:[%s1427_s1 + $0x108] sm:$0xff]   ;;  %v1123_v60 = vld [vmem:[%s1427_s1 + $0x110] sm:$0xff]   ;;  %v1128_v63 = vld [vmem:[%s1427_s1 + $0x1d8] sm:$0xff]  }
  0x10   :  { %969 = vmatprep.subr.bf16.mxu0 %v1097_v16  ;;  %709 = vmatprep.mubr.bf16.mxu0 %v210_v46  ;;  %v220_v51 = vcombine.high %v210_v46, %v210_v46  ;;  %v217_v53 = vrot.slane %v189_v48, %v1269_v34  ;;  %v1121_v58 = vld [vmem:[%s1427_s1 + $0x188] sm:$0xff]   ;;  %v1125_v62 = vld [vmem:[%s1427_s1 + $0x190] sm:$0xff]   ;;  %v1127_v0 = vld [vmem:[%s1427_s1 + $0x118] sm:$0xff]  }
  0x11   :  { %990 = vmatpush3.bf16.msra.mxu1 %v1096_v15  ;;  %v1130_v1 = vld [vmem:[%s1427_s1 + $0x160] sm:$0xff]   ;;  %v1129_v2 = vld [vmem:[%s1427_s1 + $0x198] sm:$0xff]   ;;  %v1134_v5 = vld [vmem:[%s1427_s1 + $0x168] sm:$0xff]  }
  0x12   :  { %991 = vmatprep.subr.bf16.mxu1 %v1099_v18  ;;  %749 = vmatprep.mubr.bf16.mxu1 %v220_v51  ;;  %v221_v56 = vcombine.high %v217_v53, %v217_v53  ;;  %v1132_v3 = vld [vmem:[%s1427_s1 + $0x1e0] sm:$0xff]   ;;  %v1136_v7 = vld [vmem:[%s1427_s1 + $0x1e8] sm:$0xff]   ;;  %v1138_v9 = vld [vmem:[%s1427_s1 + $0x170] sm:$0xff]  }
  0x13   :  { %970 = vmatpush3.bf16.msra.mxu0 %v1098_v17  ;;  %v1131_v4 = vld [vmem:[%s1427_s1 + $0x120] sm:$0xff]   ;;  %v1135_v8 = vld [vmem:[%s1427_s1 + $0x128] sm:$0xff]   ;;  %v1140_v11 = vld [vmem:[%s1427_s1 + $0x1f0] sm:$0xff]   ;;  %v203_v17 = vrot.slane %v1289_v44, %v1269_v34 }
  0x14   :  { %971 = vmatprep.subr.bf16.mxu0 %v1101_v20  ;;  %v1133_v6 = vld [vmem:[%s1427_s1 + $0x1a0] sm:$0xff]   ;;  %v1137_v10 = vld [vmem:[%s1427_s1 + $0x1a8] sm:$0xff]   ;;  %v1139_v12 = vld [vmem:[%s1427_s1 + $0x130] sm:$0xff]   ;;  %v1155_v20 = vmov 0.0  }
  0x15   :  { %992 = vmatpush3.bf16.msra.mxu1 %v1100_v19  ;;  %v1142_v13 = vld [vmem:[%s1427_s1 + $0x178] sm:$0xff]   ;;  %v1141_v14 = vld [vmem:[%s1427_s1 + $0x1b0] sm:$0xff]   ;;  %v1146_v19 = vld [vmem:[%s1427_s1 + $0x200] sm:$0xff]   ;;  %v219_v21 = vcombine.high %v203_v17, %v203_v17 }
  0x16   :  { %993 = vmatprep.subr.bf16.mxu1 %v1103_v25  ;;  %v1144_v15 = vld [vmem:[%s1427_s1 + $0x1f8] sm:$0xff]   ;;  %v1147_v22 = vld [vmem:[%s1427_s1 + $0x208] sm:$0xff]   ;;  %v1148_v25 = vld [vmem:[%s1427_s1 + $0x210] sm:$0xff]  }
  0x17   :  { %972 = vmatpush3.bf16.msra.mxu0 %v1102_v24  ;;  %v1143_v16 = vld [vmem:[%s1427_s1 + $0x138] sm:$0xff]   ;;  %v888_v23 = vld.sshfl [vmem:[%s1428_s0 + $0x8] sm:$0x1 pattern:$0x75316420]  ;;  %v1152_v29 = vld [vmem:[%s1427_s1 + $0x230] sm:$0xff]  }
  0x18   :  { %973 = vmatprep.subr.bf16.mxu0 %v1105_v27  ;;  %v1145_v18 = vld [vmem:[%s1427_s1 + $0x1b8] sm:$0xff]   ;;  %v235_v24 = vrot.slane %v888_v23, %v1269_v34  ;;  %v1150_v27 = vld [vmem:[%s1427_s1 + $0x220] sm:$0xff]   ;;  %v1151_v28 = vld [vmem:[%s1427_s1 + $0x228] sm:$0xff]  }
  0x19   :  { %994 = vmatpush3.bf16.msra.mxu1 %v1104_v26  ;;  %v1149_v26 = vld [vmem:[%s1427_s1 + $0x218] sm:$0xff]  }
  0x1a   :  { %995 = vmatprep.subr.bf16.mxu1 %v1107_v31 }
  0x1b   :  { %974 = vmatpush3.bf16.msra.mxu0 %v1106_v30  ;;  %v1153_v30 = vld [vmem:[%s1427_s1 + $0x238] sm:$0xff]  }
  0x1c   :  { %975 = vmatprep.subr.bf16.mxu0 %v1109_v33 }
  0x1d   :  { %996 = vmatpush3.bf16.msra.mxu1 %v1108_v32  ;;  %v887_v32 = vld [vmem:[%s1429_s2] ss:$0 sm:$0xff] }
  0x1e   :  { %997 = vmatprep.subr.bf16.mxu1 %v1111_v36 }
  0x1f   :  { %976 = vmatpush3.bf16.msra.mxu0 %v1110_v35 }
  0x20   :  { %1005 = vmatprep.subr.bf16.mxu0 %v1114_v41 }
  0x21   :  { %998 = vmatpush3.bf16.msra.mxu1 %v1113_v40 }
  0x22   :  { %1027 = vmatprep.subr.bf16.mxu1 %v1116_v45  ;;  %710 = vmatmul.mubr.bf16.vlgmr.msra.gmra.mrb[0].mxu0 %v196_v43 }
  0x23   :  { %1006 = vmatpush3.bf16.msra.mxu0 %v1115_v47  ;;  %789 = vmatprep.mubr.bf16.mxu0 %v217_v53 }
  0x24   :  { %750 = vmatmul.mubr.bf16.vlgmr.msra.gmra.mrb[0].mxu1 %v218_v49  ;;  %1007 = vmatprep.subr.bf16.mxu0 %v1118_v50 }
  0x25   :  { %1028 = vmatpush3.bf16.msra.mxu1 %v1117_v52  ;;  %829 = vmatprep.mubr.bf16.mxu1 %v221_v56  ;;  %v877_v56 = vld [vmem:[%s1430_s3] sm:$0x1] }
  0x26   :  { %1029 = vmatprep.subr.bf16.mxu1 %v1120_v54 }
  0x27   :  { %1008 = vmatpush3.bf16.msra.mxu0 %v1119_v55 }
  0x28   :  { %1009 = vmatprep.subr.bf16.mxu0 %v1122_v57  ;;  %v878_v57 = vunpack.c.l.bf16 %v877_v56 }
  0x29   :  { %1030 = vmatpush3.bf16.msra.mxu1 %v1121_v58 }
  0x2a   :  { %1031 = vmatprep.subr.bf16.mxu1 %v1124_v59 }
  0x2b   :  { %1010 = vmatpush3.bf16.msra.mxu0 %v1123_v60 }
  0x2c   :  { %1011 = vmatprep.subr.bf16.mxu0 %v1126_v61 }
  0x2d   :  { %1032 = vmatpush3.bf16.msra.mxu1 %v1125_v62 }
  0x2e   :  { %1033 = vmatprep.subr.bf16.mxu1 %v1128_v63 }
  0x2f   :  { %1012 = vmatpush3.bf16.msra.mxu0 %v1127_v0 }
  0x30   :  { %1013 = vmatprep.subr.bf16.mxu0 %v1130_v1 }
  0x31   :  { %1034 = vmatpush3.bf16.msra.mxu1 %v1129_v2 }
  0x32   :  { %1035 = vmatprep.subr.bf16.mxu1 %v1132_v3 }
  0x33   :  { %1014 = vmatpush3.bf16.msra.mxu0 %v1131_v4 }
  0x34   :  { %1015 = vmatprep.subr.bf16.mxu0 %v1134_v5 }
  0x35   :  { %1036 = vmatpush3.bf16.msra.mxu1 %v1133_v6 }
  0x36   :  { %1037 = vmatprep.subr.bf16.mxu1 %v1136_v7 }
  0x37   :  { %1016 = vmatpush3.bf16.msra.mxu0 %v1135_v8 }
  0x38   :  { %1017 = vmatprep.subr.bf16.mxu0 %v1138_v9 }
  0x39   :  { %1038 = vmatpush3.bf16.msra.mxu1 %v1137_v10 }
  0x3a   :  { %1039 = vmatprep.subr.bf16.mxu1 %v1140_v11 }
  0x3b   :  { %1018 = vmatpush3.bf16.msra.mxu0 %v1139_v12 }
  0x3c   :  { %1019 = vmatprep.subr.bf16.mxu0 %v1142_v13 }
  0x3d   :  { %1040 = vmatpush3.bf16.msra.mxu1 %v1141_v14 }
  0x3e   :  { %1041 = vmatprep.subr.bf16.mxu1 %v1144_v15 }
  0x3f   :  { %1020 = vmatpush3.bf16.msra.mxu0 %v1143_v16 }
  0x40   :  { %1058 = vmatprep.subr.bf16.mxu0 %v1155_v20 }
  0x41   :  { %1042 = vmatpush3.bf16.msra.mxu1 %v1145_v18 }
  0x42   :  { %790 = vmatmul.mubr.bf16.vlgmr.msra.gmra.mrb[4].mxu0 %v203_v17 }
  0x43   :  { %1059 = vmatpush3.bf16.msra.mxu0 %v1146_v19  ;;  %1074 = vmatprep.mubr.msk.bf16.mxu0 %vm1156_vm0, %v1155_v20 }
  0x44   :  { %830 = vmatmul.mubr.bf16.vlgmr.msra.gmra.mrb[4].mxu1 %v219_v21  ;;  %1060 = vmatprep.subr.bf16.mxu0 %v1155_v20 }
  0x47   :  { %1061 = vmatpush3.bf16.msra.mxu0 %v1147_v22 }
  0x48   :  { %1062 = vmatprep.subr.bf16.mxu0 %v1155_v20 }
  0x4b   :  { %1063 = vmatpush3.bf16.msra.mxu0 %v1148_v25 }
  0x4c   :  { %1064 = vmatprep.subr.bf16.mxu0 %v1155_v20 }
  0x4f   :  { %1065 = vmatpush3.bf16.msra.mxu0 %v1149_v26 }
  0x50   :  { %1066 = vmatprep.subr.bf16.mxu0 %v1155_v20 }
  0x53   :  { %1067 = vmatpush3.bf16.msra.mxu0 %v1150_v27 }
  0x54   :  { %1068 = vmatprep.subr.bf16.mxu0 %v1155_v20 }
  0x57   :  { %1069 = vmatpush3.bf16.msra.mxu0 %v1151_v28 }
  0x58   :  { %1070 = vmatprep.subr.bf16.mxu0 %v1155_v20 }
  0x5b   :  { %1071 = vmatpush3.bf16.msra.mxu0 %v1152_v29 }
  0x5c   :  { %1072 = vmatprep.subr.bf16.mxu0 %v1155_v20 }
  0x5f   :  { %1073 = vmatpush3.bf16.msra.mxu0 %v1153_v30 }
  0x62   :  { %1075 = vmatmul.mubr.bf16.vlgmr.msra.gmra.mrb[8].mxu0 %v235_v24 }
  0xf5   :  { %v977_v31 = vpop.f32.mrb[0].mxu0 }
  0xf6   :  { %v978_v33 = vpop.f32.mrb[1].mxu0 }
  0xf7   :  { %v979_v34 = vadd.f32 %v978_v33, %v977_v31  ;;  %v980_v35 = vpop.f32.mrb[2].mxu0  ;;  %v999_v36 = vpop.f32.mrb[0].mxu1 }
  0xf8   :  { %v981_v37 = vpop.f32.mrb[3].mxu0  ;;  %v1000_v38 = vpop.f32.mrb[1].mxu1 }
  0xf9   :  { %v712_v39 = vadd.f32 %v979_v34, %v887_v32  ;;  %v1001_v40 = vadd.f32 %v1000_v38, %v999_v36  ;;  %v1002_v41 = vpop.f32.mrb[2].mxu1 }
  0xfa   :  { %v1003_v42 = vpop.f32.mrb[3].mxu1 }
  0xfb   :  { %v752_v43 = vadd.f32 %v1001_v40, %v712_v39 }
 0x115   :  { %v1021_v44 = vpop.f32.mrb[4].mxu0 }
 0x116   :  { %v1022_v45 = vpop.f32.mrb[5].mxu0 }
 0x117   :  { %v1023_v46 = vadd.f32 %v1022_v45, %v1021_v44  ;;  %v1024_v47 = vpop.f32.mrb[6].mxu0  ;;  %v1043_v48 = vpop.f32.mrb[4].mxu1 }
 0x118   :  { %v1025_v49 = vpop.f32.mrb[7].mxu0  ;;  %v1044_v50 = vpop.f32.mrb[5].mxu1 }
 0x119   :  { %v792_v51 = vadd.f32 %v1023_v46, %v752_v43  ;;  %v1045_v52 = vadd.f32 %v1044_v50, %v1043_v48  ;;  %v1046_v53 = vpop.f32.mrb[6].mxu1 }
 0x11a   :  { %v1047_v54 = vpop.f32.mrb[7].mxu1 }
 0x11b   :  { %v832_v55 = vadd.f32 %v1045_v52, %v792_v51 }
 0x135   :  { %v871_v58 = vpop.f32.mrb[8].mxu0 }
 0x136   :  { %v872_v59 = vadd.f32 %v871_v58, %v832_v55  ;;  %v1076_v60 = vpop.f32.mrb[9].mxu0 }
 0x137   :  { %v874_v61 = vpop.f32.mrb[10].mxu0 }
 0x138   :  { %v879_v62 = vadd.f32 %v878_v57, %v872_v59  ;;  %v1077_v63 = vpop.f32.mrb[11].mxu0 }
 0x13a   :  { %v880_v0 = vmax.f32 %v879_v62, 0.0 }
 0x13c   :  { %v881_v1 = vpack.c.bf16 %v880_v0, %v880_v0 }
 0x13e   :  { %882 = vst [vmem:[%s1431_s4] sm:$0x1] %v881_v1 }

// kernel: _lambda_.43
= control target key start
LH: loop header
LB: loop body
LE: loop exit
PB: predicated region body
PF: predicated region fallthrough
CT: control target
= control target key end

     0   :  { %v247_v3 = vmov 0.0|0.0   ;;  %vm248_vm0 = vmmov 0   ;;  %v249_v6 = vmov 0.0   ;;  %s340_s0 = inlined_call_operand.vmem [shape: bf16[2,1,128], index: 0, kind: input, shape index: {}]   ;;  %s341_s1 = inlined_call_operand.vmem [shape: f32[128,128], index: 1, kind: input, shape index: {}]   ;;  %s342_s2 = inlined_call_operand.vmem [shape: f32[1,128], index: 2, kind: input, shape index: {}]   ;;  %s343_s3 = inlined_call_operand.hbm [shape: f32[2,128], index: 3, kind: output, shape index: {}]  }
   0x1   :  { %v21_v0 = vld [vmem:[%s341_s1] sm:$0xff]  ;;  %v22_v1 = vld [vmem:[%s341_s1 + $0x8] sm:$0xff]  ;;  %v23_v2 = vld [vmem:[%s341_s1 + $0x10] sm:$0xff]  ;;  %195 = vmatprep.subr.bf16.mxu0 %v247_v3  ;;  %192 = vmatprep.mubr.msk.f32.mxu0 %vm248_vm0, %v249_v6 }
   0x2   :  { %v196_v4 = vpack.c.bf16 %v22_v1, %v21_v0  ;;  %v24_v5 = vld [vmem:[%s341_s1 + $0x18] sm:$0xff]  ;;  %v25_v8 = vld [vmem:[%s341_s1 + $0x20] sm:$0xff]  ;;  %v26_v9 = vld [vmem:[%s341_s1 + $0x28] sm:$0xff] }
   0x3   :  { %v199_v7 = vpack.c.bf16 %v24_v5, %v23_v2 }
   0x4   :  { %197 = vmatpush3.bf16.msra.mxu0 %v196_v4 }
   0x5   :  { %198 = vmatprep.subr.bf16.mxu0 %v247_v3 }
   0x6   :  { %8 = vsyncpa [#allocation3], 0  ;;  %v202_v10 = vpack.c.bf16 %v26_v9, %v25_v8  ;;  %v27_v11 = vld [vmem:[%s341_s1 + $0x30] sm:$0xff]  ;;  %v28_v12 = vld [vmem:[%s341_s1 + $0x38] sm:$0xff]  ;;  %v46_v17 = vlaneseq  ;;  %vm54_vm1 = vcmask 1041409   ;;  %s250_s22 = smov [#allocation2]  }
   0x7   :  { %v205_v13 = vpack.c.bf16 %v28_v12, %v27_v11  ;;  %v29_v14 = vld [vmem:[%s341_s1 + $0x40] sm:$0xff]  ;;  %v30_v15 = vld [vmem:[%s341_s1 + $0x48] sm:$0xff]  ;;  %v31_v18 = vld [vmem:[%s341_s1 + $0x50] sm:$0xff]  ;;  %s134_s23 = sshll.u32 %s250_s22, 4  ;;  %s135_s23 = int_to_ptr.vmem [resolvable:$true] %s134_s23 }
   0x8   :  { %200 = vmatpush3.bf16.msra.mxu0 %v199_v7  ;;  %v208_v16 = vpack.c.bf16 %v30_v15, %v29_v14  ;;  %v32_v19 = vld [vmem:[%s341_s1 + $0x58] sm:$0xff]  ;;  %v33_v21 = vld [vmem:[%s341_s1 + $0x60] sm:$0xff]  ;;  %v47_v22 = vshrl.u32 %v46_v17, 7  ;;  %v34_v23 = vld [vmem:[%s341_s1 + $0x68] sm:$0xff]  ;;  %p228_p1 = scmp.lt.s32.totalorder %s135_s23, %s135_s23 }
   0x9   :  { %201 = vmatprep.subr.bf16.mxu0 %v247_v3  ;;  %v211_v20 = vpack.c.bf16 %v32_v19, %v31_v18  ;;  %v15_v24 = vld [vmem:[%s340_s0] sm:$0x1]  ;;  %v16_v25 = vld [vmem:[%s340_s0 + $0x1] sm:$0x1]  ;;  %v214_v26 = vpack.c.bf16 %v34_v23, %v33_v21  ;;  %v35_v30 = vld [vmem:[%s341_s1 + $0x70] sm:$0xff] }
   0xa   :  { %v17_v27 = vunpack.c.l.bf16 %v15_v24  ;;  %v18_v28 = vunpack.c.l.bf16 %v16_v25  ;;  %v48_v29 = vsub.s32 0, %v47_v22  ;;  %v36_v31 = vld [vmem:[%s341_s1 + $0x78] sm:$0xff]  ;;  %v142_v36 = vld [vmem:[%s342_s2] ss:$0 sm:$0xff]  ;;  %s223_s1 = scalar_lea.vmem %s135_s23, 32 }
   0xb   :  { %v217_v32 = vpack.c.bf16 %v36_v31, %v35_v30  ;;  %p224_p0 = scmp.ne.s32.totalorder %s135_s23, %s223_s1  ;;  %p229_p2 = scmp.lt.s32.totalorder %s223_s1, %s223_s1 }
   0xc   :  { %203 = vmatpush3.bf16.msra.mxu0 %v202_v10  ;;  %v49_v33 = vrot.slane %v17_v27, %v48_v29  ;;  %v53_v34 = vrot.slane %v18_v28, %v48_v29 }
   0xd   :  { %204 = vmatprep.subr.bf16.mxu0 %v247_v3  ;;  %p230_p3 = por %p229_p2, %p228_p1 }
   0xe   :  { %v55_v35 = vsel %vm54_vm1, %v53_v34, %v49_v33 }
   0xf   :  { %p231_p4 = pnand %p230_p3, %p224_p0 }
  0x10   :  { %206 = vmatpush3.bf16.msra.mxu0 %v205_v13 }
  0x11   :  { %207 = vmatprep.subr.bf16.mxu0 %v247_v3 }
  0x14   :  { %209 = vmatpush3.bf16.msra.mxu0 %v208_v16 }
  0x15   :  { %210 = vmatprep.subr.bf16.mxu0 %v247_v3 }
  0x18   :  { %212 = vmatpush3.bf16.msra.mxu0 %v211_v20 }
  0x19   :  { %213 = vmatprep.subr.bf16.mxu0 %v247_v3 }
  0x1c   :  { %215 = vmatpush3.bf16.msra.mxu0 %v214_v26 }
  0x1d   :  { %216 = vmatprep.subr.bf16.mxu0 %v247_v3 }
  0x20   :  { %218 = vmatpush3.bf16.msra.mxu0 %v217_v32 }
  0x23   :  { %193 = vmatmul.mubr.f32.vlgmr.msra.gmra.mrb[0].mxu0 %v55_v35 }
  0xf6   :  { %v123_v37 = vpop.f32.mrb[0].mxu0 }
  0xf7   :  { %v124_v38 = vadd.f32 %v142_v36, %v123_v37  ;;  %v194_v39 = vpop.f32.mrb[1].mxu0 }
  0xf9   :  { %127 = vst [vmem:[#allocation2] sm:$0x3] %v124_v38 }
  0xfa   :  { %234 = shalt.err (!%p231_p4)
}
  0xfb   :  { %s235_s26 = scalar_lea.hbm %s343_s3, 32 }
  0xfc   :  { %p236_p5 = scmp.ne.s32.totalorder %s343_s3, %s235_s26  ;;  %p239_p6 = scmp.lt.u32.totalorder %s235_s26, %s343_s3 }
  0xfe   :  { %p241_p7 = pnand %p239_p6, %p236_p5 }
 0x100   :  { %244 = shalt.err (!%p241_p7)
}
 0x101   :  { %137 = dma.vmem_to_hbm [thread:$0]  %s135_s23, 32, %s343_s3, [#allocation3]  }
 0x102   :  { %245 = dma.done.wait [#allocation3], 32  }
 0x103   :  { %246 = vsyncadd [#allocation3], 4294967264 }
 0x104   :  { %141 = vsyncpa [#allocation3], 1 }

</bundles_post_ra>
